<compile_context>
chip_gen: v7x
topology: tpu7x:2x2x1
jax: 0.10.0
libtpu: 0.0.40
codegen_flags: <defaults>
</compile_context>

<pallas_src>
import functools

import jax
import jax.numpy as jnp
import numpy as np
from jax import lax
from jax.experimental import pallas as pl
from jax.experimental.pallas import tpu as pltpu


# ----------------------------- CNN encoder kernel -----------------------------
def _cnn_kernel(x_ref, wc_ref, bc_ref, wp_ref, bp_ref, h0_ref, *, row_chunk):
    # x_ref : (1, C, H, W) VMEM   -- one full image per grid step
    # wc_ref: (CC, C*3*3)  SMEM   -- conv weights as scalars
    # bc_ref: (CC,)        SMEM   -- conv bias as scalars
    # wp_ref: (CC, HIDDEN) VMEM, bp_ref: (1, HIDDEN) VMEM
    # h0_ref: (1, 1, HIDDEN) VMEM output
    _, cin, h, w = x_ref.shape
    kh = kw = 3
    ho, wo = h - kh + 1, w - kw + 1
    cc, hidden = wp_ref.shape
    inv_area = 1.0 / float(ho * wo)

    z = bp_ref[...]                                   # (1, HIDDEN)
    for o in range(cc):
        tot = jnp.zeros((1, 1), jnp.float32)          # pooled sum for channel o
        for r0 in range(0, ho, row_chunk):            # chunk rows -> acc stays in vregs
            rc = min(row_chunk, ho - r0)
            acc = jnp.zeros((rc, wo), jnp.float32) + bc_ref[o]
            for ci in range(cin):                     # 3x3 conv = 27 shifted MACs
                for ky in range(kh):
                    for kx in range(kw):
                        wv = wc_ref[o, (ci * kh + ky) * kw + kx]
                        acc = acc + x_ref[0, ci,
                                          r0 + ky:r0 + ky + rc,
                                          kx:kx + wo] * wv
            relu = jnp.maximum(acc, 0.0)
            tot = tot + jnp.sum(jnp.sum(relu, axis=1, keepdims=True),
                                axis=0, keepdims=True)
        # global-avg-pool value for channel o folded into the projection:
        z = z + wp_ref[o:o + 1, :] * (tot * inv_area)
    h0_ref[0] = jnp.tanh(z)


def cnn_encode(x, wc2d, bc, wp_t, bp, *, row_chunk=64):
    """x: (B, C, H, W) raw (normalized) images.  Returns h0: (B, 1, HIDDEN)."""
    b, cin, h, w = x.shape
    cc = wc2d.shape[0]
    hidden = wp_t.shape[1]

    kernel = functools.partial(_cnn_kernel, row_chunk=row_chunk)
    return pl.pallas_call(
        kernel,
        out_shape=jax.ShapeDtypeStruct((b, 1, hidden), jnp.float32),
        grid=(b,),
        in_specs=[
            pl.BlockSpec((1, cin, h, w), lambda i: (i, 0, 0, 0)),
            pl.BlockSpec(memory_space=pltpu.MemorySpace.SMEM),   # conv weights (scalars)
            pl.BlockSpec(memory_space=pltpu.MemorySpace.SMEM),   # conv bias   (scalars)
            pl.BlockSpec((cc, hidden), lambda i: (0, 0)),
            pl.BlockSpec((1, hidden), lambda i: (0, 0)),
        ],
        out_specs=pl.BlockSpec((1, 1, hidden), lambda i: (i, 0, 0)),
        compiler_params=pltpu.CompilerParams(
            dimension_semantics=("parallel",),
            vmem_limit_bytes=32 * 1024 * 1024),
    )(x, wc2d, bc, wp_t, bp)


# --------------------------- LSTM decoder (batch-parallel grid) ----------------
def _decoder_kernel(h0_ref, wih_ref, whh_ref, bg_ref, wout_ref, bout_ref,
                    logp_ref, *, steps):
    # h0_ref  : (bb, 1, H)           logp_ref: (bb, steps, 1, V)
    # wih_ref : (V, 4H)  whh_ref: (H, 4H)  bg_ref: (1, 4H)
    # wout_ref: (H, V)   bout_ref: (1, V)
    bb = h0_ref.shape[0]
    hd = h0_ref.shape[2]
    vocab = wih_ref.shape[0]

    h0 = h0_ref[:, 0, :]                                        # (bb, H)
    col = lax.broadcasted_iota(jnp.int32, (bb, vocab), 1)       # hoisted out of loop

    def step(t, carry):
        h, c, inp = carry
        # split dots (no per-step concatenate on the recurrence critical path)
        gates = (jnp.dot(inp, wih_ref[...], preferred_element_type=jnp.float32)
                 + jnp.dot(h, whh_ref[...], preferred_element_type=jnp.float32)
                 + bg_ref[...])
        i_g = jax.nn.sigmoid(gates[:, 0 * hd:1 * hd])
        f_g = jax.nn.sigmoid(gates[:, 1 * hd:2 * hd])
        g_g = jnp.tanh(gates[:, 2 * hd:3 * hd])
        o_g = jax.nn.sigmoid(gates[:, 3 * hd:4 * hd])
        c = f_g * c + i_g * g_g
        h = o_g * jnp.tanh(c)

        # output head + log_softmax
        logits = jnp.dot(h, wout_ref[...],
                         preferred_element_type=jnp.float32) + bout_ref[...]
        m = jnp.max(logits, axis=1, keepdims=True)
        lse = jnp.log(jnp.sum(jnp.exp(logits - m), axis=1, keepdims=True)) + m
        logp = logits - lse
        logp_ref[:, pl.ds(t, 1), :, :] = logp[:, None, None, :]

        # TODO(synk): utils.randSamp(top-k) replaced by deterministic greedy argmax.
        word = jnp.min(jnp.where(logits == m, col, vocab), axis=1, keepdims=True)
        inp = (col == word).astype(jnp.float32)                 # one-hot feedback
        return h, c, inp

    init = (h0, h0, jnp.zeros((bb, vocab), jnp.float32))        # twoStates: cell = hidden
    lax.fori_loop(0, steps, step, init)


def lstm_decode(h0_b1h, w_ih_t, w_hh_t, bg, wout_t, bout, steps):
    b = h0_b1h.shape[0]
    hd = h0_b1h.shape[2]
    vocab = w_ih_t.shape[0]

    # two batch blocks -> both v7x TensorCores get work; weights stay VMEM-resident
    batch_block = max(1, pl.cdiv(b, 2))
    nb = pl.cdiv(b, batch_block)
    b_pad = nb * batch_block
    if b_pad != b:
        h0_b1h = jnp.pad(h0_b1h, ((0, b_pad - b), (0, 0), (0, 0)))

    kernel = functools.partial(_decoder_kernel, steps=steps)
    out = pl.pallas_call(
        kernel,
        out_shape=jax.ShapeDtypeStruct((b_pad, steps, 1, vocab), jnp.float32),
        grid=(nb,),
        in_specs=[
            pl.BlockSpec((batch_block, 1, hd), lambda i: (i, 0, 0)),
            pl.BlockSpec((vocab, 4 * hd), lambda i: (0, 0)),
            pl.BlockSpec((hd, 4 * hd), lambda i: (0, 0)),
            pl.BlockSpec((1, 4 * hd), lambda i: (0, 0)),
            pl.BlockSpec((hd, vocab), lambda i: (0, 0)),
            pl.BlockSpec((1, vocab), lambda i: (0, 0)),
        ],
        out_specs=pl.BlockSpec((batch_block, steps, 1, vocab),
                               lambda i: (i, 0, 0, 0)),
        compiler_params=pltpu.CompilerParams(
            dimension_semantics=("parallel",)),
    )(h0_b1h, w_ih_t, w_hh_t, bg, wout_t, bout)
    return out[:b, :, 0, :]                                     # (B, steps, V)


# ---------------------------------- glue ----------------------------------
def network_forward(x, params, max_output_len, *, row_chunk=64):
    """Returns (outputSeq: list[list[int]], outputLogProbs: (B, T, V), h0, words)."""
    batch = x.shape[0]
    steps = max_output_len + 1
    cc = params["wc"].shape[0]

    h0_b1h = cnn_encode(
        x,
        params["wc"].reshape(cc, -1),       # (CC, C*3*3) scalars -> SMEM
        params["bc"],                       # (CC,)       scalars -> SMEM
        params["wp"].T,                     # (CC, HIDDEN)
        params["bp"][None, :],              # (1, HIDDEN)
        row_chunk=row_chunk)

    out_log_probs = lstm_decode(
        h0_b1h,
        params["w_ih"].T, params["w_hh"].T,
        (params["b_ih"] + params["b_hh"])[None, :],
        params["w_out"].T, params["b_out"][None, :],
        steps)

    # word indices recovered on host: argmax of log-probs == in-kernel greedy pick
    words = jnp.argmax(out_log_probs, axis=-1)                  # (B, T)
    output_seq = [[int(w) for w in np.asarray(words[b])] for b in range(batch)]
    return output_seq, out_log_probs, h0_b1h[:, 0, :], words


# ------------------------------ pure-JAX reference ------------------------------
def reference(x, params, max_output_len):
    conv = lax.conv_general_dilated(
        x, params["wc"], (1, 1), "VALID",
        dimension_numbers=("NCHW", "OIHW", "NCHW"))
    feat = jax.nn.relu(conv + params["bc"][None, :, None, None])
    pooled = feat.mean(axis=(2, 3))
    h0 = jnp.tanh(pooled @ params["wp"].T + params["bp"][None, :])

    hd = h0.shape[1]
    vocab = params["w_out"].shape[0]
    h, c = h0, h0
    inp = jnp.zeros((h0.shape[0], params["w_ih"].shape[1]), jnp.float32)
    logps, words = [], []
    for _ in range(max_output_len + 1):
        gates = inp @ params["w_ih"].T + h @ params["w_hh"].T \
            + params["b_ih"] + params["b_hh"]
        i = jax.nn.sigmoid(gates[:, :hd])
        f = jax.nn.sigmoid(gates[:, hd:2 * hd])
        g = jnp.tanh(gates[:, 2 * hd:3 * hd])
        o = jax.nn.sigmoid(gates[:, 3 * hd:])
        c = f * c + i * g
        h = o * jnp.tanh(c)
        logits = h @ params["w_out"].T + params["b_out"]
        logps.append(jax.nn.log_softmax(logits, axis=1))
        w = jnp.argmax(logits, axis=1)
        words.append(w)
        inp = jax.nn.one_hot(w, vocab, dtype=jnp.float32)
    return h0, jnp.stack(logps, 1), jnp.stack(words, 1)


# ---------------------------------- main ----------------------------------
if __name__ == "__main__":
    B, CIN, IMG = 2, 3, 16          # small demo image (module expects >=224)
    CC, HIDDEN = 8, 128             # conv channels, rnn hidden_size
    VOCAB_LEN = 127                 # -> vocabLen + 1 = 128 output classes
    V = VOCAB_LEN + 1
    MAX_OUT_LEN = 8                 # -> T = 9 decode steps

    key = jax.random.PRNGKey(0)
    ks = jax.random.split(key, 10)

    def u(k, shape, scale):
        return jax.random.uniform(k, shape, jnp.float32, -scale, scale)

    s_h = 1.0 / jnp.sqrt(HIDDEN)
    params = {
        "wc": u(ks[0], (CC, CIN, 3, 3), 0.3),
        "bc": u(ks[1], (CC,), 0.3),
        "wp": u(ks[2], (HIDDEN, CC), 0.3),
        "bp": u(ks[3], (HIDDEN,), 0.3),
        "w_ih": u(ks[4], (4 * HIDDEN, V), s_h),
        "w_hh": u(ks[5], (4 * HIDDEN, HIDDEN), s_h),
        "b_ih": u(ks[6], (4 * HIDDEN,), s_h),
        "b_hh": u(ks[7], (4 * HIDDEN,), s_h),
        "w_out": u(ks[8], (V, HIDDEN), s_h),
        "b_out": u(ks[9], (V,), s_h),
    }

    # Normalized RGB input (preconditions of the module).
    x_raw = jax.random.uniform(jax.random.PRNGKey(42), (B, CIN, IMG, IMG),
                               jnp.float32, 0.0, 1.0)
    mean = jnp.array([0.485, 0.456, 0.406], jnp.float32)[None, :, None, None]
    std = jnp.array([0.229, 0.224, 0.225], jnp.float32)[None, :, None, None]
    x = (x_raw - mean) / std

    output_seq, out_log_probs, h0_kernel, words_kernel = network_forward(
        x, params, MAX_OUT_LEN)
    jax.block_until_ready(out_log_probs)

    # Verify against pure-JAX reference.
    h0_ref, logp_ref, words_ref = reference(x, params, MAX_OUT_LEN)
    np.testing.assert_allclose(np.asarray(h0_kernel), np.asarray(h0_ref),
                               rtol=1e-4, atol=1e-4)
    np.testing.assert_allclose(np.asarray(out_log_probs), np.asarray(logp_ref),
                               rtol=1e-4, atol=1e-4)
    np.testing.assert_array_equal(np.asarray(words_kernel),
                                  np.asarray(words_ref))
    assert out_log_probs.shape == (B, MAX_OUT_LEN + 1, V)
    assert len(output_seq) == B and len(output_seq[0]) == MAX_OUT_LEN + 1

    print("KERNEL_OK")
</pallas_src>

<mosaic_0001>
module attributes {stable_mosaic.version = 11 : i64} {
  func.func @_cnn_kernel(%arg0: i32, %arg1: memref<1x3x16x16xf32, #tpu.memory_space<vmem>>, %arg2: memref<8x27xf32, #tpu.memory_space<smem>>, %arg3: memref<8xf32, #tpu.memory_space<smem>>, %arg4: memref<8x128xf32, #tpu.memory_space<vmem>>, %arg5: memref<1x128xf32, #tpu.memory_space<vmem>>, %arg6: memref<1x1x128xf32, #tpu.memory_space<vmem>>) attributes {dimension_semantics = [#tpu.dimension_semantics<parallel>], iteration_bounds = array<i64: 2>, scalar_prefetch = 0 : i64, scratch_operands = 0 : i64, tpu.core_type = #tpu.core_type<tc>, window_params = [{transform_indices = @transform_0, window_bounds = array<i64: 1, 3, 16, 16>}, {transform_indices = @transform_1, window_bounds = array<i64: 8, 27>}, {transform_indices = @transform_2, window_bounds = array<i64: 8>}, {pipeline_mode = #tpu.pipeline_mode<synchronous>, transform_indices = @transform_3, window_bounds = array<i64: 8, 128>}, {pipeline_mode = #tpu.pipeline_mode<synchronous>, transform_indices = @transform_4, window_bounds = array<i64: 1, 128>}, {transform_indices = @transform_5, window_bounds = array<i64: 1, 1, 128>}]} {
    %c0 = arith.constant 0 : index
    %c0_0 = arith.constant 0 : index
    %0 = vector.load %arg5[%c0, %c0_0] : memref<1x128xf32, #tpu.memory_space<vmem>>, vector<1x128xf32>
    %cst = arith.constant 0.000000e+00 : f32
    %1 = vector.broadcast %cst : f32 to vector<1x1xf32>
    %cst_1 = arith.constant 0.000000e+00 : f32
    %2 = vector.broadcast %cst_1 : f32 to vector<14x14xf32>
    %c0_2 = arith.constant 0 : index
    %3 = memref.load %arg3[%c0_2] : memref<8xf32, #tpu.memory_space<smem>>
    %4 = vector.broadcast %3 : f32 to vector<14x14xf32>
    %5 = arith.addf %2, %4 : vector<14x14xf32>
    %c0_3 = arith.constant 0 : index
    %c0_4 = arith.constant 0 : index
    %6 = memref.load %arg2[%c0_3, %c0_4] : memref<8x27xf32, #tpu.memory_space<smem>>
    %c0_5 = arith.constant 0 : index
    %c0_6 = arith.constant 0 : index
    %c0_7 = arith.constant 0 : index
    %c0_8 = arith.constant 0 : index
    %7 = vector.load %arg1[%c0_5, %c0_6, %c0_7, %c0_8] : memref<1x3x16x16xf32, #tpu.memory_space<vmem>>, vector<1x1x14x14xf32>
    %8 = vector.shape_cast %7 : vector<1x1x14x14xf32> to vector<14x14xf32>
    %9 = vector.broadcast %6 : f32 to vector<14x14xf32>
    %10 = arith.mulf %8, %9 : vector<14x14xf32>
    %11 = arith.addf %5, %10 : vector<14x14xf32>
    %c0_9 = arith.constant 0 : index
    %c1 = arith.constant 1 : index
    %12 = memref.load %arg2[%c0_9, %c1] : memref<8x27xf32, #tpu.memory_space<smem>>
    %c0_10 = arith.constant 0 : index
    %c0_11 = arith.constant 0 : index
    %c0_12 = arith.constant 0 : index
    %c1_13 = arith.constant 1 : index
    %13 = vector.load %arg1[%c0_10, %c0_11, %c0_12, %c1_13] : memref<1x3x16x16xf32, #tpu.memory_space<vmem>>, vector<1x1x14x14xf32>
    %14 = vector.shape_cast %13 : vector<1x1x14x14xf32> to vector<14x14xf32>
    %15 = vector.broadcast %12 : f32 to vector<14x14xf32>
    %16 = arith.mulf %14, %15 : vector<14x14xf32>
    %17 = arith.addf %11, %16 : vector<14x14xf32>
    %c0_14 = arith.constant 0 : index
    %c2 = arith.constant 2 : index
    %18 = memref.load %arg2[%c0_14, %c2] : memref<8x27xf32, #tpu.memory_space<smem>>
    %c0_15 = arith.constant 0 : index
    %c0_16 = arith.constant 0 : index
    %c0_17 = arith.constant 0 : index
    %c2_18 = arith.constant 2 : index
    %19 = vector.load %arg1[%c0_15, %c0_16, %c0_17, %c2_18] : memref<1x3x16x16xf32, #tpu.memory_space<vmem>>, vector<1x1x14x14xf32>
    %20 = vector.shape_cast %19 : vector<1x1x14x14xf32> to vector<14x14xf32>
    %21 = vector.broadcast %18 : f32 to vector<14x14xf32>
    %22 = arith.mulf %20, %21 : vector<14x14xf32>
    %23 = arith.addf %17, %22 : vector<14x14xf32>
    %c0_19 = arith.constant 0 : index
    %c3 = arith.constant 3 : index
    %24 = memref.load %arg2[%c0_19, %c3] : memref<8x27xf32, #tpu.memory_space<smem>>
    %c0_20 = arith.constant 0 : index
    %c0_21 = arith.constant 0 : index
    %c1_22 = arith.constant 1 : index
    %c0_23 = arith.constant 0 : index
    %25 = vector.load %arg1[%c0_20, %c0_21, %c1_22, %c0_23] : memref<1x3x16x16xf32, #tpu.memory_space<vmem>>, vector<1x1x14x14xf32>
    %26 = vector.shape_cast %25 : vector<1x1x14x14xf32> to vector<14x14xf32>
    %27 = vector.broadcast %24 : f32 to vector<14x14xf32>
    %28 = arith.mulf %26, %27 : vector<14x14xf32>
    %29 = arith.addf %23, %28 : vector<14x14xf32>
    %c0_24 = arith.constant 0 : index
    %c4 = arith.constant 4 : index
    %30 = memref.load %arg2[%c0_24, %c4] : memref<8x27xf32, #tpu.memory_space<smem>>
    %c0_25 = arith.constant 0 : index
    %c0_26 = arith.constant 0 : index
    %c1_27 = arith.constant 1 : index
    %c1_28 = arith.constant 1 : index
    %31 = vector.load %arg1[%c0_25, %c0_26, %c1_27, %c1_28] : memref<1x3x16x16xf32, #tpu.memory_space<vmem>>, vector<1x1x14x14xf32>
    %32 = vector.shape_cast %31 : vector<1x1x14x14xf32> to vector<14x14xf32>
    %33 = vector.broadcast %30 : f32 to vector<14x14xf32>
    %34 = arith.mulf %32, %33 : vector<14x14xf32>
    %35 = arith.addf %29, %34 : vector<14x14xf32>
    %c0_29 = arith.constant 0 : index
    %c5 = arith.constant 5 : index
    %36 = memref.load %arg2[%c0_29, %c5] : memref<8x27xf32, #tpu.memory_space<smem>>
    %c0_30 = arith.constant 0 : index
    %c0_31 = arith.constant 0 : index
    %c1_32 = arith.constant 1 : index
    %c2_33 = arith.constant 2 : index
    %37 = vector.load %arg1[%c0_30, %c0_31, %c1_32, %c2_33] : memref<1x3x16x16xf32, #tpu.memory_space<vmem>>, vector<1x1x14x14xf32>
    %38 = vector.shape_cast %37 : vector<1x1x14x14xf32> to vector<14x14xf32>
    %39 = vector.broadcast %36 : f32 to vector<14x14xf32>
    %40 = arith.mulf %38, %39 : vector<14x14xf32>
    %41 = arith.addf %35, %40 : vector<14x14xf32>
    %c0_34 = arith.constant 0 : index
    %c6 = arith.constant 6 : index
    %42 = memref.load %arg2[%c0_34, %c6] : memref<8x27xf32, #tpu.memory_space<smem>>
    %c0_35 = arith.constant 0 : index
    %c0_36 = arith.constant 0 : index
    %c2_37 = arith.constant 2 : index
    %c0_38 = arith.constant 0 : index
    %43 = vector.load %arg1[%c0_35, %c0_36, %c2_37, %c0_38] : memref<1x3x16x16xf32, #tpu.memory_space<vmem>>, vector<1x1x14x14xf32>
    %44 = vector.shape_cast %43 : vector<1x1x14x14xf32> to vector<14x14xf32>
    %45 = vector.broadcast %42 : f32 to vector<14x14xf32>
    %46 = arith.mulf %44, %45 : vector<14x14xf32>
    %47 = arith.addf %41, %46 : vector<14x14xf32>
    %c0_39 = arith.constant 0 : index
    %c7 = arith.constant 7 : index
    %48 = memref.load %arg2[%c0_39, %c7] : memref<8x27xf32, #tpu.memory_space<smem>>
    %c0_40 = arith.constant 0 : index
    %c0_41 = arith.constant 0 : index
    %c2_42 = arith.constant 2 : index
    %c1_43 = arith.constant 1 : index
    %49 = vector.load %arg1[%c0_40, %c0_41, %c2_42, %c1_43] : memref<1x3x16x16xf32, #tpu.memory_space<vmem>>, vector<1x1x14x14xf32>
    %50 = vector.shape_cast %49 : vector<1x1x14x14xf32> to vector<14x14xf32>
    %51 = vector.broadcast %48 : f32 to vector<14x14xf32>
    %52 = arith.mulf %50, %51 : vector<14x14xf32>
    %53 = arith.addf %47, %52 : vector<14x14xf32>
    %c0_44 = arith.constant 0 : index
    %c8 = arith.constant 8 : index
    %54 = memref.load %arg2[%c0_44, %c8] : memref<8x27xf32, #tpu.memory_space<smem>>
    %c0_45 = arith.constant 0 : index
    %c0_46 = arith.constant 0 : index
    %c2_47 = arith.constant 2 : index
    %c2_48 = arith.constant 2 : index
    %55 = vector.load %arg1[%c0_45, %c0_46, %c2_47, %c2_48] : memref<1x3x16x16xf32, #tpu.memory_space<vmem>>, vector<1x1x14x14xf32>
    %56 = vector.shape_cast %55 : vector<1x1x14x14xf32> to vector<14x14xf32>
    %57 = vector.broadcast %54 : f32 to vector<14x14xf32>
    %58 = arith.mulf %56, %57 : vector<14x14xf32>
    %59 = arith.addf %53, %58 : vector<14x14xf32>
    %c0_49 = arith.constant 0 : index
    %c9 = arith.constant 9 : index
    %60 = memref.load %arg2[%c0_49, %c9] : memref<8x27xf32, #tpu.memory_space<smem>>
    %c0_50 = arith.constant 0 : index
    %c1_51 = arith.constant 1 : index
    %c0_52 = arith.constant 0 : index
    %c0_53 = arith.constant 0 : index
    %61 = vector.load %arg1[%c0_50, %c1_51, %c0_52, %c0_53] : memref<1x3x16x16xf32, #tpu.memory_space<vmem>>, vector<1x1x14x14xf32>
    %62 = vector.shape_cast %61 : vector<1x1x14x14xf32> to vector<14x14xf32>
    %63 = vector.broadcast %60 : f32 to vector<14x14xf32>
    %64 = arith.mulf %62, %63 : vector<14x14xf32>
    %65 = arith.addf %59, %64 : vector<14x14xf32>
    %c0_54 = arith.constant 0 : index
    %c10 = arith.constant 10 : index
    %66 = memref.load %arg2[%c0_54, %c10] : memref<8x27xf32, #tpu.memory_space<smem>>
    %c0_55 = arith.constant 0 : index
    %c1_56 = arith.constant 1 : index
    %c0_57 = arith.constant 0 : index
    %c1_58 = arith.constant 1 : index
    %67 = vector.load %arg1[%c0_55, %c1_56, %c0_57, %c1_58] : memref<1x3x16x16xf32, #tpu.memory_space<vmem>>, vector<1x1x14x14xf32>
    %68 = vector.shape_cast %67 : vector<1x1x14x14xf32> to vector<14x14xf32>
    %69 = vector.broadcast %66 : f32 to vector<14x14xf32>
    %70 = arith.mulf %68, %69 : vector<14x14xf32>
    %71 = arith.addf %65, %70 : vector<14x14xf32>
    %c0_59 = arith.constant 0 : index
    %c11 = arith.constant 11 : index
    %72 = memref.load %arg2[%c0_59, %c11] : memref<8x27xf32, #tpu.memory_space<smem>>
    %c0_60 = arith.constant 0 : index
    %c1_61 = arith.constant 1 : index
    %c0_62 = arith.constant 0 : index
    %c2_63 = arith.constant 2 : index
    %73 = vector.load %arg1[%c0_60, %c1_61, %c0_62, %c2_63] : memref<1x3x16x16xf32, #tpu.memory_space<vmem>>, vector<1x1x14x14xf32>
    %74 = vector.shape_cast %73 : vector<1x1x14x14xf32> to vector<14x14xf32>
    %75 = vector.broadcast %72 : f32 to vector<14x14xf32>
    %76 = arith.mulf %74, %75 : vector<14x14xf32>
    %77 = arith.addf %71, %76 : vector<14x14xf32>
    %c0_64 = arith.constant 0 : index
    %c12 = arith.constant 12 : index
    %78 = memref.load %arg2[%c0_64, %c12] : memref<8x27xf32, #tpu.memory_space<smem>>
    %c0_65 = arith.constant 0 : index
    %c1_66 = arith.constant 1 : index
    %c1_67 = arith.constant 1 : index
    %c0_68 = arith.constant 0 : index
    %79 = vector.load %arg1[%c0_65, %c1_66, %c1_67, %c0_68] : memref<1x3x16x16xf32, #tpu.memory_space<vmem>>, vector<1x1x14x14xf32>
    %80 = vector.shape_cast %79 : vector<1x1x14x14xf32> to vector<14x14xf32>
    %81 = vector.broadcast %78 : f32 to vector<14x14xf32>
    %82 = arith.mulf %80, %81 : vector<14x14xf32>
    %83 = arith.addf %77, %82 : vector<14x14xf32>
    %c0_69 = arith.constant 0 : index
    %c13 = arith.constant 13 : index
    %84 = memref.load %arg2[%c0_69, %c13] : memref<8x27xf32, #tpu.memory_space<smem>>
    %c0_70 = arith.constant 0 : index
    %c1_71 = arith.constant 1 : index
    %c1_72 = arith.constant 1 : index
    %c1_73 = arith.constant 1 : index
    %85 = vector.load %arg1[%c0_70, %c1_71, %c1_72, %c1_73] : memref<1x3x16x16xf32, #tpu.memory_space<vmem>>, vector<1x1x14x14xf32>
    %86 = vector.shape_cast %85 : vector<1x1x14x14xf32> to vector<14x14xf32>
    %87 = vector.broadcast %84 : f32 to vector<14x14xf32>
    %88 = arith.mulf %86, %87 : vector<14x14xf32>
    %89 = arith.addf %83, %88 : vector<14x14xf32>
    %c0_74 = arith.constant 0 : index
    %c14 = arith.constant 14 : index
    %90 = memref.load %arg2[%c0_74, %c14] : memref<8x27xf32, #tpu.memory_space<smem>>
    %c0_75 = arith.constant 0 : index
    %c1_76 = arith.constant 1 : index
    %c1_77 = arith.constant 1 : index
    %c2_78 = arith.constant 2 : index
    %91 = vector.load %arg1[%c0_75, %c1_76, %c1_77, %c2_78] : memref<1x3x16x16xf32, #tpu.memory_space<vmem>>, vector<1x1x14x14xf32>
    %92 = vector.shape_cast %91 : vector<1x1x14x14xf32> to vector<14x14xf32>
    %93 = vector.broadcast %90 : f32 to vector<14x14xf32>
    %94 = arith.mulf %92, %93 : vector<14x14xf32>
    %95 = arith.addf %89, %94 : vector<14x14xf32>
    %c0_79 = arith.constant 0 : index
    %c15 = arith.constant 15 : index
    %96 = memref.load %arg2[%c0_79, %c15] : memref<8x27xf32, #tpu.memory_space<smem>>
    %c0_80 = arith.constant 0 : index
    %c1_81 = arith.constant 1 : index
    %c2_82 = arith.constant 2 : index
    %c0_83 = arith.constant 0 : index
    %97 = vector.load %arg1[%c0_80, %c1_81, %c2_82, %c0_83] : memref<1x3x16x16xf32, #tpu.memory_space<vmem>>, vector<1x1x14x14xf32>
    %98 = vector.shape_cast %97 : vector<1x1x14x14xf32> to vector<14x14xf32>
    %99 = vector.broadcast %96 : f32 to vector<14x14xf32>
    %100 = arith.mulf %98, %99 : vector<14x14xf32>
    %101 = arith.addf %95, %100 : vector<14x14xf32>
    %c0_84 = arith.constant 0 : index
    %c16 = arith.constant 16 : index
    %102 = memref.load %arg2[%c0_84, %c16] : memref<8x27xf32, #tpu.memory_space<smem>>
    %c0_85 = arith.constant 0 : index
    %c1_86 = arith.constant 1 : index
    %c2_87 = arith.constant 2 : index
    %c1_88 = arith.constant 1 : index
    %103 = vector.load %arg1[%c0_85, %c1_86, %c2_87, %c1_88] : memref<1x3x16x16xf32, #tpu.memory_space<vmem>>, vector<1x1x14x14xf32>
    %104 = vector.shape_cast %103 : vector<1x1x14x14xf32> to vector<14x14xf32>
    %105 = vector.broadcast %102 : f32 to vector<14x14xf32>
    %106 = arith.mulf %104, %105 : vector<14x14xf32>
    %107 = arith.addf %101, %106 : vector<14x14xf32>
    %c0_89 = arith.constant 0 : index
    %c17 = arith.constant 17 : index
    %108 = memref.load %arg2[%c0_89, %c17] : memref<8x27xf32, #tpu.memory_space<smem>>
    %c0_90 = arith.constant 0 : index
    %c1_91 = arith.constant 1 : index
    %c2_92 = arith.constant 2 : index
    %c2_93 = arith.constant 2 : index
    %109 = vector.load %arg1[%c0_90, %c1_91, %c2_92, %c2_93] : memref<1x3x16x16xf32, #tpu.memory_space<vmem>>, vector<1x1x14x14xf32>
    %110 = vector.shape_cast %109 : vector<1x1x14x14xf32> to vector<14x14xf32>
    %111 = vector.broadcast %108 : f32 to vector<14x14xf32>
    %112 = arith.mulf %110, %111 : vector<14x14xf32>
    %113 = arith.addf %107, %112 : vector<14x14xf32>
    %c0_94 = arith.constant 0 : index
    %c18 = arith.constant 18 : index
    %114 = memref.load %arg2[%c0_94, %c18] : memref<8x27xf32, #tpu.memory_space<smem>>
    %c0_95 = arith.constant 0 : index
    %c2_96 = arith.constant 2 : index
    %c0_97 = arith.constant 0 : index
    %c0_98 = arith.constant 0 : index
    %115 = vector.load %arg1[%c0_95, %c2_96, %c0_97, %c0_98] : memref<1x3x16x16xf32, #tpu.memory_space<vmem>>, vector<1x1x14x14xf32>
    %116 = vector.shape_cast %115 : vector<1x1x14x14xf32> to vector<14x14xf32>
    %117 = vector.broadcast %114 : f32 to vector<14x14xf32>
    %118 = arith.mulf %116, %117 : vector<14x14xf32>
    %119 = arith.addf %113, %118 : vector<14x14xf32>
    %c0_99 = arith.constant 0 : index
    %c19 = arith.constant 19 : index
    %120 = memref.load %arg2[%c0_99, %c19] : memref<8x27xf32, #tpu.memory_space<smem>>
    %c0_100 = arith.constant 0 : index
    %c2_101 = arith.constant 2 : index
    %c0_102 = arith.constant 0 : index
    %c1_103 = arith.constant 1 : index
    %121 = vector.load %arg1[%c0_100, %c2_101, %c0_102, %c1_103] : memref<1x3x16x16xf32, #tpu.memory_space<vmem>>, vector<1x1x14x14xf32>
    %122 = vector.shape_cast %121 : vector<1x1x14x14xf32> to vector<14x14xf32>
    %123 = vector.broadcast %120 : f32 to vector<14x14xf32>
    %124 = arith.mulf %122, %123 : vector<14x14xf32>
    %125 = arith.addf %119, %124 : vector<14x14xf32>
    %c0_104 = arith.constant 0 : index
    %c20 = arith.constant 20 : index
    %126 = memref.load %arg2[%c0_104, %c20] : memref<8x27xf32, #tpu.memory_space<smem>>
    %c0_105 = arith.constant 0 : index
    %c2_106 = arith.constant 2 : index
    %c0_107 = arith.constant 0 : index
    %c2_108 = arith.constant 2 : index
    %127 = vector.load %arg1[%c0_105, %c2_106, %c0_107, %c2_108] : memref<1x3x16x16xf32, #tpu.memory_space<vmem>>, vector<1x1x14x14xf32>
    %128 = vector.shape_cast %127 : vector<1x1x14x14xf32> to vector<14x14xf32>
    %129 = vector.broadcast %126 : f32 to vector<14x14xf32>
    %130 = arith.mulf %128, %129 : vector<14x14xf32>
    %131 = arith.addf %125, %130 : vector<14x14xf32>
    %c0_109 = arith.constant 0 : index
    %c21 = arith.constant 21 : index
    %132 = memref.load %arg2[%c0_109, %c21] : memref<8x27xf32, #tpu.memory_space<smem>>
    %c0_110 = arith.constant 0 : index
    %c2_111 = arith.constant 2 : index
    %c1_112 = arith.constant 1 : index
    %c0_113 = arith.constant 0 : index
    %133 = vector.load %arg1[%c0_110, %c2_111, %c1_112, %c0_113] : memref<1x3x16x16xf32, #tpu.memory_space<vmem>>, vector<1x1x14x14xf32>
    %134 = vector.shape_cast %133 : vector<1x1x14x14xf32> to vector<14x14xf32>
    %135 = vector.broadcast %132 : f32 to vector<14x14xf32>
    %136 = arith.mulf %134, %135 : vector<14x14xf32>
    %137 = arith.addf %131, %136 : vector<14x14xf32>
    %c0_114 = arith.constant 0 : index
    %c22 = arith.constant 22 : index
    %138 = memref.load %arg2[%c0_114, %c22] : memref<8x27xf32, #tpu.memory_space<smem>>
    %c0_115 = arith.constant 0 : index
    %c2_116 = arith.constant 2 : index
    %c1_117 = arith.constant 1 : index
    %c1_118 = arith.constant 1 : index
    %139 = vector.load %arg1[%c0_115, %c2_116, %c1_117, %c1_118] : memref<1x3x16x16xf32, #tpu.memory_space<vmem>>, vector<1x1x14x14xf32>
    %140 = vector.shape_cast %139 : vector<1x1x14x14xf32> to vector<14x14xf32>
    %141 = vector.broadcast %138 : f32 to vector<14x14xf32>
    %142 = arith.mulf %140, %141 : vector<14x14xf32>
    %143 = arith.addf %137, %142 : vector<14x14xf32>
    %c0_119 = arith.constant 0 : index
    %c23 = arith.constant 23 : index
    %144 = memref.load %arg2[%c0_119, %c23] : memref<8x27xf32, #tpu.memory_space<smem>>
    %c0_120 = arith.constant 0 : index
    %c2_121 = arith.constant 2 : index
    %c1_122 = arith.constant 1 : index
    %c2_123 = arith.constant 2 : index
    %145 = vector.load %arg1[%c0_120, %c2_121, %c1_122, %c2_123] : memref<1x3x16x16xf32, #tpu.memory_space<vmem>>, vector<1x1x14x14xf32>
    %146 = vector.shape_cast %145 : vector<1x1x14x14xf32> to vector<14x14xf32>
    %147 = vector.broadcast %144 : f32 to vector<14x14xf32>
    %148 = arith.mulf %146, %147 : vector<14x14xf32>
    %149 = arith.addf %143, %148 : vector<14x14xf32>
    %c0_124 = arith.constant 0 : index
    %c24 = arith.constant 24 : index
    %150 = memref.load %arg2[%c0_124, %c24] : memref<8x27xf32, #tpu.memory_space<smem>>
    %c0_125 = arith.constant 0 : index
    %c2_126 = arith.constant 2 : index
    %c2_127 = arith.constant 2 : index
    %c0_128 = arith.constant 0 : index
    %151 = vector.load %arg1[%c0_125, %c2_126, %c2_127, %c0_128] : memref<1x3x16x16xf32, #tpu.memory_space<vmem>>, vector<1x1x14x14xf32>
    %152 = vector.shape_cast %151 : vector<1x1x14x14xf32> to vector<14x14xf32>
    %153 = vector.broadcast %150 : f32 to vector<14x14xf32>
    %154 = arith.mulf %152, %153 : vector<14x14xf32>
    %155 = arith.addf %149, %154 : vector<14x14xf32>
    %c0_129 = arith.constant 0 : index
    %c25 = arith.constant 25 : index
    %156 = memref.load %arg2[%c0_129, %c25] : memref<8x27xf32, #tpu.memory_space<smem>>
    %c0_130 = arith.constant 0 : index
    %c2_131 = arith.constant 2 : index
    %c2_132 = arith.constant 2 : index
    %c1_133 = arith.constant 1 : index
    %157 = vector.load %arg1[%c0_130, %c2_131, %c2_132, %c1_133] : memref<1x3x16x16xf32, #tpu.memory_space<vmem>>, vector<1x1x14x14xf32>
    %158 = vector.shape_cast %157 : vector<1x1x14x14xf32> to vector<14x14xf32>
    %159 = vector.broadcast %156 : f32 to vector<14x14xf32>
    %160 = arith.mulf %158, %159 : vector<14x14xf32>
    %161 = arith.addf %155, %160 : vector<14x14xf32>
    %c0_134 = arith.constant 0 : index
    %c26 = arith.constant 26 : index
    %162 = memref.load %arg2[%c0_134, %c26] : memref<8x27xf32, #tpu.memory_space<smem>>
    %c0_135 = arith.constant 0 : index
    %c2_136 = arith.constant 2 : index
    %c2_137 = arith.constant 2 : index
    %c2_138 = arith.constant 2 : index
    %163 = vector.load %arg1[%c0_135, %c2_136, %c2_137, %c2_138] : memref<1x3x16x16xf32, #tpu.memory_space<vmem>>, vector<1x1x14x14xf32>
    %164 = vector.shape_cast %163 : vector<1x1x14x14xf32> to vector<14x14xf32>
    %165 = vector.broadcast %162 : f32 to vector<14x14xf32>
    %166 = arith.mulf %164, %165 : vector<14x14xf32>
    %167 = arith.addf %161, %166 : vector<14x14xf32>
    %cst_139 = arith.constant 0.000000e+00 : f32
    %168 = vector.broadcast %cst_139 : f32 to vector<14x14xf32>
    %169 = arith.maximumf %167, %168 : vector<14x14xf32>
    %cst_140 = arith.constant dense<0.000000e+00> : vector<14xf32>
    %170 = vector.multi_reduction <add>, %169, %cst_140 [1] : vector<14x14xf32> to vector<14xf32>
    %171 = vector.shape_cast %170 : vector<14xf32> to vector<14x1xf32>
    %cst_141 = arith.constant dense<0.000000e+00> : vector<1xf32>
    %172 = vector.multi_reduction <add>, %171, %cst_141 [0] : vector<14x1xf32> to vector<1xf32>
    %173 = vector.shape_cast %172 : vector<1xf32> to vector<1x1xf32>
    %174 = arith.addf %1, %173 : vector<1x1xf32>
    %c0_142 = arith.constant 0 : index
    %c0_143 = arith.constant 0 : index
    %175 = vector.load %arg4[%c0_142, %c0_143] : memref<8x128xf32, #tpu.memory_space<vmem>>, vector<1x128xf32>
    %cst_144 = arith.constant 0.00510204071 : f32
    %176 = vector.broadcast %cst_144 : f32 to vector<1x1xf32>
    %177 = arith.mulf %174, %176 : vector<1x1xf32>
    %178 = vector.broadcast %177 : vector<1x1xf32> to vector<1x128xf32>
    %179 = arith.mulf %175, %178 : vector<1x128xf32>
    %180 = arith.addf %0, %179 : vector<1x128xf32>
    %cst_145 = arith.constant 0.000000e+00 : f32
    %181 = vector.broadcast %cst_145 : f32 to vector<1x1xf32>
    %cst_146 = arith.constant 0.000000e+00 : f32
    %182 = vector.broadcast %cst_146 : f32 to vector<14x14xf32>
    %c1_147 = arith.constant 1 : index
    %183 = memref.load %arg3[%c1_147] : memref<8xf32, #tpu.memory_space<smem>>
    %184 = vector.broadcast %183 : f32 to vector<14x14xf32>
    %185 = arith.addf %182, %184 : vector<14x14xf32>
    %c1_148 = arith.constant 1 : index
    %c0_149 = arith.constant 0 : index
    %186 = memref.load %arg2[%c1_148, %c0_149] : memref<8x27xf32, #tpu.memory_space<smem>>
    %c0_150 = arith.constant 0 : index
    %c0_151 = arith.constant 0 : index
    %c0_152 = arith.constant 0 : index
    %c0_153 = arith.constant 0 : index
    %187 = vector.load %arg1[%c0_150, %c0_151, %c0_152, %c0_153] : memref<1x3x16x16xf32, #tpu.memory_space<vmem>>, vector<1x1x14x14xf32>
    %188 = vector.shape_cast %187 : vector<1x1x14x14xf32> to vector<14x14xf32>
    %189 = vector.broadcast %186 : f32 to vector<14x14xf32>
    %190 = arith.mulf %188, %189 : vector<14x14xf32>
    %191 = arith.addf %185, %190 : vector<14x14xf32>
    %c1_154 = arith.constant 1 : index
    %c1_155 = arith.constant 1 : index
    %192 = memref.load %arg2[%c1_154, %c1_155] : memref<8x27xf32, #tpu.memory_space<smem>>
    %c0_156 = arith.constant 0 : index
    %c0_157 = arith.constant 0 : index
    %c0_158 = arith.constant 0 : index
    %c1_159 = arith.constant 1 : index
    %193 = vector.load %arg1[%c0_156, %c0_157, %c0_158, %c1_159] : memref<1x3x16x16xf32, #tpu.memory_space<vmem>>, vector<1x1x14x14xf32>
    %194 = vector.shape_cast %193 : vector<1x1x14x14xf32> to vector<14x14xf32>
    %195 = vector.broadcast %192 : f32 to vector<14x14xf32>
    %196 = arith.mulf %194, %195 : vector<14x14xf32>
    %197 = arith.addf %191, %196 : vector<14x14xf32>
    %c1_160 = arith.constant 1 : index
    %c2_161 = arith.constant 2 : index
    %198 = memref.load %arg2[%c1_160, %c2_161] : memref<8x27xf32, #tpu.memory_space<smem>>
    %c0_162 = arith.constant 0 : index
    %c0_163 = arith.constant 0 : index
    %c0_164 = arith.constant 0 : index
    %c2_165 = arith.constant 2 : index
    %199 = vector.load %arg1[%c0_162, %c0_163, %c0_164, %c2_165] : memref<1x3x16x16xf32, #tpu.memory_space<vmem>>, vector<1x1x14x14xf32>
    %200 = vector.shape_cast %199 : vector<1x1x14x14xf32> to vector<14x14xf32>
    %201 = vector.broadcast %198 : f32 to vector<14x14xf32>
    %202 = arith.mulf %200, %201 : vector<14x14xf32>
    %203 = arith.addf %197, %202 : vector<14x14xf32>
    %c1_166 = arith.constant 1 : index
    %c3_167 = arith.constant 3 : index
    %204 = memref.load %arg2[%c1_166, %c3_167] : memref<8x27xf32, #tpu.memory_space<smem>>
    %c0_168 = arith.constant 0 : index
    %c0_169 = arith.constant 0 : index
    %c1_170 = arith.constant 1 : index
    %c0_171 = arith.constant 0 : index
    %205 = vector.load %arg1[%c0_168, %c0_169, %c1_170, %c0_171] : memref<1x3x16x16xf32, #tpu.memory_space<vmem>>, vector<1x1x14x14xf32>
    %206 = vector.shape_cast %205 : vector<1x1x14x14xf32> to vector<14x14xf32>
    %207 = vector.broadcast %204 : f32 to vector<14x14xf32>
    %208 = arith.mulf %206, %207 : vector<14x14xf32>
    %209 = arith.addf %203, %208 : vector<14x14xf32>
    %c1_172 = arith.constant 1 : index
    %c4_173 = arith.constant 4 : index
    %210 = memref.load %arg2[%c1_172, %c4_173] : memref<8x27xf32, #tpu.memory_space<smem>>
    %c0_174 = arith.constant 0 : index
    %c0_175 = arith.constant 0 : index
    %c1_176 = arith.constant 1 : index
    %c1_177 = arith.constant 1 : index
    %211 = vector.load %arg1[%c0_174, %c0_175, %c1_176, %c1_177] : memref<1x3x16x16xf32, #tpu.memory_space<vmem>>, vector<1x1x14x14xf32>
    %212 = vector.shape_cast %211 : vector<1x1x14x14xf32> to vector<14x14xf32>
    %213 = vector.broadcast %210 : f32 to vector<14x14xf32>
    %214 = arith.mulf %212, %213 : vector<14x14xf32>
    %215 = arith.addf %209, %214 : vector<14x14xf32>
    %c1_178 = arith.constant 1 : index
    %c5_179 = arith.constant 5 : index
    %216 = memref.load %arg2[%c1_178, %c5_179] : memref<8x27xf32, #tpu.memory_space<smem>>
    %c0_180 = arith.constant 0 : index
    %c0_181 = arith.constant 0 : index
    %c1_182 = arith.constant 1 : index
    %c2_183 = arith.constant 2 : index
    %217 = vector.load %arg1[%c0_180, %c0_181, %c1_182, %c2_183] : memref<1x3x16x16xf32, #tpu.memory_space<vmem>>, vector<1x1x14x14xf32>
    %218 = vector.shape_cast %217 : vector<1x1x14x14xf32> to vector<14x14xf32>
    %219 = vector.broadcast %216 : f32 to vector<14x14xf32>
    %220 = arith.mulf %218, %219 : vector<14x14xf32>
    %221 = arith.addf %215, %220 : vector<14x14xf32>
    %c1_184 = arith.constant 1 : index
    %c6_185 = arith.constant 6 : index
    %222 = memref.load %arg2[%c1_184, %c6_185] : memref<8x27xf32, #tpu.memory_space<smem>>
    %c0_186 = arith.constant 0 : index
    %c0_187 = arith.constant 0 : index
    %c2_188 = arith.constant 2 : index
    %c0_189 = arith.constant 0 : index
    %223 = vector.load %arg1[%c0_186, %c0_187, %c2_188, %c0_189] : memref<1x3x16x16xf32, #tpu.memory_space<vmem>>, vector<1x1x14x14xf32>
    %224 = vector.shape_cast %223 : vector<1x1x14x14xf32> to vector<14x14xf32>
    %225 = vector.broadcast %222 : f32 to vector<14x14xf32>
    %226 = arith.mulf %224, %225 : vector<14x14xf32>
    %227 = arith.addf %221, %226 : vector<14x14xf32>
    %c1_190 = arith.constant 1 : index
    %c7_191 = arith.constant 7 : index
    %228 = memref.load %arg2[%c1_190, %c7_191] : memref<8x27xf32, #tpu.memory_space<smem>>
    %c0_192 = arith.constant 0 : index
    %c0_193 = arith.constant 0 : index
    %c2_194 = arith.constant 2 : index
    %c1_195 = arith.constant 1 : index
    %229 = vector.load %arg1[%c0_192, %c0_193, %c2_194, %c1_195] : memref<1x3x16x16xf32, #tpu.memory_space<vmem>>, vector<1x1x14x14xf32>
    %230 = vector.shape_cast %229 : vector<1x1x14x14xf32> to vector<14x14xf32>
    %231 = vector.broadcast %228 : f32 to vector<14x14xf32>
    %232 = arith.mulf %230, %231 : vector<14x14xf32>
    %233 = arith.addf %227, %232 : vector<14x14xf32>
    %c1_196 = arith.constant 1 : index
    %c8_197 = arith.constant 8 : index
    %234 = memref.load %arg2[%c1_196, %c8_197] : memref<8x27xf32, #tpu.memory_space<smem>>
    %c0_198 = arith.constant 0 : index
    %c0_199 = arith.constant 0 : index
    %c2_200 = arith.constant 2 : index
    %c2_201 = arith.constant 2 : index
    %235 = vector.load %arg1[%c0_198, %c0_199, %c2_200, %c2_201] : memref<1x3x16x16xf32, #tpu.memory_space<vmem>>, vector<1x1x14x14xf32>
    %236 = vector.shape_cast %235 : vector<1x1x14x14xf32> to vector<14x14xf32>
    %237 = vector.broadcast %234 : f32 to vector<14x14xf32>
    %238 = arith.mulf %236, %237 : vector<14x14xf32>
    %239 = arith.addf %233, %238 : vector<14x14xf32>
    %c1_202 = arith.constant 1 : index
    %c9_203 = arith.constant 9 : index
    %240 = memref.load %arg2[%c1_202, %c9_203] : memref<8x27xf32, #tpu.memory_space<smem>>
    %c0_204 = arith.constant 0 : index
    %c1_205 = arith.constant 1 : index
    %c0_206 = arith.constant 0 : index
    %c0_207 = arith.constant 0 : index
    %241 = vector.load %arg1[%c0_204, %c1_205, %c0_206, %c0_207] : memref<1x3x16x16xf32, #tpu.memory_space<vmem>>, vector<1x1x14x14xf32>
    %242 = vector.shape_cast %241 : vector<1x1x14x14xf32> to vector<14x14xf32>
    %243 = vector.broadcast %240 : f32 to vector<14x14xf32>
    %244 = arith.mulf %242, %243 : vector<14x14xf32>
    %245 = arith.addf %239, %244 : vector<14x14xf32>
    %c1_208 = arith.constant 1 : index
    %c10_209 = arith.constant 10 : index
    %246 = memref.load %arg2[%c1_208, %c10_209] : memref<8x27xf32, #tpu.memory_space<smem>>
    %c0_210 = arith.constant 0 : index
    %c1_211 = arith.constant 1 : index
    %c0_212 = arith.constant 0 : index
    %c1_213 = arith.constant 1 : index
    %247 = vector.load %arg1[%c0_210, %c1_211, %c0_212, %c1_213] : memref<1x3x16x16xf32, #tpu.memory_space<vmem>>, vector<1x1x14x14xf32>
    %248 = vector.shape_cast %247 : vector<1x1x14x14xf32> to vector<14x14xf32>
    %249 = vector.broadcast %246 : f32 to vector<14x14xf32>
    %250 = arith.mulf %248, %249 : vector<14x14xf32>
    %251 = arith.addf %245, %250 : vector<14x14xf32>
    %c1_214 = arith.constant 1 : index
    %c11_215 = arith.constant 11 : index
    %252 = memref.load %arg2[%c1_214, %c11_215] : memref<8x27xf32, #tpu.memory_space<smem>>
    %c0_216 = arith.constant 0 : index
    %c1_217 = arith.constant 1 : index
    %c0_218 = arith.constant 0 : index
    %c2_219 = arith.constant 2 : index
    %253 = vector.load %arg1[%c0_216, %c1_217, %c0_218, %c2_219] : memref<1x3x16x16xf32, #tpu.memory_space<vmem>>, vector<1x1x14x14xf32>
    %254 = vector.shape_cast %253 : vector<1x1x14x14xf32> to vector<14x14xf32>
    %255 = vector.broadcast %252 : f32 to vector<14x14xf32>
    %256 = arith.mulf %254, %255 : vector<14x14xf32>
    %257 = arith.addf %251, %256 : vector<14x14xf32>
    %c1_220 = arith.constant 1 : index
    %c12_221 = arith.constant 12 : index
    %258 = memref.load %arg2[%c1_220, %c12_221] : memref<8x27xf32, #tpu.memory_space<smem>>
    %c0_222 = arith.constant 0 : index
    %c1_223 = arith.constant 1 : index
    %c1_224 = arith.constant 1 : index
    %c0_225 = arith.constant 0 : index
    %259 = vector.load %arg1[%c0_222, %c1_223, %c1_224, %c0_225] : memref<1x3x16x16xf32, #tpu.memory_space<vmem>>, vector<1x1x14x14xf32>
    %260 = vector.shape_cast %259 : vector<1x1x14x14xf32> to vector<14x14xf32>
    %261 = vector.broadcast %258 : f32 to vector<14x14xf32>
    %262 = arith.mulf %260, %261 : vector<14x14xf32>
    %263 = arith.addf %257, %262 : vector<14x14xf32>
    %c1_226 = arith.constant 1 : index
    %c13_227 = arith.constant 13 : index
    %264 = memref.load %arg2[%c1_226, %c13_227] : memref<8x27xf32, #tpu.memory_space<smem>>
    %c0_228 = arith.constant 0 : index
    %c1_229 = arith.constant 1 : index
    %c1_230 = arith.constant 1 : index
    %c1_231 = arith.constant 1 : index
    %265 = vector.load %arg1[%c0_228, %c1_229, %c1_230, %c1_231] : memref<1x3x16x16xf32, #tpu.memory_space<vmem>>, vector<1x1x14x14xf32>
    %266 = vector.shape_cast %265 : vector<1x1x14x14xf32> to vector<14x14xf32>
    %267 = vector.broadcast %264 : f32 to vector<14x14xf32>
    %268 = arith.mulf %266, %267 : vector<14x14xf32>
    %269 = arith.addf %263, %268 : vector<14x14xf32>
    %c1_232 = arith.constant 1 : index
    %c14_233 = arith.constant 14 : index
    %270 = memref.load %arg2[%c1_232, %c14_233] : memref<8x27xf32, #tpu.memory_space<smem>>
    %c0_234 = arith.constant 0 : index
    %c1_235 = arith.constant 1 : index
    %c1_236 = arith.constant 1 : index
    %c2_237 = arith.constant 2 : index
    %271 = vector.load %arg1[%c0_234, %c1_235, %c1_236, %c2_237] : memref<1x3x16x16xf32, #tpu.memory_space<vmem>>, vector<1x1x14x14xf32>
    %272 = vector.shape_cast %271 : vector<1x1x14x14xf32> to vector<14x14xf32>
    %273 = vector.broadcast %270 : f32 to vector<14x14xf32>
    %274 = arith.mulf %272, %273 : vector<14x14xf32>
    %275 = arith.addf %269, %274 : vector<14x14xf32>
    %c1_238 = arith.constant 1 : index
    %c15_239 = arith.constant 15 : index
    %276 = memref.load %arg2[%c1_238, %c15_239] : memref<8x27xf32, #tpu.memory_space<smem>>
    %c0_240 = arith.constant 0 : index
    %c1_241 = arith.constant 1 : index
    %c2_242 = arith.constant 2 : index
    %c0_243 = arith.constant 0 : index
    %277 = vector.load %arg1[%c0_240, %c1_241, %c2_242, %c0_243] : memref<1x3x16x16xf32, #tpu.memory_space<vmem>>, vector<1x1x14x14xf32>
    %278 = vector.shape_cast %277 : vector<1x1x14x14xf32> to vector<14x14xf32>
    %279 = vector.broadcast %276 : f32 to vector<14x14xf32>
    %280 = arith.mulf %278, %279 : vector<14x14xf32>
    %281 = arith.addf %275, %280 : vector<14x14xf32>
    %c1_244 = arith.constant 1 : index
    %c16_245 = arith.constant 16 : index
    %282 = memref.load %arg2[%c1_244, %c16_245] : memref<8x27xf32, #tpu.memory_space<smem>>
    %c0_246 = arith.constant 0 : index
    %c1_247 = arith.constant 1 : index
    %c2_248 = arith.constant 2 : index
    %c1_249 = arith.constant 1 : index
    %283 = vector.load %arg1[%c0_246, %c1_247, %c2_248, %c1_249] : memref<1x3x16x16xf32, #tpu.memory_space<vmem>>, vector<1x1x14x14xf32>
    %284 = vector.shape_cast %283 : vector<1x1x14x14xf32> to vector<14x14xf32>
    %285 = vector.broadcast %282 : f32 to vector<14x14xf32>
    %286 = arith.mulf %284, %285 : vector<14x14xf32>
    %287 = arith.addf %281, %286 : vector<14x14xf32>
    %c1_250 = arith.constant 1 : index
    %c17_251 = arith.constant 17 : index
    %288 = memref.load %arg2[%c1_250, %c17_251] : memref<8x27xf32, #tpu.memory_space<smem>>
    %c0_252 = arith.constant 0 : index
    %c1_253 = arith.constant 1 : index
    %c2_254 = arith.constant 2 : index
    %c2_255 = arith.constant 2 : index
    %289 = vector.load %arg1[%c0_252, %c1_253, %c2_254, %c2_255] : memref<1x3x16x16xf32, #tpu.memory_space<vmem>>, vector<1x1x14x14xf32>
    %290 = vector.shape_cast %289 : vector<1x1x14x14xf32> to vector<14x14xf32>
    %291 = vector.broadcast %288 : f32 to vector<14x14xf32>
    %292 = arith.mulf %290, %291 : vector<14x14xf32>
    %293 = arith.addf %287, %292 : vector<14x14xf32>
    %c1_256 = arith.constant 1 : index
    %c18_257 = arith.constant 18 : index
    %294 = memref.load %arg2[%c1_256, %c18_257] : memref<8x27xf32, #tpu.memory_space<smem>>
    %c0_258 = arith.constant 0 : index
    %c2_259 = arith.constant 2 : index
    %c0_260 = arith.constant 0 : index
    %c0_261 = arith.constant 0 : index
    %295 = vector.load %arg1[%c0_258, %c2_259, %c0_260, %c0_261] : memref<1x3x16x16xf32, #tpu.memory_space<vmem>>, vector<1x1x14x14xf32>
    %296 = vector.shape_cast %295 : vector<1x1x14x14xf32> to vector<14x14xf32>
    %297 = vector.broadcast %294 : f32 to vector<14x14xf32>
    %298 = arith.mulf %296, %297 : vector<14x14xf32>
    %299 = arith.addf %293, %298 : vector<14x14xf32>
    %c1_262 = arith.constant 1 : index
    %c19_263 = arith.constant 19 : index
    %300 = memref.load %arg2[%c1_262, %c19_263] : memref<8x27xf32, #tpu.memory_space<smem>>
    %c0_264 = arith.constant 0 : index
    %c2_265 = arith.constant 2 : index
    %c0_266 = arith.constant 0 : index
    %c1_267 = arith.constant 1 : index
    %301 = vector.load %arg1[%c0_264, %c2_265, %c0_266, %c1_267] : memref<1x3x16x16xf32, #tpu.memory_space<vmem>>, vector<1x1x14x14xf32>
    %302 = vector.shape_cast %301 : vector<1x1x14x14xf32> to vector<14x14xf32>
    %303 = vector.broadcast %300 : f32 to vector<14x14xf32>
    %304 = arith.mulf %302, %303 : vector<14x14xf32>
    %305 = arith.addf %299, %304 : vector<14x14xf32>
    %c1_268 = arith.constant 1 : index
    %c20_269 = arith.constant 20 : index
    %306 = memref.load %arg2[%c1_268, %c20_269] : memref<8x27xf32, #tpu.memory_space<smem>>
    %c0_270 = arith.constant 0 : index
    %c2_271 = arith.constant 2 : index
    %c0_272 = arith.constant 0 : index
    %c2_273 = arith.constant 2 : index
    %307 = vector.load %arg1[%c0_270, %c2_271, %c0_272, %c2_273] : memref<1x3x16x16xf32, #tpu.memory_space<vmem>>, vector<1x1x14x14xf32>
    %308 = vector.shape_cast %307 : vector<1x1x14x14xf32> to vector<14x14xf32>
    %309 = vector.broadcast %306 : f32 to vector<14x14xf32>
    %310 = arith.mulf %308, %309 : vector<14x14xf32>
    %311 = arith.addf %305, %310 : vector<14x14xf32>
    %c1_274 = arith.constant 1 : index
    %c21_275 = arith.constant 21 : index
    %312 = memref.load %arg2[%c1_274, %c21_275] : memref<8x27xf32, #tpu.memory_space<smem>>
    %c0_276 = arith.constant 0 : index
    %c2_277 = arith.constant 2 : index
    %c1_278 = arith.constant 1 : index
    %c0_279 = arith.constant 0 : index
    %313 = vector.load %arg1[%c0_276, %c2_277, %c1_278, %c0_279] : memref<1x3x16x16xf32, #tpu.memory_space<vmem>>, vector<1x1x14x14xf32>
    %314 = vector.shape_cast %313 : vector<1x1x14x14xf32> to vector<14x14xf32>
    %315 = vector.broadcast %312 : f32 to vector<14x14xf32>
    %316 = arith.mulf %314, %315 : vector<14x14xf32>
    %317 = arith.addf %311, %316 : vector<14x14xf32>
    %c1_280 = arith.constant 1 : index
    %c22_281 = arith.constant 22 : index
    %318 = memref.load %arg2[%c1_280, %c22_281] : memref<8x27xf32, #tpu.memory_space<smem>>
    %c0_282 = arith.constant 0 : index
    %c2_283 = arith.constant 2 : index
    %c1_284 = arith.constant 1 : index
    %c1_285 = arith.constant 1 : index
    %319 = vector.load %arg1[%c0_282, %c2_283, %c1_284, %c1_285] : memref<1x3x16x16xf32, #tpu.memory_space<vmem>>, vector<1x1x14x14xf32>
    %320 = vector.shape_cast %319 : vector<1x1x14x14xf32> to vector<14x14xf32>
    %321 = vector.broadcast %318 : f32 to vector<14x14xf32>
    %322 = arith.mulf %320, %321 : vector<14x14xf32>
    %323 = arith.addf %317, %322 : vector<14x14xf32>
    %c1_286 = arith.constant 1 : index
    %c23_287 = arith.constant 23 : index
    %324 = memref.load %arg2[%c1_286, %c23_287] : memref<8x27xf32, #tpu.memory_space<smem>>
    %c0_288 = arith.constant 0 : index
    %c2_289 = arith.constant 2 : index
    %c1_290 = arith.constant 1 : index
    %c2_291 = arith.constant 2 : index
    %325 = vector.load %arg1[%c0_288, %c2_289, %c1_290, %c2_291] : memref<1x3x16x16xf32, #tpu.memory_space<vmem>>, vector<1x1x14x14xf32>
    %326 = vector.shape_cast %325 : vector<1x1x14x14xf32> to vector<14x14xf32>
    %327 = vector.broadcast %324 : f32 to vector<14x14xf32>
    %328 = arith.mulf %326, %327 : vector<14x14xf32>
    %329 = arith.addf %323, %328 : vector<14x14xf32>
    %c1_292 = arith.constant 1 : index
    %c24_293 = arith.constant 24 : index
    %330 = memref.load %arg2[%c1_292, %c24_293] : memref<8x27xf32, #tpu.memory_space<smem>>
    %c0_294 = arith.constant 0 : index
    %c2_295 = arith.constant 2 : index
    %c2_296 = arith.constant 2 : index
    %c0_297 = arith.constant 0 : index
    %331 = vector.load %arg1[%c0_294, %c2_295, %c2_296, %c0_297] : memref<1x3x16x16xf32, #tpu.memory_space<vmem>>, vector<1x1x14x14xf32>
    %332 = vector.shape_cast %331 : vector<1x1x14x14xf32> to vector<14x14xf32>
    %333 = vector.broadcast %330 : f32 to vector<14x14xf32>
    %334 = arith.mulf %332, %333 : vector<14x14xf32>
    %335 = arith.addf %329, %334 : vector<14x14xf32>
    %c1_298 = arith.constant 1 : index
    %c25_299 = arith.constant 25 : index
    %336 = memref.load %arg2[%c1_298, %c25_299] : memref<8x27xf32, #tpu.memory_space<smem>>
    %c0_300 = arith.constant 0 : index
    %c2_301 = arith.constant 2 : index
    %c2_302 = arith.constant 2 : index
    %c1_303 = arith.constant 1 : index
    %337 = vector.load %arg1[%c0_300, %c2_301, %c2_302, %c1_303] : memref<1x3x16x16xf32, #tpu.memory_space<vmem>>, vector<1x1x14x14xf32>
    %338 = vector.shape_cast %337 : vector<1x1x14x14xf32> to vector<14x14xf32>
    %339 = vector.broadcast %336 : f32 to vector<14x14xf32>
    %340 = arith.mulf %338, %339 : vector<14x14xf32>
    %341 = arith.addf %335, %340 : vector<14x14xf32>
    %c1_304 = arith.constant 1 : index
    %c26_305 = arith.constant 26 : index
    %342 = memref.load %arg2[%c1_304, %c26_305] : memref<8x27xf32, #tpu.memory_space<smem>>
    %c0_306 = arith.constant 0 : index
    %c2_307 = arith.constant 2 : index
    %c2_308 = arith.constant 2 : index
    %c2_309 = arith.constant 2 : index
    %343 = vector.load %arg1[%c0_306, %c2_307, %c2_308, %c2_309] : memref<1x3x16x16xf32, #tpu.memory_space<vmem>>, vector<1x1x14x14xf32>
    %344 = vector.shape_cast %343 : vector<1x1x14x14xf32> to vector<14x14xf32>
    %345 = vector.broadcast %342 : f32 to vector<14x14xf32>
    %346 = arith.mulf %344, %345 : vector<14x14xf32>
    %347 = arith.addf %341, %346 : vector<14x14xf32>
    %cst_310 = arith.constant 0.000000e+00 : f32
    %348 = vector.broadcast %cst_310 : f32 to vector<14x14xf32>
    %349 = arith.maximumf %347, %348 : vector<14x14xf32>
    %cst_311 = arith.constant dense<0.000000e+00> : vector<14xf32>
    %350 = vector.multi_reduction <add>, %349, %cst_311 [1] : vector<14x14xf32> to vector<14xf32>
    %351 = vector.shape_cast %350 : vector<14xf32> to vector<14x1xf32>
    %cst_312 = arith.constant dense<0.000000e+00> : vector<1xf32>
    %352 = vector.multi_reduction <add>, %351, %cst_312 [0] : vector<14x1xf32> to vector<1xf32>
    %353 = vector.shape_cast %352 : vector<1xf32> to vector<1x1xf32>
    %354 = arith.addf %181, %353 : vector<1x1xf32>
    %c1_313 = arith.constant 1 : index
    %c0_314 = arith.constant 0 : index
    %355 = vector.load %arg4[%c1_313, %c0_314] : memref<8x128xf32, #tpu.memory_space<vmem>>, vector<1x128xf32>
    %cst_315 = arith.constant 0.00510204071 : f32
    %356 = vector.broadcast %cst_315 : f32 to vector<1x1xf32>
    %357 = arith.mulf %354, %356 : vector<1x1xf32>
    %358 = vector.broadcast %357 : vector<1x1xf32> to vector<1x128xf32>
    %359 = arith.mulf %355, %358 : vector<1x128xf32>
    %360 = arith.addf %180, %359 : vector<1x128xf32>
    %cst_316 = arith.constant 0.000000e+00 : f32
    %361 = vector.broadcast %cst_316 : f32 to vector<1x1xf32>
    %cst_317 = arith.constant 0.000000e+00 : f32
    %362 = vector.broadcast %cst_317 : f32 to vector<14x14xf32>
    %c2_318 = arith.constant 2 : index
    %363 = memref.load %arg3[%c2_318] : memref<8xf32, #tpu.memory_space<smem>>
    %364 = vector.broadcast %363 : f32 to vector<14x14xf32>
    %365 = arith.addf %362, %364 : vector<14x14xf32>
    %c2_319 = arith.constant 2 : index
    %c0_320 = arith.constant 0 : index
    %366 = memref.load %arg2[%c2_319, %c0_320] : memref<8x27xf32, #tpu.memory_space<smem>>
    %c0_321 = arith.constant 0 : index
    %c0_322 = arith.constant 0 : index
    %c0_323 = arith.constant 0 : index
    %c0_324 = arith.constant 0 : index
    %367 = vector.load %arg1[%c0_321, %c0_322, %c0_323, %c0_324] : memref<1x3x16x16xf32, #tpu.memory_space<vmem>>, vector<1x1x14x14xf32>
    %368 = vector.shape_cast %367 : vector<1x1x14x14xf32> to vector<14x14xf32>
    %369 = vector.broadcast %366 : f32 to vector<14x14xf32>
    %370 = arith.mulf %368, %369 : vector<14x14xf32>
    %371 = arith.addf %365, %370 : vector<14x14xf32>
    %c2_325 = arith.constant 2 : index
    %c1_326 = arith.constant 1 : index
    %372 = memref.load %arg2[%c2_325, %c1_326] : memref<8x27xf32, #tpu.memory_space<smem>>
    %c0_327 = arith.constant 0 : index
    %c0_328 = arith.constant 0 : index
    %c0_329 = arith.constant 0 : index
    %c1_330 = arith.constant 1 : index
    %373 = vector.load %arg1[%c0_327, %c0_328, %c0_329, %c1_330] : memref<1x3x16x16xf32, #tpu.memory_space<vmem>>, vector<1x1x14x14xf32>
    %374 = vector.shape_cast %373 : vector<1x1x14x14xf32> to vector<14x14xf32>
    %375 = vector.broadcast %372 : f32 to vector<14x14xf32>
    %376 = arith.mulf %374, %375 : vector<14x14xf32>
    %377 = arith.addf %371, %376 : vector<14x14xf32>
    %c2_331 = arith.constant 2 : index
    %c2_332 = arith.constant 2 : index
    %378 = memref.load %arg2[%c2_331, %c2_332] : memref<8x27xf32, #tpu.memory_space<smem>>
    %c0_333 = arith.constant 0 : index
    %c0_334 = arith.constant 0 : index
    %c0_335 = arith.constant 0 : index
    %c2_336 = arith.constant 2 : index
    %379 = vector.load %arg1[%c0_333, %c0_334, %c0_335, %c2_336] : memref<1x3x16x16xf32, #tpu.memory_space<vmem>>, vector<1x1x14x14xf32>
    %380 = vector.shape_cast %379 : vector<1x1x14x14xf32> to vector<14x14xf32>
    %381 = vector.broadcast %378 : f32 to vector<14x14xf32>
    %382 = arith.mulf %380, %381 : vector<14x14xf32>
    %383 = arith.addf %377, %382 : vector<14x14xf32>
    %c2_337 = arith.constant 2 : index
    %c3_338 = arith.constant 3 : index
    %384 = memref.load %arg2[%c2_337, %c3_338] : memref<8x27xf32, #tpu.memory_space<smem>>
    %c0_339 = arith.constant 0 : index
    %c0_340 = arith.constant 0 : index
    %c1_341 = arith.constant 1 : index
    %c0_342 = arith.constant 0 : index
    %385 = vector.load %arg1[%c0_339, %c0_340, %c1_341, %c0_342] : memref<1x3x16x16xf32, #tpu.memory_space<vmem>>, vector<1x1x14x14xf32>
    %386 = vector.shape_cast %385 : vector<1x1x14x14xf32> to vector<14x14xf32>
    %387 = vector.broadcast %384 : f32 to vector<14x14xf32>
    %388 = arith.mulf %386, %387 : vector<14x14xf32>
    %389 = arith.addf %383, %388 : vector<14x14xf32>
    %c2_343 = arith.constant 2 : index
    %c4_344 = arith.constant 4 : index
    %390 = memref.load %arg2[%c2_343, %c4_344] : memref<8x27xf32, #tpu.memory_space<smem>>
    %c0_345 = arith.constant 0 : index
    %c0_346 = arith.constant 0 : index
    %c1_347 = arith.constant 1 : index
    %c1_348 = arith.constant 1 : index
    %391 = vector.load %arg1[%c0_345, %c0_346, %c1_347, %c1_348] : memref<1x3x16x16xf32, #tpu.memory_space<vmem>>, vector<1x1x14x14xf32>
    %392 = vector.shape_cast %391 : vector<1x1x14x14xf32> to vector<14x14xf32>
    %393 = vector.broadcast %390 : f32 to vector<14x14xf32>
    %394 = arith.mulf %392, %393 : vector<14x14xf32>
    %395 = arith.addf %389, %394 : vector<14x14xf32>
    %c2_349 = arith.constant 2 : index
    %c5_350 = arith.constant 5 : index
    %396 = memref.load %arg2[%c2_349, %c5_350] : memref<8x27xf32, #tpu.memory_space<smem>>
    %c0_351 = arith.constant 0 : index
    %c0_352 = arith.constant 0 : index
    %c1_353 = arith.constant 1 : index
    %c2_354 = arith.constant 2 : index
    %397 = vector.load %arg1[%c0_351, %c0_352, %c1_353, %c2_354] : memref<1x3x16x16xf32, #tpu.memory_space<vmem>>, vector<1x1x14x14xf32>
    %398 = vector.shape_cast %397 : vector<1x1x14x14xf32> to vector<14x14xf32>
    %399 = vector.broadcast %396 : f32 to vector<14x14xf32>
    %400 = arith.mulf %398, %399 : vector<14x14xf32>
    %401 = arith.addf %395, %400 : vector<14x14xf32>
    %c2_355 = arith.constant 2 : index
    %c6_356 = arith.constant 6 : index
    %402 = memref.load %arg2[%c2_355, %c6_356] : memref<8x27xf32, #tpu.memory_space<smem>>
    %c0_357 = arith.constant 0 : index
    %c0_358 = arith.constant 0 : index
    %c2_359 = arith.constant 2 : index
    %c0_360 = arith.constant 0 : index
    %403 = vector.load %arg1[%c0_357, %c0_358, %c2_359, %c0_360] : memref<1x3x16x16xf32, #tpu.memory_space<vmem>>, vector<1x1x14x14xf32>
    %404 = vector.shape_cast %403 : vector<1x1x14x14xf32> to vector<14x14xf32>
    %405 = vector.broadcast %402 : f32 to vector<14x14xf32>
    %406 = arith.mulf %404, %405 : vector<14x14xf32>
    %407 = arith.addf %401, %406 : vector<14x14xf32>
    %c2_361 = arith.constant 2 : index
    %c7_362 = arith.constant 7 : index
    %408 = memref.load %arg2[%c2_361, %c7_362] : memref<8x27xf32, #tpu.memory_space<smem>>
    %c0_363 = arith.constant 0 : index
    %c0_364 = arith.constant 0 : index
    %c2_365 = arith.constant 2 : index
    %c1_366 = arith.constant 1 : index
    %409 = vector.load %arg1[%c0_363, %c0_364, %c2_365, %c1_366] : memref<1x3x16x16xf32, #tpu.memory_space<vmem>>, vector<1x1x14x14xf32>
    %410 = vector.shape_cast %409 : vector<1x1x14x14xf32> to vector<14x14xf32>
    %411 = vector.broadcast %408 : f32 to vector<14x14xf32>
    %412 = arith.mulf %410, %411 : vector<14x14xf32>
    %413 = arith.addf %407, %412 : vector<14x14xf32>
    %c2_367 = arith.constant 2 : index
    %c8_368 = arith.constant 8 : index
    %414 = memref.load %arg2[%c2_367, %c8_368] : memref<8x27xf32, #tpu.memory_space<smem>>
    %c0_369 = arith.constant 0 : index
    %c0_370 = arith.constant 0 : index
    %c2_371 = arith.constant 2 : index
    %c2_372 = arith.constant 2 : index
    %415 = vector.load %arg1[%c0_369, %c0_370, %c2_371, %c2_372] : memref<1x3x16x16xf32, #tpu.memory_space<vmem>>, vector<1x1x14x14xf32>
    %416 = vector.shape_cast %415 : vector<1x1x14x14xf32> to vector<14x14xf32>
    %417 = vector.broadcast %414 : f32 to vector<14x14xf32>
    %418 = arith.mulf %416, %417 : vector<14x14xf32>
    %419 = arith.addf %413, %418 : vector<14x14xf32>
    %c2_373 = arith.constant 2 : index
    %c9_374 = arith.constant 9 : index
    %420 = memref.load %arg2[%c2_373, %c9_374] : memref<8x27xf32, #tpu.memory_space<smem>>
    %c0_375 = arith.constant 0 : index
    %c1_376 = arith.constant 1 : index
    %c0_377 = arith.constant 0 : index
    %c0_378 = arith.constant 0 : index
    %421 = vector.load %arg1[%c0_375, %c1_376, %c0_377, %c0_378] : memref<1x3x16x16xf32, #tpu.memory_space<vmem>>, vector<1x1x14x14xf32>
    %422 = vector.shape_cast %421 : vector<1x1x14x14xf32> to vector<14x14xf32>
    %423 = vector.broadcast %420 : f32 to vector<14x14xf32>
    %424 = arith.mulf %422, %423 : vector<14x14xf32>
    %425 = arith.addf %419, %424 : vector<14x14xf32>
    %c2_379 = arith.constant 2 : index
    %c10_380 = arith.constant 10 : index
    %426 = memref.load %arg2[%c2_379, %c10_380] : memref<8x27xf32, #tpu.memory_space<smem>>
    %c0_381 = arith.constant 0 : index
    %c1_382 = arith.constant 1 : index
    %c0_383 = arith.constant 0 : index
    %c1_384 = arith.constant 1 : index
    %427 = vector.load %arg1[%c0_381, %c1_382, %c0_383, %c1_384] : memref<1x3x16x16xf32, #tpu.memory_space<vmem>>, vector<1x1x14x14xf32>
    %428 = vector.shape_cast %427 : vector<1x1x14x14xf32> to vector<14x14xf32>
    %429 = vector.broadcast %426 : f32 to vector<14x14xf32>
    %430 = arith.mulf %428, %429 : vector<14x14xf32>
    %431 = arith.addf %425, %430 : vector<14x14xf32>
    %c2_385 = arith.constant 2 : index
    %c11_386 = arith.constant 11 : index
    %432 = memref.load %arg2[%c2_385, %c11_386] : memref<8x27xf32, #tpu.memory_space<smem>>
    %c0_387 = arith.constant 0 : index
    %c1_388 = arith.constant 1 : index
    %c0_389 = arith.constant 0 : index
    %c2_390 = arith.constant 2 : index
    %433 = vector.load %arg1[%c0_387, %c1_388, %c0_389, %c2_390] : memref<1x3x16x16xf32, #tpu.memory_space<vmem>>, vector<1x1x14x14xf32>
    %434 = vector.shape_cast %433 : vector<1x1x14x14xf32> to vector<14x14xf32>
    %435 = vector.broadcast %432 : f32 to vector<14x14xf32>
    %436 = arith.mulf %434, %435 : vector<14x14xf32>
    %437 = arith.addf %431, %436 : vector<14x14xf32>
    %c2_391 = arith.constant 2 : index
    %c12_392 = arith.constant 12 : index
    %438 = memref.load %arg2[%c2_391, %c12_392] : memref<8x27xf32, #tpu.memory_space<smem>>
    %c0_393 = arith.constant 0 : index
    %c1_394 = arith.constant 1 : index
    %c1_395 = arith.constant 1 : index
    %c0_396 = arith.constant 0 : index
    %439 = vector.load %arg1[%c0_393, %c1_394, %c1_395, %c0_396] : memref<1x3x16x16xf32, #tpu.memory_space<vmem>>, vector<1x1x14x14xf32>
    %440 = vector.shape_cast %439 : vector<1x1x14x14xf32> to vector<14x14xf32>
    %441 = vector.broadcast %438 : f32 to vector<14x14xf32>
    %442 = arith.mulf %440, %441 : vector<14x14xf32>
    %443 = arith.addf %437, %442 : vector<14x14xf32>
    %c2_397 = arith.constant 2 : index
    %c13_398 = arith.constant 13 : index
    %444 = memref.load %arg2[%c2_397, %c13_398] : memref<8x27xf32, #tpu.memory_space<smem>>
    %c0_399 = arith.constant 0 : index
    %c1_400 = arith.constant 1 : index
    %c1_401 = arith.constant 1 : index
    %c1_402 = arith.constant 1 : index
    %445 = vector.load %arg1[%c0_399, %c1_400, %c1_401, %c1_402] : memref<1x3x16x16xf32, #tpu.memory_space<vmem>>, vector<1x1x14x14xf32>
    %446 = vector.shape_cast %445 : vector<1x1x14x14xf32> to vector<14x14xf32>
    %447 = vector.broadcast %444 : f32 to vector<14x14xf32>
    %448 = arith.mulf %446, %447 : vector<14x14xf32>
    %449 = arith.addf %443, %448 : vector<14x14xf32>
    %c2_403 = arith.constant 2 : index
    %c14_404 = arith.constant 14 : index
    %450 = memref.load %arg2[%c2_403, %c14_404] : memref<8x27xf32, #tpu.memory_space<smem>>
    %c0_405 = arith.constant 0 : index
    %c1_406 = arith.constant 1 : index
    %c1_407 = arith.constant 1 : index
    %c2_408 = arith.constant 2 : index
    %451 = vector.load %arg1[%c0_405, %c1_406, %c1_407, %c2_408] : memref<1x3x16x16xf32, #tpu.memory_space<vmem>>, vector<1x1x14x14xf32>
    %452 = vector.shape_cast %451 : vector<1x1x14x14xf32> to vector<14x14xf32>
    %453 = vector.broadcast %450 : f32 to vector<14x14xf32>
    %454 = arith.mulf %452, %453 : vector<14x14xf32>
    %455 = arith.addf %449, %454 : vector<14x14xf32>
    %c2_409 = arith.constant 2 : index
    %c15_410 = arith.constant 15 : index
    %456 = memref.load %arg2[%c2_409, %c15_410] : memref<8x27xf32, #tpu.memory_space<smem>>
    %c0_411 = arith.constant 0 : index
    %c1_412 = arith.constant 1 : index
    %c2_413 = arith.constant 2 : index
    %c0_414 = arith.constant 0 : index
    %457 = vector.load %arg1[%c0_411, %c1_412, %c2_413, %c0_414] : memref<1x3x16x16xf32, #tpu.memory_space<vmem>>, vector<1x1x14x14xf32>
    %458 = vector.shape_cast %457 : vector<1x1x14x14xf32> to vector<14x14xf32>
    %459 = vector.broadcast %456 : f32 to vector<14x14xf32>
    %460 = arith.mulf %458, %459 : vector<14x14xf32>
    %461 = arith.addf %455, %460 : vector<14x14xf32>
    %c2_415 = arith.constant 2 : index
    %c16_416 = arith.constant 16 : index
    %462 = memref.load %arg2[%c2_415, %c16_416] : memref<8x27xf32, #tpu.memory_space<smem>>
    %c0_417 = arith.constant 0 : index
    %c1_418 = arith.constant 1 : index
    %c2_419 = arith.constant 2 : index
    %c1_420 = arith.constant 1 : index
    %463 = vector.load %arg1[%c0_417, %c1_418, %c2_419, %c1_420] : memref<1x3x16x16xf32, #tpu.memory_space<vmem>>, vector<1x1x14x14xf32>
    %464 = vector.shape_cast %463 : vector<1x1x14x14xf32> to vector<14x14xf32>
    %465 = vector.broadcast %462 : f32 to vector<14x14xf32>
    %466 = arith.mulf %464, %465 : vector<14x14xf32>
    %467 = arith.addf %461, %466 : vector<14x14xf32>
    %c2_421 = arith.constant 2 : index
    %c17_422 = arith.constant 17 : index
    %468 = memref.load %arg2[%c2_421, %c17_422] : memref<8x27xf32, #tpu.memory_space<smem>>
    %c0_423 = arith.constant 0 : index
    %c1_424 = arith.constant 1 : index
    %c2_425 = arith.constant 2 : index
    %c2_426 = arith.constant 2 : index
    %469 = vector.load %arg1[%c0_423, %c1_424, %c2_425, %c2_426] : memref<1x3x16x16xf32, #tpu.memory_space<vmem>>, vector<1x1x14x14xf32>
    %470 = vector.shape_cast %469 : vector<1x1x14x14xf32> to vector<14x14xf32>
    %471 = vector.broadcast %468 : f32 to vector<14x14xf32>
    %472 = arith.mulf %470, %471 : vector<14x14xf32>
    %473 = arith.addf %467, %472 : vector<14x14xf32>
    %c2_427 = arith.constant 2 : index
    %c18_428 = arith.constant 18 : index
    %474 = memref.load %arg2[%c2_427, %c18_428] : memref<8x27xf32, #tpu.memory_space<smem>>
    %c0_429 = arith.constant 0 : index
    %c2_430 = arith.constant 2 : index
    %c0_431 = arith.constant 0 : index
    %c0_432 = arith.constant 0 : index
    %475 = vector.load %arg1[%c0_429, %c2_430, %c0_431, %c0_432] : memref<1x3x16x16xf32, #tpu.memory_space<vmem>>, vector<1x1x14x14xf32>
    %476 = vector.shape_cast %475 : vector<1x1x14x14xf32> to vector<14x14xf32>
    %477 = vector.broadcast %474 : f32 to vector<14x14xf32>
    %478 = arith.mulf %476, %477 : vector<14x14xf32>
    %479 = arith.addf %473, %478 : vector<14x14xf32>
    %c2_433 = arith.constant 2 : index
    %c19_434 = arith.constant 19 : index
    %480 = memref.load %arg2[%c2_433, %c19_434] : memref<8x27xf32, #tpu.memory_space<smem>>
    %c0_435 = arith.constant 0 : index
    %c2_436 = arith.constant 2 : index
    %c0_437 = arith.constant 0 : index
    %c1_438 = arith.constant 1 : index
    %481 = vector.load %arg1[%c0_435, %c2_436, %c0_437, %c1_438] : memref<1x3x16x16xf32, #tpu.memory_space<vmem>>, vector<1x1x14x14xf32>
    %482 = vector.shape_cast %481 : vector<1x1x14x14xf32> to vector<14x14xf32>
    %483 = vector.broadcast %480 : f32 to vector<14x14xf32>
    %484 = arith.mulf %482, %483 : vector<14x14xf32>
    %485 = arith.addf %479, %484 : vector<14x14xf32>
    %c2_439 = arith.constant 2 : index
    %c20_440 = arith.constant 20 : index
    %486 = memref.load %arg2[%c2_439, %c20_440] : memref<8x27xf32, #tpu.memory_space<smem>>
    %c0_441 = arith.constant 0 : index
    %c2_442 = arith.constant 2 : index
    %c0_443 = arith.constant 0 : index
    %c2_444 = arith.constant 2 : index
    %487 = vector.load %arg1[%c0_441, %c2_442, %c0_443, %c2_444] : memref<1x3x16x16xf32, #tpu.memory_space<vmem>>, vector<1x1x14x14xf32>
    %488 = vector.shape_cast %487 : vector<1x1x14x14xf32> to vector<14x14xf32>
    %489 = vector.broadcast %486 : f32 to vector<14x14xf32>
    %490 = arith.mulf %488, %489 : vector<14x14xf32>
    %491 = arith.addf %485, %490 : vector<14x14xf32>
    %c2_445 = arith.constant 2 : index
    %c21_446 = arith.constant 21 : index
    %492 = memref.load %arg2[%c2_445, %c21_446] : memref<8x27xf32, #tpu.memory_space<smem>>
    %c0_447 = arith.constant 0 : index
    %c2_448 = arith.constant 2 : index
    %c1_449 = arith.constant 1 : index
    %c0_450 = arith.constant 0 : index
    %493 = vector.load %arg1[%c0_447, %c2_448, %c1_449, %c0_450] : memref<1x3x16x16xf32, #tpu.memory_space<vmem>>, vector<1x1x14x14xf32>
    %494 = vector.shape_cast %493 : vector<1x1x14x14xf32> to vector<14x14xf32>
    %495 = vector.broadcast %492 : f32 to vector<14x14xf32>
    %496 = arith.mulf %494, %495 : vector<14x14xf32>
    %497 = arith.addf %491, %496 : vector<14x14xf32>
    %c2_451 = arith.constant 2 : index
    %c22_452 = arith.constant 22 : index
    %498 = memref.load %arg2[%c2_451, %c22_452] : memref<8x27xf32, #tpu.memory_space<smem>>
    %c0_453 = arith.constant 0 : index
    %c2_454 = arith.constant 2 : index
    %c1_455 = arith.constant 1 : index
    %c1_456 = arith.constant 1 : index
    %499 = vector.load %arg1[%c0_453, %c2_454, %c1_455, %c1_456] : memref<1x3x16x16xf32, #tpu.memory_space<vmem>>, vector<1x1x14x14xf32>
    %500 = vector.shape_cast %499 : vector<1x1x14x14xf32> to vector<14x14xf32>
    %501 = vector.broadcast %498 : f32 to vector<14x14xf32>
    %502 = arith.mulf %500, %501 : vector<14x14xf32>
    %503 = arith.addf %497, %502 : vector<14x14xf32>
    %c2_457 = arith.constant 2 : index
    %c23_458 = arith.constant 23 : index
    %504 = memref.load %arg2[%c2_457, %c23_458] : memref<8x27xf32, #tpu.memory_space<smem>>
    %c0_459 = arith.constant 0 : index
    %c2_460 = arith.constant 2 : index
    %c1_461 = arith.constant 1 : index
    %c2_462 = arith.constant 2 : index
    %505 = vector.load %arg1[%c0_459, %c2_460, %c1_461, %c2_462] : memref<1x3x16x16xf32, #tpu.memory_space<vmem>>, vector<1x1x14x14xf32>
    %506 = vector.shape_cast %505 : vector<1x1x14x14xf32> to vector<14x14xf32>
    %507 = vector.broadcast %504 : f32 to vector<14x14xf32>
    %508 = arith.mulf %506, %507 : vector<14x14xf32>
    %509 = arith.addf %503, %508 : vector<14x14xf32>
    %c2_463 = arith.constant 2 : index
    %c24_464 = arith.constant 24 : index
    %510 = memref.load %arg2[%c2_463, %c24_464] : memref<8x27xf32, #tpu.memory_space<smem>>
    %c0_465 = arith.constant 0 : index
    %c2_466 = arith.constant 2 : index
    %c2_467 = arith.constant 2 : index
    %c0_468 = arith.constant 0 : index
    %511 = vector.load %arg1[%c0_465, %c2_466, %c2_467, %c0_468] : memref<1x3x16x16xf32, #tpu.memory_space<vmem>>, vector<1x1x14x14xf32>
    %512 = vector.shape_cast %511 : vector<1x1x14x14xf32> to vector<14x14xf32>
    %513 = vector.broadcast %510 : f32 to vector<14x14xf32>
    %514 = arith.mulf %512, %513 : vector<14x14xf32>
    %515 = arith.addf %509, %514 : vector<14x14xf32>
    %c2_469 = arith.constant 2 : index
    %c25_470 = arith.constant 25 : index
    %516 = memref.load %arg2[%c2_469, %c25_470] : memref<8x27xf32, #tpu.memory_space<smem>>
    %c0_471 = arith.constant 0 : index
    %c2_472 = arith.constant 2 : index
    %c2_473 = arith.constant 2 : index
    %c1_474 = arith.constant 1 : index
    %517 = vector.load %arg1[%c0_471, %c2_472, %c2_473, %c1_474] : memref<1x3x16x16xf32, #tpu.memory_space<vmem>>, vector<1x1x14x14xf32>
    %518 = vector.shape_cast %517 : vector<1x1x14x14xf32> to vector<14x14xf32>
    %519 = vector.broadcast %516 : f32 to vector<14x14xf32>
    %520 = arith.mulf %518, %519 : vector<14x14xf32>
    %521 = arith.addf %515, %520 : vector<14x14xf32>
    %c2_475 = arith.constant 2 : index
    %c26_476 = arith.constant 26 : index
    %522 = memref.load %arg2[%c2_475, %c26_476] : memref<8x27xf32, #tpu.memory_space<smem>>
    %c0_477 = arith.constant 0 : index
    %c2_478 = arith.constant 2 : index
    %c2_479 = arith.constant 2 : index
    %c2_480 = arith.constant 2 : index
    %523 = vector.load %arg1[%c0_477, %c2_478, %c2_479, %c2_480] : memref<1x3x16x16xf32, #tpu.memory_space<vmem>>, vector<1x1x14x14xf32>
    %524 = vector.shape_cast %523 : vector<1x1x14x14xf32> to vector<14x14xf32>
    %525 = vector.broadcast %522 : f32 to vector<14x14xf32>
    %526 = arith.mulf %524, %525 : vector<14x14xf32>
    %527 = arith.addf %521, %526 : vector<14x14xf32>
    %cst_481 = arith.constant 0.000000e+00 : f32
    %528 = vector.broadcast %cst_481 : f32 to vector<14x14xf32>
    %529 = arith.maximumf %527, %528 : vector<14x14xf32>
    %cst_482 = arith.constant dense<0.000000e+00> : vector<14xf32>
    %530 = vector.multi_reduction <add>, %529, %cst_482 [1] : vector<14x14xf32> to vector<14xf32>
    %531 = vector.shape_cast %530 : vector<14xf32> to vector<14x1xf32>
    %cst_483 = arith.constant dense<0.000000e+00> : vector<1xf32>
    %532 = vector.multi_reduction <add>, %531, %cst_483 [0] : vector<14x1xf32> to vector<1xf32>
    %533 = vector.shape_cast %532 : vector<1xf32> to vector<1x1xf32>
    %534 = arith.addf %361, %533 : vector<1x1xf32>
    %c2_484 = arith.constant 2 : index
    %c0_485 = arith.constant 0 : index
    %535 = vector.load %arg4[%c2_484, %c0_485] : memref<8x128xf32, #tpu.memory_space<vmem>>, vector<1x128xf32>
    %cst_486 = arith.constant 0.00510204071 : f32
    %536 = vector.broadcast %cst_486 : f32 to vector<1x1xf32>
    %537 = arith.mulf %534, %536 : vector<1x1xf32>
    %538 = vector.broadcast %537 : vector<1x1xf32> to vector<1x128xf32>
    %539 = arith.mulf %535, %538 : vector<1x128xf32>
    %540 = arith.addf %360, %539 : vector<1x128xf32>
    %cst_487 = arith.constant 0.000000e+00 : f32
    %541 = vector.broadcast %cst_487 : f32 to vector<1x1xf32>
    %cst_488 = arith.constant 0.000000e+00 : f32
    %542 = vector.broadcast %cst_488 : f32 to vector<14x14xf32>
    %c3_489 = arith.constant 3 : index
    %543 = memref.load %arg3[%c3_489] : memref<8xf32, #tpu.memory_space<smem>>
    %544 = vector.broadcast %543 : f32 to vector<14x14xf32>
    %545 = arith.addf %542, %544 : vector<14x14xf32>
    %c3_490 = arith.constant 3 : index
    %c0_491 = arith.constant 0 : index
    %546 = memref.load %arg2[%c3_490, %c0_491] : memref<8x27xf32, #tpu.memory_space<smem>>
    %c0_492 = arith.constant 0 : index
    %c0_493 = arith.constant 0 : index
    %c0_494 = arith.constant 0 : index
    %c0_495 = arith.constant 0 : index
    %547 = vector.load %arg1[%c0_492, %c0_493, %c0_494, %c0_495] : memref<1x3x16x16xf32, #tpu.memory_space<vmem>>, vector<1x1x14x14xf32>
    %548 = vector.shape_cast %547 : vector<1x1x14x14xf32> to vector<14x14xf32>
    %549 = vector.broadcast %546 : f32 to vector<14x14xf32>
    %550 = arith.mulf %548, %549 : vector<14x14xf32>
    %551 = arith.addf %545, %550 : vector<14x14xf32>
    %c3_496 = arith.constant 3 : index
    %c1_497 = arith.constant 1 : index
    %552 = memref.load %arg2[%c3_496, %c1_497] : memref<8x27xf32, #tpu.memory_space<smem>>
    %c0_498 = arith.constant 0 : index
    %c0_499 = arith.constant 0 : index
    %c0_500 = arith.constant 0 : index
    %c1_501 = arith.constant 1 : index
    %553 = vector.load %arg1[%c0_498, %c0_499, %c0_500, %c1_501] : memref<1x3x16x16xf32, #tpu.memory_space<vmem>>, vector<1x1x14x14xf32>
    %554 = vector.shape_cast %553 : vector<1x1x14x14xf32> to vector<14x14xf32>
    %555 = vector.broadcast %552 : f32 to vector<14x14xf32>
    %556 = arith.mulf %554, %555 : vector<14x14xf32>
    %557 = arith.addf %551, %556 : vector<14x14xf32>
    %c3_502 = arith.constant 3 : index
    %c2_503 = arith.constant 2 : index
    %558 = memref.load %arg2[%c3_502, %c2_503] : memref<8x27xf32, #tpu.memory_space<smem>>
    %c0_504 = arith.constant 0 : index
    %c0_505 = arith.constant 0 : index
    %c0_506 = arith.constant 0 : index
    %c2_507 = arith.constant 2 : index
    %559 = vector.load %arg1[%c0_504, %c0_505, %c0_506, %c2_507] : memref<1x3x16x16xf32, #tpu.memory_space<vmem>>, vector<1x1x14x14xf32>
    %560 = vector.shape_cast %559 : vector<1x1x14x14xf32> to vector<14x14xf32>
    %561 = vector.broadcast %558 : f32 to vector<14x14xf32>
    %562 = arith.mulf %560, %561 : vector<14x14xf32>
    %563 = arith.addf %557, %562 : vector<14x14xf32>
    %c3_508 = arith.constant 3 : index
    %c3_509 = arith.constant 3 : index
    %564 = memref.load %arg2[%c3_508, %c3_509] : memref<8x27xf32, #tpu.memory_space<smem>>
    %c0_510 = arith.constant 0 : index
    %c0_511 = arith.constant 0 : index
    %c1_512 = arith.constant 1 : index
    %c0_513 = arith.constant 0 : index
    %565 = vector.load %arg1[%c0_510, %c0_511, %c1_512, %c0_513] : memref<1x3x16x16xf32, #tpu.memory_space<vmem>>, vector<1x1x14x14xf32>
    %566 = vector.shape_cast %565 : vector<1x1x14x14xf32> to vector<14x14xf32>
    %567 = vector.broadcast %564 : f32 to vector<14x14xf32>
    %568 = arith.mulf %566, %567 : vector<14x14xf32>
    %569 = arith.addf %563, %568 : vector<14x14xf32>
    %c3_514 = arith.constant 3 : index
    %c4_515 = arith.constant 4 : index
    %570 = memref.load %arg2[%c3_514, %c4_515] : memref<8x27xf32, #tpu.memory_space<smem>>
    %c0_516 = arith.constant 0 : index
    %c0_517 = arith.constant 0 : index
    %c1_518 = arith.constant 1 : index
    %c1_519 = arith.constant 1 : index
    %571 = vector.load %arg1[%c0_516, %c0_517, %c1_518, %c1_519] : memref<1x3x16x16xf32, #tpu.memory_space<vmem>>, vector<1x1x14x14xf32>
    %572 = vector.shape_cast %571 : vector<1x1x14x14xf32> to vector<14x14xf32>
    %573 = vector.broadcast %570 : f32 to vector<14x14xf32>
    %574 = arith.mulf %572, %573 : vector<14x14xf32>
    %575 = arith.addf %569, %574 : vector<14x14xf32>
    %c3_520 = arith.constant 3 : index
    %c5_521 = arith.constant 5 : index
    %576 = memref.load %arg2[%c3_520, %c5_521] : memref<8x27xf32, #tpu.memory_space<smem>>
    %c0_522 = arith.constant 0 : index
    %c0_523 = arith.constant 0 : index
    %c1_524 = arith.constant 1 : index
    %c2_525 = arith.constant 2 : index
    %577 = vector.load %arg1[%c0_522, %c0_523, %c1_524, %c2_525] : memref<1x3x16x16xf32, #tpu.memory_space<vmem>>, vector<1x1x14x14xf32>
    %578 = vector.shape_cast %577 : vector<1x1x14x14xf32> to vector<14x14xf32>
    %579 = vector.broadcast %576 : f32 to vector<14x14xf32>
    %580 = arith.mulf %578, %579 : vector<14x14xf32>
    %581 = arith.addf %575, %580 : vector<14x14xf32>
    %c3_526 = arith.constant 3 : index
    %c6_527 = arith.constant 6 : index
    %582 = memref.load %arg2[%c3_526, %c6_527] : memref<8x27xf32, #tpu.memory_space<smem>>
    %c0_528 = arith.constant 0 : index
    %c0_529 = arith.constant 0 : index
    %c2_530 = arith.constant 2 : index
    %c0_531 = arith.constant 0 : index
    %583 = vector.load %arg1[%c0_528, %c0_529, %c2_530, %c0_531] : memref<1x3x16x16xf32, #tpu.memory_space<vmem>>, vector<1x1x14x14xf32>
    %584 = vector.shape_cast %583 : vector<1x1x14x14xf32> to vector<14x14xf32>
    %585 = vector.broadcast %582 : f32 to vector<14x14xf32>
    %586 = arith.mulf %584, %585 : vector<14x14xf32>
    %587 = arith.addf %581, %586 : vector<14x14xf32>
    %c3_532 = arith.constant 3 : index
    %c7_533 = arith.constant 7 : index
    %588 = memref.load %arg2[%c3_532, %c7_533] : memref<8x27xf32, #tpu.memory_space<smem>>
    %c0_534 = arith.constant 0 : index
    %c0_535 = arith.constant 0 : index
    %c2_536 = arith.constant 2 : index
    %c1_537 = arith.constant 1 : index
    %589 = vector.load %arg1[%c0_534, %c0_535, %c2_536, %c1_537] : memref<1x3x16x16xf32, #tpu.memory_space<vmem>>, vector<1x1x14x14xf32>
    %590 = vector.shape_cast %589 : vector<1x1x14x14xf32> to vector<14x14xf32>
    %591 = vector.broadcast %588 : f32 to vector<14x14xf32>
    %592 = arith.mulf %590, %591 : vector<14x14xf32>
    %593 = arith.addf %587, %592 : vector<14x14xf32>
    %c3_538 = arith.constant 3 : index
    %c8_539 = arith.constant 8 : index
    %594 = memref.load %arg2[%c3_538, %c8_539] : memref<8x27xf32, #tpu.memory_space<smem>>
    %c0_540 = arith.constant 0 : index
    %c0_541 = arith.constant 0 : index
    %c2_542 = arith.constant 2 : index
    %c2_543 = arith.constant 2 : index
    %595 = vector.load %arg1[%c0_540, %c0_541, %c2_542, %c2_543] : memref<1x3x16x16xf32, #tpu.memory_space<vmem>>, vector<1x1x14x14xf32>
    %596 = vector.shape_cast %595 : vector<1x1x14x14xf32> to vector<14x14xf32>
    %597 = vector.broadcast %594 : f32 to vector<14x14xf32>
    %598 = arith.mulf %596, %597 : vector<14x14xf32>
    %599 = arith.addf %593, %598 : vector<14x14xf32>
    %c3_544 = arith.constant 3 : index
    %c9_545 = arith.constant 9 : index
    %600 = memref.load %arg2[%c3_544, %c9_545] : memref<8x27xf32, #tpu.memory_space<smem>>
    %c0_546 = arith.constant 0 : index
    %c1_547 = arith.constant 1 : index
    %c0_548 = arith.constant 0 : index
    %c0_549 = arith.constant 0 : index
    %601 = vector.load %arg1[%c0_546, %c1_547, %c0_548, %c0_549] : memref<1x3x16x16xf32, #tpu.memory_space<vmem>>, vector<1x1x14x14xf32>
    %602 = vector.shape_cast %601 : vector<1x1x14x14xf32> to vector<14x14xf32>
    %603 = vector.broadcast %600 : f32 to vector<14x14xf32>
    %604 = arith.mulf %602, %603 : vector<14x14xf32>
    %605 = arith.addf %599, %604 : vector<14x14xf32>
    %c3_550 = arith.constant 3 : index
    %c10_551 = arith.constant 10 : index
    %606 = memref.load %arg2[%c3_550, %c10_551] : memref<8x27xf32, #tpu.memory_space<smem>>
    %c0_552 = arith.constant 0 : index
    %c1_553 = arith.constant 1 : index
    %c0_554 = arith.constant 0 : index
    %c1_555 = arith.constant 1 : index
    %607 = vector.load %arg1[%c0_552, %c1_553, %c0_554, %c1_555] : memref<1x3x16x16xf32, #tpu.memory_space<vmem>>, vector<1x1x14x14xf32>
    %608 = vector.shape_cast %607 : vector<1x1x14x14xf32> to vector<14x14xf32>
    %609 = vector.broadcast %606 : f32 to vector<14x14xf32>
    %610 = arith.mulf %608, %609 : vector<14x14xf32>
    %611 = arith.addf %605, %610 : vector<14x14xf32>
    %c3_556 = arith.constant 3 : index
    %c11_557 = arith.constant 11 : index
    %612 = memref.load %arg2[%c3_556, %c11_557] : memref<8x27xf32, #tpu.memory_space<smem>>
    %c0_558 = arith.constant 0 : index
    %c1_559 = arith.constant 1 : index
    %c0_560 = arith.constant 0 : index
    %c2_561 = arith.constant 2 : index
    %613 = vector.load %arg1[%c0_558, %c1_559, %c0_560, %c2_561] : memref<1x3x16x16xf32, #tpu.memory_space<vmem>>, vector<1x1x14x14xf32>
    %614 = vector.shape_cast %613 : vector<1x1x14x14xf32> to vector<14x14xf32>
    %615 = vector.broadcast %612 : f32 to vector<14x14xf32>
    %616 = arith.mulf %614, %615 : vector<14x14xf32>
    %617 = arith.addf %611, %616 : vector<14x14xf32>
    %c3_562 = arith.constant 3 : index
    %c12_563 = arith.constant 12 : index
    %618 = memref.load %arg2[%c3_562, %c12_563] : memref<8x27xf32, #tpu.memory_space<smem>>
    %c0_564 = arith.constant 0 : index
    %c1_565 = arith.constant 1 : index
    %c1_566 = arith.constant 1 : index
    %c0_567 = arith.constant 0 : index
    %619 = vector.load %arg1[%c0_564, %c1_565, %c1_566, %c0_567] : memref<1x3x16x16xf32, #tpu.memory_space<vmem>>, vector<1x1x14x14xf32>
    %620 = vector.shape_cast %619 : vector<1x1x14x14xf32> to vector<14x14xf32>
    %621 = vector.broadcast %618 : f32 to vector<14x14xf32>
    %622 = arith.mulf %620, %621 : vector<14x14xf32>
    %623 = arith.addf %617, %622 : vector<14x14xf32>
    %c3_568 = arith.constant 3 : index
    %c13_569 = arith.constant 13 : index
    %624 = memref.load %arg2[%c3_568, %c13_569] : memref<8x27xf32, #tpu.memory_space<smem>>
    %c0_570 = arith.constant 0 : index
    %c1_571 = arith.constant 1 : index
    %c1_572 = arith.constant 1 : index
    %c1_573 = arith.constant 1 : index
    %625 = vector.load %arg1[%c0_570, %c1_571, %c1_572, %c1_573] : memref<1x3x16x16xf32, #tpu.memory_space<vmem>>, vector<1x1x14x14xf32>
    %626 = vector.shape_cast %625 : vector<1x1x14x14xf32> to vector<14x14xf32>
    %627 = vector.broadcast %624 : f32 to vector<14x14xf32>
    %628 = arith.mulf %626, %627 : vector<14x14xf32>
    %629 = arith.addf %623, %628 : vector<14x14xf32>
    %c3_574 = arith.constant 3 : index
    %c14_575 = arith.constant 14 : index
    %630 = memref.load %arg2[%c3_574, %c14_575] : memref<8x27xf32, #tpu.memory_space<smem>>
    %c0_576 = arith.constant 0 : index
    %c1_577 = arith.constant 1 : index
    %c1_578 = arith.constant 1 : index
    %c2_579 = arith.constant 2 : index
    %631 = vector.load %arg1[%c0_576, %c1_577, %c1_578, %c2_579] : memref<1x3x16x16xf32, #tpu.memory_space<vmem>>, vector<1x1x14x14xf32>
    %632 = vector.shape_cast %631 : vector<1x1x14x14xf32> to vector<14x14xf32>
    %633 = vector.broadcast %630 : f32 to vector<14x14xf32>
    %634 = arith.mulf %632, %633 : vector<14x14xf32>
    %635 = arith.addf %629, %634 : vector<14x14xf32>
    %c3_580 = arith.constant 3 : index
    %c15_581 = arith.constant 15 : index
    %636 = memref.load %arg2[%c3_580, %c15_581] : memref<8x27xf32, #tpu.memory_space<smem>>
    %c0_582 = arith.constant 0 : index
    %c1_583 = arith.constant 1 : index
    %c2_584 = arith.constant 2 : index
    %c0_585 = arith.constant 0 : index
    %637 = vector.load %arg1[%c0_582, %c1_583, %c2_584, %c0_585] : memref<1x3x16x16xf32, #tpu.memory_space<vmem>>, vector<1x1x14x14xf32>
    %638 = vector.shape_cast %637 : vector<1x1x14x14xf32> to vector<14x14xf32>
    %639 = vector.broadcast %636 : f32 to vector<14x14xf32>
    %640 = arith.mulf %638, %639 : vector<14x14xf32>
    %641 = arith.addf %635, %640 : vector<14x14xf32>
    %c3_586 = arith.constant 3 : index
    %c16_587 = arith.constant 16 : index
    %642 = memref.load %arg2[%c3_586, %c16_587] : memref<8x27xf32, #tpu.memory_space<smem>>
    %c0_588 = arith.constant 0 : index
    %c1_589 = arith.constant 1 : index
    %c2_590 = arith.constant 2 : index
    %c1_591 = arith.constant 1 : index
    %643 = vector.load %arg1[%c0_588, %c1_589, %c2_590, %c1_591] : memref<1x3x16x16xf32, #tpu.memory_space<vmem>>, vector<1x1x14x14xf32>
    %644 = vector.shape_cast %643 : vector<1x1x14x14xf32> to vector<14x14xf32>
    %645 = vector.broadcast %642 : f32 to vector<14x14xf32>
    %646 = arith.mulf %644, %645 : vector<14x14xf32>
    %647 = arith.addf %641, %646 : vector<14x14xf32>
    %c3_592 = arith.constant 3 : index
    %c17_593 = arith.constant 17 : index
    %648 = memref.load %arg2[%c3_592, %c17_593] : memref<8x27xf32, #tpu.memory_space<smem>>
    %c0_594 = arith.constant 0 : index
    %c1_595 = arith.constant 1 : index
    %c2_596 = arith.constant 2 : index
    %c2_597 = arith.constant 2 : index
    %649 = vector.load %arg1[%c0_594, %c1_595, %c2_596, %c2_597] : memref<1x3x16x16xf32, #tpu.memory_space<vmem>>, vector<1x1x14x14xf32>
    %650 = vector.shape_cast %649 : vector<1x1x14x14xf32> to vector<14x14xf32>
    %651 = vector.broadcast %648 : f32 to vector<14x14xf32>
    %652 = arith.mulf %650, %651 : vector<14x14xf32>
    %653 = arith.addf %647, %652 : vector<14x14xf32>
    %c3_598 = arith.constant 3 : index
    %c18_599 = arith.constant 18 : index
    %654 = memref.load %arg2[%c3_598, %c18_599] : memref<8x27xf32, #tpu.memory_space<smem>>
    %c0_600 = arith.constant 0 : index
    %c2_601 = arith.constant 2 : index
    %c0_602 = arith.constant 0 : index
    %c0_603 = arith.constant 0 : index
    %655 = vector.load %arg1[%c0_600, %c2_601, %c0_602, %c0_603] : memref<1x3x16x16xf32, #tpu.memory_space<vmem>>, vector<1x1x14x14xf32>
    %656 = vector.shape_cast %655 : vector<1x1x14x14xf32> to vector<14x14xf32>
    %657 = vector.broadcast %654 : f32 to vector<14x14xf32>
    %658 = arith.mulf %656, %657 : vector<14x14xf32>
    %659 = arith.addf %653, %658 : vector<14x14xf32>
    %c3_604 = arith.constant 3 : index
    %c19_605 = arith.constant 19 : index
    %660 = memref.load %arg2[%c3_604, %c19_605] : memref<8x27xf32, #tpu.memory_space<smem>>
    %c0_606 = arith.constant 0 : index
    %c2_607 = arith.constant 2 : index
    %c0_608 = arith.constant 0 : index
    %c1_609 = arith.constant 1 : index
    %661 = vector.load %arg1[%c0_606, %c2_607, %c0_608, %c1_609] : memref<1x3x16x16xf32, #tpu.memory_space<vmem>>, vector<1x1x14x14xf32>
    %662 = vector.shape_cast %661 : vector<1x1x14x14xf32> to vector<14x14xf32>
    %663 = vector.broadcast %660 : f32 to vector<14x14xf32>
    %664 = arith.mulf %662, %663 : vector<14x14xf32>
    %665 = arith.addf %659, %664 : vector<14x14xf32>
    %c3_610 = arith.constant 3 : index
    %c20_611 = arith.constant 20 : index
    %666 = memref.load %arg2[%c3_610, %c20_611] : memref<8x27xf32, #tpu.memory_space<smem>>
    %c0_612 = arith.constant 0 : index
    %c2_613 = arith.constant 2 : index
    %c0_614 = arith.constant 0 : index
    %c2_615 = arith.constant 2 : index
    %667 = vector.load %arg1[%c0_612, %c2_613, %c0_614, %c2_615] : memref<1x3x16x16xf32, #tpu.memory_space<vmem>>, vector<1x1x14x14xf32>
    %668 = vector.shape_cast %667 : vector<1x1x14x14xf32> to vector<14x14xf32>
    %669 = vector.broadcast %666 : f32 to vector<14x14xf32>
    %670 = arith.mulf %668, %669 : vector<14x14xf32>
    %671 = arith.addf %665, %670 : vector<14x14xf32>
    %c3_616 = arith.constant 3 : index
    %c21_617 = arith.constant 21 : index
    %672 = memref.load %arg2[%c3_616, %c21_617] : memref<8x27xf32, #tpu.memory_space<smem>>
    %c0_618 = arith.constant 0 : index
    %c2_619 = arith.constant 2 : index
    %c1_620 = arith.constant 1 : index
    %c0_621 = arith.constant 0 : index
    %673 = vector.load %arg1[%c0_618, %c2_619, %c1_620, %c0_621] : memref<1x3x16x16xf32, #tpu.memory_space<vmem>>, vector<1x1x14x14xf32>
    %674 = vector.shape_cast %673 : vector<1x1x14x14xf32> to vector<14x14xf32>
    %675 = vector.broadcast %672 : f32 to vector<14x14xf32>
    %676 = arith.mulf %674, %675 : vector<14x14xf32>
    %677 = arith.addf %671, %676 : vector<14x14xf32>
    %c3_622 = arith.constant 3 : index
    %c22_623 = arith.constant 22 : index
    %678 = memref.load %arg2[%c3_622, %c22_623] : memref<8x27xf32, #tpu.memory_space<smem>>
    %c0_624 = arith.constant 0 : index
    %c2_625 = arith.constant 2 : index
    %c1_626 = arith.constant 1 : index
    %c1_627 = arith.constant 1 : index
    %679 = vector.load %arg1[%c0_624, %c2_625, %c1_626, %c1_627] : memref<1x3x16x16xf32, #tpu.memory_space<vmem>>, vector<1x1x14x14xf32>
    %680 = vector.shape_cast %679 : vector<1x1x14x14xf32> to vector<14x14xf32>
    %681 = vector.broadcast %678 : f32 to vector<14x14xf32>
    %682 = arith.mulf %680, %681 : vector<14x14xf32>
    %683 = arith.addf %677, %682 : vector<14x14xf32>
    %c3_628 = arith.constant 3 : index
    %c23_629 = arith.constant 23 : index
    %684 = memref.load %arg2[%c3_628, %c23_629] : memref<8x27xf32, #tpu.memory_space<smem>>
    %c0_630 = arith.constant 0 : index
    %c2_631 = arith.constant 2 : index
    %c1_632 = arith.constant 1 : index
    %c2_633 = arith.constant 2 : index
    %685 = vector.load %arg1[%c0_630, %c2_631, %c1_632, %c2_633] : memref<1x3x16x16xf32, #tpu.memory_space<vmem>>, vector<1x1x14x14xf32>
    %686 = vector.shape_cast %685 : vector<1x1x14x14xf32> to vector<14x14xf32>
    %687 = vector.broadcast %684 : f32 to vector<14x14xf32>
    %688 = arith.mulf %686, %687 : vector<14x14xf32>
    %689 = arith.addf %683, %688 : vector<14x14xf32>
    %c3_634 = arith.constant 3 : index
    %c24_635 = arith.constant 24 : index
    %690 = memref.load %arg2[%c3_634, %c24_635] : memref<8x27xf32, #tpu.memory_space<smem>>
    %c0_636 = arith.constant 0 : index
    %c2_637 = arith.constant 2 : index
    %c2_638 = arith.constant 2 : index
    %c0_639 = arith.constant 0 : index
    %691 = vector.load %arg1[%c0_636, %c2_637, %c2_638, %c0_639] : memref<1x3x16x16xf32, #tpu.memory_space<vmem>>, vector<1x1x14x14xf32>
    %692 = vector.shape_cast %691 : vector<1x1x14x14xf32> to vector<14x14xf32>
    %693 = vector.broadcast %690 : f32 to vector<14x14xf32>
    %694 = arith.mulf %692, %693 : vector<14x14xf32>
    %695 = arith.addf %689, %694 : vector<14x14xf32>
    %c3_640 = arith.constant 3 : index
    %c25_641 = arith.constant 25 : index
    %696 = memref.load %arg2[%c3_640, %c25_641] : memref<8x27xf32, #tpu.memory_space<smem>>
    %c0_642 = arith.constant 0 : index
    %c2_643 = arith.constant 2 : index
    %c2_644 = arith.constant 2 : index
    %c1_645 = arith.constant 1 : index
    %697 = vector.load %arg1[%c0_642, %c2_643, %c2_644, %c1_645] : memref<1x3x16x16xf32, #tpu.memory_space<vmem>>, vector<1x1x14x14xf32>
    %698 = vector.shape_cast %697 : vector<1x1x14x14xf32> to vector<14x14xf32>
    %699 = vector.broadcast %696 : f32 to vector<14x14xf32>
    %700 = arith.mulf %698, %699 : vector<14x14xf32>
    %701 = arith.addf %695, %700 : vector<14x14xf32>
    %c3_646 = arith.constant 3 : index
    %c26_647 = arith.constant 26 : index
    %702 = memref.load %arg2[%c3_646, %c26_647] : memref<8x27xf32, #tpu.memory_space<smem>>
    %c0_648 = arith.constant 0 : index
    %c2_649 = arith.constant 2 : index
    %c2_650 = arith.constant 2 : index
    %c2_651 = arith.constant 2 : index
    %703 = vector.load %arg1[%c0_648, %c2_649, %c2_650, %c2_651] : memref<1x3x16x16xf32, #tpu.memory_space<vmem>>, vector<1x1x14x14xf32>
    %704 = vector.shape_cast %703 : vector<1x1x14x14xf32> to vector<14x14xf32>
    %705 = vector.broadcast %702 : f32 to vector<14x14xf32>
    %706 = arith.mulf %704, %705 : vector<14x14xf32>
    %707 = arith.addf %701, %706 : vector<14x14xf32>
    %cst_652 = arith.constant 0.000000e+00 : f32
    %708 = vector.broadcast %cst_652 : f32 to vector<14x14xf32>
    %709 = arith.maximumf %707, %708 : vector<14x14xf32>
    %cst_653 = arith.constant dense<0.000000e+00> : vector<14xf32>
    %710 = vector.multi_reduction <add>, %709, %cst_653 [1] : vector<14x14xf32> to vector<14xf32>
    %711 = vector.shape_cast %710 : vector<14xf32> to vector<14x1xf32>
    %cst_654 = arith.constant dense<0.000000e+00> : vector<1xf32>
    %712 = vector.multi_reduction <add>, %711, %cst_654 [0] : vector<14x1xf32> to vector<1xf32>
    %713 = vector.shape_cast %712 : vector<1xf32> to vector<1x1xf32>
    %714 = arith.addf %541, %713 : vector<1x1xf32>
    %c3_655 = arith.constant 3 : index
    %c0_656 = arith.constant 0 : index
    %715 = vector.load %arg4[%c3_655, %c0_656] : memref<8x128xf32, #tpu.memory_space<vmem>>, vector<1x128xf32>
    %cst_657 = arith.constant 0.00510204071 : f32
    %716 = vector.broadcast %cst_657 : f32 to vector<1x1xf32>
    %717 = arith.mulf %714, %716 : vector<1x1xf32>
    %718 = vector.broadcast %717 : vector<1x1xf32> to vector<1x128xf32>
    %719 = arith.mulf %715, %718 : vector<1x128xf32>
    %720 = arith.addf %540, %719 : vector<1x128xf32>
    %cst_658 = arith.constant 0.000000e+00 : f32
    %721 = vector.broadcast %cst_658 : f32 to vector<1x1xf32>
    %cst_659 = arith.constant 0.000000e+00 : f32
    %722 = vector.broadcast %cst_659 : f32 to vector<14x14xf32>
    %c4_660 = arith.constant 4 : index
    %723 = memref.load %arg3[%c4_660] : memref<8xf32, #tpu.memory_space<smem>>
    %724 = vector.broadcast %723 : f32 to vector<14x14xf32>
    %725 = arith.addf %722, %724 : vector<14x14xf32>
    %c4_661 = arith.constant 4 : index
    %c0_662 = arith.constant 0 : index
    %726 = memref.load %arg2[%c4_661, %c0_662] : memref<8x27xf32, #tpu.memory_space<smem>>
    %c0_663 = arith.constant 0 : index
    %c0_664 = arith.constant 0 : index
    %c0_665 = arith.constant 0 : index
    %c0_666 = arith.constant 0 : index
    %727 = vector.load %arg1[%c0_663, %c0_664, %c0_665, %c0_666] : memref<1x3x16x16xf32, #tpu.memory_space<vmem>>, vector<1x1x14x14xf32>
    %728 = vector.shape_cast %727 : vector<1x1x14x14xf32> to vector<14x14xf32>
    %729 = vector.broadcast %726 : f32 to vector<14x14xf32>
    %730 = arith.mulf %728, %729 : vector<14x14xf32>
    %731 = arith.addf %725, %730 : vector<14x14xf32>
    %c4_667 = arith.constant 4 : index
    %c1_668 = arith.constant 1 : index
    %732 = memref.load %arg2[%c4_667, %c1_668] : memref<8x27xf32, #tpu.memory_space<smem>>
    %c0_669 = arith.constant 0 : index
    %c0_670 = arith.constant 0 : index
    %c0_671 = arith.constant 0 : index
    %c1_672 = arith.constant 1 : index
    %733 = vector.load %arg1[%c0_669, %c0_670, %c0_671, %c1_672] : memref<1x3x16x16xf32, #tpu.memory_space<vmem>>, vector<1x1x14x14xf32>
    %734 = vector.shape_cast %733 : vector<1x1x14x14xf32> to vector<14x14xf32>
    %735 = vector.broadcast %732 : f32 to vector<14x14xf32>
    %736 = arith.mulf %734, %735 : vector<14x14xf32>
    %737 = arith.addf %731, %736 : vector<14x14xf32>
    %c4_673 = arith.constant 4 : index
    %c2_674 = arith.constant 2 : index
    %738 = memref.load %arg2[%c4_673, %c2_674] : memref<8x27xf32, #tpu.memory_space<smem>>
    %c0_675 = arith.constant 0 : index
    %c0_676 = arith.constant 0 : index
    %c0_677 = arith.constant 0 : index
    %c2_678 = arith.constant 2 : index
    %739 = vector.load %arg1[%c0_675, %c0_676, %c0_677, %c2_678] : memref<1x3x16x16xf32, #tpu.memory_space<vmem>>, vector<1x1x14x14xf32>
    %740 = vector.shape_cast %739 : vector<1x1x14x14xf32> to vector<14x14xf32>
    %741 = vector.broadcast %738 : f32 to vector<14x14xf32>
    %742 = arith.mulf %740, %741 : vector<14x14xf32>
    %743 = arith.addf %737, %742 : vector<14x14xf32>
    %c4_679 = arith.constant 4 : index
    %c3_680 = arith.constant 3 : index
    %744 = memref.load %arg2[%c4_679, %c3_680] : memref<8x27xf32, #tpu.memory_space<smem>>
    %c0_681 = arith.constant 0 : index
    %c0_682 = arith.constant 0 : index
    %c1_683 = arith.constant 1 : index
    %c0_684 = arith.constant 0 : index
    %745 = vector.load %arg1[%c0_681, %c0_682, %c1_683, %c0_684] : memref<1x3x16x16xf32, #tpu.memory_space<vmem>>, vector<1x1x14x14xf32>
    %746 = vector.shape_cast %745 : vector<1x1x14x14xf32> to vector<14x14xf32>
    %747 = vector.broadcast %744 : f32 to vector<14x14xf32>
    %748 = arith.mulf %746, %747 : vector<14x14xf32>
    %749 = arith.addf %743, %748 : vector<14x14xf32>
    %c4_685 = arith.constant 4 : index
    %c4_686 = arith.constant 4 : index
    %750 = memref.load %arg2[%c4_685, %c4_686] : memref<8x27xf32, #tpu.memory_space<smem>>
    %c0_687 = arith.constant 0 : index
    %c0_688 = arith.constant 0 : index
    %c1_689 = arith.constant 1 : index
    %c1_690 = arith.constant 1 : index
    %751 = vector.load %arg1[%c0_687, %c0_688, %c1_689, %c1_690] : memref<1x3x16x16xf32, #tpu.memory_space<vmem>>, vector<1x1x14x14xf32>
    %752 = vector.shape_cast %751 : vector<1x1x14x14xf32> to vector<14x14xf32>
    %753 = vector.broadcast %750 : f32 to vector<14x14xf32>
    %754 = arith.mulf %752, %753 : vector<14x14xf32>
    %755 = arith.addf %749, %754 : vector<14x14xf32>
    %c4_691 = arith.constant 4 : index
    %c5_692 = arith.constant 5 : index
    %756 = memref.load %arg2[%c4_691, %c5_692] : memref<8x27xf32, #tpu.memory_space<smem>>
    %c0_693 = arith.constant 0 : index
    %c0_694 = arith.constant 0 : index
    %c1_695 = arith.constant 1 : index
    %c2_696 = arith.constant 2 : index
    %757 = vector.load %arg1[%c0_693, %c0_694, %c1_695, %c2_696] : memref<1x3x16x16xf32, #tpu.memory_space<vmem>>, vector<1x1x14x14xf32>
    %758 = vector.shape_cast %757 : vector<1x1x14x14xf32> to vector<14x14xf32>
    %759 = vector.broadcast %756 : f32 to vector<14x14xf32>
    %760 = arith.mulf %758, %759 : vector<14x14xf32>
    %761 = arith.addf %755, %760 : vector<14x14xf32>
    %c4_697 = arith.constant 4 : index
    %c6_698 = arith.constant 6 : index
    %762 = memref.load %arg2[%c4_697, %c6_698] : memref<8x27xf32, #tpu.memory_space<smem>>
    %c0_699 = arith.constant 0 : index
    %c0_700 = arith.constant 0 : index
    %c2_701 = arith.constant 2 : index
    %c0_702 = arith.constant 0 : index
    %763 = vector.load %arg1[%c0_699, %c0_700, %c2_701, %c0_702] : memref<1x3x16x16xf32, #tpu.memory_space<vmem>>, vector<1x1x14x14xf32>
    %764 = vector.shape_cast %763 : vector<1x1x14x14xf32> to vector<14x14xf32>
    %765 = vector.broadcast %762 : f32 to vector<14x14xf32>
    %766 = arith.mulf %764, %765 : vector<14x14xf32>
    %767 = arith.addf %761, %766 : vector<14x14xf32>
    %c4_703 = arith.constant 4 : index
    %c7_704 = arith.constant 7 : index
    %768 = memref.load %arg2[%c4_703, %c7_704] : memref<8x27xf32, #tpu.memory_space<smem>>
    %c0_705 = arith.constant 0 : index
    %c0_706 = arith.constant 0 : index
    %c2_707 = arith.constant 2 : index
    %c1_708 = arith.constant 1 : index
    %769 = vector.load %arg1[%c0_705, %c0_706, %c2_707, %c1_708] : memref<1x3x16x16xf32, #tpu.memory_space<vmem>>, vector<1x1x14x14xf32>
    %770 = vector.shape_cast %769 : vector<1x1x14x14xf32> to vector<14x14xf32>
    %771 = vector.broadcast %768 : f32 to vector<14x14xf32>
    %772 = arith.mulf %770, %771 : vector<14x14xf32>
    %773 = arith.addf %767, %772 : vector<14x14xf32>
    %c4_709 = arith.constant 4 : index
    %c8_710 = arith.constant 8 : index
    %774 = memref.load %arg2[%c4_709, %c8_710] : memref<8x27xf32, #tpu.memory_space<smem>>
    %c0_711 = arith.constant 0 : index
    %c0_712 = arith.constant 0 : index
    %c2_713 = arith.constant 2 : index
    %c2_714 = arith.constant 2 : index
    %775 = vector.load %arg1[%c0_711, %c0_712, %c2_713, %c2_714] : memref<1x3x16x16xf32, #tpu.memory_space<vmem>>, vector<1x1x14x14xf32>
    %776 = vector.shape_cast %775 : vector<1x1x14x14xf32> to vector<14x14xf32>
    %777 = vector.broadcast %774 : f32 to vector<14x14xf32>
    %778 = arith.mulf %776, %777 : vector<14x14xf32>
    %779 = arith.addf %773, %778 : vector<14x14xf32>
    %c4_715 = arith.constant 4 : index
    %c9_716 = arith.constant 9 : index
    %780 = memref.load %arg2[%c4_715, %c9_716] : memref<8x27xf32, #tpu.memory_space<smem>>
    %c0_717 = arith.constant 0 : index
    %c1_718 = arith.constant 1 : index
    %c0_719 = arith.constant 0 : index
    %c0_720 = arith.constant 0 : index
    %781 = vector.load %arg1[%c0_717, %c1_718, %c0_719, %c0_720] : memref<1x3x16x16xf32, #tpu.memory_space<vmem>>, vector<1x1x14x14xf32>
    %782 = vector.shape_cast %781 : vector<1x1x14x14xf32> to vector<14x14xf32>
    %783 = vector.broadcast %780 : f32 to vector<14x14xf32>
    %784 = arith.mulf %782, %783 : vector<14x14xf32>
    %785 = arith.addf %779, %784 : vector<14x14xf32>
    %c4_721 = arith.constant 4 : index
    %c10_722 = arith.constant 10 : index
    %786 = memref.load %arg2[%c4_721, %c10_722] : memref<8x27xf32, #tpu.memory_space<smem>>
    %c0_723 = arith.constant 0 : index
    %c1_724 = arith.constant 1 : index
    %c0_725 = arith.constant 0 : index
    %c1_726 = arith.constant 1 : index
    %787 = vector.load %arg1[%c0_723, %c1_724, %c0_725, %c1_726] : memref<1x3x16x16xf32, #tpu.memory_space<vmem>>, vector<1x1x14x14xf32>
    %788 = vector.shape_cast %787 : vector<1x1x14x14xf32> to vector<14x14xf32>
    %789 = vector.broadcast %786 : f32 to vector<14x14xf32>
    %790 = arith.mulf %788, %789 : vector<14x14xf32>
    %791 = arith.addf %785, %790 : vector<14x14xf32>
    %c4_727 = arith.constant 4 : index
    %c11_728 = arith.constant 11 : index
    %792 = memref.load %arg2[%c4_727, %c11_728] : memref<8x27xf32, #tpu.memory_space<smem>>
    %c0_729 = arith.constant 0 : index
    %c1_730 = arith.constant 1 : index
    %c0_731 = arith.constant 0 : index
    %c2_732 = arith.constant 2 : index
    %793 = vector.load %arg1[%c0_729, %c1_730, %c0_731, %c2_732] : memref<1x3x16x16xf32, #tpu.memory_space<vmem>>, vector<1x1x14x14xf32>
    %794 = vector.shape_cast %793 : vector<1x1x14x14xf32> to vector<14x14xf32>
    %795 = vector.broadcast %792 : f32 to vector<14x14xf32>
    %796 = arith.mulf %794, %795 : vector<14x14xf32>
    %797 = arith.addf %791, %796 : vector<14x14xf32>
    %c4_733 = arith.constant 4 : index
    %c12_734 = arith.constant 12 : index
    %798 = memref.load %arg2[%c4_733, %c12_734] : memref<8x27xf32, #tpu.memory_space<smem>>
    %c0_735 = arith.constant 0 : index
    %c1_736 = arith.constant 1 : index
    %c1_737 = arith.constant 1 : index
    %c0_738 = arith.constant 0 : index
    %799 = vector.load %arg1[%c0_735, %c1_736, %c1_737, %c0_738] : memref<1x3x16x16xf32, #tpu.memory_space<vmem>>, vector<1x1x14x14xf32>
    %800 = vector.shape_cast %799 : vector<1x1x14x14xf32> to vector<14x14xf32>
    %801 = vector.broadcast %798 : f32 to vector<14x14xf32>
    %802 = arith.mulf %800, %801 : vector<14x14xf32>
    %803 = arith.addf %797, %802 : vector<14x14xf32>
    %c4_739 = arith.constant 4 : index
    %c13_740 = arith.constant 13 : index
    %804 = memref.load %arg2[%c4_739, %c13_740] : memref<8x27xf32, #tpu.memory_space<smem>>
    %c0_741 = arith.constant 0 : index
    %c1_742 = arith.constant 1 : index
    %c1_743 = arith.constant 1 : index
    %c1_744 = arith.constant 1 : index
    %805 = vector.load %arg1[%c0_741, %c1_742, %c1_743, %c1_744] : memref<1x3x16x16xf32, #tpu.memory_space<vmem>>, vector<1x1x14x14xf32>
    %806 = vector.shape_cast %805 : vector<1x1x14x14xf32> to vector<14x14xf32>
    %807 = vector.broadcast %804 : f32 to vector<14x14xf32>
    %808 = arith.mulf %806, %807 : vector<14x14xf32>
    %809 = arith.addf %803, %808 : vector<14x14xf32>
    %c4_745 = arith.constant 4 : index
    %c14_746 = arith.constant 14 : index
    %810 = memref.load %arg2[%c4_745, %c14_746] : memref<8x27xf32, #tpu.memory_space<smem>>
    %c0_747 = arith.constant 0 : index
    %c1_748 = arith.constant 1 : index
    %c1_749 = arith.constant 1 : index
    %c2_750 = arith.constant 2 : index
    %811 = vector.load %arg1[%c0_747, %c1_748, %c1_749, %c2_750] : memref<1x3x16x16xf32, #tpu.memory_space<vmem>>, vector<1x1x14x14xf32>
    %812 = vector.shape_cast %811 : vector<1x1x14x14xf32> to vector<14x14xf32>
    %813 = vector.broadcast %810 : f32 to vector<14x14xf32>
    %814 = arith.mulf %812, %813 : vector<14x14xf32>
    %815 = arith.addf %809, %814 : vector<14x14xf32>
    %c4_751 = arith.constant 4 : index
    %c15_752 = arith.constant 15 : index
    %816 = memref.load %arg2[%c4_751, %c15_752] : memref<8x27xf32, #tpu.memory_space<smem>>
    %c0_753 = arith.constant 0 : index
    %c1_754 = arith.constant 1 : index
    %c2_755 = arith.constant 2 : index
    %c0_756 = arith.constant 0 : index
    %817 = vector.load %arg1[%c0_753, %c1_754, %c2_755, %c0_756] : memref<1x3x16x16xf32, #tpu.memory_space<vmem>>, vector<1x1x14x14xf32>
    %818 = vector.shape_cast %817 : vector<1x1x14x14xf32> to vector<14x14xf32>
    %819 = vector.broadcast %816 : f32 to vector<14x14xf32>
    %820 = arith.mulf %818, %819 : vector<14x14xf32>
    %821 = arith.addf %815, %820 : vector<14x14xf32>
    %c4_757 = arith.constant 4 : index
    %c16_758 = arith.constant 16 : index
    %822 = memref.load %arg2[%c4_757, %c16_758] : memref<8x27xf32, #tpu.memory_space<smem>>
    %c0_759 = arith.constant 0 : index
    %c1_760 = arith.constant 1 : index
    %c2_761 = arith.constant 2 : index
    %c1_762 = arith.constant 1 : index
    %823 = vector.load %arg1[%c0_759, %c1_760, %c2_761, %c1_762] : memref<1x3x16x16xf32, #tpu.memory_space<vmem>>, vector<1x1x14x14xf32>
    %824 = vector.shape_cast %823 : vector<1x1x14x14xf32> to vector<14x14xf32>
    %825 = vector.broadcast %822 : f32 to vector<14x14xf32>
    %826 = arith.mulf %824, %825 : vector<14x14xf32>
    %827 = arith.addf %821, %826 : vector<14x14xf32>
    %c4_763 = arith.constant 4 : index
    %c17_764 = arith.constant 17 : index
    %828 = memref.load %arg2[%c4_763, %c17_764] : memref<8x27xf32, #tpu.memory_space<smem>>
    %c0_765 = arith.constant 0 : index
    %c1_766 = arith.constant 1 : index
    %c2_767 = arith.constant 2 : index
    %c2_768 = arith.constant 2 : index
    %829 = vector.load %arg1[%c0_765, %c1_766, %c2_767, %c2_768] : memref<1x3x16x16xf32, #tpu.memory_space<vmem>>, vector<1x1x14x14xf32>
    %830 = vector.shape_cast %829 : vector<1x1x14x14xf32> to vector<14x14xf32>
    %831 = vector.broadcast %828 : f32 to vector<14x14xf32>
    %832 = arith.mulf %830, %831 : vector<14x14xf32>
    %833 = arith.addf %827, %832 : vector<14x14xf32>
    %c4_769 = arith.constant 4 : index
    %c18_770 = arith.constant 18 : index
    %834 = memref.load %arg2[%c4_769, %c18_770] : memref<8x27xf32, #tpu.memory_space<smem>>
    %c0_771 = arith.constant 0 : index
    %c2_772 = arith.constant 2 : index
    %c0_773 = arith.constant 0 : index
    %c0_774 = arith.constant 0 : index
    %835 = vector.load %arg1[%c0_771, %c2_772, %c0_773, %c0_774] : memref<1x3x16x16xf32, #tpu.memory_space<vmem>>, vector<1x1x14x14xf32>
    %836 = vector.shape_cast %835 : vector<1x1x14x14xf32> to vector<14x14xf32>
    %837 = vector.broadcast %834 : f32 to vector<14x14xf32>
    %838 = arith.mulf %836, %837 : vector<14x14xf32>
    %839 = arith.addf %833, %838 : vector<14x14xf32>
    %c4_775 = arith.constant 4 : index
    %c19_776 = arith.constant 19 : index
    %840 = memref.load %arg2[%c4_775, %c19_776] : memref<8x27xf32, #tpu.memory_space<smem>>
    %c0_777 = arith.constant 0 : index
    %c2_778 = arith.constant 2 : index
    %c0_779 = arith.constant 0 : index
    %c1_780 = arith.constant 1 : index
    %841 = vector.load %arg1[%c0_777, %c2_778, %c0_779, %c1_780] : memref<1x3x16x16xf32, #tpu.memory_space<vmem>>, vector<1x1x14x14xf32>
    %842 = vector.shape_cast %841 : vector<1x1x14x14xf32> to vector<14x14xf32>
    %843 = vector.broadcast %840 : f32 to vector<14x14xf32>
    %844 = arith.mulf %842, %843 : vector<14x14xf32>
    %845 = arith.addf %839, %844 : vector<14x14xf32>
    %c4_781 = arith.constant 4 : index
    %c20_782 = arith.constant 20 : index
    %846 = memref.load %arg2[%c4_781, %c20_782] : memref<8x27xf32, #tpu.memory_space<smem>>
    %c0_783 = arith.constant 0 : index
    %c2_784 = arith.constant 2 : index
    %c0_785 = arith.constant 0 : index
    %c2_786 = arith.constant 2 : index
    %847 = vector.load %arg1[%c0_783, %c2_784, %c0_785, %c2_786] : memref<1x3x16x16xf32, #tpu.memory_space<vmem>>, vector<1x1x14x14xf32>
    %848 = vector.shape_cast %847 : vector<1x1x14x14xf32> to vector<14x14xf32>
    %849 = vector.broadcast %846 : f32 to vector<14x14xf32>
    %850 = arith.mulf %848, %849 : vector<14x14xf32>
    %851 = arith.addf %845, %850 : vector<14x14xf32>
    %c4_787 = arith.constant 4 : index
    %c21_788 = arith.constant 21 : index
    %852 = memref.load %arg2[%c4_787, %c21_788] : memref<8x27xf32, #tpu.memory_space<smem>>
    %c0_789 = arith.constant 0 : index
    %c2_790 = arith.constant 2 : index
    %c1_791 = arith.constant 1 : index
    %c0_792 = arith.constant 0 : index
    %853 = vector.load %arg1[%c0_789, %c2_790, %c1_791, %c0_792] : memref<1x3x16x16xf32, #tpu.memory_space<vmem>>, vector<1x1x14x14xf32>
    %854 = vector.shape_cast %853 : vector<1x1x14x14xf32> to vector<14x14xf32>
    %855 = vector.broadcast %852 : f32 to vector<14x14xf32>
    %856 = arith.mulf %854, %855 : vector<14x14xf32>
    %857 = arith.addf %851, %856 : vector<14x14xf32>
    %c4_793 = arith.constant 4 : index
    %c22_794 = arith.constant 22 : index
    %858 = memref.load %arg2[%c4_793, %c22_794] : memref<8x27xf32, #tpu.memory_space<smem>>
    %c0_795 = arith.constant 0 : index
    %c2_796 = arith.constant 2 : index
    %c1_797 = arith.constant 1 : index
    %c1_798 = arith.constant 1 : index
    %859 = vector.load %arg1[%c0_795, %c2_796, %c1_797, %c1_798] : memref<1x3x16x16xf32, #tpu.memory_space<vmem>>, vector<1x1x14x14xf32>
    %860 = vector.shape_cast %859 : vector<1x1x14x14xf32> to vector<14x14xf32>
    %861 = vector.broadcast %858 : f32 to vector<14x14xf32>
    %862 = arith.mulf %860, %861 : vector<14x14xf32>
    %863 = arith.addf %857, %862 : vector<14x14xf32>
    %c4_799 = arith.constant 4 : index
    %c23_800 = arith.constant 23 : index
    %864 = memref.load %arg2[%c4_799, %c23_800] : memref<8x27xf32, #tpu.memory_space<smem>>
    %c0_801 = arith.constant 0 : index
    %c2_802 = arith.constant 2 : index
    %c1_803 = arith.constant 1 : index
    %c2_804 = arith.constant 2 : index
    %865 = vector.load %arg1[%c0_801, %c2_802, %c1_803, %c2_804] : memref<1x3x16x16xf32, #tpu.memory_space<vmem>>, vector<1x1x14x14xf32>
    %866 = vector.shape_cast %865 : vector<1x1x14x14xf32> to vector<14x14xf32>
    %867 = vector.broadcast %864 : f32 to vector<14x14xf32>
    %868 = arith.mulf %866, %867 : vector<14x14xf32>
    %869 = arith.addf %863, %868 : vector<14x14xf32>
    %c4_805 = arith.constant 4 : index
    %c24_806 = arith.constant 24 : index
    %870 = memref.load %arg2[%c4_805, %c24_806] : memref<8x27xf32, #tpu.memory_space<smem>>
    %c0_807 = arith.constant 0 : index
    %c2_808 = arith.constant 2 : index
    %c2_809 = arith.constant 2 : index
    %c0_810 = arith.constant 0 : index
    %871 = vector.load %arg1[%c0_807, %c2_808, %c2_809, %c0_810] : memref<1x3x16x16xf32, #tpu.memory_space<vmem>>, vector<1x1x14x14xf32>
    %872 = vector.shape_cast %871 : vector<1x1x14x14xf32> to vector<14x14xf32>
    %873 = vector.broadcast %870 : f32 to vector<14x14xf32>
    %874 = arith.mulf %872, %873 : vector<14x14xf32>
    %875 = arith.addf %869, %874 : vector<14x14xf32>
    %c4_811 = arith.constant 4 : index
    %c25_812 = arith.constant 25 : index
    %876 = memref.load %arg2[%c4_811, %c25_812] : memref<8x27xf32, #tpu.memory_space<smem>>
    %c0_813 = arith.constant 0 : index
    %c2_814 = arith.constant 2 : index
    %c2_815 = arith.constant 2 : index
    %c1_816 = arith.constant 1 : index
    %877 = vector.load %arg1[%c0_813, %c2_814, %c2_815, %c1_816] : memref<1x3x16x16xf32, #tpu.memory_space<vmem>>, vector<1x1x14x14xf32>
    %878 = vector.shape_cast %877 : vector<1x1x14x14xf32> to vector<14x14xf32>
    %879 = vector.broadcast %876 : f32 to vector<14x14xf32>
    %880 = arith.mulf %878, %879 : vector<14x14xf32>
    %881 = arith.addf %875, %880 : vector<14x14xf32>
    %c4_817 = arith.constant 4 : index
    %c26_818 = arith.constant 26 : index
    %882 = memref.load %arg2[%c4_817, %c26_818] : memref<8x27xf32, #tpu.memory_space<smem>>
    %c0_819 = arith.constant 0 : index
    %c2_820 = arith.constant 2 : index
    %c2_821 = arith.constant 2 : index
    %c2_822 = arith.constant 2 : index
    %883 = vector.load %arg1[%c0_819, %c2_820, %c2_821, %c2_822] : memref<1x3x16x16xf32, #tpu.memory_space<vmem>>, vector<1x1x14x14xf32>
    %884 = vector.shape_cast %883 : vector<1x1x14x14xf32> to vector<14x14xf32>
    %885 = vector.broadcast %882 : f32 to vector<14x14xf32>
    %886 = arith.mulf %884, %885 : vector<14x14xf32>
    %887 = arith.addf %881, %886 : vector<14x14xf32>
    %cst_823 = arith.constant 0.000000e+00 : f32
    %888 = vector.broadcast %cst_823 : f32 to vector<14x14xf32>
    %889 = arith.maximumf %887, %888 : vector<14x14xf32>
    %cst_824 = arith.constant dense<0.000000e+00> : vector<14xf32>
    %890 = vector.multi_reduction <add>, %889, %cst_824 [1] : vector<14x14xf32> to vector<14xf32>
    %891 = vector.shape_cast %890 : vector<14xf32> to vector<14x1xf32>
    %cst_825 = arith.constant dense<0.000000e+00> : vector<1xf32>
    %892 = vector.multi_reduction <add>, %891, %cst_825 [0] : vector<14x1xf32> to vector<1xf32>
    %893 = vector.shape_cast %892 : vector<1xf32> to vector<1x1xf32>
    %894 = arith.addf %721, %893 : vector<1x1xf32>
    %c4_826 = arith.constant 4 : index
    %c0_827 = arith.constant 0 : index
    %895 = vector.load %arg4[%c4_826, %c0_827] : memref<8x128xf32, #tpu.memory_space<vmem>>, vector<1x128xf32>
    %cst_828 = arith.constant 0.00510204071 : f32
    %896 = vector.broadcast %cst_828 : f32 to vector<1x1xf32>
    %897 = arith.mulf %894, %896 : vector<1x1xf32>
    %898 = vector.broadcast %897 : vector<1x1xf32> to vector<1x128xf32>
    %899 = arith.mulf %895, %898 : vector<1x128xf32>
    %900 = arith.addf %720, %899 : vector<1x128xf32>
    %cst_829 = arith.constant 0.000000e+00 : f32
    %901 = vector.broadcast %cst_829 : f32 to vector<1x1xf32>
    %cst_830 = arith.constant 0.000000e+00 : f32
    %902 = vector.broadcast %cst_830 : f32 to vector<14x14xf32>
    %c5_831 = arith.constant 5 : index
    %903 = memref.load %arg3[%c5_831] : memref<8xf32, #tpu.memory_space<smem>>
    %904 = vector.broadcast %903 : f32 to vector<14x14xf32>
    %905 = arith.addf %902, %904 : vector<14x14xf32>
    %c5_832 = arith.constant 5 : index
    %c0_833 = arith.constant 0 : index
    %906 = memref.load %arg2[%c5_832, %c0_833] : memref<8x27xf32, #tpu.memory_space<smem>>
    %c0_834 = arith.constant 0 : index
    %c0_835 = arith.constant 0 : index
    %c0_836 = arith.constant 0 : index
    %c0_837 = arith.constant 0 : index
    %907 = vector.load %arg1[%c0_834, %c0_835, %c0_836, %c0_837] : memref<1x3x16x16xf32, #tpu.memory_space<vmem>>, vector<1x1x14x14xf32>
    %908 = vector.shape_cast %907 : vector<1x1x14x14xf32> to vector<14x14xf32>
    %909 = vector.broadcast %906 : f32 to vector<14x14xf32>
    %910 = arith.mulf %908, %909 : vector<14x14xf32>
    %911 = arith.addf %905, %910 : vector<14x14xf32>
    %c5_838 = arith.constant 5 : index
    %c1_839 = arith.constant 1 : index
    %912 = memref.load %arg2[%c5_838, %c1_839] : memref<8x27xf32, #tpu.memory_space<smem>>
    %c0_840 = arith.constant 0 : index
    %c0_841 = arith.constant 0 : index
    %c0_842 = arith.constant 0 : index
    %c1_843 = arith.constant 1 : index
    %913 = vector.load %arg1[%c0_840, %c0_841, %c0_842, %c1_843] : memref<1x3x16x16xf32, #tpu.memory_space<vmem>>, vector<1x1x14x14xf32>
    %914 = vector.shape_cast %913 : vector<1x1x14x14xf32> to vector<14x14xf32>
    %915 = vector.broadcast %912 : f32 to vector<14x14xf32>
    %916 = arith.mulf %914, %915 : vector<14x14xf32>
    %917 = arith.addf %911, %916 : vector<14x14xf32>
    %c5_844 = arith.constant 5 : index
    %c2_845 = arith.constant 2 : index
    %918 = memref.load %arg2[%c5_844, %c2_845] : memref<8x27xf32, #tpu.memory_space<smem>>
    %c0_846 = arith.constant 0 : index
    %c0_847 = arith.constant 0 : index
    %c0_848 = arith.constant 0 : index
    %c2_849 = arith.constant 2 : index
    %919 = vector.load %arg1[%c0_846, %c0_847, %c0_848, %c2_849] : memref<1x3x16x16xf32, #tpu.memory_space<vmem>>, vector<1x1x14x14xf32>
    %920 = vector.shape_cast %919 : vector<1x1x14x14xf32> to vector<14x14xf32>
    %921 = vector.broadcast %918 : f32 to vector<14x14xf32>
    %922 = arith.mulf %920, %921 : vector<14x14xf32>
    %923 = arith.addf %917, %922 : vector<14x14xf32>
    %c5_850 = arith.constant 5 : index
    %c3_851 = arith.constant 3 : index
    %924 = memref.load %arg2[%c5_850, %c3_851] : memref<8x27xf32, #tpu.memory_space<smem>>
    %c0_852 = arith.constant 0 : index
    %c0_853 = arith.constant 0 : index
    %c1_854 = arith.constant 1 : index
    %c0_855 = arith.constant 0 : index
    %925 = vector.load %arg1[%c0_852, %c0_853, %c1_854, %c0_855] : memref<1x3x16x16xf32, #tpu.memory_space<vmem>>, vector<1x1x14x14xf32>
    %926 = vector.shape_cast %925 : vector<1x1x14x14xf32> to vector<14x14xf32>
    %927 = vector.broadcast %924 : f32 to vector<14x14xf32>
    %928 = arith.mulf %926, %927 : vector<14x14xf32>
    %929 = arith.addf %923, %928 : vector<14x14xf32>
    %c5_856 = arith.constant 5 : index
    %c4_857 = arith.constant 4 : index
    %930 = memref.load %arg2[%c5_856, %c4_857] : memref<8x27xf32, #tpu.memory_space<smem>>
    %c0_858 = arith.constant 0 : index
    %c0_859 = arith.constant 0 : index
    %c1_860 = arith.constant 1 : index
    %c1_861 = arith.constant 1 : index
    %931 = vector.load %arg1[%c0_858, %c0_859, %c1_860, %c1_861] : memref<1x3x16x16xf32, #tpu.memory_space<vmem>>, vector<1x1x14x14xf32>
    %932 = vector.shape_cast %931 : vector<1x1x14x14xf32> to vector<14x14xf32>
    %933 = vector.broadcast %930 : f32 to vector<14x14xf32>
    %934 = arith.mulf %932, %933 : vector<14x14xf32>
    %935 = arith.addf %929, %934 : vector<14x14xf32>
    %c5_862 = arith.constant 5 : index
    %c5_863 = arith.constant 5 : index
    %936 = memref.load %arg2[%c5_862, %c5_863] : memref<8x27xf32, #tpu.memory_space<smem>>
    %c0_864 = arith.constant 0 : index
    %c0_865 = arith.constant 0 : index
    %c1_866 = arith.constant 1 : index
    %c2_867 = arith.constant 2 : index
    %937 = vector.load %arg1[%c0_864, %c0_865, %c1_866, %c2_867] : memref<1x3x16x16xf32, #tpu.memory_space<vmem>>, vector<1x1x14x14xf32>
    %938 = vector.shape_cast %937 : vector<1x1x14x14xf32> to vector<14x14xf32>
    %939 = vector.broadcast %936 : f32 to vector<14x14xf32>
    %940 = arith.mulf %938, %939 : vector<14x14xf32>
    %941 = arith.addf %935, %940 : vector<14x14xf32>
    %c5_868 = arith.constant 5 : index
    %c6_869 = arith.constant 6 : index
    %942 = memref.load %arg2[%c5_868, %c6_869] : memref<8x27xf32, #tpu.memory_space<smem>>
    %c0_870 = arith.constant 0 : index
    %c0_871 = arith.constant 0 : index
    %c2_872 = arith.constant 2 : index
    %c0_873 = arith.constant 0 : index
    %943 = vector.load %arg1[%c0_870, %c0_871, %c2_872, %c0_873] : memref<1x3x16x16xf32, #tpu.memory_space<vmem>>, vector<1x1x14x14xf32>
    %944 = vector.shape_cast %943 : vector<1x1x14x14xf32> to vector<14x14xf32>
    %945 = vector.broadcast %942 : f32 to vector<14x14xf32>
    %946 = arith.mulf %944, %945 : vector<14x14xf32>
    %947 = arith.addf %941, %946 : vector<14x14xf32>
    %c5_874 = arith.constant 5 : index
    %c7_875 = arith.constant 7 : index
    %948 = memref.load %arg2[%c5_874, %c7_875] : memref<8x27xf32, #tpu.memory_space<smem>>
    %c0_876 = arith.constant 0 : index
    %c0_877 = arith.constant 0 : index
    %c2_878 = arith.constant 2 : index
    %c1_879 = arith.constant 1 : index
    %949 = vector.load %arg1[%c0_876, %c0_877, %c2_878, %c1_879] : memref<1x3x16x16xf32, #tpu.memory_space<vmem>>, vector<1x1x14x14xf32>
    %950 = vector.shape_cast %949 : vector<1x1x14x14xf32> to vector<14x14xf32>
    %951 = vector.broadcast %948 : f32 to vector<14x14xf32>
    %952 = arith.mulf %950, %951 : vector<14x14xf32>
    %953 = arith.addf %947, %952 : vector<14x14xf32>
    %c5_880 = arith.constant 5 : index
    %c8_881 = arith.constant 8 : index
    %954 = memref.load %arg2[%c5_880, %c8_881] : memref<8x27xf32, #tpu.memory_space<smem>>
    %c0_882 = arith.constant 0 : index
    %c0_883 = arith.constant 0 : index
    %c2_884 = arith.constant 2 : index
    %c2_885 = arith.constant 2 : index
    %955 = vector.load %arg1[%c0_882, %c0_883, %c2_884, %c2_885] : memref<1x3x16x16xf32, #tpu.memory_space<vmem>>, vector<1x1x14x14xf32>
    %956 = vector.shape_cast %955 : vector<1x1x14x14xf32> to vector<14x14xf32>
    %957 = vector.broadcast %954 : f32 to vector<14x14xf32>
    %958 = arith.mulf %956, %957 : vector<14x14xf32>
    %959 = arith.addf %953, %958 : vector<14x14xf32>
    %c5_886 = arith.constant 5 : index
    %c9_887 = arith.constant 9 : index
    %960 = memref.load %arg2[%c5_886, %c9_887] : memref<8x27xf32, #tpu.memory_space<smem>>
    %c0_888 = arith.constant 0 : index
    %c1_889 = arith.constant 1 : index
    %c0_890 = arith.constant 0 : index
    %c0_891 = arith.constant 0 : index
    %961 = vector.load %arg1[%c0_888, %c1_889, %c0_890, %c0_891] : memref<1x3x16x16xf32, #tpu.memory_space<vmem>>, vector<1x1x14x14xf32>
    %962 = vector.shape_cast %961 : vector<1x1x14x14xf32> to vector<14x14xf32>
    %963 = vector.broadcast %960 : f32 to vector<14x14xf32>
    %964 = arith.mulf %962, %963 : vector<14x14xf32>
    %965 = arith.addf %959, %964 : vector<14x14xf32>
    %c5_892 = arith.constant 5 : index
    %c10_893 = arith.constant 10 : index
    %966 = memref.load %arg2[%c5_892, %c10_893] : memref<8x27xf32, #tpu.memory_space<smem>>
    %c0_894 = arith.constant 0 : index
    %c1_895 = arith.constant 1 : index
    %c0_896 = arith.constant 0 : index
    %c1_897 = arith.constant 1 : index
    %967 = vector.load %arg1[%c0_894, %c1_895, %c0_896, %c1_897] : memref<1x3x16x16xf32, #tpu.memory_space<vmem>>, vector<1x1x14x14xf32>
    %968 = vector.shape_cast %967 : vector<1x1x14x14xf32> to vector<14x14xf32>
    %969 = vector.broadcast %966 : f32 to vector<14x14xf32>
    %970 = arith.mulf %968, %969 : vector<14x14xf32>
    %971 = arith.addf %965, %970 : vector<14x14xf32>
    %c5_898 = arith.constant 5 : index
    %c11_899 = arith.constant 11 : index
    %972 = memref.load %arg2[%c5_898, %c11_899] : memref<8x27xf32, #tpu.memory_space<smem>>
    %c0_900 = arith.constant 0 : index
    %c1_901 = arith.constant 1 : index
    %c0_902 = arith.constant 0 : index
    %c2_903 = arith.constant 2 : index
    %973 = vector.load %arg1[%c0_900, %c1_901, %c0_902, %c2_903] : memref<1x3x16x16xf32, #tpu.memory_space<vmem>>, vector<1x1x14x14xf32>
    %974 = vector.shape_cast %973 : vector<1x1x14x14xf32> to vector<14x14xf32>
    %975 = vector.broadcast %972 : f32 to vector<14x14xf32>
    %976 = arith.mulf %974, %975 : vector<14x14xf32>
    %977 = arith.addf %971, %976 : vector<14x14xf32>
    %c5_904 = arith.constant 5 : index
    %c12_905 = arith.constant 12 : index
    %978 = memref.load %arg2[%c5_904, %c12_905] : memref<8x27xf32, #tpu.memory_space<smem>>
    %c0_906 = arith.constant 0 : index
    %c1_907 = arith.constant 1 : index
    %c1_908 = arith.constant 1 : index
    %c0_909 = arith.constant 0 : index
    %979 = vector.load %arg1[%c0_906, %c1_907, %c1_908, %c0_909] : memref<1x3x16x16xf32, #tpu.memory_space<vmem>>, vector<1x1x14x14xf32>
    %980 = vector.shape_cast %979 : vector<1x1x14x14xf32> to vector<14x14xf32>
    %981 = vector.broadcast %978 : f32 to vector<14x14xf32>
    %982 = arith.mulf %980, %981 : vector<14x14xf32>
    %983 = arith.addf %977, %982 : vector<14x14xf32>
    %c5_910 = arith.constant 5 : index
    %c13_911 = arith.constant 13 : index
    %984 = memref.load %arg2[%c5_910, %c13_911] : memref<8x27xf32, #tpu.memory_space<smem>>
    %c0_912 = arith.constant 0 : index
    %c1_913 = arith.constant 1 : index
    %c1_914 = arith.constant 1 : index
    %c1_915 = arith.constant 1 : index
    %985 = vector.load %arg1[%c0_912, %c1_913, %c1_914, %c1_915] : memref<1x3x16x16xf32, #tpu.memory_space<vmem>>, vector<1x1x14x14xf32>
    %986 = vector.shape_cast %985 : vector<1x1x14x14xf32> to vector<14x14xf32>
    %987 = vector.broadcast %984 : f32 to vector<14x14xf32>
    %988 = arith.mulf %986, %987 : vector<14x14xf32>
    %989 = arith.addf %983, %988 : vector<14x14xf32>
    %c5_916 = arith.constant 5 : index
    %c14_917 = arith.constant 14 : index
    %990 = memref.load %arg2[%c5_916, %c14_917] : memref<8x27xf32, #tpu.memory_space<smem>>
    %c0_918 = arith.constant 0 : index
    %c1_919 = arith.constant 1 : index
    %c1_920 = arith.constant 1 : index
    %c2_921 = arith.constant 2 : index
    %991 = vector.load %arg1[%c0_918, %c1_919, %c1_920, %c2_921] : memref<1x3x16x16xf32, #tpu.memory_space<vmem>>, vector<1x1x14x14xf32>
    %992 = vector.shape_cast %991 : vector<1x1x14x14xf32> to vector<14x14xf32>
    %993 = vector.broadcast %990 : f32 to vector<14x14xf32>
    %994 = arith.mulf %992, %993 : vector<14x14xf32>
    %995 = arith.addf %989, %994 : vector<14x14xf32>
    %c5_922 = arith.constant 5 : index
    %c15_923 = arith.constant 15 : index
    %996 = memref.load %arg2[%c5_922, %c15_923] : memref<8x27xf32, #tpu.memory_space<smem>>
    %c0_924 = arith.constant 0 : index
    %c1_925 = arith.constant 1 : index
    %c2_926 = arith.constant 2 : index
    %c0_927 = arith.constant 0 : index
    %997 = vector.load %arg1[%c0_924, %c1_925, %c2_926, %c0_927] : memref<1x3x16x16xf32, #tpu.memory_space<vmem>>, vector<1x1x14x14xf32>
    %998 = vector.shape_cast %997 : vector<1x1x14x14xf32> to vector<14x14xf32>
    %999 = vector.broadcast %996 : f32 to vector<14x14xf32>
    %1000 = arith.mulf %998, %999 : vector<14x14xf32>
    %1001 = arith.addf %995, %1000 : vector<14x14xf32>
    %c5_928 = arith.constant 5 : index
    %c16_929 = arith.constant 16 : index
    %1002 = memref.load %arg2[%c5_928, %c16_929] : memref<8x27xf32, #tpu.memory_space<smem>>
    %c0_930 = arith.constant 0 : index
    %c1_931 = arith.constant 1 : index
    %c2_932 = arith.constant 2 : index
    %c1_933 = arith.constant 1 : index
    %1003 = vector.load %arg1[%c0_930, %c1_931, %c2_932, %c1_933] : memref<1x3x16x16xf32, #tpu.memory_space<vmem>>, vector<1x1x14x14xf32>
    %1004 = vector.shape_cast %1003 : vector<1x1x14x14xf32> to vector<14x14xf32>
    %1005 = vector.broadcast %1002 : f32 to vector<14x14xf32>
    %1006 = arith.mulf %1004, %1005 : vector<14x14xf32>
    %1007 = arith.addf %1001, %1006 : vector<14x14xf32>
    %c5_934 = arith.constant 5 : index
    %c17_935 = arith.constant 17 : index
    %1008 = memref.load %arg2[%c5_934, %c17_935] : memref<8x27xf32, #tpu.memory_space<smem>>
    %c0_936 = arith.constant 0 : index
    %c1_937 = arith.constant 1 : index
    %c2_938 = arith.constant 2 : index
    %c2_939 = arith.constant 2 : index
    %1009 = vector.load %arg1[%c0_936, %c1_937, %c2_938, %c2_939] : memref<1x3x16x16xf32, #tpu.memory_space<vmem>>, vector<1x1x14x14xf32>
    %1010 = vector.shape_cast %1009 : vector<1x1x14x14xf32> to vector<14x14xf32>
    %1011 = vector.broadcast %1008 : f32 to vector<14x14xf32>
    %1012 = arith.mulf %1010, %1011 : vector<14x14xf32>
    %1013 = arith.addf %1007, %1012 : vector<14x14xf32>
    %c5_940 = arith.constant 5 : index
    %c18_941 = arith.constant 18 : index
    %1014 = memref.load %arg2[%c5_940, %c18_941] : memref<8x27xf32, #tpu.memory_space<smem>>
    %c0_942 = arith.constant 0 : index
    %c2_943 = arith.constant 2 : index
    %c0_944 = arith.constant 0 : index
    %c0_945 = arith.constant 0 : index
    %1015 = vector.load %arg1[%c0_942, %c2_943, %c0_944, %c0_945] : memref<1x3x16x16xf32, #tpu.memory_space<vmem>>, vector<1x1x14x14xf32>
    %1016 = vector.shape_cast %1015 : vector<1x1x14x14xf32> to vector<14x14xf32>
    %1017 = vector.broadcast %1014 : f32 to vector<14x14xf32>
    %1018 = arith.mulf %1016, %1017 : vector<14x14xf32>
    %1019 = arith.addf %1013, %1018 : vector<14x14xf32>
    %c5_946 = arith.constant 5 : index
    %c19_947 = arith.constant 19 : index
    %1020 = memref.load %arg2[%c5_946, %c19_947] : memref<8x27xf32, #tpu.memory_space<smem>>
    %c0_948 = arith.constant 0 : index
    %c2_949 = arith.constant 2 : index
    %c0_950 = arith.constant 0 : index
    %c1_951 = arith.constant 1 : index
    %1021 = vector.load %arg1[%c0_948, %c2_949, %c0_950, %c1_951] : memref<1x3x16x16xf32, #tpu.memory_space<vmem>>, vector<1x1x14x14xf32>
    %1022 = vector.shape_cast %1021 : vector<1x1x14x14xf32> to vector<14x14xf32>
    %1023 = vector.broadcast %1020 : f32 to vector<14x14xf32>
    %1024 = arith.mulf %1022, %1023 : vector<14x14xf32>
    %1025 = arith.addf %1019, %1024 : vector<14x14xf32>
    %c5_952 = arith.constant 5 : index
    %c20_953 = arith.constant 20 : index
    %1026 = memref.load %arg2[%c5_952, %c20_953] : memref<8x27xf32, #tpu.memory_space<smem>>
    %c0_954 = arith.constant 0 : index
    %c2_955 = arith.constant 2 : index
    %c0_956 = arith.constant 0 : index
    %c2_957 = arith.constant 2 : index
    %1027 = vector.load %arg1[%c0_954, %c2_955, %c0_956, %c2_957] : memref<1x3x16x16xf32, #tpu.memory_space<vmem>>, vector<1x1x14x14xf32>
    %1028 = vector.shape_cast %1027 : vector<1x1x14x14xf32> to vector<14x14xf32>
    %1029 = vector.broadcast %1026 : f32 to vector<14x14xf32>
    %1030 = arith.mulf %1028, %1029 : vector<14x14xf32>
    %1031 = arith.addf %1025, %1030 : vector<14x14xf32>
    %c5_958 = arith.constant 5 : index
    %c21_959 = arith.constant 21 : index
    %1032 = memref.load %arg2[%c5_958, %c21_959] : memref<8x27xf32, #tpu.memory_space<smem>>
    %c0_960 = arith.constant 0 : index
    %c2_961 = arith.constant 2 : index
    %c1_962 = arith.constant 1 : index
    %c0_963 = arith.constant 0 : index
    %1033 = vector.load %arg1[%c0_960, %c2_961, %c1_962, %c0_963] : memref<1x3x16x16xf32, #tpu.memory_space<vmem>>, vector<1x1x14x14xf32>
    %1034 = vector.shape_cast %1033 : vector<1x1x14x14xf32> to vector<14x14xf32>
    %1035 = vector.broadcast %1032 : f32 to vector<14x14xf32>
    %1036 = arith.mulf %1034, %1035 : vector<14x14xf32>
    %1037 = arith.addf %1031, %1036 : vector<14x14xf32>
    %c5_964 = arith.constant 5 : index
    %c22_965 = arith.constant 22 : index
    %1038 = memref.load %arg2[%c5_964, %c22_965] : memref<8x27xf32, #tpu.memory_space<smem>>
    %c0_966 = arith.constant 0 : index
    %c2_967 = arith.constant 2 : index
    %c1_968 = arith.constant 1 : index
    %c1_969 = arith.constant 1 : index
    %1039 = vector.load %arg1[%c0_966, %c2_967, %c1_968, %c1_969] : memref<1x3x16x16xf32, #tpu.memory_space<vmem>>, vector<1x1x14x14xf32>
    %1040 = vector.shape_cast %1039 : vector<1x1x14x14xf32> to vector<14x14xf32>
    %1041 = vector.broadcast %1038 : f32 to vector<14x14xf32>
    %1042 = arith.mulf %1040, %1041 : vector<14x14xf32>
    %1043 = arith.addf %1037, %1042 : vector<14x14xf32>
    %c5_970 = arith.constant 5 : index
    %c23_971 = arith.constant 23 : index
    %1044 = memref.load %arg2[%c5_970, %c23_971] : memref<8x27xf32, #tpu.memory_space<smem>>
    %c0_972 = arith.constant 0 : index
    %c2_973 = arith.constant 2 : index
    %c1_974 = arith.constant 1 : index
    %c2_975 = arith.constant 2 : index
    %1045 = vector.load %arg1[%c0_972, %c2_973, %c1_974, %c2_975] : memref<1x3x16x16xf32, #tpu.memory_space<vmem>>, vector<1x1x14x14xf32>
    %1046 = vector.shape_cast %1045 : vector<1x1x14x14xf32> to vector<14x14xf32>
    %1047 = vector.broadcast %1044 : f32 to vector<14x14xf32>
    %1048 = arith.mulf %1046, %1047 : vector<14x14xf32>
    %1049 = arith.addf %1043, %1048 : vector<14x14xf32>
    %c5_976 = arith.constant 5 : index
    %c24_977 = arith.constant 24 : index
    %1050 = memref.load %arg2[%c5_976, %c24_977] : memref<8x27xf32, #tpu.memory_space<smem>>
    %c0_978 = arith.constant 0 : index
    %c2_979 = arith.constant 2 : index
    %c2_980 = arith.constant 2 : index
    %c0_981 = arith.constant 0 : index
    %1051 = vector.load %arg1[%c0_978, %c2_979, %c2_980, %c0_981] : memref<1x3x16x16xf32, #tpu.memory_space<vmem>>, vector<1x1x14x14xf32>
    %1052 = vector.shape_cast %1051 : vector<1x1x14x14xf32> to vector<14x14xf32>
    %1053 = vector.broadcast %1050 : f32 to vector<14x14xf32>
    %1054 = arith.mulf %1052, %1053 : vector<14x14xf32>
    %1055 = arith.addf %1049, %1054 : vector<14x14xf32>
    %c5_982 = arith.constant 5 : index
    %c25_983 = arith.constant 25 : index
    %1056 = memref.load %arg2[%c5_982, %c25_983] : memref<8x27xf32, #tpu.memory_space<smem>>
    %c0_984 = arith.constant 0 : index
    %c2_985 = arith.constant 2 : index
    %c2_986 = arith.constant 2 : index
    %c1_987 = arith.constant 1 : index
    %1057 = vector.load %arg1[%c0_984, %c2_985, %c2_986, %c1_987] : memref<1x3x16x16xf32, #tpu.memory_space<vmem>>, vector<1x1x14x14xf32>
    %1058 = vector.shape_cast %1057 : vector<1x1x14x14xf32> to vector<14x14xf32>
    %1059 = vector.broadcast %1056 : f32 to vector<14x14xf32>
    %1060 = arith.mulf %1058, %1059 : vector<14x14xf32>
    %1061 = arith.addf %1055, %1060 : vector<14x14xf32>
    %c5_988 = arith.constant 5 : index
    %c26_989 = arith.constant 26 : index
    %1062 = memref.load %arg2[%c5_988, %c26_989] : memref<8x27xf32, #tpu.memory_space<smem>>
    %c0_990 = arith.constant 0 : index
    %c2_991 = arith.constant 2 : index
    %c2_992 = arith.constant 2 : index
    %c2_993 = arith.constant 2 : index
    %1063 = vector.load %arg1[%c0_990, %c2_991, %c2_992, %c2_993] : memref<1x3x16x16xf32, #tpu.memory_space<vmem>>, vector<1x1x14x14xf32>
    %1064 = vector.shape_cast %1063 : vector<1x1x14x14xf32> to vector<14x14xf32>
    %1065 = vector.broadcast %1062 : f32 to vector<14x14xf32>
    %1066 = arith.mulf %1064, %1065 : vector<14x14xf32>
    %1067 = arith.addf %1061, %1066 : vector<14x14xf32>
    %cst_994 = arith.constant 0.000000e+00 : f32
    %1068 = vector.broadcast %cst_994 : f32 to vector<14x14xf32>
    %1069 = arith.maximumf %1067, %1068 : vector<14x14xf32>
    %cst_995 = arith.constant dense<0.000000e+00> : vector<14xf32>
    %1070 = vector.multi_reduction <add>, %1069, %cst_995 [1] : vector<14x14xf32> to vector<14xf32>
    %1071 = vector.shape_cast %1070 : vector<14xf32> to vector<14x1xf32>
    %cst_996 = arith.constant dense<0.000000e+00> : vector<1xf32>
    %1072 = vector.multi_reduction <add>, %1071, %cst_996 [0] : vector<14x1xf32> to vector<1xf32>
    %1073 = vector.shape_cast %1072 : vector<1xf32> to vector<1x1xf32>
    %1074 = arith.addf %901, %1073 : vector<1x1xf32>
    %c5_997 = arith.constant 5 : index
    %c0_998 = arith.constant 0 : index
    %1075 = vector.load %arg4[%c5_997, %c0_998] : memref<8x128xf32, #tpu.memory_space<vmem>>, vector<1x128xf32>
    %cst_999 = arith.constant 0.00510204071 : f32
    %1076 = vector.broadcast %cst_999 : f32 to vector<1x1xf32>
    %1077 = arith.mulf %1074, %1076 : vector<1x1xf32>
    %1078 = vector.broadcast %1077 : vector<1x1xf32> to vector<1x128xf32>
    %1079 = arith.mulf %1075, %1078 : vector<1x128xf32>
    %1080 = arith.addf %900, %1079 : vector<1x128xf32>
    %cst_1000 = arith.constant 0.000000e+00 : f32
    %1081 = vector.broadcast %cst_1000 : f32 to vector<1x1xf32>
    %cst_1001 = arith.constant 0.000000e+00 : f32
    %1082 = vector.broadcast %cst_1001 : f32 to vector<14x14xf32>
    %c6_1002 = arith.constant 6 : index
    %1083 = memref.load %arg3[%c6_1002] : memref<8xf32, #tpu.memory_space<smem>>
    %1084 = vector.broadcast %1083 : f32 to vector<14x14xf32>
    %1085 = arith.addf %1082, %1084 : vector<14x14xf32>
    %c6_1003 = arith.constant 6 : index
    %c0_1004 = arith.constant 0 : index
    %1086 = memref.load %arg2[%c6_1003, %c0_1004] : memref<8x27xf32, #tpu.memory_space<smem>>
    %c0_1005 = arith.constant 0 : index
    %c0_1006 = arith.constant 0 : index
    %c0_1007 = arith.constant 0 : index
    %c0_1008 = arith.constant 0 : index
    %1087 = vector.load %arg1[%c0_1005, %c0_1006, %c0_1007, %c0_1008] : memref<1x3x16x16xf32, #tpu.memory_space<vmem>>, vector<1x1x14x14xf32>
    %1088 = vector.shape_cast %1087 : vector<1x1x14x14xf32> to vector<14x14xf32>
    %1089 = vector.broadcast %1086 : f32 to vector<14x14xf32>
    %1090 = arith.mulf %1088, %1089 : vector<14x14xf32>
    %1091 = arith.addf %1085, %1090 : vector<14x14xf32>
    %c6_1009 = arith.constant 6 : index
    %c1_1010 = arith.constant 1 : index
    %1092 = memref.load %arg2[%c6_1009, %c1_1010] : memref<8x27xf32, #tpu.memory_space<smem>>
    %c0_1011 = arith.constant 0 : index
    %c0_1012 = arith.constant 0 : index
    %c0_1013 = arith.constant 0 : index
    %c1_1014 = arith.constant 1 : index
    %1093 = vector.load %arg1[%c0_1011, %c0_1012, %c0_1013, %c1_1014] : memref<1x3x16x16xf32, #tpu.memory_space<vmem>>, vector<1x1x14x14xf32>
    %1094 = vector.shape_cast %1093 : vector<1x1x14x14xf32> to vector<14x14xf32>
    %1095 = vector.broadcast %1092 : f32 to vector<14x14xf32>
    %1096 = arith.mulf %1094, %1095 : vector<14x14xf32>
    %1097 = arith.addf %1091, %1096 : vector<14x14xf32>
    %c6_1015 = arith.constant 6 : index
    %c2_1016 = arith.constant 2 : index
    %1098 = memref.load %arg2[%c6_1015, %c2_1016] : memref<8x27xf32, #tpu.memory_space<smem>>
    %c0_1017 = arith.constant 0 : index
    %c0_1018 = arith.constant 0 : index
    %c0_1019 = arith.constant 0 : index
    %c2_1020 = arith.constant 2 : index
    %1099 = vector.load %arg1[%c0_1017, %c0_1018, %c0_1019, %c2_1020] : memref<1x3x16x16xf32, #tpu.memory_space<vmem>>, vector<1x1x14x14xf32>
    %1100 = vector.shape_cast %1099 : vector<1x1x14x14xf32> to vector<14x14xf32>
    %1101 = vector.broadcast %1098 : f32 to vector<14x14xf32>
    %1102 = arith.mulf %1100, %1101 : vector<14x14xf32>
    %1103 = arith.addf %1097, %1102 : vector<14x14xf32>
    %c6_1021 = arith.constant 6 : index
    %c3_1022 = arith.constant 3 : index
    %1104 = memref.load %arg2[%c6_1021, %c3_1022] : memref<8x27xf32, #tpu.memory_space<smem>>
    %c0_1023 = arith.constant 0 : index
    %c0_1024 = arith.constant 0 : index
    %c1_1025 = arith.constant 1 : index
    %c0_1026 = arith.constant 0 : index
    %1105 = vector.load %arg1[%c0_1023, %c0_1024, %c1_1025, %c0_1026] : memref<1x3x16x16xf32, #tpu.memory_space<vmem>>, vector<1x1x14x14xf32>
    %1106 = vector.shape_cast %1105 : vector<1x1x14x14xf32> to vector<14x14xf32>
    %1107 = vector.broadcast %1104 : f32 to vector<14x14xf32>
    %1108 = arith.mulf %1106, %1107 : vector<14x14xf32>
    %1109 = arith.addf %1103, %1108 : vector<14x14xf32>
    %c6_1027 = arith.constant 6 : index
    %c4_1028 = arith.constant 4 : index
    %1110 = memref.load %arg2[%c6_1027, %c4_1028] : memref<8x27xf32, #tpu.memory_space<smem>>
    %c0_1029 = arith.constant 0 : index
    %c0_1030 = arith.constant 0 : index
    %c1_1031 = arith.constant 1 : index
    %c1_1032 = arith.constant 1 : index
    %1111 = vector.load %arg1[%c0_1029, %c0_1030, %c1_1031, %c1_1032] : memref<1x3x16x16xf32, #tpu.memory_space<vmem>>, vector<1x1x14x14xf32>
    %1112 = vector.shape_cast %1111 : vector<1x1x14x14xf32> to vector<14x14xf32>
    %1113 = vector.broadcast %1110 : f32 to vector<14x14xf32>
    %1114 = arith.mulf %1112, %1113 : vector<14x14xf32>
    %1115 = arith.addf %1109, %1114 : vector<14x14xf32>
    %c6_1033 = arith.constant 6 : index
    %c5_1034 = arith.constant 5 : index
    %1116 = memref.load %arg2[%c6_1033, %c5_1034] : memref<8x27xf32, #tpu.memory_space<smem>>
    %c0_1035 = arith.constant 0 : index
    %c0_1036 = arith.constant 0 : index
    %c1_1037 = arith.constant 1 : index
    %c2_1038 = arith.constant 2 : index
    %1117 = vector.load %arg1[%c0_1035, %c0_1036, %c1_1037, %c2_1038] : memref<1x3x16x16xf32, #tpu.memory_space<vmem>>, vector<1x1x14x14xf32>
    %1118 = vector.shape_cast %1117 : vector<1x1x14x14xf32> to vector<14x14xf32>
    %1119 = vector.broadcast %1116 : f32 to vector<14x14xf32>
    %1120 = arith.mulf %1118, %1119 : vector<14x14xf32>
    %1121 = arith.addf %1115, %1120 : vector<14x14xf32>
    %c6_1039 = arith.constant 6 : index
    %c6_1040 = arith.constant 6 : index
    %1122 = memref.load %arg2[%c6_1039, %c6_1040] : memref<8x27xf32, #tpu.memory_space<smem>>
    %c0_1041 = arith.constant 0 : index
    %c0_1042 = arith.constant 0 : index
    %c2_1043 = arith.constant 2 : index
    %c0_1044 = arith.constant 0 : index
    %1123 = vector.load %arg1[%c0_1041, %c0_1042, %c2_1043, %c0_1044] : memref<1x3x16x16xf32, #tpu.memory_space<vmem>>, vector<1x1x14x14xf32>
    %1124 = vector.shape_cast %1123 : vector<1x1x14x14xf32> to vector<14x14xf32>
    %1125 = vector.broadcast %1122 : f32 to vector<14x14xf32>
    %1126 = arith.mulf %1124, %1125 : vector<14x14xf32>
    %1127 = arith.addf %1121, %1126 : vector<14x14xf32>
    %c6_1045 = arith.constant 6 : index
    %c7_1046 = arith.constant 7 : index
    %1128 = memref.load %arg2[%c6_1045, %c7_1046] : memref<8x27xf32, #tpu.memory_space<smem>>
    %c0_1047 = arith.constant 0 : index
    %c0_1048 = arith.constant 0 : index
    %c2_1049 = arith.constant 2 : index
    %c1_1050 = arith.constant 1 : index
    %1129 = vector.load %arg1[%c0_1047, %c0_1048, %c2_1049, %c1_1050] : memref<1x3x16x16xf32, #tpu.memory_space<vmem>>, vector<1x1x14x14xf32>
    %1130 = vector.shape_cast %1129 : vector<1x1x14x14xf32> to vector<14x14xf32>
    %1131 = vector.broadcast %1128 : f32 to vector<14x14xf32>
    %1132 = arith.mulf %1130, %1131 : vector<14x14xf32>
    %1133 = arith.addf %1127, %1132 : vector<14x14xf32>
    %c6_1051 = arith.constant 6 : index
    %c8_1052 = arith.constant 8 : index
    %1134 = memref.load %arg2[%c6_1051, %c8_1052] : memref<8x27xf32, #tpu.memory_space<smem>>
    %c0_1053 = arith.constant 0 : index
    %c0_1054 = arith.constant 0 : index
    %c2_1055 = arith.constant 2 : index
    %c2_1056 = arith.constant 2 : index
    %1135 = vector.load %arg1[%c0_1053, %c0_1054, %c2_1055, %c2_1056] : memref<1x3x16x16xf32, #tpu.memory_space<vmem>>, vector<1x1x14x14xf32>
    %1136 = vector.shape_cast %1135 : vector<1x1x14x14xf32> to vector<14x14xf32>
    %1137 = vector.broadcast %1134 : f32 to vector<14x14xf32>
    %1138 = arith.mulf %1136, %1137 : vector<14x14xf32>
    %1139 = arith.addf %1133, %1138 : vector<14x14xf32>
    %c6_1057 = arith.constant 6 : index
    %c9_1058 = arith.constant 9 : index
    %1140 = memref.load %arg2[%c6_1057, %c9_1058] : memref<8x27xf32, #tpu.memory_space<smem>>
    %c0_1059 = arith.constant 0 : index
    %c1_1060 = arith.constant 1 : index
    %c0_1061 = arith.constant 0 : index
    %c0_1062 = arith.constant 0 : index
    %1141 = vector.load %arg1[%c0_1059, %c1_1060, %c0_1061, %c0_1062] : memref<1x3x16x16xf32, #tpu.memory_space<vmem>>, vector<1x1x14x14xf32>
    %1142 = vector.shape_cast %1141 : vector<1x1x14x14xf32> to vector<14x14xf32>
    %1143 = vector.broadcast %1140 : f32 to vector<14x14xf32>
    %1144 = arith.mulf %1142, %1143 : vector<14x14xf32>
    %1145 = arith.addf %1139, %1144 : vector<14x14xf32>
    %c6_1063 = arith.constant 6 : index
    %c10_1064 = arith.constant 10 : index
    %1146 = memref.load %arg2[%c6_1063, %c10_1064] : memref<8x27xf32, #tpu.memory_space<smem>>
    %c0_1065 = arith.constant 0 : index
    %c1_1066 = arith.constant 1 : index
    %c0_1067 = arith.constant 0 : index
    %c1_1068 = arith.constant 1 : index
    %1147 = vector.load %arg1[%c0_1065, %c1_1066, %c0_1067, %c1_1068] : memref<1x3x16x16xf32, #tpu.memory_space<vmem>>, vector<1x1x14x14xf32>
    %1148 = vector.shape_cast %1147 : vector<1x1x14x14xf32> to vector<14x14xf32>
    %1149 = vector.broadcast %1146 : f32 to vector<14x14xf32>
    %1150 = arith.mulf %1148, %1149 : vector<14x14xf32>
    %1151 = arith.addf %1145, %1150 : vector<14x14xf32>
    %c6_1069 = arith.constant 6 : index
    %c11_1070 = arith.constant 11 : index
    %1152 = memref.load %arg2[%c6_1069, %c11_1070] : memref<8x27xf32, #tpu.memory_space<smem>>
    %c0_1071 = arith.constant 0 : index
    %c1_1072 = arith.constant 1 : index
    %c0_1073 = arith.constant 0 : index
    %c2_1074 = arith.constant 2 : index
    %1153 = vector.load %arg1[%c0_1071, %c1_1072, %c0_1073, %c2_1074] : memref<1x3x16x16xf32, #tpu.memory_space<vmem>>, vector<1x1x14x14xf32>
    %1154 = vector.shape_cast %1153 : vector<1x1x14x14xf32> to vector<14x14xf32>
    %1155 = vector.broadcast %1152 : f32 to vector<14x14xf32>
    %1156 = arith.mulf %1154, %1155 : vector<14x14xf32>
    %1157 = arith.addf %1151, %1156 : vector<14x14xf32>
    %c6_1075 = arith.constant 6 : index
    %c12_1076 = arith.constant 12 : index
    %1158 = memref.load %arg2[%c6_1075, %c12_1076] : memref<8x27xf32, #tpu.memory_space<smem>>
    %c0_1077 = arith.constant 0 : index
    %c1_1078 = arith.constant 1 : index
    %c1_1079 = arith.constant 1 : index
    %c0_1080 = arith.constant 0 : index
    %1159 = vector.load %arg1[%c0_1077, %c1_1078, %c1_1079, %c0_1080] : memref<1x3x16x16xf32, #tpu.memory_space<vmem>>, vector<1x1x14x14xf32>
    %1160 = vector.shape_cast %1159 : vector<1x1x14x14xf32> to vector<14x14xf32>
    %1161 = vector.broadcast %1158 : f32 to vector<14x14xf32>
    %1162 = arith.mulf %1160, %1161 : vector<14x14xf32>
    %1163 = arith.addf %1157, %1162 : vector<14x14xf32>
    %c6_1081 = arith.constant 6 : index
    %c13_1082 = arith.constant 13 : index
    %1164 = memref.load %arg2[%c6_1081, %c13_1082] : memref<8x27xf32, #tpu.memory_space<smem>>
    %c0_1083 = arith.constant 0 : index
    %c1_1084 = arith.constant 1 : index
    %c1_1085 = arith.constant 1 : index
    %c1_1086 = arith.constant 1 : index
    %1165 = vector.load %arg1[%c0_1083, %c1_1084, %c1_1085, %c1_1086] : memref<1x3x16x16xf32, #tpu.memory_space<vmem>>, vector<1x1x14x14xf32>
    %1166 = vector.shape_cast %1165 : vector<1x1x14x14xf32> to vector<14x14xf32>
    %1167 = vector.broadcast %1164 : f32 to vector<14x14xf32>
    %1168 = arith.mulf %1166, %1167 : vector<14x14xf32>
    %1169 = arith.addf %1163, %1168 : vector<14x14xf32>
    %c6_1087 = arith.constant 6 : index
    %c14_1088 = arith.constant 14 : index
    %1170 = memref.load %arg2[%c6_1087, %c14_1088] : memref<8x27xf32, #tpu.memory_space<smem>>
    %c0_1089 = arith.constant 0 : index
    %c1_1090 = arith.constant 1 : index
    %c1_1091 = arith.constant 1 : index
    %c2_1092 = arith.constant 2 : index
    %1171 = vector.load %arg1[%c0_1089, %c1_1090, %c1_1091, %c2_1092] : memref<1x3x16x16xf32, #tpu.memory_space<vmem>>, vector<1x1x14x14xf32>
    %1172 = vector.shape_cast %1171 : vector<1x1x14x14xf32> to vector<14x14xf32>
    %1173 = vector.broadcast %1170 : f32 to vector<14x14xf32>
    %1174 = arith.mulf %1172, %1173 : vector<14x14xf32>
    %1175 = arith.addf %1169, %1174 : vector<14x14xf32>
    %c6_1093 = arith.constant 6 : index
    %c15_1094 = arith.constant 15 : index
    %1176 = memref.load %arg2[%c6_1093, %c15_1094] : memref<8x27xf32, #tpu.memory_space<smem>>
    %c0_1095 = arith.constant 0 : index
    %c1_1096 = arith.constant 1 : index
    %c2_1097 = arith.constant 2 : index
    %c0_1098 = arith.constant 0 : index
    %1177 = vector.load %arg1[%c0_1095, %c1_1096, %c2_1097, %c0_1098] : memref<1x3x16x16xf32, #tpu.memory_space<vmem>>, vector<1x1x14x14xf32>
    %1178 = vector.shape_cast %1177 : vector<1x1x14x14xf32> to vector<14x14xf32>
    %1179 = vector.broadcast %1176 : f32 to vector<14x14xf32>
    %1180 = arith.mulf %1178, %1179 : vector<14x14xf32>
    %1181 = arith.addf %1175, %1180 : vector<14x14xf32>
    %c6_1099 = arith.constant 6 : index
    %c16_1100 = arith.constant 16 : index
    %1182 = memref.load %arg2[%c6_1099, %c16_1100] : memref<8x27xf32, #tpu.memory_space<smem>>
    %c0_1101 = arith.constant 0 : index
    %c1_1102 = arith.constant 1 : index
    %c2_1103 = arith.constant 2 : index
    %c1_1104 = arith.constant 1 : index
    %1183 = vector.load %arg1[%c0_1101, %c1_1102, %c2_1103, %c1_1104] : memref<1x3x16x16xf32, #tpu.memory_space<vmem>>, vector<1x1x14x14xf32>
    %1184 = vector.shape_cast %1183 : vector<1x1x14x14xf32> to vector<14x14xf32>
    %1185 = vector.broadcast %1182 : f32 to vector<14x14xf32>
    %1186 = arith.mulf %1184, %1185 : vector<14x14xf32>
    %1187 = arith.addf %1181, %1186 : vector<14x14xf32>
    %c6_1105 = arith.constant 6 : index
    %c17_1106 = arith.constant 17 : index
    %1188 = memref.load %arg2[%c6_1105, %c17_1106] : memref<8x27xf32, #tpu.memory_space<smem>>
    %c0_1107 = arith.constant 0 : index
    %c1_1108 = arith.constant 1 : index
    %c2_1109 = arith.constant 2 : index
    %c2_1110 = arith.constant 2 : index
    %1189 = vector.load %arg1[%c0_1107, %c1_1108, %c2_1109, %c2_1110] : memref<1x3x16x16xf32, #tpu.memory_space<vmem>>, vector<1x1x14x14xf32>
    %1190 = vector.shape_cast %1189 : vector<1x1x14x14xf32> to vector<14x14xf32>
    %1191 = vector.broadcast %1188 : f32 to vector<14x14xf32>
    %1192 = arith.mulf %1190, %1191 : vector<14x14xf32>
    %1193 = arith.addf %1187, %1192 : vector<14x14xf32>
    %c6_1111 = arith.constant 6 : index
    %c18_1112 = arith.constant 18 : index
    %1194 = memref.load %arg2[%c6_1111, %c18_1112] : memref<8x27xf32, #tpu.memory_space<smem>>
    %c0_1113 = arith.constant 0 : index
    %c2_1114 = arith.constant 2 : index
    %c0_1115 = arith.constant 0 : index
    %c0_1116 = arith.constant 0 : index
    %1195 = vector.load %arg1[%c0_1113, %c2_1114, %c0_1115, %c0_1116] : memref<1x3x16x16xf32, #tpu.memory_space<vmem>>, vector<1x1x14x14xf32>
    %1196 = vector.shape_cast %1195 : vector<1x1x14x14xf32> to vector<14x14xf32>
    %1197 = vector.broadcast %1194 : f32 to vector<14x14xf32>
    %1198 = arith.mulf %1196, %1197 : vector<14x14xf32>
    %1199 = arith.addf %1193, %1198 : vector<14x14xf32>
    %c6_1117 = arith.constant 6 : index
    %c19_1118 = arith.constant 19 : index
    %1200 = memref.load %arg2[%c6_1117, %c19_1118] : memref<8x27xf32, #tpu.memory_space<smem>>
    %c0_1119 = arith.constant 0 : index
    %c2_1120 = arith.constant 2 : index
    %c0_1121 = arith.constant 0 : index
    %c1_1122 = arith.constant 1 : index
    %1201 = vector.load %arg1[%c0_1119, %c2_1120, %c0_1121, %c1_1122] : memref<1x3x16x16xf32, #tpu.memory_space<vmem>>, vector<1x1x14x14xf32>
    %1202 = vector.shape_cast %1201 : vector<1x1x14x14xf32> to vector<14x14xf32>
    %1203 = vector.broadcast %1200 : f32 to vector<14x14xf32>
    %1204 = arith.mulf %1202, %1203 : vector<14x14xf32>
    %1205 = arith.addf %1199, %1204 : vector<14x14xf32>
    %c6_1123 = arith.constant 6 : index
    %c20_1124 = arith.constant 20 : index
    %1206 = memref.load %arg2[%c6_1123, %c20_1124] : memref<8x27xf32, #tpu.memory_space<smem>>
    %c0_1125 = arith.constant 0 : index
    %c2_1126 = arith.constant 2 : index
    %c0_1127 = arith.constant 0 : index
    %c2_1128 = arith.constant 2 : index
    %1207 = vector.load %arg1[%c0_1125, %c2_1126, %c0_1127, %c2_1128] : memref<1x3x16x16xf32, #tpu.memory_space<vmem>>, vector<1x1x14x14xf32>
    %1208 = vector.shape_cast %1207 : vector<1x1x14x14xf32> to vector<14x14xf32>
    %1209 = vector.broadcast %1206 : f32 to vector<14x14xf32>
    %1210 = arith.mulf %1208, %1209 : vector<14x14xf32>
    %1211 = arith.addf %1205, %1210 : vector<14x14xf32>
    %c6_1129 = arith.constant 6 : index
    %c21_1130 = arith.constant 21 : index
    %1212 = memref.load %arg2[%c6_1129, %c21_1130] : memref<8x27xf32, #tpu.memory_space<smem>>
    %c0_1131 = arith.constant 0 : index
    %c2_1132 = arith.constant 2 : index
    %c1_1133 = arith.constant 1 : index
    %c0_1134 = arith.constant 0 : index
    %1213 = vector.load %arg1[%c0_1131, %c2_1132, %c1_1133, %c0_1134] : memref<1x3x16x16xf32, #tpu.memory_space<vmem>>, vector<1x1x14x14xf32>
    %1214 = vector.shape_cast %1213 : vector<1x1x14x14xf32> to vector<14x14xf32>
    %1215 = vector.broadcast %1212 : f32 to vector<14x14xf32>
    %1216 = arith.mulf %1214, %1215 : vector<14x14xf32>
    %1217 = arith.addf %1211, %1216 : vector<14x14xf32>
    %c6_1135 = arith.constant 6 : index
    %c22_1136 = arith.constant 22 : index
    %1218 = memref.load %arg2[%c6_1135, %c22_1136] : memref<8x27xf32, #tpu.memory_space<smem>>
    %c0_1137 = arith.constant 0 : index
    %c2_1138 = arith.constant 2 : index
    %c1_1139 = arith.constant 1 : index
    %c1_1140 = arith.constant 1 : index
    %1219 = vector.load %arg1[%c0_1137, %c2_1138, %c1_1139, %c1_1140] : memref<1x3x16x16xf32, #tpu.memory_space<vmem>>, vector<1x1x14x14xf32>
    %1220 = vector.shape_cast %1219 : vector<1x1x14x14xf32> to vector<14x14xf32>
    %1221 = vector.broadcast %1218 : f32 to vector<14x14xf32>
    %1222 = arith.mulf %1220, %1221 : vector<14x14xf32>
    %1223 = arith.addf %1217, %1222 : vector<14x14xf32>
    %c6_1141 = arith.constant 6 : index
    %c23_1142 = arith.constant 23 : index
    %1224 = memref.load %arg2[%c6_1141, %c23_1142] : memref<8x27xf32, #tpu.memory_space<smem>>
    %c0_1143 = arith.constant 0 : index
    %c2_1144 = arith.constant 2 : index
    %c1_1145 = arith.constant 1 : index
    %c2_1146 = arith.constant 2 : index
    %1225 = vector.load %arg1[%c0_1143, %c2_1144, %c1_1145, %c2_1146] : memref<1x3x16x16xf32, #tpu.memory_space<vmem>>, vector<1x1x14x14xf32>
    %1226 = vector.shape_cast %1225 : vector<1x1x14x14xf32> to vector<14x14xf32>
    %1227 = vector.broadcast %1224 : f32 to vector<14x14xf32>
    %1228 = arith.mulf %1226, %1227 : vector<14x14xf32>
    %1229 = arith.addf %1223, %1228 : vector<14x14xf32>
    %c6_1147 = arith.constant 6 : index
    %c24_1148 = arith.constant 24 : index
    %1230 = memref.load %arg2[%c6_1147, %c24_1148] : memref<8x27xf32, #tpu.memory_space<smem>>
    %c0_1149 = arith.constant 0 : index
    %c2_1150 = arith.constant 2 : index
    %c2_1151 = arith.constant 2 : index
    %c0_1152 = arith.constant 0 : index
    %1231 = vector.load %arg1[%c0_1149, %c2_1150, %c2_1151, %c0_1152] : memref<1x3x16x16xf32, #tpu.memory_space<vmem>>, vector<1x1x14x14xf32>
    %1232 = vector.shape_cast %1231 : vector<1x1x14x14xf32> to vector<14x14xf32>
    %1233 = vector.broadcast %1230 : f32 to vector<14x14xf32>
    %1234 = arith.mulf %1232, %1233 : vector<14x14xf32>
    %1235 = arith.addf %1229, %1234 : vector<14x14xf32>
    %c6_1153 = arith.constant 6 : index
    %c25_1154 = arith.constant 25 : index
    %1236 = memref.load %arg2[%c6_1153, %c25_1154] : memref<8x27xf32, #tpu.memory_space<smem>>
    %c0_1155 = arith.constant 0 : index
    %c2_1156 = arith.constant 2 : index
    %c2_1157 = arith.constant 2 : index
    %c1_1158 = arith.constant 1 : index
    %1237 = vector.load %arg1[%c0_1155, %c2_1156, %c2_1157, %c1_1158] : memref<1x3x16x16xf32, #tpu.memory_space<vmem>>, vector<1x1x14x14xf32>
    %1238 = vector.shape_cast %1237 : vector<1x1x14x14xf32> to vector<14x14xf32>
    %1239 = vector.broadcast %1236 : f32 to vector<14x14xf32>
    %1240 = arith.mulf %1238, %1239 : vector<14x14xf32>
    %1241 = arith.addf %1235, %1240 : vector<14x14xf32>
    %c6_1159 = arith.constant 6 : index
    %c26_1160 = arith.constant 26 : index
    %1242 = memref.load %arg2[%c6_1159, %c26_1160] : memref<8x27xf32, #tpu.memory_space<smem>>
    %c0_1161 = arith.constant 0 : index
    %c2_1162 = arith.constant 2 : index
    %c2_1163 = arith.constant 2 : index
    %c2_1164 = arith.constant 2 : index
    %1243 = vector.load %arg1[%c0_1161, %c2_1162, %c2_1163, %c2_1164] : memref<1x3x16x16xf32, #tpu.memory_space<vmem>>, vector<1x1x14x14xf32>
    %1244 = vector.shape_cast %1243 : vector<1x1x14x14xf32> to vector<14x14xf32>
    %1245 = vector.broadcast %1242 : f32 to vector<14x14xf32>
    %1246 = arith.mulf %1244, %1245 : vector<14x14xf32>
    %1247 = arith.addf %1241, %1246 : vector<14x14xf32>
    %cst_1165 = arith.constant 0.000000e+00 : f32
    %1248 = vector.broadcast %cst_1165 : f32 to vector<14x14xf32>
    %1249 = arith.maximumf %1247, %1248 : vector<14x14xf32>
    %cst_1166 = arith.constant dense<0.000000e+00> : vector<14xf32>
    %1250 = vector.multi_reduction <add>, %1249, %cst_1166 [1] : vector<14x14xf32> to vector<14xf32>
    %1251 = vector.shape_cast %1250 : vector<14xf32> to vector<14x1xf32>
    %cst_1167 = arith.constant dense<0.000000e+00> : vector<1xf32>
    %1252 = vector.multi_reduction <add>, %1251, %cst_1167 [0] : vector<14x1xf32> to vector<1xf32>
    %1253 = vector.shape_cast %1252 : vector<1xf32> to vector<1x1xf32>
    %1254 = arith.addf %1081, %1253 : vector<1x1xf32>
    %c6_1168 = arith.constant 6 : index
    %c0_1169 = arith.constant 0 : index
    %1255 = vector.load %arg4[%c6_1168, %c0_1169] : memref<8x128xf32, #tpu.memory_space<vmem>>, vector<1x128xf32>
    %cst_1170 = arith.constant 0.00510204071 : f32
    %1256 = vector.broadcast %cst_1170 : f32 to vector<1x1xf32>
    %1257 = arith.mulf %1254, %1256 : vector<1x1xf32>
    %1258 = vector.broadcast %1257 : vector<1x1xf32> to vector<1x128xf32>
    %1259 = arith.mulf %1255, %1258 : vector<1x128xf32>
    %1260 = arith.addf %1080, %1259 : vector<1x128xf32>
    %cst_1171 = arith.constant 0.000000e+00 : f32
    %1261 = vector.broadcast %cst_1171 : f32 to vector<1x1xf32>
    %cst_1172 = arith.constant 0.000000e+00 : f32
    %1262 = vector.broadcast %cst_1172 : f32 to vector<14x14xf32>
    %c7_1173 = arith.constant 7 : index
    %1263 = memref.load %arg3[%c7_1173] : memref<8xf32, #tpu.memory_space<smem>>
    %1264 = vector.broadcast %1263 : f32 to vector<14x14xf32>
    %1265 = arith.addf %1262, %1264 : vector<14x14xf32>
    %c7_1174 = arith.constant 7 : index
    %c0_1175 = arith.constant 0 : index
    %1266 = memref.load %arg2[%c7_1174, %c0_1175] : memref<8x27xf32, #tpu.memory_space<smem>>
    %c0_1176 = arith.constant 0 : index
    %c0_1177 = arith.constant 0 : index
    %c0_1178 = arith.constant 0 : index
    %c0_1179 = arith.constant 0 : index
    %1267 = vector.load %arg1[%c0_1176, %c0_1177, %c0_1178, %c0_1179] : memref<1x3x16x16xf32, #tpu.memory_space<vmem>>, vector<1x1x14x14xf32>
    %1268 = vector.shape_cast %1267 : vector<1x1x14x14xf32> to vector<14x14xf32>
    %1269 = vector.broadcast %1266 : f32 to vector<14x14xf32>
    %1270 = arith.mulf %1268, %1269 : vector<14x14xf32>
    %1271 = arith.addf %1265, %1270 : vector<14x14xf32>
    %c7_1180 = arith.constant 7 : index
    %c1_1181 = arith.constant 1 : index
    %1272 = memref.load %arg2[%c7_1180, %c1_1181] : memref<8x27xf32, #tpu.memory_space<smem>>
    %c0_1182 = arith.constant 0 : index
    %c0_1183 = arith.constant 0 : index
    %c0_1184 = arith.constant 0 : index
    %c1_1185 = arith.constant 1 : index
    %1273 = vector.load %arg1[%c0_1182, %c0_1183, %c0_1184, %c1_1185] : memref<1x3x16x16xf32, #tpu.memory_space<vmem>>, vector<1x1x14x14xf32>
    %1274 = vector.shape_cast %1273 : vector<1x1x14x14xf32> to vector<14x14xf32>
    %1275 = vector.broadcast %1272 : f32 to vector<14x14xf32>
    %1276 = arith.mulf %1274, %1275 : vector<14x14xf32>
    %1277 = arith.addf %1271, %1276 : vector<14x14xf32>
    %c7_1186 = arith.constant 7 : index
    %c2_1187 = arith.constant 2 : index
    %1278 = memref.load %arg2[%c7_1186, %c2_1187] : memref<8x27xf32, #tpu.memory_space<smem>>
    %c0_1188 = arith.constant 0 : index
    %c0_1189 = arith.constant 0 : index
    %c0_1190 = arith.constant 0 : index
    %c2_1191 = arith.constant 2 : index
    %1279 = vector.load %arg1[%c0_1188, %c0_1189, %c0_1190, %c2_1191] : memref<1x3x16x16xf32, #tpu.memory_space<vmem>>, vector<1x1x14x14xf32>
    %1280 = vector.shape_cast %1279 : vector<1x1x14x14xf32> to vector<14x14xf32>
    %1281 = vector.broadcast %1278 : f32 to vector<14x14xf32>
    %1282 = arith.mulf %1280, %1281 : vector<14x14xf32>
    %1283 = arith.addf %1277, %1282 : vector<14x14xf32>
    %c7_1192 = arith.constant 7 : index
    %c3_1193 = arith.constant 3 : index
    %1284 = memref.load %arg2[%c7_1192, %c3_1193] : memref<8x27xf32, #tpu.memory_space<smem>>
    %c0_1194 = arith.constant 0 : index
    %c0_1195 = arith.constant 0 : index
    %c1_1196 = arith.constant 1 : index
    %c0_1197 = arith.constant 0 : index
    %1285 = vector.load %arg1[%c0_1194, %c0_1195, %c1_1196, %c0_1197] : memref<1x3x16x16xf32, #tpu.memory_space<vmem>>, vector<1x1x14x14xf32>
    %1286 = vector.shape_cast %1285 : vector<1x1x14x14xf32> to vector<14x14xf32>
    %1287 = vector.broadcast %1284 : f32 to vector<14x14xf32>
    %1288 = arith.mulf %1286, %1287 : vector<14x14xf32>
    %1289 = arith.addf %1283, %1288 : vector<14x14xf32>
    %c7_1198 = arith.constant 7 : index
    %c4_1199 = arith.constant 4 : index
    %1290 = memref.load %arg2[%c7_1198, %c4_1199] : memref<8x27xf32, #tpu.memory_space<smem>>
    %c0_1200 = arith.constant 0 : index
    %c0_1201 = arith.constant 0 : index
    %c1_1202 = arith.constant 1 : index
    %c1_1203 = arith.constant 1 : index
    %1291 = vector.load %arg1[%c0_1200, %c0_1201, %c1_1202, %c1_1203] : memref<1x3x16x16xf32, #tpu.memory_space<vmem>>, vector<1x1x14x14xf32>
    %1292 = vector.shape_cast %1291 : vector<1x1x14x14xf32> to vector<14x14xf32>
    %1293 = vector.broadcast %1290 : f32 to vector<14x14xf32>
    %1294 = arith.mulf %1292, %1293 : vector<14x14xf32>
    %1295 = arith.addf %1289, %1294 : vector<14x14xf32>
    %c7_1204 = arith.constant 7 : index
    %c5_1205 = arith.constant 5 : index
    %1296 = memref.load %arg2[%c7_1204, %c5_1205] : memref<8x27xf32, #tpu.memory_space<smem>>
    %c0_1206 = arith.constant 0 : index
    %c0_1207 = arith.constant 0 : index
    %c1_1208 = arith.constant 1 : index
    %c2_1209 = arith.constant 2 : index
    %1297 = vector.load %arg1[%c0_1206, %c0_1207, %c1_1208, %c2_1209] : memref<1x3x16x16xf32, #tpu.memory_space<vmem>>, vector<1x1x14x14xf32>
    %1298 = vector.shape_cast %1297 : vector<1x1x14x14xf32> to vector<14x14xf32>
    %1299 = vector.broadcast %1296 : f32 to vector<14x14xf32>
    %1300 = arith.mulf %1298, %1299 : vector<14x14xf32>
    %1301 = arith.addf %1295, %1300 : vector<14x14xf32>
    %c7_1210 = arith.constant 7 : index
    %c6_1211 = arith.constant 6 : index
    %1302 = memref.load %arg2[%c7_1210, %c6_1211] : memref<8x27xf32, #tpu.memory_space<smem>>
    %c0_1212 = arith.constant 0 : index
    %c0_1213 = arith.constant 0 : index
    %c2_1214 = arith.constant 2 : index
    %c0_1215 = arith.constant 0 : index
    %1303 = vector.load %arg1[%c0_1212, %c0_1213, %c2_1214, %c0_1215] : memref<1x3x16x16xf32, #tpu.memory_space<vmem>>, vector<1x1x14x14xf32>
    %1304 = vector.shape_cast %1303 : vector<1x1x14x14xf32> to vector<14x14xf32>
    %1305 = vector.broadcast %1302 : f32 to vector<14x14xf32>
    %1306 = arith.mulf %1304, %1305 : vector<14x14xf32>
    %1307 = arith.addf %1301, %1306 : vector<14x14xf32>
    %c7_1216 = arith.constant 7 : index
    %c7_1217 = arith.constant 7 : index
    %1308 = memref.load %arg2[%c7_1216, %c7_1217] : memref<8x27xf32, #tpu.memory_space<smem>>
    %c0_1218 = arith.constant 0 : index
    %c0_1219 = arith.constant 0 : index
    %c2_1220 = arith.constant 2 : index
    %c1_1221 = arith.constant 1 : index
    %1309 = vector.load %arg1[%c0_1218, %c0_1219, %c2_1220, %c1_1221] : memref<1x3x16x16xf32, #tpu.memory_space<vmem>>, vector<1x1x14x14xf32>
    %1310 = vector.shape_cast %1309 : vector<1x1x14x14xf32> to vector<14x14xf32>
    %1311 = vector.broadcast %1308 : f32 to vector<14x14xf32>
    %1312 = arith.mulf %1310, %1311 : vector<14x14xf32>
    %1313 = arith.addf %1307, %1312 : vector<14x14xf32>
    %c7_1222 = arith.constant 7 : index
    %c8_1223 = arith.constant 8 : index
    %1314 = memref.load %arg2[%c7_1222, %c8_1223] : memref<8x27xf32, #tpu.memory_space<smem>>
    %c0_1224 = arith.constant 0 : index
    %c0_1225 = arith.constant 0 : index
    %c2_1226 = arith.constant 2 : index
    %c2_1227 = arith.constant 2 : index
    %1315 = vector.load %arg1[%c0_1224, %c0_1225, %c2_1226, %c2_1227] : memref<1x3x16x16xf32, #tpu.memory_space<vmem>>, vector<1x1x14x14xf32>
    %1316 = vector.shape_cast %1315 : vector<1x1x14x14xf32> to vector<14x14xf32>
    %1317 = vector.broadcast %1314 : f32 to vector<14x14xf32>
    %1318 = arith.mulf %1316, %1317 : vector<14x14xf32>
    %1319 = arith.addf %1313, %1318 : vector<14x14xf32>
    %c7_1228 = arith.constant 7 : index
    %c9_1229 = arith.constant 9 : index
    %1320 = memref.load %arg2[%c7_1228, %c9_1229] : memref<8x27xf32, #tpu.memory_space<smem>>
    %c0_1230 = arith.constant 0 : index
    %c1_1231 = arith.constant 1 : index
    %c0_1232 = arith.constant 0 : index
    %c0_1233 = arith.constant 0 : index
    %1321 = vector.load %arg1[%c0_1230, %c1_1231, %c0_1232, %c0_1233] : memref<1x3x16x16xf32, #tpu.memory_space<vmem>>, vector<1x1x14x14xf32>
    %1322 = vector.shape_cast %1321 : vector<1x1x14x14xf32> to vector<14x14xf32>
    %1323 = vector.broadcast %1320 : f32 to vector<14x14xf32>
    %1324 = arith.mulf %1322, %1323 : vector<14x14xf32>
    %1325 = arith.addf %1319, %1324 : vector<14x14xf32>
    %c7_1234 = arith.constant 7 : index
    %c10_1235 = arith.constant 10 : index
    %1326 = memref.load %arg2[%c7_1234, %c10_1235] : memref<8x27xf32, #tpu.memory_space<smem>>
    %c0_1236 = arith.constant 0 : index
    %c1_1237 = arith.constant 1 : index
    %c0_1238 = arith.constant 0 : index
    %c1_1239 = arith.constant 1 : index
    %1327 = vector.load %arg1[%c0_1236, %c1_1237, %c0_1238, %c1_1239] : memref<1x3x16x16xf32, #tpu.memory_space<vmem>>, vector<1x1x14x14xf32>
    %1328 = vector.shape_cast %1327 : vector<1x1x14x14xf32> to vector<14x14xf32>
    %1329 = vector.broadcast %1326 : f32 to vector<14x14xf32>
    %1330 = arith.mulf %1328, %1329 : vector<14x14xf32>
    %1331 = arith.addf %1325, %1330 : vector<14x14xf32>
    %c7_1240 = arith.constant 7 : index
    %c11_1241 = arith.constant 11 : index
    %1332 = memref.load %arg2[%c7_1240, %c11_1241] : memref<8x27xf32, #tpu.memory_space<smem>>
    %c0_1242 = arith.constant 0 : index
    %c1_1243 = arith.constant 1 : index
    %c0_1244 = arith.constant 0 : index
    %c2_1245 = arith.constant 2 : index
    %1333 = vector.load %arg1[%c0_1242, %c1_1243, %c0_1244, %c2_1245] : memref<1x3x16x16xf32, #tpu.memory_space<vmem>>, vector<1x1x14x14xf32>
    %1334 = vector.shape_cast %1333 : vector<1x1x14x14xf32> to vector<14x14xf32>
    %1335 = vector.broadcast %1332 : f32 to vector<14x14xf32>
    %1336 = arith.mulf %1334, %1335 : vector<14x14xf32>
    %1337 = arith.addf %1331, %1336 : vector<14x14xf32>
    %c7_1246 = arith.constant 7 : index
    %c12_1247 = arith.constant 12 : index
    %1338 = memref.load %arg2[%c7_1246, %c12_1247] : memref<8x27xf32, #tpu.memory_space<smem>>
    %c0_1248 = arith.constant 0 : index
    %c1_1249 = arith.constant 1 : index
    %c1_1250 = arith.constant 1 : index
    %c0_1251 = arith.constant 0 : index
    %1339 = vector.load %arg1[%c0_1248, %c1_1249, %c1_1250, %c0_1251] : memref<1x3x16x16xf32, #tpu.memory_space<vmem>>, vector<1x1x14x14xf32>
    %1340 = vector.shape_cast %1339 : vector<1x1x14x14xf32> to vector<14x14xf32>
    %1341 = vector.broadcast %1338 : f32 to vector<14x14xf32>
    %1342 = arith.mulf %1340, %1341 : vector<14x14xf32>
    %1343 = arith.addf %1337, %1342 : vector<14x14xf32>
    %c7_1252 = arith.constant 7 : index
    %c13_1253 = arith.constant 13 : index
    %1344 = memref.load %arg2[%c7_1252, %c13_1253] : memref<8x27xf32, #tpu.memory_space<smem>>
    %c0_1254 = arith.constant 0 : index
    %c1_1255 = arith.constant 1 : index
    %c1_1256 = arith.constant 1 : index
    %c1_1257 = arith.constant 1 : index
    %1345 = vector.load %arg1[%c0_1254, %c1_1255, %c1_1256, %c1_1257] : memref<1x3x16x16xf32, #tpu.memory_space<vmem>>, vector<1x1x14x14xf32>
    %1346 = vector.shape_cast %1345 : vector<1x1x14x14xf32> to vector<14x14xf32>
    %1347 = vector.broadcast %1344 : f32 to vector<14x14xf32>
    %1348 = arith.mulf %1346, %1347 : vector<14x14xf32>
    %1349 = arith.addf %1343, %1348 : vector<14x14xf32>
    %c7_1258 = arith.constant 7 : index
    %c14_1259 = arith.constant 14 : index
    %1350 = memref.load %arg2[%c7_1258, %c14_1259] : memref<8x27xf32, #tpu.memory_space<smem>>
    %c0_1260 = arith.constant 0 : index
    %c1_1261 = arith.constant 1 : index
    %c1_1262 = arith.constant 1 : index
    %c2_1263 = arith.constant 2 : index
    %1351 = vector.load %arg1[%c0_1260, %c1_1261, %c1_1262, %c2_1263] : memref<1x3x16x16xf32, #tpu.memory_space<vmem>>, vector<1x1x14x14xf32>
    %1352 = vector.shape_cast %1351 : vector<1x1x14x14xf32> to vector<14x14xf32>
    %1353 = vector.broadcast %1350 : f32 to vector<14x14xf32>
    %1354 = arith.mulf %1352, %1353 : vector<14x14xf32>
    %1355 = arith.addf %1349, %1354 : vector<14x14xf32>
    %c7_1264 = arith.constant 7 : index
    %c15_1265 = arith.constant 15 : index
    %1356 = memref.load %arg2[%c7_1264, %c15_1265] : memref<8x27xf32, #tpu.memory_space<smem>>
    %c0_1266 = arith.constant 0 : index
    %c1_1267 = arith.constant 1 : index
    %c2_1268 = arith.constant 2 : index
    %c0_1269 = arith.constant 0 : index
    %1357 = vector.load %arg1[%c0_1266, %c1_1267, %c2_1268, %c0_1269] : memref<1x3x16x16xf32, #tpu.memory_space<vmem>>, vector<1x1x14x14xf32>
    %1358 = vector.shape_cast %1357 : vector<1x1x14x14xf32> to vector<14x14xf32>
    %1359 = vector.broadcast %1356 : f32 to vector<14x14xf32>
    %1360 = arith.mulf %1358, %1359 : vector<14x14xf32>
    %1361 = arith.addf %1355, %1360 : vector<14x14xf32>
    %c7_1270 = arith.constant 7 : index
    %c16_1271 = arith.constant 16 : index
    %1362 = memref.load %arg2[%c7_1270, %c16_1271] : memref<8x27xf32, #tpu.memory_space<smem>>
    %c0_1272 = arith.constant 0 : index
    %c1_1273 = arith.constant 1 : index
    %c2_1274 = arith.constant 2 : index
    %c1_1275 = arith.constant 1 : index
    %1363 = vector.load %arg1[%c0_1272, %c1_1273, %c2_1274, %c1_1275] : memref<1x3x16x16xf32, #tpu.memory_space<vmem>>, vector<1x1x14x14xf32>
    %1364 = vector.shape_cast %1363 : vector<1x1x14x14xf32> to vector<14x14xf32>
    %1365 = vector.broadcast %1362 : f32 to vector<14x14xf32>
    %1366 = arith.mulf %1364, %1365 : vector<14x14xf32>
    %1367 = arith.addf %1361, %1366 : vector<14x14xf32>
    %c7_1276 = arith.constant 7 : index
    %c17_1277 = arith.constant 17 : index
    %1368 = memref.load %arg2[%c7_1276, %c17_1277] : memref<8x27xf32, #tpu.memory_space<smem>>
    %c0_1278 = arith.constant 0 : index
    %c1_1279 = arith.constant 1 : index
    %c2_1280 = arith.constant 2 : index
    %c2_1281 = arith.constant 2 : index
    %1369 = vector.load %arg1[%c0_1278, %c1_1279, %c2_1280, %c2_1281] : memref<1x3x16x16xf32, #tpu.memory_space<vmem>>, vector<1x1x14x14xf32>
    %1370 = vector.shape_cast %1369 : vector<1x1x14x14xf32> to vector<14x14xf32>
    %1371 = vector.broadcast %1368 : f32 to vector<14x14xf32>
    %1372 = arith.mulf %1370, %1371 : vector<14x14xf32>
    %1373 = arith.addf %1367, %1372 : vector<14x14xf32>
    %c7_1282 = arith.constant 7 : index
    %c18_1283 = arith.constant 18 : index
    %1374 = memref.load %arg2[%c7_1282, %c18_1283] : memref<8x27xf32, #tpu.memory_space<smem>>
    %c0_1284 = arith.constant 0 : index
    %c2_1285 = arith.constant 2 : index
    %c0_1286 = arith.constant 0 : index
    %c0_1287 = arith.constant 0 : index
    %1375 = vector.load %arg1[%c0_1284, %c2_1285, %c0_1286, %c0_1287] : memref<1x3x16x16xf32, #tpu.memory_space<vmem>>, vector<1x1x14x14xf32>
    %1376 = vector.shape_cast %1375 : vector<1x1x14x14xf32> to vector<14x14xf32>
    %1377 = vector.broadcast %1374 : f32 to vector<14x14xf32>
    %1378 = arith.mulf %1376, %1377 : vector<14x14xf32>
    %1379 = arith.addf %1373, %1378 : vector<14x14xf32>
    %c7_1288 = arith.constant 7 : index
    %c19_1289 = arith.constant 19 : index
    %1380 = memref.load %arg2[%c7_1288, %c19_1289] : memref<8x27xf32, #tpu.memory_space<smem>>
    %c0_1290 = arith.constant 0 : index
    %c2_1291 = arith.constant 2 : index
    %c0_1292 = arith.constant 0 : index
    %c1_1293 = arith.constant 1 : index
    %1381 = vector.load %arg1[%c0_1290, %c2_1291, %c0_1292, %c1_1293] : memref<1x3x16x16xf32, #tpu.memory_space<vmem>>, vector<1x1x14x14xf32>
    %1382 = vector.shape_cast %1381 : vector<1x1x14x14xf32> to vector<14x14xf32>
    %1383 = vector.broadcast %1380 : f32 to vector<14x14xf32>
    %1384 = arith.mulf %1382, %1383 : vector<14x14xf32>
    %1385 = arith.addf %1379, %1384 : vector<14x14xf32>
    %c7_1294 = arith.constant 7 : index
    %c20_1295 = arith.constant 20 : index
    %1386 = memref.load %arg2[%c7_1294, %c20_1295] : memref<8x27xf32, #tpu.memory_space<smem>>
    %c0_1296 = arith.constant 0 : index
    %c2_1297 = arith.constant 2 : index
    %c0_1298 = arith.constant 0 : index
    %c2_1299 = arith.constant 2 : index
    %1387 = vector.load %arg1[%c0_1296, %c2_1297, %c0_1298, %c2_1299] : memref<1x3x16x16xf32, #tpu.memory_space<vmem>>, vector<1x1x14x14xf32>
    %1388 = vector.shape_cast %1387 : vector<1x1x14x14xf32> to vector<14x14xf32>
    %1389 = vector.broadcast %1386 : f32 to vector<14x14xf32>
    %1390 = arith.mulf %1388, %1389 : vector<14x14xf32>
    %1391 = arith.addf %1385, %1390 : vector<14x14xf32>
    %c7_1300 = arith.constant 7 : index
    %c21_1301 = arith.constant 21 : index
    %1392 = memref.load %arg2[%c7_1300, %c21_1301] : memref<8x27xf32, #tpu.memory_space<smem>>
    %c0_1302 = arith.constant 0 : index
    %c2_1303 = arith.constant 2 : index
    %c1_1304 = arith.constant 1 : index
    %c0_1305 = arith.constant 0 : index
    %1393 = vector.load %arg1[%c0_1302, %c2_1303, %c1_1304, %c0_1305] : memref<1x3x16x16xf32, #tpu.memory_space<vmem>>, vector<1x1x14x14xf32>
    %1394 = vector.shape_cast %1393 : vector<1x1x14x14xf32> to vector<14x14xf32>
    %1395 = vector.broadcast %1392 : f32 to vector<14x14xf32>
    %1396 = arith.mulf %1394, %1395 : vector<14x14xf32>
    %1397 = arith.addf %1391, %1396 : vector<14x14xf32>
    %c7_1306 = arith.constant 7 : index
    %c22_1307 = arith.constant 22 : index
    %1398 = memref.load %arg2[%c7_1306, %c22_1307] : memref<8x27xf32, #tpu.memory_space<smem>>
    %c0_1308 = arith.constant 0 : index
    %c2_1309 = arith.constant 2 : index
    %c1_1310 = arith.constant 1 : index
    %c1_1311 = arith.constant 1 : index
    %1399 = vector.load %arg1[%c0_1308, %c2_1309, %c1_1310, %c1_1311] : memref<1x3x16x16xf32, #tpu.memory_space<vmem>>, vector<1x1x14x14xf32>
    %1400 = vector.shape_cast %1399 : vector<1x1x14x14xf32> to vector<14x14xf32>
    %1401 = vector.broadcast %1398 : f32 to vector<14x14xf32>
    %1402 = arith.mulf %1400, %1401 : vector<14x14xf32>
    %1403 = arith.addf %1397, %1402 : vector<14x14xf32>
    %c7_1312 = arith.constant 7 : index
    %c23_1313 = arith.constant 23 : index
    %1404 = memref.load %arg2[%c7_1312, %c23_1313] : memref<8x27xf32, #tpu.memory_space<smem>>
    %c0_1314 = arith.constant 0 : index
    %c2_1315 = arith.constant 2 : index
    %c1_1316 = arith.constant 1 : index
    %c2_1317 = arith.constant 2 : index
    %1405 = vector.load %arg1[%c0_1314, %c2_1315, %c1_1316, %c2_1317] : memref<1x3x16x16xf32, #tpu.memory_space<vmem>>, vector<1x1x14x14xf32>
    %1406 = vector.shape_cast %1405 : vector<1x1x14x14xf32> to vector<14x14xf32>
    %1407 = vector.broadcast %1404 : f32 to vector<14x14xf32>
    %1408 = arith.mulf %1406, %1407 : vector<14x14xf32>
    %1409 = arith.addf %1403, %1408 : vector<14x14xf32>
    %c7_1318 = arith.constant 7 : index
    %c24_1319 = arith.constant 24 : index
    %1410 = memref.load %arg2[%c7_1318, %c24_1319] : memref<8x27xf32, #tpu.memory_space<smem>>
    %c0_1320 = arith.constant 0 : index
    %c2_1321 = arith.constant 2 : index
    %c2_1322 = arith.constant 2 : index
    %c0_1323 = arith.constant 0 : index
    %1411 = vector.load %arg1[%c0_1320, %c2_1321, %c2_1322, %c0_1323] : memref<1x3x16x16xf32, #tpu.memory_space<vmem>>, vector<1x1x14x14xf32>
    %1412 = vector.shape_cast %1411 : vector<1x1x14x14xf32> to vector<14x14xf32>
    %1413 = vector.broadcast %1410 : f32 to vector<14x14xf32>
    %1414 = arith.mulf %1412, %1413 : vector<14x14xf32>
    %1415 = arith.addf %1409, %1414 : vector<14x14xf32>
    %c7_1324 = arith.constant 7 : index
    %c25_1325 = arith.constant 25 : index
    %1416 = memref.load %arg2[%c7_1324, %c25_1325] : memref<8x27xf32, #tpu.memory_space<smem>>
    %c0_1326 = arith.constant 0 : index
    %c2_1327 = arith.constant 2 : index
    %c2_1328 = arith.constant 2 : index
    %c1_1329 = arith.constant 1 : index
    %1417 = vector.load %arg1[%c0_1326, %c2_1327, %c2_1328, %c1_1329] : memref<1x3x16x16xf32, #tpu.memory_space<vmem>>, vector<1x1x14x14xf32>
    %1418 = vector.shape_cast %1417 : vector<1x1x14x14xf32> to vector<14x14xf32>
    %1419 = vector.broadcast %1416 : f32 to vector<14x14xf32>
    %1420 = arith.mulf %1418, %1419 : vector<14x14xf32>
    %1421 = arith.addf %1415, %1420 : vector<14x14xf32>
    %c7_1330 = arith.constant 7 : index
    %c26_1331 = arith.constant 26 : index
    %1422 = memref.load %arg2[%c7_1330, %c26_1331] : memref<8x27xf32, #tpu.memory_space<smem>>
    %c0_1332 = arith.constant 0 : index
    %c2_1333 = arith.constant 2 : index
    %c2_1334 = arith.constant 2 : index
    %c2_1335 = arith.constant 2 : index
    %1423 = vector.load %arg1[%c0_1332, %c2_1333, %c2_1334, %c2_1335] : memref<1x3x16x16xf32, #tpu.memory_space<vmem>>, vector<1x1x14x14xf32>
    %1424 = vector.shape_cast %1423 : vector<1x1x14x14xf32> to vector<14x14xf32>
    %1425 = vector.broadcast %1422 : f32 to vector<14x14xf32>
    %1426 = arith.mulf %1424, %1425 : vector<14x14xf32>
    %1427 = arith.addf %1421, %1426 : vector<14x14xf32>
    %cst_1336 = arith.constant 0.000000e+00 : f32
    %1428 = vector.broadcast %cst_1336 : f32 to vector<14x14xf32>
    %1429 = arith.maximumf %1427, %1428 : vector<14x14xf32>
    %cst_1337 = arith.constant dense<0.000000e+00> : vector<14xf32>
    %1430 = vector.multi_reduction <add>, %1429, %cst_1337 [1] : vector<14x14xf32> to vector<14xf32>
    %1431 = vector.shape_cast %1430 : vector<14xf32> to vector<14x1xf32>
    %cst_1338 = arith.constant dense<0.000000e+00> : vector<1xf32>
    %1432 = vector.multi_reduction <add>, %1431, %cst_1338 [0] : vector<14x1xf32> to vector<1xf32>
    %1433 = vector.shape_cast %1432 : vector<1xf32> to vector<1x1xf32>
    %1434 = arith.addf %1261, %1433 : vector<1x1xf32>
    %c7_1339 = arith.constant 7 : index
    %c0_1340 = arith.constant 0 : index
    %1435 = vector.load %arg4[%c7_1339, %c0_1340] : memref<8x128xf32, #tpu.memory_space<vmem>>, vector<1x128xf32>
    %cst_1341 = arith.constant 0.00510204071 : f32
    %1436 = vector.broadcast %cst_1341 : f32 to vector<1x1xf32>
    %1437 = arith.mulf %1434, %1436 : vector<1x1xf32>
    %1438 = vector.broadcast %1437 : vector<1x1xf32> to vector<1x128xf32>
    %1439 = arith.mulf %1435, %1438 : vector<1x128xf32>
    %1440 = arith.addf %1260, %1439 : vector<1x128xf32>
    %1441 = math.tanh %1440 : vector<1x128xf32>
    %c0_1342 = arith.constant 0 : index
    %c0_1343 = arith.constant 0 : index
    %c0_1344 = arith.constant 0 : index
    %1442 = vector.load %arg6[%c0_1342, %c0_1343, %c0_1344] : memref<1x1x128xf32, #tpu.memory_space<vmem>>, vector<1x1x128xf32>
    %1443 = vector.shape_cast %1442 : vector<1x1x128xf32> to vector<1x128xf32>
    %1444 = vector.shape_cast %1441 : vector<1x128xf32> to vector<1x1x128xf32>
    tpu.vector_store %arg6[%c0_1342, %c0_1343, %c0_1344], %1444 {strides = array<i32>} : memref<1x1x128xf32, #tpu.memory_space<vmem>>, vector<1x1x128xf32>,
    return
  }
  func.func @transform_0(%arg0: i32) -> (i32, i32, i32, i32) {
    %c0_i32 = arith.constant 0 : i32
    %c0_i32_0 = arith.constant 0 : i32
    %c0_i32_1 = arith.constant 0 : i32
    %c0_i32_2 = arith.constant 0 : i32
    return %arg0, %c0_i32, %c0_i32_0, %c0_i32_1 : i32, i32, i32, i32
  }
  func.func @transform_1(%arg0: i32) -> (i32, i32) {
    %c0_i32 = arith.constant 0 : i32
    %c0_i32_0 = arith.constant 0 : i32
    %c0_i32_1 = arith.constant 0 : i32
    return %c0_i32, %c0_i32_0 : i32, i32
  }
  func.func @transform_2(%arg0: i32) -> i32 {
    %c0_i32 = arith.constant 0 : i32
    %c0_i32_0 = arith.constant 0 : i32
    return %c0_i32 : i32
  }
  func.func @transform_3(%arg0: i32) -> (i32, i32) {
    %c0_i32 = arith.constant 0 : i32
    %c0_i32_0 = arith.constant 0 : i32
    %c0_i32_1 = arith.constant 0 : i32
    return %c0_i32, %c0_i32_0 : i32, i32
  }
  func.func @transform_4(%arg0: i32) -> (i32, i32) {
    %c0_i32 = arith.constant 0 : i32
    %c0_i32_0 = arith.constant 0 : i32
    %c0_i32_1 = arith.constant 0 : i32
    return %c0_i32, %c0_i32_0 : i32, i32
  }
  func.func @transform_5(%arg0: i32) -> (i32, i32, i32) {
    %c0_i32 = arith.constant 0 : i32
    %c0_i32_0 = arith.constant 0 : i32
    %c0_i32_1 = arith.constant 0 : i32
    return %arg0, %c0_i32, %c0_i32_0 : i32, i32, i32
  }
}

</mosaic_0001>

<bundles_post_ra>
// kernel: tpu_custom_call.1
= control target key start
LH: loop header
LB: loop body
LE: loop exit
PB: predicated region body
PF: predicated region fallthrough
CT: control target
= control target key end

     0   :  { %10 = vsyncpa [#allocation3], 0  ;;  %s4977_s0 = inlined_call_operand.hbm [shape: f32[2,3,16,16], index: 0, kind: input, shape index: {}]   ;;  %s4978_s1 = inlined_call_operand.hbm [shape: f32[8,27], index: 1, kind: input, shape index: {}]   ;;  %s4979_s2 = inlined_call_operand.vmem [shape: f32[8], index: 2, kind: input, shape index: {}]   ;;  %s4980_s3 = inlined_call_operand.vmem [shape: f32[8,128], index: 3, kind: input, shape index: {}]   ;;  %s4981_s4 = inlined_call_operand.vmem [shape: f32[1,128], index: 4, kind: input, shape index: {}]   ;;  %s4982_s5 = inlined_call_operand.hbm [shape: f32[2,1,128], index: 5, kind: output, shape index: {}]  }
   0x1   :  { %12 = vsyncpa [#allocation3 + $0x1], 0 }
   0x2   :  { %13 = vsyncpa [#allocation5], 0 }
   0x3   :  { %14 = vsyncpa [#allocation6], 0 }
   0x4   :  { %15 = vsyncpa [#allocation4], 0 }
   0x5   :  { %17 = vsyncpa [#allocation4 + $0x1], 0  ;;  %s3582_s18 = smov 0   ;;  %s3584_s19 = smov 0  }
   0x6   :  { %s3586_s20 = smov 0   ;;  %s3588_s21 = smov 0  }
   0x7 LB: > { %s3603_s22 = sadd.s32 4294967295, %s3542_s21   ;;  %s3036_s23 = sadd.s32 4294967294, %s3542_s21   ;;  %s3542_s21 = sphi %s3588_s21, %s5005_s21   ;;  %s3538_s20 = sphi %s3586_s20, %s5004_s20   ;;  %s3534_s19 = sphi %s3584_s19, %s5003_s19   ;;  %s3530_s18 = sphi %s3582_s18, %s5002_s18  }
   0x8   : > { %s3607_s24 = sadd.s32 1, %s3542_s21   ;;  %s30_s25 = sadd.s32 1, %s3538_s20 }
   0x9   : > { %s27_s26 = ssub.s32 %s3542_s21, %s3607_s24  ;;  %p37_p0 = scmp.ne.s32.totalorder %s3538_s20, %s3534_s19 }
   0xa   : > { %p28_p1 = scmp.eq.s32.totalorder %s27_s26, 0  ;;  %p38_p2 = scmp.eq.s32.totalorder %s3542_s21, 0 }
   0xb   : > { %p43_p3 = scmp.ne.s32.totalorder %s3534_s19, %s3530_s18  ;;  %p4983_p4 = scmp.eq.s32.totalorder %s3603_s22, 0 }
   0xc   : > { %s3619_s27 = scalar_select %p28_p1, %s3538_s20, %s30_s25  }
   0xd   : > { %p3621_p5 = por %p38_p2, %p37_p0  ;;  %p3627_p6 = por %p4983_p4, %p43_p3 }
   0xe   : > { %p151_p7 = scmp.eq.s32.totalorder %s3603_s22, 1  ;;  %p157_p8 = scmp.eq.s32.totalorder %s3036_s23, 1 }
   0xf   : > { %s4987_s29 = scalar_select %p3627_p6, 1, 0 }
  0x10   : > { %p3037_p9 = scmp.ge.s32.totalorder %s3542_s21, 1  ;;  %p164_p10 = scmp.lt.s32.totalorder %s3542_s21, 3 }
  0x11   : > { %p3634_p11 = por %p151_p7, %p37_p0  ;;  %p3638_p12 = por %p157_p8, %p43_p3 }
  0x12   : > { %p3642_p13 = pnand %p3037_p9, %p164_p10  ;;  %p3314_p4 = scmp.lt.s32.totalorder %s3542_s21, 2 }
  0x13   : > { %s4988_s30 = scalar_select %p3634_p11, 1, 0 }
  0x14   : > { %s4989_s6 = scalar_select %p3638_p12, 1, 0 }
  0x15   : > { %p3297_p2 = pneg %p3642_p13  ;;  %s186_s10 = sshll.u32 %s4979_s2, 4  ;;  %s187_s10 = int_to_ptr.vmem [resolvable:$true] %s186_s10 }
  0x16   : > { %p4991_p0 = scmp.eq.s32.totalorder %s3603_s22, 0  ;;  %p3661_p3 = pnand %p3314_p4, %p3621_p5 }
  0x17   : > { %s203_s13 = sand.u32 1, %s3538_s20   ;;  %s3410_s16 = scalar_lea.hbm %s4978_s1, 128 }
  0x18   : > { %p3655_p7 = pnand %p3297_p2, %p4991_p0  ;;  %p3411_p8 = scmp.ne.s32.totalorder %s4978_s1, %s3410_s16 }
  0x19   : > { %p3417_p4 = scmp.lt.u32.totalorder %s3410_s16, %s4978_s1 }
  0x1a   : > { %p3412_p9 = pneg %p3655_p7 }
  0x1c   : > { %p3413_p10 = pnand %p3412_p9, %p3411_p8 }
  0x1e   : > { %p3414_p2 = pneg %p3413_p10 }
  0x20   : > { %p3419_p5 = pnand %p3417_p4, %p3414_p2 }
  0x22   : > { %3422 = shalt.err (!%p3419_p5)
}
  0x23   : > { %s3544_s28 = smov [#allocation7]   ;;  %s3423_s14 = scalar_lea.vmem %s187_s10, 16 }
  0x24   : > { %3300 = dma.hbm_to_smem (!%p3655_p7), %s4978_s1, 128, %s3544_s28, [#allocation5]  }
  0x25   : > { %p3424_p0 = scmp.ne.s32.totalorder %s187_s10, %s3423_s14  ;;  %p3431_p11 = scmp.lt.s32.totalorder %s187_s10, %s187_s10 }
  0x26   : > { %p3432_p8 = scmp.lt.s32.totalorder %s3423_s14, %s3423_s14 }
  0x27   : > { %p3426_p1 = pnand %p3424_p0, %p3412_p9 }
  0x28   : > { %p3433_p10 = por %p3432_p8, %p3431_p11 }
  0x29   : > { %p3427_p12 = pneg %p3426_p1 }
  0x2b   : > { %p3434_p6 = pnand %p3433_p10, %p3427_p12 }
  0x2d   : > { %3437 = shalt.err (!%p3434_p6)
}
  0x2e   : > { %s3545_s15 = smov [#allocation8]   ;;  %s3282_s16 = smul.u32 48, %s203_s13 }
  0x2f   : > { %3303 = dma.vmem_to_smem (!%p3655_p7), %s187_s10, 16, %s3545_s15, [#allocation6]  }
  0x30   : > { %s3283_s17 = smul.u32 768, %s3542_s21  ;;  %s207_s28 = scalar_lea.vmem [#allocation2], %s3282_s16 }
  0x31   : > { %s214_s8 = sshll.u32 %s207_s28, 4  ;;  %s3692_s11 = scalar_lea.sflag [#allocation3], %s203_s13  ;;  %s3690_s8 = int_to_ptr.vmem [resolvable:$true] %s214_s8 }
  0x32   : > { %s3688_s26 = scalar_lea.hbm %s4977_s0, %s3283_s17  ;;  %p3440_p11 = pneg %p3661_p3 }
  0x33   : > { %s3438_s9 = scalar_lea.hbm %s3688_s26, 768  ;;  %s3443_s15 = scalar_lea.hbm %s4977_s0, 1536 }
  0x34   : > { %p3439_p6 = scmp.ne.s32.totalorder %s3688_s26, %s3438_s9  ;;  %p3444_p7 = scmp.lt.u32.totalorder %s3688_s26, %s4977_s0 }
  0x35   : > { %p3445_p9 = scmp.lt.u32.totalorder %s3443_s15, %s3438_s9  ;;  %p3447_p4 = scmp.lt.u32.totalorder %s3438_s9, %s3688_s26 }
  0x36   : > { %p3441_p12 = pnand %p3440_p11, %p3439_p6 }
  0x37   : > { %p3446_p2 = por %p3445_p9, %p3444_p7 }
  0x38   : > { %p3442_p1 = pneg %p3441_p12 }
  0x39   : > { %p3448_p5 = por %p3447_p4, %p3446_p2 }
  0x3b   : > { %p3449_p0 = pnand %p3448_p5, %p3442_p1 }
  0x3d   : > { %3452 = shalt.err (!%p3449_p0)
}
  0x3e   : > { %s3453_s13 = scalar_lea.vmem %s3690_s8, 768  ;;  %s3546_s16 = smov [#allocation2]  }
  0x3f   : > { %p3454_p8 = scmp.ne.s32.totalorder %s3690_s8, %s3453_s13  ;;  %s3458_s25 = sshll.u32 %s3546_s16, 4  ;;  %s3459_s25 = int_to_ptr.vmem [resolvable:$false] %s3458_s25 }
  0x40   : > { %s3460_s28 = scalar_lea.vmem %s3459_s25, 1536  ;;  %p3461_p12 = scmp.lt.s32.totalorder %s3690_s8, %s3459_s25 }
  0x41   : > { %p3456_p10 = pnand %p3454_p8, %p3440_p11  ;;  %p3462_p7 = scmp.lt.s32.totalorder %s3460_s28, %s3453_s13 }
  0x43   : > { %p3457_p6 = pneg %p3456_p10  ;;  %p3463_p9 = por %p3462_p7, %p3461_p12 }
  0x45   : > { %p3464_p2 = pnand %p3463_p9, %p3457_p6 }
  0x47   : > { %3467 = shalt.err (!%p3464_p2)
}
  0x48   : > { %s3547_s9 = smov 128   ;;  %s3548_s10 = smov 8  }
  0x49   : > { %3307 = dma.hbm_to_vmem [thread:$0]  (!%p3661_p3), %s3688_s26, 768, %s3690_s8, %s3692_s11, %s3547_s9, %s3547_s9, %s3548_s10  }
  0x4a   : > { %226 = sbr.rel (%p3642_p13) target bundleno = 1655 (0x677), region = 40  ;;  %s3723_s14 = sand.u32 (!%p3642_p13), 1, %s3534_s19  }
  0x4b   : > { %s3284_s15 = smul.u32 (!%p3642_p13), 48, %s3723_s14  ;;  %s229_s17 = scalar_lea.sflag (!%p3642_p13), [#allocation3], %s3723_s14 }
  0x4c   : > { %p4994_p11 = scmp.ne.s32.totalorder (!%p3642_p13), %s4987_s29, 0 }
  0x4d   : > { %s3727_s23 = scalar_lea.vmem (!%p3642_p13), [#allocation2], %s3284_s15 }
  0x51   : > { %3513 = dma.done.wait (%p4994_p11), %s229_s17, 768  }
  0x52   : > { %3515 = vsyncadd (%p4994_p11), %s229_s17, 4294966528  ;;  %p4995_p3 = scmp.eq.s32.totalorder %s3603_s22, 0 }
  0x54   : > { %3517 = dma.done.wait (%p4995_p3), [#allocation5], 128   ;;  %p4996_p13 = pmov %p4995_p3 }
  0x55   : > { %p4997_p1 = pmov %p4995_p3 }
  0x56   : > { %3519 = vsyncadd (%p4996_p13), [#allocation5], 4294967168 }
  0x57   : > { %3521 = dma.done.wait (%p4997_p1), [#allocation6], 16   ;;  %p4998_p4 = pmov %p4997_p1 }
  0x59   : > { %3523 = vsyncadd (%p4998_p4), [#allocation6], 4294967280 }
  0x5a   : > { %245 = sfence }
  0x5b   : > { %s3046_s7 = sld [smem:[#allocation7 + $0x2]]  ;;  %s3045_s12 = sld [smem:[#allocation7 + $0x1]]  ;;  %v3742_v0 = vld [vmem:[%s3727_s23] sm:$0xff]  ;;  %v3745_v1 = vld [vmem:[%s3727_s23 + $0x8] sm:$0x3f]  ;;  %v3785_v26 = vld [vmem:[%s3727_s23 + $0x10] sm:$0xff] }
  0x5c   : > { %s3048_s29 = sld [smem:[#allocation7 + $0x4]]  ;;  %s3049_s26 = sld [smem:[#allocation7 + $0x5]]  ;;  %v3754_v8 = vld [vmem:[%s3727_s23 + $0x9] sm:$0x3f]  ;;  %v3757_v10 = vld [vmem:[%s3727_s23 + $0x1] sm:$0xff]  ;;  %v3799_v34 = vld [vmem:[%s3727_s23 + $0x11] sm:$0xff] }
  0x5d   : > { %s3549_s8 = smov 126   ;;  %s3550_s11 = smov 127   ;;  %v3768_v16 = vld [vmem:[%s3727_s23 + $0xa] sm:$0x3f]  ;;  %v3771_v18 = vld [vmem:[%s3727_s23 + $0x2] sm:$0xff]  ;;  %v3813_v42 = vld [vmem:[%s3727_s23 + $0x12] sm:$0xff] }
  0x5e   : > { %s3051_s13 = sld [smem:[#allocation7 + $0x7]]  ;;  %s3052_s16 = sld [smem:[#allocation7 + $0x8]]  ;;  %v3782_v24 = vld [vmem:[%s3727_s23 + $0x18] sm:$0x3f]  ;;  %v3824_v48 = vld [vmem:[%s3727_s23 + $0x28] sm:$0x3f] }
  0x5f   : > { %s3056_s25 = sld [smem:[#allocation7 + $0xa]]  ;;  %s3057_s28 = sld [smem:[#allocation7 + $0xb]]  ;;  %v3796_v32 = vld [vmem:[%s3727_s23 + $0x19] sm:$0x3f]  ;;  %v3827_v50 = vld [vmem:[%s3727_s23 + $0x20] sm:$0xff]  ;;  %vm603_vm0 = vcmask 111616  }
  0x60   : > { %s3061_s9 = sld [smem:[#allocation7 + $0xd]]  ;;  %s3062_s10 = sld [smem:[#allocation7 + $0xe]]  ;;  %v3810_v40 = vld [vmem:[%s3727_s23 + $0x1a] sm:$0x3f]  ;;  %v3838_v56 = vld [vmem:[%s3727_s23 + $0x29] sm:$0x3f] }
  0x61   : > { %v294_v2 = vstv %s3046_s7  ;;  %v280_v4 = vstv %s3045_s12  ;;  %s3066_s15 = sld [smem:[#allocation7 + $0x10]]  ;;  %s3067_s17 = sld [smem:[#allocation7 + $0x11]]  ;;  %v3841_v58 = vld [vmem:[%s3727_s23 + $0x21] sm:$0xff]  ;;  %vm599_vm1 = vcmask 113664   ;;  %vm607_vm2 = vcmask 1045504  }
  0x62   : > { %v295_v3 = vmul.f32 %v294_v2, %v3742_v0  ;;  %v281_v5 = vmul.f32 %v280_v4, %v3742_v0  ;;  %v296_v6 = vmul.f32 %v294_v2, %v3745_v1  ;;  %v282_v7 = vmul.f32 %v280_v4, %v3745_v1  ;;  %s3071_s7 = sld [smem:[#allocation7 + $0x13]]  ;;  %s3072_s12 = sld [smem:[#allocation7 + $0x14]]  ;;  %v3852_v2 = vld [vmem:[%s3727_s23 + $0x2a] sm:$0x3f]  ;;  %v3855_v4 = vld [vmem:[%s3727_s23 + $0x22] sm:$0xff] }
  0x63   : > { %v316_v9 = vstv %s3048_s29  ;;  %v330_v13 = vstv %s3049_s26  ;;  %s3076_s29 = sld [smem:[#allocation7 + $0x16]]  ;;  %s3077_s26 = sld [smem:[#allocation7 + $0x17]] }
  0x64   : > { %299 = vrot.lane.b32.xlu1 %v295_v3, %s3549_s8  ;;  %285 = vrot.lane.b32.xlu0 %v281_v5, %s3550_s11  ;;  %v318_v11 = vmul.f32 %v316_v9, %v3754_v8  ;;  %v317_v12 = vmul.f32 %v316_v9, %v3757_v10  ;;  %v332_v14 = vmul.f32 %v330_v13, %v3754_v8  ;;  %v352_v17 = vstv %s3051_s13  ;;  %s3081_s13 = sld [smem:[#allocation7 + $0x19]]  ;;  %p4999_p0 = scmp.ne.s32.totalorder %s4988_s30, 0 }
  0x65   : > { %v331_v15 = vmul.f32 %v330_v13, %v3757_v10  ;;  %v354_v19 = vmul.f32 %v352_v17, %v3768_v16  ;;  %v353_v20 = vmul.f32 %v352_v17, %v3771_v18  ;;  %v366_v21 = vstv %s3052_s16  ;;  %s3082_s16 = sld [smem:[#allocation7 + $0x1a]] }
  0x66   : > { %v368_v22 = vmul.f32 %v366_v21, %v3768_v16  ;;  %v367_v23 = vmul.f32 %v366_v21, %v3771_v18  ;;  %v389_v25 = vstv %s3056_s25  ;;  %v403_v29 = vstv %s3057_s28  ;;  %s3085_s25 = sld [smem:[#allocation7 + $0x81]]  ;;  %s3086_s28 = sld [smem:[#allocation7 + $0x82]] }
  0x67   : > { %v391_v27 = vmul.f32 %v3782_v24, %v389_v25  ;;  %v390_v28 = vmul.f32 %v3785_v26, %v389_v25  ;;  %v405_v30 = vmul.f32 %v3782_v24, %v403_v29  ;;  %v404_v31 = vmul.f32 %v3785_v26, %v403_v29 }
  0x68   : > { %301 = vrot.lane.b32.xlu1 %v296_v6, %s3549_s8  ;;  %287 = vrot.lane.b32.xlu0 %v282_v7, %s3550_s11  ;;  %v425_v33 = vstv %s3061_s9  ;;  %v439_v37 = vstv %s3062_s10  ;;  %s3088_s9 = sld [smem:[#allocation7 + $0x84]]  ;;  %s3089_s10 = sld [smem:[#allocation7 + $0x85]] }
  0x69   : > { %v427_v35 = vmul.f32 %v3796_v32, %v425_v33  ;;  %v426_v36 = vmul.f32 %v3799_v34, %v425_v33  ;;  %v441_v38 = vmul.f32 %v3796_v32, %v439_v37  ;;  %v440_v39 = vmul.f32 %v3799_v34, %v439_v37 }
  0x6a   : > { %v461_v41 = vstv %s3066_s15  ;;  %v475_v45 = vstv %s3067_s17  ;;  %v498_v49 = vstv %s3071_s7  ;;  %v512_v53 = vstv %s3072_s12  ;;  %s3091_s15 = sld [smem:[#allocation7 + $0x87]]  ;;  %s3092_s17 = sld [smem:[#allocation7 + $0x88]] }
  0x6b   : > { %v463_v43 = vmul.f32 %v3810_v40, %v461_v41  ;;  %v462_v44 = vmul.f32 %v3813_v42, %v461_v41  ;;  %v477_v46 = vmul.f32 %v3810_v40, %v475_v45  ;;  %v476_v47 = vmul.f32 %v3813_v42, %v475_v45  ;;  %s3094_s7 = sld [smem:[#allocation7 + $0x8a]]  ;;  %s3095_s12 = sld [smem:[#allocation7 + $0x8b]] }
  0x6c   : > { %323 = vrot.lane.b32.xlu1 %v318_v11, %s3550_s11  ;;  %321 = vrot.lane.b32.xlu0 %v317_v12, %s3550_s11  ;;  %v500_v51 = vmul.f32 %v3824_v48, %v498_v49  ;;  %v499_v52 = vmul.f32 %v3827_v50, %v498_v49  ;;  %v514_v54 = vmul.f32 %v3824_v48, %v512_v53  ;;  %v534_v57 = vstv %s3076_s29  ;;  %s3097_s29 = sld [smem:[#allocation7 + $0x8d]] }
  0x6d   : > { %v513_v55 = vmul.f32 %v3827_v50, %v512_v53  ;;  %v536_v59 = vmul.f32 %v3838_v56, %v534_v57  ;;  %v535_v60 = vmul.f32 %v3841_v58, %v534_v57  ;;  %v548_v61 = vstv %s3077_s26  ;;  %s3098_s26 = sld [smem:[#allocation7 + $0x8e]] }
  0x6e   : > { %v550_v62 = vmul.f32 %v3838_v56, %v548_v61  ;;  %v549_v63 = vmul.f32 %v3841_v58, %v548_v61  ;;  %v570_v3 = vstv %s3081_s13  ;;  %v584_v7 = vstv %s3082_s16  ;;  %s271_s13 = sld [smem:[#allocation7]] }
  0x6f   : > { %v572_v5 = vmul.f32 %v3852_v2, %v570_v3  ;;  %v571_v6 = vmul.f32 %v3855_v4, %v570_v3  ;;  %v586_v9 = vmul.f32 %v3852_v2, %v584_v7  ;;  %v585_v11 = vmul.f32 %v3855_v4, %v584_v7  ;;  %s3100_s16 = sld [smem:[#allocation7 + $0x90]] }
  0x70   : > { %337 = vrot.lane.b32.xlu1 %v332_v14, %s3549_s8  ;;  %335 = vrot.lane.b32.xlu0 %v331_v15, %s3549_s8  ;;  %v631_v12 = vstv %s3085_s25  ;;  %v645_v14 = vstv %s3086_s28  ;;  %s3899_s25 = sld [smem:[#allocation8]]  ;;  %s3101_s28 = sld [smem:[#allocation7 + $0x91]] }
  0x71   : > { %v633_v13 = vmul.f32 %v631_v12, %v3745_v1  ;;  %v632_v15 = vmul.f32 %v631_v12, %v3742_v0  ;;  %v647_v17 = vmul.f32 %v645_v14, %v3745_v1 }
  0x74   : > { %359 = vrot.lane.b32.xlu1 %v354_v19, %s3550_s11  ;;  %357 = vrot.lane.b32.xlu0 %v353_v20, %s3550_s11  ;;  %v665_v19 = vstv %s3088_s9  ;;  %v646_v20 = vmul.f32 %v645_v14, %v3742_v0  ;;  %s3103_s9 = sld [smem:[#allocation7 + $0x93]] }
  0x75   : > { %v667_v21 = vmul.f32 %v665_v19, %v3754_v8 }
  0x76   : > { %v269_v57 = vstv %s3899_s25  ;;  %s3078_s25 = sld [smem:[#allocation7 + $0x18]] }
  0x78   : > { %373 = vrot.lane.b32.xlu1 %v368_v22, %s3549_s8  ;;  %371 = vrot.lane.b32.xlu0 %v367_v23, %s3549_s8  ;;  %v679_v22 = vstv %s3089_s10  ;;  %v666_v23 = vmul.f32 %v665_v19, %v3757_v10  ;;  %s3047_s10 = sld [smem:[#allocation7 + $0x3]] }
  0x79   : > { %v681_v25 = vmul.f32 %v679_v22, %v3754_v8 }
  0x7a   : > { %v835_v3 = vstv %s3103_s9  ;;  %s3109_s9 = sld [smem:[#allocation7 + $0x99]] }
  0x7b   : > { %v837_v12 = vmul.f32 %v3824_v48, %v835_v3 }
  0x7c   : > { %396 = vrot.lane.b32.xlu1 %v391_v27, %s3550_s11  ;;  %394 = vrot.lane.b32.xlu0 %v390_v28, %s3550_s11  ;;  %v699_v27 = vstv %s3091_s15  ;;  %v680_v28 = vmul.f32 %v679_v22, %v3757_v10  ;;  %s3913_s15 = sld [smem:[#allocation7 + $0x94]] }
  0x7d   : > { %v701_v29 = vmul.f32 %v699_v27, %v3768_v16 }
  0x80   : > { %410 = vrot.lane.b32.xlu1 %v405_v30, %s3549_s8  ;;  %408 = vrot.lane.b32.xlu0 %v404_v31, %s3549_s8  ;;  %v713_v30 = vstv %s3092_s17  ;;  %v700_v31 = vmul.f32 %v699_v27, %v3771_v18  ;;  %s3920_s17 = sld [smem:[#allocation7 + $0x96]] }
  0x81   : > { %v715_v33 = vmul.f32 %v713_v30, %v3768_v16 }
  0x82   : > { %v849_v14 = vstv %s3913_s15  ;;  %s3084_s15 = sld [smem:[#allocation7 + $0x80]] }
  0x84   : > { %432 = vrot.lane.b32.xlu1 %v427_v35, %s3550_s11  ;;  %430 = vrot.lane.b32.xlu0 %v426_v36, %s3550_s11  ;;  %v733_v35 = vstv %s3094_s7  ;;  %v714_v36 = vmul.f32 %v713_v30, %v3771_v18  ;;  %s3922_s7 = sld [smem:[#allocation7 + $0x6]] }
  0x85   : > { %v735_v37 = vmul.f32 %v3782_v24, %v733_v35 }
  0x86   : > { %v869_v27 = vstv %s3920_s17  ;;  %s3083_s17 = sld [smem:[#allocation8 + $0x1]] }
  0x88   : > { %446 = vrot.lane.b32.xlu1 %v441_v38, %s3549_s8  ;;  %444 = vrot.lane.b32.xlu0 %v440_v39, %s3549_s8  ;;  %v747_v38 = vstv %s3095_s12  ;;  %v734_v39 = vmul.f32 %v3785_v26, %v733_v35  ;;  %s3053_s12 = sld [smem:[#allocation7 + $0x9]] }
  0x89   : > { %v749_v41 = vmul.f32 %v3782_v24, %v747_v38 }
  0x8c   : > { %468 = vrot.lane.b32.xlu1 %v463_v43, %s3550_s11  ;;  %466 = vrot.lane.b32.xlu0 %v462_v44, %s3550_s11  ;;  %v767_v43 = vstv %s3097_s29  ;;  %v748_v44 = vmul.f32 %v3785_v26, %v747_v38  ;;  %v870_v38 = vmul.f32 %v3841_v58, %v869_v27  ;;  %s3058_s29 = sld [smem:[#allocation7 + $0xc]] }
  0x8d   : > { %v769_v45 = vmul.f32 %v3796_v32, %v767_v43 }
  0x90   : > { %482 = vrot.lane.b32.xlu1 %v477_v46, %s3549_s8  ;;  %480 = vrot.lane.b32.xlu0 %v476_v47, %s3549_s8  ;;  %v781_v46 = vstv %s3098_s26  ;;  %v768_v47 = vmul.f32 %v3799_v34, %v767_v43  ;;  %s3063_s26 = sld [smem:[#allocation7 + $0xf]] }
  0x91   : > { %v783_v49 = vmul.f32 %v3796_v32, %v781_v46  ;;  %v782_v53 = vmul.f32 %v3799_v34, %v781_v46 }
  0x94   : > { %505 = vrot.lane.b32.xlu1 %v500_v51, %s3550_s11  ;;  %503 = vrot.lane.b32.xlu0 %v499_v52, %s3550_s11  ;;  %v274_v51 = vstv %s271_s13  ;;  %v801_v52 = vstv %s3100_s16  ;;  %s3068_s13 = sld [smem:[#allocation7 + $0x12]]  ;;  %s3073_s16 = sld [smem:[#allocation7 + $0x15]] }
  0x98   : > { %519 = vrot.lane.b32.xlu1 %v514_v54, %s3549_s8  ;;  %517 = vrot.lane.b32.xlu0 %v513_v55, %s3549_s8  ;;  %v275_v54 = vmul.f32 %v274_v51, %v3742_v0  ;;  %v803_v55 = vmul.f32 %v3810_v40, %v801_v52 }
  0x9a   : > { %v277_v61 = vadd.f32 %v275_v54, %v269_v57  ;;  %v383_v54 = vstv %s3053_s12  ;;  %s3090_s12 = sld [smem:[#allocation7 + $0x86]] }
  0x9c   : > { %541 = vrot.lane.b32.xlu1 %v536_v59, %s3550_s11  ;;  %539 = vrot.lane.b32.xlu0 %v535_v60, %s3550_s11  ;;  %v815_v59 = vstv %s3101_s28  ;;  %v802_v60 = vmul.f32 %v3813_v42, %v801_v52  ;;  %s3107_s28 = sld [smem:[#allocation7 + $0x97]] }
  0xa0   : > { %555 = vrot.lane.b32.xlu1 %v550_v62, %s3549_s8  ;;  %553 = vrot.lane.b32.xlu0 %v549_v63, %s3549_s8  ;;  %v276_v62 = vmul.f32 %v274_v51, %v3745_v1  ;;  %v817_v63 = vmul.f32 %v3810_v40, %v815_v59 }
  0xa4   : > { %577 = vrot.lane.b32.xlu1 %v572_v5, %s3550_s11  ;;  %575 = vrot.lane.b32.xlu0 %v571_v6, %s3550_s11  ;;  %v816_v5 = vmul.f32 %v3813_v42, %v815_v59  ;;  %v385_v59 = vmul.f32 %v3782_v24, %v383_v54 }
  0xa8   : > { %591 = vrot.lane.b32.xlu1 %v586_v9, %s3549_s8  ;;  %589 = vrot.lane.b32.xlu0 %v585_v11, %s3549_s8  ;;  %v278_v11 = vadd.f32 %v276_v62, %v269_v57  ;;  %v384_v62 = vmul.f32 %v3785_v26, %v383_v54 }
  0xac   : > { %638 = vrot.lane.b32.xlu1 %v633_v13, %s3550_s11  ;;  %636 = vrot.lane.b32.xlu0 %v632_v15, %s3550_s11  ;;  %v310_v13 = vstv %s3047_s10  ;;  %v836_v15 = vmul.f32 %v3827_v50, %v835_v3  ;;  %s3110_s10 = sld [smem:[#allocation7 + $0x9a]] }
  0xb0   : > { %652 = vrot.lane.b32.xlu1 %v647_v17, %s3549_s8  ;;  %650 = vrot.lane.b32.xlu0 %v646_v20, %s3549_s8  ;;  %v312_v20 = vmul.f32 %v310_v13, %v3754_v8 }
  0xb4   : > { %672 = vrot.lane.b32.xlu1 %v667_v21, %s3550_s11  ;;  %670 = vrot.lane.b32.xlu0 %v666_v23, %s3550_s11  ;;  %v311_v23 = vmul.f32 %v310_v13, %v3757_v10 }
  0xb8   : > { %686 = vrot.lane.b32.xlu1 %v681_v25, %s3549_s8  ;;  %684 = vrot.lane.b32.xlu0 %v680_v28, %s3549_s8  ;;  %v851_v25 = vmul.f32 %v3824_v48, %v849_v14  ;;  %v850_v28 = vmul.f32 %v3827_v50, %v849_v14 }
  0xbc   : > { %706 = vrot.lane.b32.xlu1 %v701_v29, %s3550_s11  ;;  %704 = vrot.lane.b32.xlu0 %v700_v31, %s3550_s11 }
  0xc0   : > { %720 = vrot.lane.b32.xlu1 %v715_v33, %s3549_s8  ;;  %718 = vrot.lane.b32.xlu0 %v714_v36, %s3549_s8  ;;  %v346_v33 = vstv %s3922_s7  ;;  %s3087_s7 = sld [smem:[#allocation7 + $0x83]] }
  0xc4   : > { %740 = vrot.lane.b32.xlu1 %v735_v37, %s3550_s11  ;;  %738 = vrot.lane.b32.xlu0 %v734_v39, %s3550_s11  ;;  %v871_v37 = vmul.f32 %v3838_v56, %v869_v27 }
  0xc8   : > { %754 = vrot.lane.b32.xlu1 %v749_v41, %s3549_s8  ;;  %752 = vrot.lane.b32.xlu0 %v748_v44, %s3549_s8  ;;  %v348_v44 = vmul.f32 %v346_v33, %v3768_v16 }
  0xcc   : > { %774 = vrot.lane.b32.xlu1 %v769_v45, %s3550_s11  ;;  %772 = vrot.lane.b32.xlu0 %v768_v47, %s3550_s11  ;;  %v347_v45 = vmul.f32 %v346_v33, %v3771_v18 }
  0xd0   : > { %788 = vrot.lane.b32.xlu1 %v783_v49, %s3549_s8  ;;  %786 = vrot.lane.b32.xlu0 %v782_v53, %s3549_s8 }
  0xd4   : > { %808 = vrot.lane.b32.xlu1 %v803_v55, %s3550_s11  ;;  %806 = vrot.lane.b32.xlu0 %v802_v60, %s3550_s11 }
  0xd6   : > { %v300_v6 = vpop.permute.xlu1 %299  ;;  %v286_v7 = vpop.permute.xlu0 %285 }
  0xd7   : > { %v291_v9 = vadd.f32 %v286_v7, %v277_v61 }
  0xd8   : > { %822 = vrot.lane.b32.xlu1 %v817_v63, %s3549_s8  ;;  %820 = vrot.lane.b32.xlu0 %v816_v5, %s3549_s8 }
  0xd9   : > { %v305_v21 = vadd.f32 %v300_v6, %v291_v9 }
  0xda   : > { %v302_v17 = vpop.permute.xlu1 %301  ;;  %v288_v19 = vpop.permute.xlu0 %287 }
  0xdb   : > { %v292_v22 = vadd.f32 %v288_v19, %v278_v11  ;;  %v313_v36 = vadd.f32 %v311_v23, %v305_v21  ;;  %v419_v11 = vstv %s3058_s29  ;;  %s3093_s29 = sld [smem:[#allocation7 + $0x89]] }
  0xdc   : > { %842 = vrot.lane.b32.xlu1 %v837_v12, %s3550_s11  ;;  %840 = vrot.lane.b32.xlu0 %v836_v15, %s3550_s11  ;;  %v421_v14 = vmul.f32 %v3796_v32, %v419_v11  ;;  %v420_v19 = vmul.f32 %v3799_v34, %v419_v11 }
  0xdd   : > { %v306_v29 = vadd.f32 %v302_v17, %v292_v22 }
  0xde   : > { %v324_v30 = vpop.permute.xlu1 %323  ;;  %v322_v31 = vpop.permute.xlu0 %321 }
  0xdf   : > { %v314_v35 = vadd.f32 %v312_v20, %v306_v29  ;;  %v327_v41 = vadd.f32 %v322_v31, %v313_v36 }
  0xe0   : > { %856 = vrot.lane.b32.xlu1 %v851_v25, %s3549_s8  ;;  %854 = vrot.lane.b32.xlu0 %v850_v28, %s3549_s8  ;;  %v455_v28 = vstv %s3063_s26  ;;  %s3096_s26 = sld [smem:[#allocation7 + $0x8c]] }
  0xe1   : > { %v328_v39 = vadd.f32 %v324_v30, %v314_v35  ;;  %v457_v31 = vmul.f32 %v3810_v40, %v455_v28  ;;  %v456_v36 = vmul.f32 %v3813_v42, %v455_v28 }
  0xe2   : > { %v338_v43 = vpop.permute.xlu1 %337  ;;  %v336_v46 = vpop.permute.xlu0 %335 }
  0xe3   : > { %v342_v47 = vadd.f32 %v338_v43, %v328_v39  ;;  %v341_v49 = vadd.f32 %v336_v46, %v327_v41 }
  0xe4   : > { %876 = vrot.lane.b32.xlu1 %v871_v37, %s3550_s11  ;;  %874 = vrot.lane.b32.xlu0 %v870_v38, %s3550_s11 }
  0xe5   : > { %v350_v52 = vadd.f32 %v348_v44, %v342_v47  ;;  %v349_v53 = vadd.f32 %v347_v45, %v341_v49  ;;  %v492_v45 = vstv %s3068_s13  ;;  %s3099_s13 = sld [smem:[#allocation7 + $0x8f]] }
  0xe6   : > { %v360_v51 = vpop.permute.xlu1 %359  ;;  %v358_v55 = vpop.permute.xlu0 %357  ;;  %v494_v49 = vmul.f32 %v3824_v48, %v492_v45 }
  0xe7   : > { %v364_v57 = vadd.f32 %v360_v51, %v350_v52  ;;  %v363_v60 = vadd.f32 %v358_v55, %v349_v53  ;;  %v493_v53 = vmul.f32 %v3827_v50, %v492_v45 }
  0xea   : > { %v374_v61 = vpop.permute.xlu1 %373  ;;  %v372_v3 = vpop.permute.xlu0 %371 }
  0xeb   : > { %v378_v63 = vadd.f32 %v374_v61, %v364_v57  ;;  %v377_v5 = vadd.f32 %v372_v3, %v363_v60 }
  0xed   : > { %v387_v6 = vadd.f32 %v385_v59, %v378_v63  ;;  %v386_v9 = vadd.f32 %v384_v62, %v377_v5  ;;  %v528_v62 = vstv %s3073_s16  ;;  %s3102_s16 = sld [smem:[#allocation7 + $0x92]] }
  0xee   : > { %v397_v7 = vpop.permute.xlu1 %396  ;;  %v395_v12 = vpop.permute.xlu0 %394  ;;  %v530_v5 = vmul.f32 %v3838_v56, %v528_v62 }
  0xef   : > { %v401_v13 = vadd.f32 %v397_v7, %v387_v6  ;;  %v400_v15 = vadd.f32 %v395_v12, %v386_v9  ;;  %v529_v9 = vmul.f32 %v3841_v58, %v528_v62  ;;  %v625_v62 = vstv %s3084_s15  ;;  %s3116_s15 = sld [smem:[#allocation7 + $0x104]] }
  0xf2   : > { %v411_v17 = vpop.permute.xlu1 %410  ;;  %v409_v21 = vpop.permute.xlu0 %408 }
  0xf3   : > { %v415_v20 = vadd.f32 %v411_v17, %v401_v13  ;;  %v414_v22 = vadd.f32 %v409_v21, %v400_v15 }
  0xf5   : > { %v423_v23 = vadd.f32 %v421_v14, %v415_v20  ;;  %v422_v27 = vadd.f32 %v420_v19, %v414_v22  ;;  %v564_v19 = vstv %s3078_s25  ;;  %s3105_s25 = sld [smem:[#allocation7 + $0x95]] }
  0xf6   : > { %v433_v25 = vpop.permute.xlu1 %432  ;;  %v431_v29 = vpop.permute.xlu0 %430  ;;  %v566_v22 = vmul.f32 %v3852_v2, %v564_v19 }
  0xf7   : > { %v437_v30 = vadd.f32 %v433_v25, %v423_v23  ;;  %v436_v33 = vadd.f32 %v431_v29, %v422_v27  ;;  %v565_v27 = vmul.f32 %v3855_v4, %v564_v19 }
  0xfa   : > { %v447_v35 = vpop.permute.xlu1 %446  ;;  %v445_v38 = vpop.permute.xlu0 %444 }
  0xfb   : > { %v451_v37 = vadd.f32 %v447_v35, %v437_v30  ;;  %v450_v39 = vadd.f32 %v445_v38, %v436_v33 }
  0xfd   : > { %v459_v41 = vadd.f32 %v457_v31, %v451_v37  ;;  %v458_v44 = vadd.f32 %v456_v36, %v450_v39 }
  0xfe   : > { %v469_v43 = vpop.permute.xlu1 %468  ;;  %v467_v46 = vpop.permute.xlu0 %466 }
  0xff   : > { %v473_v47 = vadd.f32 %v469_v43, %v459_v41  ;;  %v472_v51 = vadd.f32 %v467_v46, %v458_v44 }
 0x102   : > { %v483_v52 = vpop.permute.xlu1 %482  ;;  %v481_v55 = vpop.permute.xlu0 %480 }
 0x103   : > { %v487_v54 = vadd.f32 %v483_v52, %v473_v47  ;;  %v486_v57 = vadd.f32 %v481_v55, %v472_v51  ;;  %v883_v51 = vstv %s3107_s28  ;;  %v917_v55 = vstv %s3110_s10  ;;  %s3108_s28 = sld [smem:[#allocation7 + $0x98]]  ;;  %s3114_s10 = sld [smem:[#allocation7 + $0x102]] }
 0x104   : > { %v885_v52 = vmul.f32 %v3838_v56, %v883_v51 }
 0x105   : > { %v496_v59 = vadd.f32 %v494_v49, %v487_v54  ;;  %v495_v61 = vadd.f32 %v493_v53, %v486_v57  ;;  %v903_v53 = vstv %s3109_s9  ;;  %v884_v57 = vmul.f32 %v3841_v58, %v883_v51  ;;  %s3113_s9 = sld [smem:[#allocation7 + $0x101]] }
 0x106   : > { %v506_v60 = vpop.permute.xlu1 %505  ;;  %v504_v63 = vpop.permute.xlu0 %503  ;;  %v905_v54 = vmul.f32 %v3852_v2, %v903_v53 }
 0x107   : > { %v510_v3 = vadd.f32 %v506_v60, %v496_v59  ;;  %v509_v6 = vadd.f32 %v504_v63, %v495_v61  ;;  %v919_v59 = vmul.f32 %v3852_v2, %v917_v55  ;;  %v904_v60 = vmul.f32 %v3855_v4, %v903_v53 }
 0x108   : > { %v918_v61 = vmul.f32 %v3855_v4, %v917_v55  ;;  %v627_v63 = vmul.f32 %v625_v62, %v3745_v1 }
 0x10a   : > { %v520_v7 = vpop.permute.xlu1 %519  ;;  %v518_v12 = vpop.permute.xlu0 %517 }
 0x10b   : > { %v524_v11 = vadd.f32 %v520_v7, %v510_v3  ;;  %v523_v13 = vadd.f32 %v518_v12, %v509_v6  ;;  %v622_v3 = vstv %s3083_s17  ;;  %v626_v6 = vmul.f32 %v625_v62, %v3742_v0  ;;  %s3117_s17 = sld [smem:[#allocation7 + $0x105]] }
 0x10d   : > { %v532_v14 = vadd.f32 %v530_v5, %v524_v11  ;;  %v531_v17 = vadd.f32 %v529_v9, %v523_v13  ;;  %v629_v9 = vadd.f32 %v627_v63, %v622_v3  ;;  %v628_v11 = vadd.f32 %v626_v6, %v622_v3 }
 0x10e   : > { %v542_v15 = vpop.permute.xlu1 %541  ;;  %v540_v20 = vpop.permute.xlu0 %539 }
 0x10f   : > { %v546_v21 = vadd.f32 %v542_v15, %v532_v14  ;;  %v545_v23 = vadd.f32 %v540_v20, %v531_v17  ;;  %v659_v17 = vstv %s3087_s7  ;;  %s3119_s7 = sld [smem:[#allocation7 + $0x107]] }
 0x110   : > { %v661_v20 = vmul.f32 %v659_v17, %v3754_v8 }
 0x112   : > { %v556_v25 = vpop.permute.xlu1 %555  ;;  %v554_v29 = vpop.permute.xlu0 %553 }
 0x113   : > { %v560_v28 = vadd.f32 %v556_v25, %v546_v21  ;;  %v559_v30 = vadd.f32 %v554_v29, %v545_v23  ;;  %v660_v23 = vmul.f32 %v659_v17, %v3757_v10 }
 0x115   : > { %v568_v31 = vadd.f32 %v566_v22, %v560_v28  ;;  %v567_v35 = vadd.f32 %v565_v27, %v559_v30 }
 0x116   : > { %v578_v33 = vpop.permute.xlu1 %577  ;;  %v576_v36 = vpop.permute.xlu0 %575 }
 0x117   : > { %v582_v37 = vadd.f32 %v578_v33, %v568_v31  ;;  %v581_v38 = vadd.f32 %v576_v36, %v567_v35  ;;  %v693_v33 = vstv %s3090_s12  ;;  %s3120_s12 = sld [smem:[#allocation7 + $0x108]] }
 0x118   : > { %v695_v36 = vmul.f32 %v693_v33, %v3768_v16 }
 0x11a   : > { %v592_v39 = vpop.permute.xlu1 %591  ;;  %v590_v43 = vpop.permute.xlu0 %589 }
 0x11b   : > { %v596_v41 = vadd.f32 %v592_v39, %v582_v37  ;;  %v595_v44 = vadd.f32 %v590_v43, %v581_v38  ;;  %v694_v39 = vmul.f32 %v693_v33, %v3771_v18 }
 0x11d   : > { %v598_v45 = vmax.f32 %v596_v41, 0.0  ;;  %v597_v46 = vmax.f32 %v595_v44, 0.0 }
 0x11e   : > { %v639_v5 = vpop.permute.xlu1 %638  ;;  %v637_v7 = vpop.permute.xlu0 %636 }
 0x11f   : > { %v604_v47 = vsel %vm603_vm0, %v598_v45, 0.0  ;;  %v600_v49 = vsel %vm599_vm1, %v597_v46, 0.0  ;;  %v643_v13 = vadd.f32 %v639_v5, %v629_v9  ;;  %v642_v15 = vadd.f32 %v637_v7, %v628_v11 }
 0x120   : > { %605 = vadd.xlane.f32.xlu1 %v604_v47  ;;  %601 = vadd.xlane.f32.xlu0 %v600_v49  ;;  %v727_v49 = vstv %s3093_s29  ;;  %v761_v5 = vstv %s3096_s26  ;;  %s3122_s29 = sld [smem:[#allocation7 + $0x10a]]  ;;  %s3123_s26 = sld [smem:[#allocation7 + $0x10b]] }
 0x121   : > { %v728_v55 = vmul.f32 %v3785_v26, %v727_v49  ;;  %v763_v7 = vmul.f32 %v3796_v32, %v761_v5 }
 0x122   : > { %v653_v12 = vpop.permute.xlu1 %652  ;;  %v651_v14 = vpop.permute.xlu0 %650 }
 0x123   : > { %v657_v19 = vadd.f32 %v653_v12, %v643_v13  ;;  %v656_v22 = vadd.f32 %v651_v14, %v642_v15  ;;  %v762_v12 = vmul.f32 %v3799_v34, %v761_v5 }
 0x125   : > { %v663_v27 = vadd.f32 %v661_v20, %v657_v19  ;;  %v662_v0 = vadd.f32 %v660_v23, %v656_v22  ;;  %v795_v22 = vstv %s3099_s13  ;;  %s3125_s13 = sld [smem:[#allocation7 + $0x10d]] }
 0x126   : > { %v673_v21 = vpop.permute.xlu1 %672  ;;  %v671_v25 = vpop.permute.xlu0 %670 }
 0x127   : > { %v677_v29 = vadd.f32 %v673_v21, %v663_v27  ;;  %v676_v31 = vadd.f32 %v671_v25, %v662_v0  ;;  %v797_v25 = vmul.f32 %v3810_v40, %v795_v22 }
 0x12a   : > { %v687_v28 = vpop.permute.xlu1 %686  ;;  %v685_v30 = vpop.permute.xlu0 %684 }
 0x12b   : > { %v691_v35 = vadd.f32 %v687_v28, %v677_v29  ;;  %v690_v38 = vadd.f32 %v685_v30, %v676_v31  ;;  %v796_v28 = vmul.f32 %v3813_v42, %v795_v22 }
 0x12d   : > { %v697_v43 = vadd.f32 %v695_v36, %v691_v35  ;;  %v696_v10 = vadd.f32 %v694_v39, %v690_v38  ;;  %v829_v38 = vstv %s3102_s16  ;;  %s3126_s16 = sld [smem:[#allocation7 + $0x10e]] }
 0x12e   : > { %v707_v37 = vpop.permute.xlu1 %706  ;;  %v705_v41 = vpop.permute.xlu0 %704 }
 0x12f   : > { %v711_v45 = vadd.f32 %v707_v37, %v697_v43  ;;  %v710_v47 = vadd.f32 %v705_v41, %v696_v10  ;;  %v831_v41 = vmul.f32 %v3824_v48, %v829_v38 }
 0x131   : > { %890 = vrot.lane.b32.xlu1 %v885_v52, %s3549_s8  ;;  %v729_v52 = vmul.f32 %v3782_v24, %v727_v49 }
 0x132   : > { %v721_v44 = vpop.permute.xlu1 %720  ;;  %v719_v46 = vpop.permute.xlu0 %718 }
 0x133   : > { %v725_v51 = vadd.f32 %v721_v44, %v711_v45  ;;  %v830_v44 = vmul.f32 %v3827_v50, %v829_v38 }
 0x135   : > { %910 = vrot.lane.b32.xlu1 %v905_v54, %s3550_s11  ;;  %v724_v54 = vadd.f32 %v719_v46, %v710_v47 }
 0x136   : > { %888 = vrot.lane.b32.xlu0 %v884_v57, %s3549_s8  ;;  %v741_v53 = vpop.permute.xlu1 %740  ;;  %v739_v57 = vpop.permute.xlu0 %738 }
 0x139   : > { %924 = vrot.lane.b32.xlu1 %v919_v59, %s3549_s8  ;;  %v731_v59 = vadd.f32 %v729_v52, %v725_v51 }
 0x13a   : > { %908 = vrot.lane.b32.xlu0 %v904_v60, %s3550_s11  ;;  %v730_v60 = vadd.f32 %v728_v55, %v724_v54  ;;  %v753_v63 = vpop.permute.xlu0 %752  ;;  %v863_v54 = vstv %s3105_s25  ;;  %s3128_s25 = sld [smem:[#allocation7 + $0x110]] }
 0x13b   : > { %v745_v62 = vadd.f32 %v741_v53, %v731_v59 }
 0x13c   : > { %v744_v3 = vadd.f32 %v739_v57, %v730_v60  ;;  %v865_v57 = vmul.f32 %v3838_v56, %v863_v54 }
 0x13e   : > { %922 = vrot.lane.b32.xlu0 %v918_v61, %s3549_s8  ;;  %v755_v61 = vpop.permute.xlu1 %754  ;;  %v758_v11 = vadd.f32 %v753_v63, %v744_v3  ;;  %v773_v13 = vpop.permute.xlu0 %772 }
 0x13f   : > { %v759_v6 = vadd.f32 %v755_v61, %v745_v62  ;;  %v864_v61 = vmul.f32 %v3841_v58, %v863_v54 }
 0x140   : > { %v764_v15 = vadd.f32 %v762_v12, %v758_v11 }
 0x141   : > { %v765_v14 = vadd.f32 %v763_v7, %v759_v6  ;;  %v897_v6 = vstv %s3108_s28  ;;  %s3129_s28 = sld [smem:[#allocation7 + $0x111]] }
 0x142   : > { %v775_v9 = vpop.permute.xlu1 %774  ;;  %v787_v20 = vpop.permute.xlu0 %786  ;;  %v778_v21 = vadd.f32 %v773_v13, %v764_v15  ;;  %v899_v11 = vmul.f32 %v3852_v2, %v897_v6 }
 0x143   : > { %v779_v19 = vadd.f32 %v775_v9, %v765_v14  ;;  %v898_v14 = vmul.f32 %v3855_v4, %v897_v6  ;;  %v1097_v6 = vstv %s3125_s13  ;;  %s3115_s13 = sld [smem:[#allocation7 + $0x103]] }
 0x144   : > { %v792_v0 = vadd.f32 %v787_v20, %v778_v21 }
 0x146   : > { %v789_v17 = vpop.permute.xlu1 %788  ;;  %v807_v29 = vpop.permute.xlu0 %806  ;;  %v798_v31 = vadd.f32 %v796_v28, %v792_v0 }
 0x147   : > { %v793_v23 = vadd.f32 %v789_v17, %v779_v19 }
 0x148   : > { %v812_v37 = vadd.f32 %v807_v29, %v798_v31 }
 0x149   : > { %v799_v30 = vadd.f32 %v797_v25, %v793_v23 }
 0x14a   : > { %v809_v27 = vpop.permute.xlu1 %808  ;;  %v821_v36 = vpop.permute.xlu0 %820 }
 0x14b   : > { %v813_v35 = vadd.f32 %v809_v27, %v799_v30  ;;  %v826_v10 = vadd.f32 %v821_v36, %v812_v37  ;;  %v961_v37 = vstv %s3113_s9  ;;  %s3131_s9 = sld [smem:[#allocation7 + $0x113]] }
 0x14c   : > { %v963_v38 = vmul.f32 %v961_v37, %v3745_v1  ;;  %v1009_v1 = vstv %s3117_s17  ;;  %s3135_s17 = sld [smem:[#allocation7 + $0x117]] }
 0x14d   : > { %v832_v47 = vadd.f32 %v830_v44, %v826_v10  ;;  %v995_v10 = vstv %s3116_s15  ;;  %v4002_v44 = vld [vmem:[%s3727_s23] sm:$0xff]  ;;  %s3134_s15 = sld [smem:[#allocation7 + $0x116]] }
 0x14e   : > { %v823_v33 = vpop.permute.xlu1 %822  ;;  %v841_v45 = vpop.permute.xlu0 %840 }
 0x14f   : > { %v827_v39 = vadd.f32 %v823_v33, %v813_v35  ;;  %v846_v53 = vadd.f32 %v841_v45, %v832_v47  ;;  %v962_v45 = vmul.f32 %v4002_v44, %v961_v37 }
 0x151   : > { %v833_v46 = vadd.f32 %v831_v41, %v827_v39  ;;  %v975_v39 = vstv %s3114_s10  ;;  %v3998_v41 = vld [vmem:[%s3727_s23 + $0x8] sm:$0x3f]  ;;  %s3132_s10 = sld [smem:[#allocation7 + $0x114]] }
 0x152   : > { %v843_v43 = vpop.permute.xlu1 %842  ;;  %v855_v52 = vpop.permute.xlu0 %854  ;;  %v976_v47 = vmul.f32 %v4002_v44, %v975_v39 }
 0x153   : > { %v847_v51 = vadd.f32 %v843_v43, %v833_v46  ;;  %v860_v60 = vadd.f32 %v855_v52, %v846_v53  ;;  %v977_v43 = vmul.f32 %v3998_v41, %v975_v39  ;;  %v997_v46 = vmul.f32 %v995_v10, %v3754_v8  ;;  %v4013_v52 = vld [vmem:[%s3727_s23 + $0x1] sm:$0xff] }
 0x154   : > { %v996_v53 = vmul.f32 %v4013_v52, %v995_v10 }
 0x155   : > { %v866_v3 = vadd.f32 %v864_v61, %v860_v60 }
 0x156   : > { %v857_v49 = vpop.permute.xlu1 %856  ;;  %v875_v62 = vpop.permute.xlu0 %874 }
 0x157   : > { %v861_v55 = vadd.f32 %v857_v49, %v847_v51  ;;  %v880_v12 = vadd.f32 %v875_v62, %v866_v3  ;;  %v1011_v49 = vmul.f32 %v1009_v1, %v3754_v8  ;;  %v1029_v51 = vstv %s3119_s7  ;;  %s3137_s7 = sld [smem:[#allocation7 + $0x119]] }
 0x158   : > { %v1031_v54 = vmul.f32 %v1029_v51, %v3768_v16  ;;  %v1030_v60 = vmul.f32 %v1029_v51, %v3771_v18  ;;  %v1077_v62 = vstv %s3123_s26  ;;  %s3111_s26 = sld [smem:[#allocation8 + $0x2]]  ;;  %v4092_v51 = vld [vmem:[%s3727_s23 + $0x9] sm:$0x3f] }
 0x159   : > { %v867_v63 = vadd.f32 %v865_v57, %v861_v55  ;;  %v1043_v55 = vstv %s3120_s12  ;;  %v1010_v57 = vmul.f32 %v4013_v52, %v1009_v1  ;;  %s3138_s12 = sld [smem:[#allocation7 + $0x11a]] }
 0x15a   : > { %v877_v59 = vpop.permute.xlu1 %876  ;;  %v1045_v8 = vmul.f32 %v1043_v55, %v3768_v16  ;;  %v1079_v16 = vmul.f32 %v3782_v24, %v1077_v62 }
 0x15b   : > { %v881_v9 = vadd.f32 %v877_v59, %v867_v63  ;;  %v1063_v59 = vstv %s3122_s29  ;;  %v4028_v63 = vld [vmem:[%s3727_s23 + $0x2] sm:$0xff]  ;;  %s3112_s29 = sld [smem:[#allocation7 + $0x100]] }
 0x15c   : > { %v1065_v61 = vmul.f32 %v3782_v24, %v1063_v59  ;;  %v1044_v3 = vmul.f32 %v4028_v63, %v1043_v55  ;;  %v1064_v18 = vmul.f32 %v3785_v26, %v1063_v59  ;;  %v1098_v26 = vmul.f32 %v3799_v34, %v1097_v6 }
 0x1ad   : > { %v3987_v5 = vpop.xlane.xlu1 %605  ;;  %v3989_v7 = vpop.xlane.xlu0 %601 }
 0x1b1   : > { %v891_v13 = vpop.permute.xlu1 %890  ;;  %v889_v17 = vpop.permute.xlu0 %888 }
 0x1b2   : > { %v895_v15 = vadd.f32 %v891_v13, %v881_v9  ;;  %v894_v19 = vadd.f32 %v889_v17, %v880_v12  ;;  %v1099_v9 = vmul.f32 %v3796_v32, %v1097_v6  ;;  %v4039_v12 = vld [vmem:[%s3727_s23 + $0x10] sm:$0xff]  ;;  %v1145_v17 = vstv %s3129_s28  ;;  %s3124_s28 = sld [smem:[#allocation7 + $0x10c]] }
 0x1b3   : > { %v1078_v13 = vmul.f32 %v4039_v12, %v1077_v62 }
 0x1b4   : > { %v901_v20 = vadd.f32 %v899_v11, %v895_v15  ;;  %v900_v22 = vadd.f32 %v898_v14, %v894_v19  ;;  %v1111_v11 = vstv %s3126_s16  ;;  %v1131_v14 = vstv %s3128_s25  ;;  %v4050_v19 = vld [vmem:[%s3727_s23 + $0x11] sm:$0xff]  ;;  %s3118_s16 = sld [smem:[#allocation7 + $0x106]]  ;;  %s3121_s25 = sld [smem:[#allocation7 + $0x109]] }
 0x1b5   : > { %v911_v21 = vpop.permute.xlu1 %910  ;;  %v909_v23 = vpop.permute.xlu0 %908  ;;  %v1113_v24 = vmul.f32 %v3796_v32, %v1111_v11  ;;  %v1133_v15 = vmul.f32 %v3810_v40, %v1131_v14  ;;  %v1147_v32 = vmul.f32 %v3810_v40, %v1145_v17  ;;  %v1132_v34 = vmul.f32 %v3813_v42, %v1131_v14 }
 0x1b6   : > { %v915_v25 = vadd.f32 %v911_v21, %v901_v20  ;;  %v914_v27 = vadd.f32 %v909_v23, %v900_v22  ;;  %v1112_v20 = vmul.f32 %v4050_v19, %v1111_v11  ;;  %v1165_v21 = vstv %s3131_s9  ;;  %s3127_s9 = sld [smem:[#allocation7 + $0x10f]] }
 0x1b7   : > { %v1167_v22 = vmul.f32 %v3824_v48, %v1165_v21  ;;  %v1179_v23 = vstv %s3132_s10  ;;  %s3130_s10 = sld [smem:[#allocation7 + $0x112]] }
 0x1b8   : > { %v1181_v40 = vmul.f32 %v3824_v48, %v1179_v23 }
 0x1b9   : > { %v925_v0 = vpop.permute.xlu1 %924  ;;  %v923_v29 = vpop.permute.xlu0 %922 }
 0x1ba   : > { %v929_v28 = vadd.f32 %v925_v0, %v915_v25  ;;  %v928_v30 = vadd.f32 %v923_v29, %v914_v27  ;;  %v1146_v25 = vmul.f32 %v3813_v42, %v1145_v17  ;;  %v1199_v27 = vstv %s3134_s15  ;;  %s3133_s15 = sld [smem:[#allocation7 + $0x115]] }
 0x1bb   : > { %v1166_v0 = vmul.f32 %v3827_v50, %v1165_v21  ;;  %v1213_v29 = vstv %s3135_s17  ;;  %v1180_v42 = vmul.f32 %v3827_v50, %v1179_v23  ;;  %s3136_s17 = sld [smem:[#allocation7 + $0x118]] }
 0x1bc   : > { %v931_v31 = vmax.f32 %v929_v28, 0.0  ;;  %v930_v33 = vmax.f32 %v928_v30, 0.0  ;;  %v1201_v28 = vmul.f32 %v3838_v56, %v1199_v27  ;;  %v1215_v48 = vmul.f32 %v3838_v56, %v1213_v29 }
 0x1bd   : > { %v1233_v30 = vstv %s3137_s7  ;;  %s3141_s7 = sld [smem:[#allocation7 + $0x181]] }
 0x1be   : > { %v935_v35 = vsel %vm603_vm0, %v931_v31, 0.0  ;;  %v932_v36 = vsel %vm599_vm1, %v930_v33, 0.0  ;;  %v1200_v31 = vmul.f32 %v3841_v58, %v1199_v27  ;;  %v1235_v33 = vmul.f32 %v3852_v2, %v1233_v30 }
 0x1bf   : > { %936 = vadd.xlane.f32.xlu1 %v935_v35  ;;  %933 = vadd.xlane.f32.xlu0 %v932_v36  ;;  %v1247_v35 = vstv %s3138_s12  ;;  %v1214_v36 = vmul.f32 %v3841_v58, %v1213_v29  ;;  %v1234_v56 = vmul.f32 %v3855_v4, %v1233_v30  ;;  %v955_v58 = vstv %s3112_s29  ;;  %s3142_s12 = sld [smem:[#allocation7 + $0x182]]  ;;  %s3144_s29 = sld [smem:[#allocation7 + $0x184]] }
 0x1c0   : > { %v1249_v50 = vmul.f32 %v3852_v2, %v1247_v35  ;;  %v1248_v37 = vmul.f32 %v3855_v4, %v1247_v35  ;;  %v952_v2 = vstv %s3111_s26  ;;  %v989_v4 = vstv %s3115_s13  ;;  %s3145_s26 = sld [smem:[#allocation7 + $0x185]]  ;;  %s3147_s13 = sld [smem:[#allocation7 + $0x187]] }
 0x1c1   : > { %v1091_v35 = vstv %s3124_s28  ;;  %s3151_s28 = sld [smem:[#allocation7 + $0x18b]] }
 0x1d0   : > { %968 = vrot.lane.b32.xlu1 %v963_v38, %s3550_s11  ;;  %v957_v38 = vmul.f32 %v3998_v41, %v955_v58 }
 0x1d4   : > { %982 = vrot.lane.b32.xlu1 %v977_v43, %s3549_s8  ;;  %v956_v43 = vmul.f32 %v4002_v44, %v955_v58 }
 0x1d5   : > { %966 = vrot.lane.b32.xlu0 %v962_v45, %s3550_s11  ;;  %v959_v45 = vadd.f32 %v957_v38, %v952_v2 }
 0x1d6   : > { %v958_v1 = vadd.f32 %v956_v43, %v952_v2  ;;  %v1092_v2 = vmul.f32 %v4050_v19, %v1091_v35 }
 0x1d8   : > { %1002 = vrot.lane.b32.xlu1 %v997_v46, %s3550_s11 }
 0x1d9   : > { %980 = vrot.lane.b32.xlu0 %v976_v47, %s3549_s8 }
 0x1dc   : > { %1016 = vrot.lane.b32.xlu1 %v1011_v49, %s3549_s8 }
 0x1dd   : > { %1000 = vrot.lane.b32.xlu0 %v996_v53, %s3550_s11  ;;  %v991_v53 = vmul.f32 %v4092_v51, %v989_v4 }
 0x1e0   : > { %1036 = vrot.lane.b32.xlu1 %v1031_v54, %s3550_s11 }
 0x1e1   : > { %1014 = vrot.lane.b32.xlu0 %v1010_v57, %s3549_s8  ;;  %v990_v57 = vmul.f32 %v4013_v52, %v989_v4 }
 0x1e4   : > { %1050 = vrot.lane.b32.xlu1 %v1045_v8, %s3549_s8 }
 0x1e5   : > { %1034 = vrot.lane.b32.xlu0 %v1030_v60, %s3550_s11 }
 0x1e8   : > { %1070 = vrot.lane.b32.xlu1 %v1065_v61, %s3550_s11 }
 0x1e9   : > { %1048 = vrot.lane.b32.xlu0 %v1044_v3, %s3549_s8 }
 0x1ec   : > { %1084 = vrot.lane.b32.xlu1 %v1079_v16, %s3549_s8  ;;  %v1023_v16 = vstv %s3118_s16  ;;  %s3148_s16 = sld [smem:[#allocation7 + $0x188]] }
 0x1ed   : > { %1068 = vrot.lane.b32.xlu0 %v1064_v18, %s3550_s11  ;;  %v1024_v14 = vmul.f32 %v4028_v63, %v1023_v16 }
 0x1f0   : > { %1104 = vrot.lane.b32.xlu1 %v1099_v9, %s3550_s11  ;;  %v4097_v9 = vld [vmem:[%s3727_s23 + $0xa] sm:$0x3f] }
 0x1f1   : > { %1082 = vrot.lane.b32.xlu0 %v1078_v13, %s3549_s8  ;;  %v1025_v11 = vmul.f32 %v4097_v9, %v1023_v16 }
 0x1f4   : > { %1118 = vrot.lane.b32.xlu1 %v1113_v24, %s3549_s8 }
 0x1f5   : > { %1102 = vrot.lane.b32.xlu0 %v1098_v26, %s3550_s11 }
 0x1f8   : > { %1138 = vrot.lane.b32.xlu1 %v1133_v15, %s3550_s11 }
 0x1f9   : > { %1116 = vrot.lane.b32.xlu0 %v1112_v20, %s3549_s8 }
 0x1fc   : > { %1152 = vrot.lane.b32.xlu1 %v1147_v32, %s3549_s8 }
 0x1fd   : > { %1136 = vrot.lane.b32.xlu0 %v1132_v34, %s3550_s11  ;;  %v1057_v34 = vstv %s3121_s25  ;;  %s3150_s25 = sld [smem:[#allocation7 + $0x18a]] }
 0x200   : > { %1172 = vrot.lane.b32.xlu1 %v1167_v22, %s3550_s11 }
 0x201   : > { %1150 = vrot.lane.b32.xlu0 %v1146_v25, %s3549_s8  ;;  %v4102_v25 = vld [vmem:[%s3727_s23 + $0x18] sm:$0x3f] }
 0x204   : > { %1186 = vrot.lane.b32.xlu1 %v1181_v40, %s3549_s8  ;;  %v1059_v40 = vmul.f32 %v4102_v25, %v1057_v34 }
 0x205   : > { %1170 = vrot.lane.b32.xlu0 %v1166_v0, %s3550_s11 }
 0x208   : > { %1206 = vrot.lane.b32.xlu1 %v1201_v28, %s3550_s11  ;;  %v1058_v28 = vmul.f32 %v4039_v12, %v1057_v34 }
 0x209   : > { %1184 = vrot.lane.b32.xlu0 %v1180_v42, %s3549_s8 }
 0x20c   : > { %1220 = vrot.lane.b32.xlu1 %v1215_v48, %s3549_s8 }
 0x20d   : > { %1204 = vrot.lane.b32.xlu0 %v1200_v31, %s3550_s11 }
 0x210   : > { %1240 = vrot.lane.b32.xlu1 %v1235_v33, %s3550_s11 }
 0x211   : > { %1218 = vrot.lane.b32.xlu0 %v1214_v36, %s3549_s8 }
 0x214   : > { %1254 = vrot.lane.b32.xlu1 %v1249_v50, %s3549_s8 }
 0x215   : > { %1238 = vrot.lane.b32.xlu0 %v1234_v56, %s3550_s11  ;;  %v4107_v56 = vld [vmem:[%s3727_s23 + $0x19] sm:$0x3f] }
 0x219   : > { %1252 = vrot.lane.b32.xlu0 %v1248_v37, %s3549_s8  ;;  %v1093_v37 = vmul.f32 %v4107_v56, %v1091_v35  ;;  %v4132_v35 = vld [vmem:[%s3727_s23 + $0x21] sm:$0xff] }
 0x24c   : > { %v4086_v39 = vpop.xlane.xlu1 %936  ;;  %v4089_v10 = vpop.xlane.xlu0 %933 }
 0x250   : > { %v969_v46 = vpop.permute.xlu1 %968  ;;  %v967_v49 = vpop.permute.xlu0 %966 }
 0x251   : > { %v973_v47 = vadd.f32 %v969_v46, %v959_v45  ;;  %v972_v54 = vadd.f32 %v967_v49, %v958_v1  ;;  %v1125_v49 = vstv %s3127_s9  ;;  %s3153_s9 = sld [smem:[#allocation7 + $0x18d]] }
 0x254   : > { %v983_v55 = vpop.permute.xlu1 %982  ;;  %v981_v59 = vpop.permute.xlu0 %980 }
 0x255   : > { %v987_v8 = vadd.f32 %v983_v55, %v973_v47  ;;  %v986_v60 = vadd.f32 %v981_v59, %v972_v54  ;;  %v4112_v55 = vld [vmem:[%s3727_s23 + $0x1a] sm:$0x3f] }
 0x257   : > { %v993_v61 = vadd.f32 %v991_v53, %v987_v8  ;;  %v992_v3 = vadd.f32 %v990_v57, %v986_v60  ;;  %v1127_v57 = vmul.f32 %v4112_v55, %v1125_v49  ;;  %v4116_v60 = vld [vmem:[%s3727_s23 + $0x12] sm:$0xff] }
 0x258   : > { %v1003_v62 = vpop.permute.xlu1 %1002  ;;  %v1001_v6 = vpop.permute.xlu0 %1000 }
 0x259   : > { %v1007_v18 = vadd.f32 %v1003_v62, %v993_v61  ;;  %v1006_v13 = vadd.f32 %v1001_v6, %v992_v3  ;;  %v1126_v61 = vmul.f32 %v4116_v60, %v1125_v49 }
 0x25c   : > { %v1017_v24 = vpop.permute.xlu1 %1016  ;;  %v1015_v15 = vpop.permute.xlu0 %1014 }
 0x25d   : > { %v1021_v26 = vadd.f32 %v1017_v24, %v1007_v18  ;;  %v1020_v17 = vadd.f32 %v1015_v15, %v1006_v13  ;;  %v1159_v13 = vstv %s3130_s10  ;;  %s3154_s10 = sld [smem:[#allocation7 + $0x18e]] }
 0x25f   : > { %v1027_v20 = vadd.f32 %v1025_v11, %v1021_v26  ;;  %v1026_v21 = vadd.f32 %v1024_v14, %v1020_v17  ;;  %v4120_v26 = vld [vmem:[%s3727_s23 + $0x28] sm:$0x3f] }
 0x260   : > { %v1037_v32 = vpop.permute.xlu1 %1036  ;;  %v1035_v22 = vpop.permute.xlu0 %1034  ;;  %v1161_v15 = vmul.f32 %v4120_v26, %v1159_v13 }
 0x261   : > { %v1041_v23 = vadd.f32 %v1037_v32, %v1027_v20  ;;  %v1040_v27 = vadd.f32 %v1035_v22, %v1026_v21  ;;  %v4124_v32 = vld [vmem:[%s3727_s23 + $0x20] sm:$0xff] }
 0x262   : > { %v1160_v21 = vmul.f32 %v4124_v32, %v1159_v13 }
 0x264   : > { %v1051_v0 = vpop.permute.xlu1 %1050  ;;  %v1049_v42 = vpop.permute.xlu0 %1048 }
 0x265   : > { %v1055_v29 = vadd.f32 %v1051_v0, %v1041_v23  ;;  %v1054_v48 = vadd.f32 %v1049_v42, %v1040_v27 }
 0x267   : > { %v1061_v30 = vadd.f32 %v1059_v40, %v1055_v29  ;;  %v1060_v33 = vadd.f32 %v1058_v28, %v1054_v48  ;;  %v1193_v28 = vstv %s3133_s15  ;;  %v4128_v48 = vld [vmem:[%s3727_s23 + $0x29] sm:$0x3f]  ;;  %s3156_s15 = sld [smem:[#allocation7 + $0x190]] }
 0x268   : > { %v1071_v31 = vpop.permute.xlu1 %1070  ;;  %v1069_v36 = vpop.permute.xlu0 %1068 }
 0x269   : > { %v1075_v50 = vadd.f32 %v1071_v31, %v1061_v30  ;;  %v1074_v58 = vadd.f32 %v1069_v36, %v1060_v33  ;;  %v1195_v30 = vmul.f32 %v4128_v48, %v1193_v28  ;;  %v1194_v36 = vmul.f32 %v4132_v35, %v1193_v28 }
 0x26c   : > { %v1085_v38 = vpop.permute.xlu1 %1084  ;;  %v1083_v45 = vpop.permute.xlu0 %1082 }
 0x26d   : > { %v1089_v43 = vadd.f32 %v1085_v38, %v1075_v50  ;;  %v1088_v46 = vadd.f32 %v1083_v45, %v1074_v58  ;;  %v1227_v45 = vstv %s3136_s17  ;;  %s3157_s17 = sld [smem:[#allocation7 + $0x191]] }
 0x26f   : > { %v1095_v1 = vadd.f32 %v1093_v37, %v1089_v43  ;;  %v1094_v47 = vadd.f32 %v1092_v2, %v1088_v46 }
 0x270   : > { %v1105_v4 = vpop.permute.xlu1 %1104  ;;  %v1103_v53 = vpop.permute.xlu0 %1102 }
 0x271   : > { %v1109_v54 = vadd.f32 %v1105_v4, %v1095_v1  ;;  %v1108_v8 = vadd.f32 %v1103_v53, %v1094_v47  ;;  %v4136_v4 = vld [vmem:[%s3727_s23 + $0x2a] sm:$0x3f] }
 0x272   : > { %v1229_v47 = vmul.f32 %v4136_v4, %v1227_v45 }
 0x274   : > { %v1119_v59 = vpop.permute.xlu1 %1118  ;;  %v1117_v3 = vpop.permute.xlu0 %1116 }
 0x275   : > { %v1123_v62 = vadd.f32 %v1119_v59, %v1109_v54  ;;  %v1122_v16 = vadd.f32 %v1117_v3, %v1108_v8  ;;  %v4140_v54 = vld [vmem:[%s3727_s23 + $0x22] sm:$0xff] }
 0x277   : > { %v1129_v6 = vadd.f32 %v1127_v57, %v1123_v62  ;;  %v1128_v11 = vadd.f32 %v1126_v61, %v1122_v16  ;;  %v1228_v57 = vmul.f32 %v4140_v54, %v1227_v45 }
 0x278   : > { %v1139_v18 = vpop.permute.xlu1 %1138  ;;  %v1137_v24 = vpop.permute.xlu0 %1136 }
 0x279   : > { %v1143_v14 = vadd.f32 %v1139_v18, %v1129_v6  ;;  %v1142_v17 = vadd.f32 %v1137_v24, %v1128_v11 }
 0x27c   : > { %v1153_v20 = vpop.permute.xlu1 %1152  ;;  %v1151_v22 = vpop.permute.xlu0 %1150 }
 0x27d   : > { %v1157_v34 = vadd.f32 %v1153_v20, %v1143_v14  ;;  %v1156_v23 = vadd.f32 %v1151_v22, %v1142_v17  ;;  %v1291_v22 = vstv %s3141_s7  ;;  %s3159_s7 = sld [smem:[#allocation7 + $0x193]] }
 0x27e   : > { %v1292_v28 = vmul.f32 %v4002_v44, %v1291_v22 }
 0x27f   : > { %v1163_v40 = vadd.f32 %v1161_v15, %v1157_v34  ;;  %v1162_v0 = vadd.f32 %v1160_v21, %v1156_v23  ;;  %v1293_v23 = vmul.f32 %v3998_v41, %v1291_v22 }
 0x280   : > { %v1173_v27 = vpop.permute.xlu1 %1172  ;;  %v1171_v29 = vpop.permute.xlu0 %1170 }
 0x281   : > { %v1177_v42 = vadd.f32 %v1173_v27, %v1163_v40  ;;  %v1176_v31 = vadd.f32 %v1171_v29, %v1162_v0  ;;  %v1305_v40 = vstv %s3142_s12  ;;  %v1325_v0 = vstv %s3144_s29  ;;  %s3160_s12 = sld [smem:[#allocation7 + $0x194]]  ;;  %s3162_s29 = sld [smem:[#allocation7 + $0x196]] }
 0x282   : > { %v1307_v27 = vmul.f32 %v3998_v41, %v1305_v40  ;;  %v1327_v29 = vmul.f32 %v4092_v51, %v1325_v0 }
 0x284   : > { %v1187_v33 = vpop.permute.xlu1 %1186  ;;  %v1185_v37 = vpop.permute.xlu0 %1184 }
 0x285   : > { %v1191_v50 = vadd.f32 %v1187_v33, %v1177_v42  ;;  %v1190_v58 = vadd.f32 %v1185_v37, %v1176_v31  ;;  %v1339_v42 = vstv %s3145_s26  ;;  %v1359_v33 = vstv %s3147_s13  ;;  %s3163_s26 = sld [smem:[#allocation7 + $0x197]]  ;;  %s3165_s13 = sld [smem:[#allocation7 + $0x199]] }
 0x286   : > { %v1341_v31 = vmul.f32 %v4092_v51, %v1339_v42  ;;  %v1373_v37 = vstv %s3148_s16  ;;  %s3166_s16 = sld [smem:[#allocation7 + $0x19a]] }
 0x287   : > { %v1197_v38 = vadd.f32 %v1195_v30, %v1191_v50  ;;  %v1196_v43 = vadd.f32 %v1194_v36, %v1190_v58  ;;  %v1306_v30 = vmul.f32 %v4002_v44, %v1305_v40  ;;  %v1326_v36 = vmul.f32 %v4013_v52, %v1325_v0 }
 0x288   : > { %v1207_v2 = vpop.permute.xlu1 %1206  ;;  %v1205_v46 = vpop.permute.xlu0 %1204  ;;  %v1361_v50 = vmul.f32 %v4097_v9, %v1359_v33  ;;  %v1340_v58 = vmul.f32 %v4013_v52, %v1339_v42 }
 0x289   : > { %v1211_v1 = vadd.f32 %v1207_v2, %v1197_v38  ;;  %v1210_v49 = vadd.f32 %v1205_v46, %v1196_v43  ;;  %v1375_v38 = vmul.f32 %v4097_v9, %v1373_v37  ;;  %v1393_v2 = vstv %s3150_s25  ;;  %s3140_s25 = sld [smem:[#allocation7 + $0x180]] }
 0x28a   : > { %v1360_v43 = vmul.f32 %v4028_v63, %v1359_v33  ;;  %v1395_v45 = vmul.f32 %v4102_v25, %v1393_v2  ;;  %v1407_v46 = vstv %s3151_s28  ;;  %s3139_s28 = sld [smem:[#allocation8 + $0x3]] }
 0x28b   : > { %v1563_v0 = vstv %s3165_s13  ;;  %s3169_s13 = sld [smem:[#allocation7 + $0x201]] }
 0x28c   : > { %v1221_v53 = vpop.permute.xlu1 %1220  ;;  %v1219_v59 = vpop.permute.xlu0 %1218  ;;  %v1577_v42 = vstv %s3166_s16  ;;  %v1564_v33 = vmul.f32 %v4140_v54, %v1563_v0  ;;  %s3170_s16 = sld [smem:[#allocation7 + $0x202]] }
 0x28d   : > { %v1225_v8 = vadd.f32 %v1221_v53, %v1211_v1  ;;  %v1224_v61 = vadd.f32 %v1219_v59, %v1210_v49  ;;  %v1374_v1 = vmul.f32 %v4028_v63, %v1373_v37  ;;  %v1427_v49 = vstv %s3153_s9  ;;  %s3143_s9 = sld [smem:[#allocation7 + $0x183]] }
 0x28e   : > { %v1394_v53 = vmul.f32 %v4039_v12, %v1393_v2  ;;  %v1408_v59 = vmul.f32 %v4039_v12, %v1407_v46 }
 0x28f   : > { %v1231_v62 = vadd.f32 %v1229_v47, %v1225_v8  ;;  %v1230_v16 = vadd.f32 %v1228_v57, %v1224_v61  ;;  %v1409_v47 = vmul.f32 %v4102_v25, %v1407_v46  ;;  %v1429_v57 = vmul.f32 %v4107_v56, %v1427_v49 }
 0x290   : > { %v1241_v3 = vpop.permute.xlu1 %1240  ;;  %v1239_v6 = vpop.permute.xlu0 %1238  ;;  %v1441_v8 = vstv %s3154_s10  ;;  %s3146_s10 = sld [smem:[#allocation7 + $0x186]] }
 0x291   : > { %v1245_v18 = vadd.f32 %v1241_v3, %v1231_v62  ;;  %v1244_v11 = vadd.f32 %v1239_v6, %v1230_v16  ;;  %v1443_v61 = vmul.f32 %v4107_v56, %v1441_v8  ;;  %v1461_v62 = vstv %s3156_s15  ;;  %s3149_s15 = sld [smem:[#allocation7 + $0x189]] }
 0x292   : > { %v1428_v3 = vmul.f32 %v4050_v19, %v1427_v49  ;;  %v1463_v16 = vmul.f32 %v4112_v55, %v1461_v62  ;;  %v1475_v6 = vstv %s3157_s17  ;;  %s3152_s17 = sld [smem:[#allocation7 + $0x18c]] }
 0x294   : > { %v1255_v13 = vpop.permute.xlu1 %1254  ;;  %v1253_v14 = vpop.permute.xlu0 %1252 }
 0x295   : > { %v1259_v24 = vadd.f32 %v1255_v13, %v1245_v18  ;;  %v1258_v15 = vadd.f32 %v1253_v14, %v1244_v11  ;;  %v1442_v18 = vmul.f32 %v4050_v19, %v1441_v8  ;;  %v1477_v11 = vmul.f32 %v4112_v55, %v1475_v6 }
 0x296   : > { %v1495_v13 = vstv %s3159_s7  ;;  %s3155_s7 = sld [smem:[#allocation7 + $0x18f]] }
 0x297   : > { %v1261_v17 = vmax.f32 %v1259_v24, 0.0  ;;  %v1260_v20 = vmax.f32 %v1258_v15, 0.0  ;;  %v1462_v24 = vmul.f32 %v4116_v60, %v1461_v62  ;;  %v1497_v14 = vmul.f32 %v4120_v26, %v1495_v13 }
 0x298   : > { %v1509_v15 = vstv %s3160_s12  ;;  %s3158_s12 = sld [smem:[#allocation7 + $0x192]] }
 0x299   : > { %v1265_v21 = vsel %vm603_vm0, %v1261_v17, 0.0  ;;  %v1262_v34 = vsel %vm599_vm1, %v1260_v20, 0.0  ;;  %v1476_v17 = vmul.f32 %v4116_v60, %v1475_v6  ;;  %v1511_v20 = vmul.f32 %v4120_v26, %v1509_v15 }
 0x29a   : > { %1266 = vadd.xlane.f32.xlu1 %v1265_v21  ;;  %1263 = vadd.xlane.f32.xlu0 %v1262_v34  ;;  %v1529_v21 = vstv %s3162_s29  ;;  %v1496_v34 = vmul.f32 %v4124_v32, %v1495_v13  ;;  %v1510_v40 = vmul.f32 %v4124_v32, %v1509_v15  ;;  %v1353_v13 = vstv %s3146_s10  ;;  %s3161_s29 = sld [smem:[#allocation7 + $0x195]]  ;;  %s3176_s10 = sld [smem:[#allocation7 + $0x208]] }
 0x29b   : > { %v1531_v22 = vmul.f32 %v4128_v48, %v1529_v21  ;;  %v1355_v15 = vmul.f32 %v4097_v9, %v1353_v13 }
 0x2ab   : > { %1298 = vrot.lane.b32.xlu1 %v1293_v23, %s3550_s11  ;;  %v1543_v23 = vstv %s3163_s26  ;;  %s3164_s26 = sld [smem:[#allocation7 + $0x198]] }
 0x2af   : > { %1312 = vrot.lane.b32.xlu1 %v1307_v27, %s3549_s8  ;;  %v1545_v27 = vmul.f32 %v4128_v48, %v1543_v23 }
 0x2b0   : > { %1296 = vrot.lane.b32.xlu0 %v1292_v28, %s3550_s11  ;;  %v1530_v28 = vmul.f32 %v4132_v35, %v1529_v21  ;;  %v1354_v21 = vmul.f32 %v4028_v63, %v1353_v13 }
 0x2b3   : > { %1332 = vrot.lane.b32.xlu1 %v1327_v29, %s3550_s11  ;;  %v1565_v29 = vmul.f32 %v4136_v4, %v1563_v0 }
 0x2b4   : > { %1310 = vrot.lane.b32.xlu0 %v1306_v30, %s3549_s8  ;;  %v1544_v30 = vmul.f32 %v4132_v35, %v1543_v23 }
 0x2b7   : > { %1346 = vrot.lane.b32.xlu1 %v1341_v31, %s3549_s8  ;;  %v1579_v31 = vmul.f32 %v4136_v4, %v1577_v42 }
 0x2b8   : > { %1330 = vrot.lane.b32.xlu0 %v1326_v36, %s3550_s11  ;;  %v1578_v36 = vmul.f32 %v4140_v54, %v1577_v42 }
 0x2bb   : > { %1366 = vrot.lane.b32.xlu1 %v1361_v50, %s3550_s11  ;;  %v1285_v50 = vstv %s3140_s25  ;;  %s3172_s25 = sld [smem:[#allocation7 + $0x204]] }
 0x2bc   : > { %1344 = vrot.lane.b32.xlu0 %v1340_v58, %s3549_s8  ;;  %v1287_v37 = vmul.f32 %v3998_v41, %v1285_v50  ;;  %v1282_v58 = vstv %s3139_s28  ;;  %v1286_v2 = vmul.f32 %v4002_v44, %v1285_v50  ;;  %s3173_s28 = sld [smem:[#allocation7 + $0x205]] }
 0x2bf   : > { %1380 = vrot.lane.b32.xlu1 %v1375_v38, %s3549_s8 }
 0x2c0   : > { %1364 = vrot.lane.b32.xlu0 %v1360_v43, %s3550_s11 }
 0x2c3   : > { %1400 = vrot.lane.b32.xlu1 %v1395_v45, %s3550_s11  ;;  %v1289_v45 = vadd.f32 %v1287_v37, %v1282_v58 }
 0x2c4   : > { %1378 = vrot.lane.b32.xlu0 %v1374_v1, %s3549_s8  ;;  %v1288_v1 = vadd.f32 %v1286_v2, %v1282_v58 }
 0x2c7   : > { %1414 = vrot.lane.b32.xlu1 %v1409_v47, %s3549_s8  ;;  %v1319_v47 = vstv %s3143_s9  ;;  %s3175_s9 = sld [smem:[#allocation7 + $0x207]] }
 0x2c8   : > { %1398 = vrot.lane.b32.xlu0 %v1394_v53, %s3550_s11 }
 0x2cb   : > { %1434 = vrot.lane.b32.xlu1 %v1429_v57, %s3550_s11  ;;  %v1321_v57 = vmul.f32 %v4092_v51, %v1319_v47 }
 0x2cc   : > { %1412 = vrot.lane.b32.xlu0 %v1408_v59, %s3549_s8 }
 0x2cf   : > { %1448 = vrot.lane.b32.xlu1 %v1443_v61, %s3549_s8  ;;  %v1320_v61 = vmul.f32 %v4013_v52, %v1319_v47 }
 0x2d0   : > { %1432 = vrot.lane.b32.xlu0 %v1428_v3, %s3550_s11 }
 0x2d3   : > { %1468 = vrot.lane.b32.xlu1 %v1463_v16, %s3550_s11 }
 0x2d4   : > { %1446 = vrot.lane.b32.xlu0 %v1442_v18, %s3549_s8 }
 0x2d7   : > { %1482 = vrot.lane.b32.xlu1 %v1477_v11, %s3549_s8 }
 0x2d8   : > { %1466 = vrot.lane.b32.xlu0 %v1462_v24, %s3550_s11 }
 0x2db   : > { %1502 = vrot.lane.b32.xlu1 %v1497_v14, %s3550_s11 }
 0x2dc   : > { %1480 = vrot.lane.b32.xlu0 %v1476_v17, %s3549_s8 }
 0x2df   : > { %1516 = vrot.lane.b32.xlu1 %v1511_v20, %s3549_s8 }
 0x2e0   : > { %1500 = vrot.lane.b32.xlu0 %v1496_v34, %s3550_s11 }
 0x2e3   : > { %1536 = vrot.lane.b32.xlu1 %v1531_v22, %s3550_s11 }
 0x2e4   : > { %1514 = vrot.lane.b32.xlu0 %v1510_v40, %s3549_s8 }
 0x2e7   : > { %1550 = vrot.lane.b32.xlu1 %v1545_v27, %s3549_s8 }
 0x2e8   : > { %1534 = vrot.lane.b32.xlu0 %v1530_v28, %s3550_s11  ;;  %v1387_v28 = vstv %s3149_s15  ;;  %s3178_s15 = sld [smem:[#allocation7 + $0x20a]] }
 0x2eb   : > { %1570 = vrot.lane.b32.xlu1 %v1565_v29, %s3550_s11 }
 0x2ec   : > { %1548 = vrot.lane.b32.xlu0 %v1544_v30, %s3549_s8  ;;  %v1389_v30 = vmul.f32 %v4102_v25, %v1387_v28 }
 0x2ef   : > { %1584 = vrot.lane.b32.xlu1 %v1579_v31, %s3549_s8 }
 0x2f0   : > { %1568 = vrot.lane.b32.xlu0 %v1564_v33, %s3550_s11 }
 0x2f4   : > { %1582 = vrot.lane.b32.xlu0 %v1578_v36, %s3549_s8  ;;  %v1388_v36 = vmul.f32 %v4039_v12, %v1387_v28 }
 0x327   : > { %v4218_v38 = vpop.xlane.xlu1 %1266  ;;  %v4221_v43 = vpop.xlane.xlu0 %1263 }
 0x32b   : > { %v1299_v46 = vpop.permute.xlu1 %1298  ;;  %v1297_v53 = vpop.permute.xlu0 %1296 }
 0x32c   : > { %v1303_v49 = vadd.f32 %v1299_v46, %v1289_v45  ;;  %v1302_v8 = vadd.f32 %v1297_v53, %v1288_v1  ;;  %v1421_v1 = vstv %s3152_s17  ;;  %s3179_s17 = sld [smem:[#allocation7 + $0x20b]] }
 0x32d   : > { %v1423_v53 = vmul.f32 %v4107_v56, %v1421_v1 }
 0x32f   : > { %v1313_v59 = vpop.permute.xlu1 %1312  ;;  %v1311_v3 = vpop.permute.xlu0 %1310 }
 0x330   : > { %v1317_v62 = vadd.f32 %v1313_v59, %v1303_v49  ;;  %v1316_v16 = vadd.f32 %v1311_v3, %v1302_v8  ;;  %v1422_v59 = vmul.f32 %v4050_v19, %v1421_v1 }
 0x332   : > { %v1323_v6 = vadd.f32 %v1321_v57, %v1317_v62  ;;  %v1322_v11 = vadd.f32 %v1320_v61, %v1316_v16 }
 0x333   : > { %v1333_v18 = vpop.permute.xlu1 %1332  ;;  %v1331_v24 = vpop.permute.xlu0 %1330 }
 0x334   : > { %v1337_v14 = vadd.f32 %v1333_v18, %v1323_v6  ;;  %v1336_v17 = vadd.f32 %v1331_v24, %v1322_v11  ;;  %v1455_v11 = vstv %s3155_s7  ;;  %s3181_s7 = sld [smem:[#allocation7 + $0x20d]] }
 0x337   : > { %v1347_v20 = vpop.permute.xlu1 %1346  ;;  %v1345_v22 = vpop.permute.xlu0 %1344 }
 0x338   : > { %v1351_v34 = vadd.f32 %v1347_v20, %v1337_v14  ;;  %v1350_v23 = vadd.f32 %v1345_v22, %v1336_v17  ;;  %v1457_v14 = vmul.f32 %v4112_v55, %v1455_v11  ;;  %v1456_v20 = vmul.f32 %v4116_v60, %v1455_v11 }
 0x33a   : > { %v1357_v40 = vadd.f32 %v1355_v15, %v1351_v34  ;;  %v1356_v0 = vadd.f32 %v1354_v21, %v1350_v23 }
 0x33b   : > { %v1367_v27 = vpop.permute.xlu1 %1366  ;;  %v1365_v29 = vpop.permute.xlu0 %1364 }
 0x33c   : > { %v1371_v42 = vadd.f32 %v1367_v27, %v1357_v40  ;;  %v1370_v31 = vadd.f32 %v1365_v29, %v1356_v0  ;;  %v1489_v0 = vstv %s3158_s12  ;;  %s3182_s12 = sld [smem:[#allocation7 + $0x20e]] }
 0x33f   : > { %v1381_v33 = vpop.permute.xlu1 %1380  ;;  %v1379_v37 = vpop.permute.xlu0 %1378 }
 0x340   : > { %v1385_v50 = vadd.f32 %v1381_v33, %v1371_v42  ;;  %v1384_v58 = vadd.f32 %v1379_v37, %v1370_v31  ;;  %v1491_v42 = vmul.f32 %v4120_v26, %v1489_v0  ;;  %v1490_v33 = vmul.f32 %v4124_v32, %v1489_v0 }
 0x342   : > { %v1391_v2 = vadd.f32 %v1389_v30, %v1385_v50  ;;  %v1390_v46 = vadd.f32 %v1388_v36, %v1384_v58 }
 0x343   : > { %v1401_v45 = vpop.permute.xlu1 %1400  ;;  %v1399_v47 = vpop.permute.xlu0 %1398 }
 0x344   : > { %v1405_v49 = vadd.f32 %v1401_v45, %v1391_v2  ;;  %v1404_v57 = vadd.f32 %v1399_v47, %v1390_v46  ;;  %v1523_v46 = vstv %s3161_s29  ;;  %s3184_s29 = sld [smem:[#allocation7 + $0x210]] }
 0x347   : > { %v1415_v8 = vpop.permute.xlu1 %1414  ;;  %v1413_v62 = vpop.permute.xlu0 %1412 }
 0x348   : > { %v1419_v61 = vadd.f32 %v1415_v8, %v1405_v49  ;;  %v1418_v3 = vadd.f32 %v1413_v62, %v1404_v57  ;;  %v1525_v49 = vmul.f32 %v4128_v48, %v1523_v46  ;;  %v1524_v8 = vmul.f32 %v4132_v35, %v1523_v46 }
 0x34a   : > { %v1425_v16 = vadd.f32 %v1423_v53, %v1419_v61  ;;  %v1424_v18 = vadd.f32 %v1422_v59, %v1418_v3 }
 0x34b   : > { %v1435_v6 = vpop.permute.xlu1 %1434  ;;  %v1433_v13 = vpop.permute.xlu0 %1432 }
 0x34c   : > { %v1439_v24 = vadd.f32 %v1435_v6, %v1425_v16  ;;  %v1438_v15 = vadd.f32 %v1433_v13, %v1424_v18  ;;  %v1557_v18 = vstv %s3164_s26  ;;  %s3185_s26 = sld [smem:[#allocation7 + $0x211]] }
 0x34f   : > { %v1449_v17 = vpop.permute.xlu1 %1448  ;;  %v1447_v34 = vpop.permute.xlu0 %1446 }
 0x350   : > { %v1453_v21 = vadd.f32 %v1449_v17, %v1439_v24  ;;  %v1452_v22 = vadd.f32 %v1447_v34, %v1438_v15  ;;  %v1559_v24 = vmul.f32 %v4136_v4, %v1557_v18  ;;  %v1558_v17 = vmul.f32 %v4140_v54, %v1557_v18 }
 0x352   : > { %v1459_v23 = vadd.f32 %v1457_v14, %v1453_v21  ;;  %v1458_v27 = vadd.f32 %v1456_v20, %v1452_v22 }
 0x353   : > { %v1469_v40 = vpop.permute.xlu1 %1468  ;;  %v1467_v28 = vpop.permute.xlu0 %1466 }
 0x354   : > { %v1473_v29 = vadd.f32 %v1469_v40, %v1459_v23  ;;  %v1472_v30 = vadd.f32 %v1467_v28, %v1458_v27 }
 0x357   : > { %v1483_v31 = vpop.permute.xlu1 %1482  ;;  %v1481_v50 = vpop.permute.xlu0 %1480 }
 0x358   : > { %v1487_v36 = vadd.f32 %v1483_v31, %v1473_v29  ;;  %v1486_v37 = vadd.f32 %v1481_v50, %v1472_v30 }
 0x35a   : > { %v1493_v58 = vadd.f32 %v1491_v42, %v1487_v36  ;;  %v1492_v45 = vadd.f32 %v1490_v33, %v1486_v37 }
 0x35b   : > { %v1503_v2 = vpop.permute.xlu1 %1502  ;;  %v1501_v1 = vpop.permute.xlu0 %1500 }
 0x35c   : > { %v1507_v47 = vadd.f32 %v1503_v2, %v1493_v58  ;;  %v1506_v53 = vadd.f32 %v1501_v1, %v1492_v45  ;;  %v1621_v58 = vstv %s3169_s13  ;;  %v1635_v45 = vstv %s3170_s16  ;;  %s3187_s13 = sld [smem:[#allocation7 + $0x213]]  ;;  %s3188_s16 = sld [smem:[#allocation7 + $0x214]] }
 0x35d   : > { %v1623_v2 = vmul.f32 %v3998_v41, %v1621_v58  ;;  %v1637_v46 = vmul.f32 %v3998_v41, %v1635_v45  ;;  %v1655_v1 = vstv %s3172_s25  ;;  %s3190_s25 = sld [smem:[#allocation7 + $0x216]] }
 0x35e   : > { %v1656_v41 = vmul.f32 %v4013_v52, %v1655_v1 }
 0x35f   : > { %v1517_v57 = vpop.permute.xlu1 %1516  ;;  %v1515_v61 = vpop.permute.xlu0 %1514 }
 0x360   : > { %v1521_v59 = vadd.f32 %v1517_v57, %v1507_v47  ;;  %v1520_v62 = vadd.f32 %v1515_v61, %v1506_v53  ;;  %v1622_v47 = vmul.f32 %v4002_v44, %v1621_v58  ;;  %v1669_v53 = vstv %s3173_s28  ;;  %s3191_s28 = sld [smem:[#allocation7 + $0x217]] }
 0x361   : > { %v1636_v57 = vmul.f32 %v4002_v44, %v1635_v45  ;;  %v1670_v44 = vmul.f32 %v4013_v52, %v1669_v53 }
 0x362   : > { %v1527_v3 = vadd.f32 %v1525_v49, %v1521_v59  ;;  %v1526_v6 = vadd.f32 %v1524_v8, %v1520_v62  ;;  %v1657_v49 = vmul.f32 %v4092_v51, %v1655_v1  ;;  %v1671_v8 = vmul.f32 %v4092_v51, %v1669_v53 }
 0x363   : > { %v1537_v16 = vpop.permute.xlu1 %1536  ;;  %v1535_v11 = vpop.permute.xlu0 %1534  ;;  %v1689_v59 = vstv %s3175_s9  ;;  %v1703_v62 = vstv %s3176_s10  ;;  %s3193_s9 = sld [smem:[#allocation7 + $0x219]]  ;;  %s3194_s10 = sld [smem:[#allocation7 + $0x21a]] }
 0x364   : > { %v1541_v13 = vadd.f32 %v1537_v16, %v1527_v3  ;;  %v1540_v14 = vadd.f32 %v1535_v11, %v1526_v6  ;;  %v1691_v61 = vmul.f32 %v4097_v9, %v1689_v59  ;;  %v1705_v3 = vmul.f32 %v4097_v9, %v1703_v62 }
 0x365   : > { %v1723_v16 = vstv %s3178_s15  ;;  %v1690_v6 = vmul.f32 %v4028_v63, %v1689_v59  ;;  %v1737_v11 = vstv %s3179_s17  ;;  %v1704_v52 = vmul.f32 %v4028_v63, %v1703_v62  ;;  %s3168_s15 = sld [smem:[#allocation7 + $0x200]]  ;;  %s3167_s17 = sld [smem:[#allocation8 + $0x4]]  ;;  %v4320_v62 = vld [vmem:[%s3727_s23] sm:$0xff] }
 0x366   : > { %v1725_v18 = vmul.f32 %v4102_v25, %v1723_v16  ;;  %v1738_v63 = vmul.f32 %v4039_v12, %v1737_v11 }
 0x367   : > { %v1551_v15 = vpop.permute.xlu1 %1550  ;;  %v1549_v21 = vpop.permute.xlu0 %1548 }
 0x368   : > { %v1555_v20 = vadd.f32 %v1551_v15, %v1541_v13  ;;  %v1554_v34 = vadd.f32 %v1549_v21, %v1540_v14  ;;  %v1739_v13 = vmul.f32 %v4102_v25, %v1737_v11  ;;  %v1724_v14 = vmul.f32 %v4039_v12, %v1723_v16 }
 0x369   : > { %v1791_v21 = vstv %s3184_s29  ;;  %v1893_v58 = vstv %s3193_s9  ;;  %s3177_s29 = sld [smem:[#allocation7 + $0x209]] }
 0x36a   : > { %v1561_v22 = vadd.f32 %v1559_v24, %v1555_v20  ;;  %v1560_v40 = vadd.f32 %v1558_v17, %v1554_v34  ;;  %v1757_v24 = vstv %s3181_s7  ;;  %v1771_v17 = vstv %s3182_s12  ;;  %s3171_s7 = sld [smem:[#allocation7 + $0x203]]  ;;  %s3174_s12 = sld [smem:[#allocation7 + $0x206]] }
 0x36b   : > { %v1571_v23 = vpop.permute.xlu1 %1570  ;;  %v1569_v27 = vpop.permute.xlu0 %1568  ;;  %v1759_v15 = vmul.f32 %v4107_v56, %v1757_v24  ;;  %v1773_v20 = vmul.f32 %v4107_v56, %v1771_v17  ;;  %v1758_v34 = vmul.f32 %v4050_v19, %v1757_v24  ;;  %v1772_v12 = vmul.f32 %v4050_v19, %v1771_v17  ;;  %v4327_v17 = vld [vmem:[%s3727_s23 + $0x1] sm:$0xff]  ;;  %s3197_s9 = sld [smem:[#allocation7 + $0x281]] }
 0x36c   : > { %v1575_v0 = vadd.f32 %v1571_v23, %v1561_v22  ;;  %v1574_v28 = vadd.f32 %v1569_v27, %v1560_v40  ;;  %v1793_v22 = vmul.f32 %v4112_v55, %v1791_v21  ;;  %v1805_v23 = vstv %s3185_s26  ;;  %s3180_s26 = sld [smem:[#allocation7 + $0x20c]] }
 0x36d   : > { %v1807_v40 = vmul.f32 %v4112_v55, %v1805_v23  ;;  %v1825_v27 = vstv %s3187_s13  ;;  %v1806_v19 = vmul.f32 %v4116_v60, %v1805_v23  ;;  %v1895_v45 = vmul.f32 %v4136_v4, %v1893_v58  ;;  %s3183_s13 = sld [smem:[#allocation7 + $0x20f]] }
 0x36f   : > { %v1585_v29 = vpop.permute.xlu1 %1584  ;;  %v1583_v30 = vpop.permute.xlu0 %1582 }
 0x370   : > { %v1589_v42 = vadd.f32 %v1585_v29, %v1575_v0  ;;  %v1588_v31 = vadd.f32 %v1583_v30, %v1574_v28  ;;  %v1792_v0 = vmul.f32 %v4116_v60, %v1791_v21  ;;  %v1827_v28 = vmul.f32 %v4120_v26, %v1825_v27 }
 0x371   : > { %v1839_v29 = vstv %s3188_s16  ;;  %v1859_v30 = vstv %s3190_s25  ;;  %v1649_v11 = vstv %s3171_s7  ;;  %s3186_s16 = sld [smem:[#allocation7 + $0x212]]  ;;  %s3189_s25 = sld [smem:[#allocation7 + $0x215]] }
 0x372   : > { %v1591_v33 = vmax.f32 %v1589_v42, 0.0  ;;  %v1590_v36 = vmax.f32 %v1588_v31, 0.0  ;;  %v1841_v42 = vmul.f32 %v4120_v26, %v1839_v29  ;;  %v1826_v31 = vmul.f32 %v4124_v32, %v1825_v27  ;;  %s3203_s7 = sld [smem:[#allocation7 + $0x287]] }
 0x373   : > { %v1651_v24 = vmul.f32 %v4092_v51, %v1649_v11 }
 0x374   : > { %v1595_v50 = vsel %vm603_vm0, %v1591_v33, 0.0  ;;  %v1592_v37 = vsel %vm599_vm1, %v1590_v36, 0.0  ;;  %v1861_v33 = vmul.f32 %v4128_v48, %v1859_v30  ;;  %v1873_v36 = vstv %s3191_s28  ;;  %s3192_s28 = sld [smem:[#allocation7 + $0x218]] }
 0x375   : > { %1596 = vadd.xlane.f32.xlu1 %v1595_v50  ;;  %1593 = vadd.xlane.f32.xlu0 %v1592_v37  ;;  %v1840_v50 = vmul.f32 %v4124_v32, %v1839_v29  ;;  %v1875_v37 = vmul.f32 %v4128_v48, %v1873_v36  ;;  %v1874_v1 = vmul.f32 %v4132_v35, %v1873_v36 }
 0x386   : > { %1628 = vrot.lane.b32.xlu1 %v1623_v2, %s3550_s11  ;;  %v1860_v2 = vmul.f32 %v4132_v35, %v1859_v30 }
 0x38a   : > { %1642 = vrot.lane.b32.xlu1 %v1637_v46, %s3549_s8  ;;  %v1907_v46 = vstv %s3194_s10  ;;  %s3198_s10 = sld [smem:[#allocation7 + $0x282]] }
 0x38b   : > { %1626 = vrot.lane.b32.xlu0 %v1622_v47, %s3550_s11  ;;  %v1909_v47 = vmul.f32 %v4136_v4, %v1907_v46  ;;  %v1908_v53 = vmul.f32 %v4140_v54, %v1907_v46 }
 0x38e   : > { %1662 = vrot.lane.b32.xlu1 %v1657_v49, %s3550_s11  ;;  %v1894_v49 = vmul.f32 %v4140_v54, %v1893_v58  ;;  %v1717_v58 = vstv %s3177_s29  ;;  %s3206_s29 = sld [smem:[#allocation7 + $0x28a]] }
 0x38f   : > { %1640 = vrot.lane.b32.xlu0 %v1636_v57, %s3549_s8  ;;  %v1615_v57 = vstv %s3168_s15  ;;  %v1719_v46 = vmul.f32 %v4102_v25, %v1717_v58  ;;  %s3200_s15 = sld [smem:[#allocation7 + $0x284]] }
 0x392   : > { %1676 = vrot.lane.b32.xlu1 %v1671_v8, %s3549_s8  ;;  %v4314_v8 = vld [vmem:[%s3727_s23 + $0x8] sm:$0x3f] }
 0x393   : > { %1660 = vrot.lane.b32.xlu0 %v1656_v41, %s3550_s11  ;;  %v1617_v59 = vmul.f32 %v4314_v8, %v1615_v57  ;;  %v1612_v41 = vstv %s3167_s17  ;;  %s3201_s17 = sld [smem:[#allocation7 + $0x285]] }
 0x395   : > { %v1619_v16 = vadd.f32 %v1617_v59, %v1612_v41 }
 0x396   : > { %1696 = vrot.lane.b32.xlu1 %v1691_v61, %s3550_s11 }
 0x397   : > { %1674 = vrot.lane.b32.xlu0 %v1670_v44, %s3549_s8  ;;  %v1616_v44 = vmul.f32 %v4320_v62, %v1615_v57 }
 0x39a   : > { %1710 = vrot.lane.b32.xlu1 %v1705_v3, %s3549_s8 }
 0x39b   : > { %1694 = vrot.lane.b32.xlu0 %v1690_v6, %s3550_s11 }
 0x39e   : > { %1730 = vrot.lane.b32.xlu1 %v1725_v18, %s3550_s11  ;;  %v1618_v18 = vadd.f32 %v1616_v44, %v1612_v41 }
 0x39f   : > { %1708 = vrot.lane.b32.xlu0 %v1704_v52, %s3549_s8 }
 0x3a2   : > { %1744 = vrot.lane.b32.xlu1 %v1739_v13, %s3549_s8 }
 0x3a3   : > { %1728 = vrot.lane.b32.xlu0 %v1724_v14, %s3550_s11 }
 0x3a6   : > { %1764 = vrot.lane.b32.xlu1 %v1759_v15, %s3550_s11 }
 0x3a7   : > { %1742 = vrot.lane.b32.xlu0 %v1738_v63, %s3549_s8  ;;  %v1650_v63 = vmul.f32 %v4327_v17, %v1649_v11 }
 0x3aa   : > { %1778 = vrot.lane.b32.xlu1 %v1773_v20, %s3549_s8 }
 0x3ab   : > { %1762 = vrot.lane.b32.xlu0 %v1758_v34, %s3550_s11 }
 0x3ae   : > { %1798 = vrot.lane.b32.xlu1 %v1793_v22, %s3550_s11 }
 0x3af   : > { %1776 = vrot.lane.b32.xlu0 %v1772_v12, %s3549_s8 }
 0x3b2   : > { %1812 = vrot.lane.b32.xlu1 %v1807_v40, %s3549_s8  ;;  %v1683_v40 = vstv %s3174_s12  ;;  %s3204_s12 = sld [smem:[#allocation7 + $0x288]] }
 0x3b3   : > { %1796 = vrot.lane.b32.xlu0 %v1792_v0, %s3550_s11 }
 0x3b6   : > { %1832 = vrot.lane.b32.xlu1 %v1827_v28, %s3550_s11  ;;  %v1685_v28 = vmul.f32 %v4097_v9, %v1683_v40 }
 0x3b7   : > { %1810 = vrot.lane.b32.xlu0 %v1806_v19, %s3549_s8  ;;  %v4332_v19 = vld [vmem:[%s3727_s23 + $0x2] sm:$0xff] }
 0x3ba   : > { %1846 = vrot.lane.b32.xlu1 %v1841_v42, %s3549_s8  ;;  %v1684_v42 = vmul.f32 %v4332_v19, %v1683_v40 }
 0x3bb   : > { %1830 = vrot.lane.b32.xlu0 %v1826_v31, %s3550_s11 }
 0x3be   : > { %1866 = vrot.lane.b32.xlu1 %v1861_v33, %s3550_s11 }
 0x3bf   : > { %1844 = vrot.lane.b32.xlu0 %v1840_v50, %s3549_s8 }
 0x3c2   : > { %1880 = vrot.lane.b32.xlu1 %v1875_v37, %s3549_s8 }
 0x3c3   : > { %1864 = vrot.lane.b32.xlu0 %v1860_v2, %s3550_s11 }
 0x3c6   : > { %1900 = vrot.lane.b32.xlu1 %v1895_v45, %s3550_s11 }
 0x3c7   : > { %1878 = vrot.lane.b32.xlu0 %v1874_v1, %s3549_s8 }
 0x3ca   : > { %1914 = vrot.lane.b32.xlu1 %v1909_v47, %s3549_s8  ;;  %v4337_v47 = vld [vmem:[%s3727_s23 + $0x10] sm:$0xff] }
 0x3cb   : > { %1898 = vrot.lane.b32.xlu0 %v1894_v49, %s3550_s11  ;;  %v1718_v49 = vmul.f32 %v4337_v47, %v1717_v58 }
 0x3cf   : > { %1912 = vrot.lane.b32.xlu0 %v1908_v53, %s3549_s8 }
 0x402   : > { %v4317_v61 = vpop.xlane.xlu1 %1596  ;;  %v4323_v3 = vpop.xlane.xlu0 %1593 }
 0x406   : > { %v1629_v6 = vpop.permute.xlu1 %1628  ;;  %v1627_v13 = vpop.permute.xlu0 %1626 }
 0x407   : > { %v1633_v52 = vadd.f32 %v1629_v6, %v1619_v16  ;;  %v1632_v14 = vadd.f32 %v1627_v13, %v1618_v18  ;;  %v1751_v6 = vstv %s3180_s26  ;;  %s3207_s26 = sld [smem:[#allocation7 + $0x28b]] }
 0x40a   : > { %v1643_v15 = vpop.permute.xlu1 %1642  ;;  %v1641_v21 = vpop.permute.xlu0 %1640 }
 0x40b   : > { %v1647_v20 = vadd.f32 %v1643_v15, %v1633_v52  ;;  %v1646_v34 = vadd.f32 %v1641_v21, %v1632_v14  ;;  %v1753_v52 = vmul.f32 %v4107_v56, %v1751_v6 }
 0x40d   : > { %v1653_v22 = vadd.f32 %v1651_v24, %v1647_v20  ;;  %v1652_v12 = vadd.f32 %v1650_v63, %v1646_v34  ;;  %v4342_v24 = vld [vmem:[%s3727_s23 + $0x11] sm:$0xff] }
 0x40e   : > { %v1663_v23 = vpop.permute.xlu1 %1662  ;;  %v1661_v27 = vpop.permute.xlu0 %1660  ;;  %v1752_v14 = vmul.f32 %v4342_v24, %v1751_v6 }
 0x40f   : > { %v1667_v0 = vadd.f32 %v1663_v23, %v1653_v22  ;;  %v1666_v51 = vadd.f32 %v1661_v27, %v1652_v12  ;;  %v1785_v23 = vstv %s3183_s13  ;;  %s3209_s13 = sld [smem:[#allocation7 + $0x28d]] }
 0x410   : > { %v1787_v27 = vmul.f32 %v4112_v55, %v1785_v23 }
 0x412   : > { %v1677_v29 = vpop.permute.xlu1 %1676  ;;  %v1675_v31 = vpop.permute.xlu0 %1674 }
 0x413   : > { %v1681_v30 = vadd.f32 %v1677_v29, %v1667_v0  ;;  %v1680_v33 = vadd.f32 %v1675_v31, %v1666_v51 }
 0x415   : > { %v1687_v36 = vadd.f32 %v1685_v28, %v1681_v30  ;;  %v1686_v37 = vadd.f32 %v1684_v42, %v1680_v33  ;;  %v1786_v28 = vmul.f32 %v4116_v60, %v1785_v23 }
 0x416   : > { %v1697_v50 = vpop.permute.xlu1 %1696  ;;  %v1695_v2 = vpop.permute.xlu0 %1694 }
 0x417   : > { %v1701_v45 = vadd.f32 %v1697_v50, %v1687_v36  ;;  %v1700_v9 = vadd.f32 %v1695_v2, %v1686_v37  ;;  %v1819_v36 = vstv %s3186_s16  ;;  %s3210_s16 = sld [smem:[#allocation7 + $0x28e]] }
 0x418   : > { %v1821_v58 = vmul.f32 %v4120_v26, %v1819_v36  ;;  %v1820_v55 = vmul.f32 %v4124_v32, %v1819_v36  ;;  %v1951_v36 = vstv %s3197_s9  ;;  %s4401_s9 = sld [smem:[#allocation7 + $0x293]] }
 0x41a   : > { %v1711_v1 = vpop.permute.xlu1 %1710  ;;  %v1709_v57 = vpop.permute.xlu0 %1708 }
 0x41b   : > { %v1715_v53 = vadd.f32 %v1711_v1, %v1701_v45  ;;  %v1714_v59 = vadd.f32 %v1709_v57, %v1700_v9  ;;  %v1853_v57 = vstv %s3189_s25  ;;  %s3212_s25 = sld [smem:[#allocation7 + $0x290]] }
 0x41c   : > { %v1854_v26 = vmul.f32 %v4132_v35, %v1853_v57 }
 0x41d   : > { %v1721_v41 = vadd.f32 %v1719_v46, %v1715_v53  ;;  %v1720_v16 = vadd.f32 %v1718_v49, %v1714_v59 }
 0x41e   : > { %v1731_v44 = vpop.permute.xlu1 %1730  ;;  %v1729_v18 = vpop.permute.xlu0 %1728 }
 0x41f   : > { %v1735_v11 = vadd.f32 %v1731_v44, %v1721_v41  ;;  %v1734_v25 = vadd.f32 %v1729_v18, %v1720_v16  ;;  %v1855_v44 = vmul.f32 %v4128_v48, %v1853_v57  ;;  %v4372_v57 = vld [vmem:[%s3727_s23 + $0xa] sm:$0x3f] }
 0x422   : > { %v1745_v13 = vpop.permute.xlu1 %1744  ;;  %v1743_v63 = vpop.permute.xlu0 %1742 }
 0x423   : > { %v1749_v15 = vadd.f32 %v1745_v13, %v1735_v11  ;;  %v1748_v20 = vadd.f32 %v1743_v63, %v1734_v25 }
 0x425   : > { %v1755_v21 = vadd.f32 %v1753_v52, %v1749_v15  ;;  %v1754_v22 = vadd.f32 %v1752_v14, %v1748_v20  ;;  %v1887_v14 = vstv %s3192_s28  ;;  %s3213_s28 = sld [smem:[#allocation7 + $0x291]] }
 0x426   : > { %v1765_v34 = vpop.permute.xlu1 %1764  ;;  %v1763_v12 = vpop.permute.xlu0 %1762  ;;  %v1889_v20 = vmul.f32 %v4136_v4, %v1887_v14 }
 0x427   : > { %v1769_v40 = vadd.f32 %v1765_v34, %v1755_v21  ;;  %v1768_v0 = vadd.f32 %v1763_v12, %v1754_v22  ;;  %v1888_v22 = vmul.f32 %v4140_v54, %v1887_v14 }
 0x42a   : > { %v1779_v56 = vpop.permute.xlu1 %1778  ;;  %v1777_v29 = vpop.permute.xlu0 %1776 }
 0x42b   : > { %v1783_v51 = vadd.f32 %v1779_v56, %v1769_v40  ;;  %v1782_v42 = vadd.f32 %v1777_v29, %v1768_v0 }
 0x42d   : > { %v1789_v30 = vadd.f32 %v1787_v27, %v1783_v51  ;;  %v1788_v33 = vadd.f32 %v1786_v28, %v1782_v42 }
 0x42e   : > { %v1799_v31 = vpop.permute.xlu1 %1798  ;;  %v1797_v50 = vpop.permute.xlu0 %1796 }
 0x42f   : > { %v1803_v37 = vadd.f32 %v1799_v31, %v1789_v30  ;;  %v1802_v2 = vadd.f32 %v1797_v50, %v1788_v33  ;;  %v1953_v50 = vmul.f32 %v4314_v8, %v1951_v36 }
 0x432   : > { %v1813_v45 = vpop.permute.xlu1 %1812  ;;  %v1811_v9 = vpop.permute.xlu0 %1810 }
 0x433   : > { %v1817_v46 = vadd.f32 %v1813_v45, %v1803_v37  ;;  %v1816_v1 = vadd.f32 %v1811_v9, %v1802_v2  ;;  %v1965_v37 = vstv %s3198_s10  ;;  %v1985_v2 = vstv %s3200_s15  ;;  %s4410_s10 = sld [smem:[#allocation7 + $0x294]]  ;;  %s4417_s15 = sld [smem:[#allocation7 + $0x296]] }
 0x434   : > { %v1952_v45 = vmul.f32 %v4320_v62, %v1951_v36  ;;  %v1999_v9 = vstv %s3201_s17  ;;  %s3219_s17 = sld [smem:[#allocation7 + $0x297]]  ;;  %v4444_v36 = vld [vmem:[%s3727_s23 + $0x29] sm:$0x3f] }
 0x435   : > { %v1823_v60 = vadd.f32 %v1821_v58, %v1817_v46  ;;  %v1822_v53 = vadd.f32 %v1820_v55, %v1816_v1  ;;  %v1967_v58 = vmul.f32 %v4314_v8, %v1965_v37  ;;  %v4361_v55 = vld [vmem:[%s3727_s23 + $0x9] sm:$0x3f]  ;;  %v1966_v1 = vmul.f32 %v4320_v62, %v1965_v37 }
 0x436   : > { %v1833_v49 = vpop.permute.xlu1 %1832  ;;  %v1831_v59 = vpop.permute.xlu0 %1830  ;;  %v1987_v46 = vmul.f32 %v4361_v55, %v1985_v2 }
 0x437   : > { %v1837_v41 = vadd.f32 %v1833_v49, %v1823_v60  ;;  %v1836_v16 = vadd.f32 %v1831_v59, %v1822_v53  ;;  %v2001_v60 = vmul.f32 %v4361_v55, %v1999_v9  ;;  %v2019_v49 = vstv %s3203_s7  ;;  %s4435_s7 = sld [smem:[#allocation7 + $0x299]] }
 0x438   : > { %v1986_v53 = vmul.f32 %v4327_v17, %v1985_v2  ;;  %v2021_v59 = vmul.f32 %v4372_v57, %v2019_v49 }
 0x43a   : > { %v1847_v6 = vpop.permute.xlu1 %1846  ;;  %v1845_v11 = vpop.permute.xlu0 %1844  ;;  %v2203_v37 = vstv %s3219_s17  ;;  %s3232_s17 = sld [smem:[#allocation7 + $0x308]] }
 0x43b   : > { %v1851_v18 = vadd.f32 %v1847_v6, %v1837_v41  ;;  %v1850_v52 = vadd.f32 %v1845_v11, %v1836_v16  ;;  %v2033_v41 = vstv %s3204_s12  ;;  %v2053_v6 = vstv %s3206_s29  ;;  %s3225_s12 = sld [smem:[#allocation7 + $0x301]] }
 0x43c   : > { %v2035_v16 = vmul.f32 %v4372_v57, %v2033_v41  ;;  %v2054_v14 = vmul.f32 %v4337_v47, %v2053_v6  ;;  %v2205_v2 = vmul.f32 %v4444_v36, %v2203_v37  ;;  %s3253_s29 = sld [smem:[#allocation7 + $0x381]] }
 0x43d   : > { %v1857_v32 = vadd.f32 %v1855_v44, %v1851_v18  ;;  %v1856_v13 = vadd.f32 %v1854_v26, %v1850_v52  ;;  %v2000_v44 = vmul.f32 %v4327_v17, %v1999_v9  ;;  %v2020_v26 = vmul.f32 %v4332_v19, %v2019_v49  ;;  %v4383_v18 = vld [vmem:[%s3727_s23 + $0x18] sm:$0x3f] }
 0x43e   : > { %v1867_v25 = vpop.permute.xlu1 %1866  ;;  %v1865_v15 = vpop.permute.xlu0 %1864  ;;  %v2055_v11 = vmul.f32 %v4383_v18, %v2053_v6  ;;  %v2067_v52 = vstv %s3207_s26  ;;  %s3226_s26 = sld [smem:[#allocation7 + $0x302]] }
 0x43f   : > { %v1871_v63 = vadd.f32 %v1867_v25, %v1857_v32  ;;  %v1870_v21 = vadd.f32 %v1865_v15, %v1856_v13  ;;  %v2034_v32 = vmul.f32 %v4332_v19, %v2033_v41  ;;  %v2069_v25 = vmul.f32 %v4383_v18, %v2067_v52  ;;  %v4394_v15 = vld [vmem:[%s3727_s23 + $0x19] sm:$0x3f] }
 0x440   : > { %v2087_v13 = vstv %s3209_s13  ;;  %s3254_s13 = sld [smem:[#allocation7 + $0x382]] }
 0x441   : > { %v2281_v49 = vstv %s3225_s12  ;;  %s3234_s12 = sld [smem:[#allocation7 + $0x30a]] }
 0x442   : > { %v1881_v34 = vpop.permute.xlu1 %1880  ;;  %v1879_v23 = vpop.permute.xlu0 %1878  ;;  %v2611_v41 = vstv %s3253_s29  ;;  %s3262_s29 = sld [smem:[#allocation7 + $0x38a]] }
 0x443   : > { %v1885_v48 = vadd.f32 %v1881_v34, %v1871_v63  ;;  %v1884_v12 = vadd.f32 %v1879_v23, %v1870_v21  ;;  %v2089_v63 = vmul.f32 %v4394_v15, %v2087_v13  ;;  %v2068_v21 = vmul.f32 %v4337_v47, %v2067_v52  ;;  %v4407_v23 = vld [vmem:[%s3727_s23 + $0x1a] sm:$0x3f] }
 0x444   : > { %v2613_v6 = vmul.f32 %v4314_v8, %v2611_v41  ;;  %v2612_v52 = vmul.f32 %v4320_v62, %v2611_v41 }
 0x445   : > { %v1891_v40 = vadd.f32 %v1889_v20, %v1885_v48  ;;  %v1890_v27 = vadd.f32 %v1888_v22, %v1884_v12  ;;  %v2101_v20 = vstv %s3210_s16  ;;  %v2121_v22 = vstv %s3212_s25  ;;  %s3228_s16 = sld [smem:[#allocation7 + $0x304]] }
 0x446   : > { %v1901_v35 = vpop.permute.xlu1 %1900  ;;  %v1899_v0 = vpop.permute.xlu0 %1898  ;;  %v2103_v34 = vmul.f32 %v4394_v15, %v2101_v20  ;;  %v2088_v48 = vmul.f32 %v4342_v24, %v2087_v13  ;;  %v2123_v12 = vmul.f32 %v4407_v23, %v2121_v22  ;;  %s3256_s25 = sld [smem:[#allocation7 + $0x384]] }
 0x447   : > { %v1905_v56 = vadd.f32 %v1901_v35, %v1891_v40  ;;  %v1904_v28 = vadd.f32 %v1899_v0, %v1890_v27  ;;  %v2135_v40 = vstv %s3213_s28  ;;  %v2102_v35 = vmul.f32 %v4342_v24, %v2101_v20  ;;  %s3229_s28 = sld [smem:[#allocation7 + $0x305]] }
 0x448   : > { %v2137_v27 = vmul.f32 %v4407_v23, %v2135_v40  ;;  %v2155_v0 = vstv %s4401_s9  ;;  %s3257_s9 = sld [smem:[#allocation7 + $0x385]] }
 0x44a   : > { %v1915_v51 = vpop.permute.xlu1 %1914  ;;  %v1913_v42 = vpop.permute.xlu0 %1912 }
 0x44b   : > { %v1919_v29 = vadd.f32 %v1915_v51, %v1905_v56  ;;  %v1918_v30 = vadd.f32 %v1913_v42, %v1904_v28  ;;  %v4421_v56 = vld [vmem:[%s3727_s23 + $0x12] sm:$0xff]  ;;  %v4426_v51 = vld [vmem:[%s3727_s23 + $0x28] sm:$0x3f]  ;;  %v2169_v42 = vstv %s4410_s10  ;;  %s3231_s10 = sld [smem:[#allocation7 + $0x307]] }
 0x44c   : > { %v2122_v28 = vmul.f32 %v4421_v56, %v2121_v22 }
 0x44d   : > { %v1921_v31 = vmax.f32 %v1919_v29, 0.0  ;;  %v1920_v33 = vmax.f32 %v1918_v30, 0.0  ;;  %v2157_v29 = vmul.f32 %v4426_v51, %v2155_v0  ;;  %v2136_v30 = vmul.f32 %v4421_v56, %v2135_v40 }
 0x44f   : > { %v1925_v4 = vsel %vm603_vm0, %v1921_v31, 0.0  ;;  %v1922_v54 = vsel %vm599_vm1, %v1920_v33, 0.0  ;;  %v2171_v31 = vmul.f32 %v4426_v51, %v2169_v42  ;;  %v2189_v33 = vstv %s4417_s15  ;;  %s3259_s15 = sld [smem:[#allocation7 + $0x387]] }
 0x450   : > { %1926 = vadd.xlane.f32.xlu1 %v1925_v4  ;;  %1923 = vadd.xlane.f32.xlu0 %v1922_v54  ;;  %v4439_v4 = vld [vmem:[%s3727_s23 + $0x20] sm:$0xff] }
 0x451   : > { %v2156_v54 = vmul.f32 %v4439_v4, %v2155_v0 }
 0x461   : > { %1958 = vrot.lane.b32.xlu1 %v1953_v50, %s3550_s11  ;;  %v2191_v50 = vmul.f32 %v4444_v36, %v2189_v33 }
 0x465   : > { %1972 = vrot.lane.b32.xlu1 %v1967_v58, %s3549_s8  ;;  %v2170_v58 = vmul.f32 %v4439_v4, %v2169_v42 }
 0x466   : > { %1956 = vrot.lane.b32.xlu0 %v1952_v45, %s3550_s11  ;;  %v2223_v45 = vstv %s4435_s7  ;;  %s3260_s7 = sld [smem:[#allocation7 + $0x388]] }
 0x469   : > { %1992 = vrot.lane.b32.xlu1 %v1987_v46, %s3550_s11  ;;  %v4454_v46 = vld [vmem:[%s3727_s23 + $0x21] sm:$0xff] }
 0x46a   : > { %1970 = vrot.lane.b32.xlu0 %v1966_v1, %s3549_s8  ;;  %v2190_v9 = vmul.f32 %v4454_v46, %v2189_v33  ;;  %v4459_v1 = vld [vmem:[%s3727_s23 + $0x2a] sm:$0x3f] }
 0x46d   : > { %2006 = vrot.lane.b32.xlu1 %v2001_v60, %s3549_s8  ;;  %v2225_v60 = vmul.f32 %v4459_v1, %v2223_v45 }
 0x46e   : > { %1990 = vrot.lane.b32.xlu0 %v1986_v53, %s3550_s11  ;;  %v2204_v53 = vmul.f32 %v4454_v46, %v2203_v37 }
 0x471   : > { %2026 = vrot.lane.b32.xlu1 %v2021_v59, %s3550_s11  ;;  %v2282_v59 = vmul.f32 %v4320_v62, %v2281_v49 }
 0x472   : > { %2004 = vrot.lane.b32.xlu0 %v2000_v44, %s3549_s8  ;;  %v4468_v44 = vld [vmem:[%s3727_s23 + $0x22] sm:$0xff] }
 0x475   : > { %2040 = vrot.lane.b32.xlu1 %v2035_v16, %s3549_s8  ;;  %v2224_v16 = vmul.f32 %v4468_v44, %v2223_v45 }
 0x476   : > { %2024 = vrot.lane.b32.xlu0 %v2020_v26, %s3550_s11  ;;  %v2283_v26 = vmul.f32 %v4314_v8, %v2281_v49 }
 0x479   : > { %2060 = vrot.lane.b32.xlu1 %v2055_v11, %s3550_s11  ;;  %v2295_v11 = vstv %s3226_s26  ;;  %s3196_s26 = sld [smem:[#allocation7 + $0x280]] }
 0x47a   : > { %2038 = vrot.lane.b32.xlu0 %v2034_v32, %s3549_s8  ;;  %v2625_v32 = vstv %s3254_s13  ;;  %s4515_s13 = sld [smem:[#allocation7 + $0x30b]] }
 0x47b   : > { %v2626_v13 = vmul.f32 %v4320_v62, %v2625_v32 }
 0x47d   : > { %2074 = vrot.lane.b32.xlu1 %v2069_v25, %s3549_s8  ;;  %v2297_v25 = vmul.f32 %v4314_v8, %v2295_v11 }
 0x47e   : > { %2058 = vrot.lane.b32.xlu0 %v2054_v14, %s3550_s11  ;;  %v2315_v14 = vstv %s3228_s16  ;;  %s4519_s16 = sld [smem:[#allocation7 + $0x38b]] }
 0x47f   : > { %v2316_v20 = vmul.f32 %v4327_v17, %v2315_v14 }
 0x481   : > { %2094 = vrot.lane.b32.xlu1 %v2089_v63, %s3550_s11  ;;  %v2296_v63 = vmul.f32 %v4320_v62, %v2295_v11 }
 0x482   : > { %2072 = vrot.lane.b32.xlu0 %v2068_v21, %s3549_s8  ;;  %v2645_v21 = vstv %s3256_s25  ;;  %s3195_s25 = sld [smem:[#allocation8 + $0x5]] }
 0x483   : > { %v2647_v22 = vmul.f32 %v4361_v55, %v2645_v21  ;;  %v2646_v40 = vmul.f32 %v4327_v17, %v2645_v21 }
 0x485   : > { %2108 = vrot.lane.b32.xlu1 %v2103_v34, %s3549_s8  ;;  %v2627_v34 = vmul.f32 %v4314_v8, %v2625_v32  ;;  %v2727_v32 = vstv %s4519_s16  ;;  %s4592_s16 = sld [smem:[#allocation7 + $0x28c]] }
 0x486   : > { %2092 = vrot.lane.b32.xlu0 %v2088_v48, %s3550_s11  ;;  %v2317_v48 = vmul.f32 %v4361_v55, %v2315_v14 }
 0x489   : > { %2128 = vrot.lane.b32.xlu1 %v2123_v12, %s3550_s11  ;;  %v2329_v12 = vstv %s3229_s28  ;;  %s4525_s28 = sld [smem:[#allocation7 + $0x30d]] }
 0x48a   : > { %2106 = vrot.lane.b32.xlu0 %v2102_v35, %s3549_s8  ;;  %v2659_v35 = vstv %s3257_s9  ;;  %s4531_s9 = sld [smem:[#allocation7 + $0x283]] }
 0x48b   : > { %v2660_v0 = vmul.f32 %v4327_v17, %v2659_v35 }
 0x48d   : > { %2142 = vrot.lane.b32.xlu1 %v2137_v27, %s3549_s8  ;;  %v2331_v27 = vmul.f32 %v4361_v55, %v2329_v12 }
 0x48e   : > { %2126 = vrot.lane.b32.xlu0 %v2122_v28, %s3550_s11  ;;  %v2349_v28 = vstv %s3231_s10  ;;  %s4536_s10 = sld [smem:[#allocation7 + $0x38d]] }
 0x48f   : > { %v2350_v42 = vmul.f32 %v4332_v19, %v2349_v28 }
 0x491   : > { %2162 = vrot.lane.b32.xlu1 %v2157_v29, %s3550_s11  ;;  %v2330_v29 = vmul.f32 %v4327_v17, %v2329_v12 }
 0x492   : > { %2140 = vrot.lane.b32.xlu0 %v2136_v30, %s3549_s8  ;;  %v2679_v30 = vstv %s3259_s15  ;;  %s4550_s15 = sld [smem:[#allocation7 + $0x30e]] }
 0x493   : > { %v2681_v33 = vmul.f32 %v4372_v57, %v2679_v30  ;;  %v2680_v37 = vmul.f32 %v4332_v19, %v2679_v30 }
 0x495   : > { %2176 = vrot.lane.b32.xlu1 %v2171_v31, %s3549_s8  ;;  %v2661_v31 = vmul.f32 %v4361_v55, %v2659_v35 }
 0x496   : > { %2160 = vrot.lane.b32.xlu0 %v2156_v54, %s3550_s11  ;;  %v2351_v54 = vmul.f32 %v4372_v57, %v2349_v28  ;;  %v2729_v28 = vmul.f32 %v4383_v18, %v2727_v32 }
 0x499   : > { %2196 = vrot.lane.b32.xlu1 %v2191_v50, %s3550_s11  ;;  %v2363_v50 = vstv %s3232_s17  ;;  %s4554_s17 = sld [smem:[#allocation7 + $0x286]] }
 0x49a   : > { %2174 = vrot.lane.b32.xlu0 %v2170_v58, %s3549_s8  ;;  %v2693_v58 = vstv %s3260_s7  ;;  %s4558_s7 = sld [smem:[#allocation7 + $0x38e]] }
 0x49b   : > { %v2694_v45 = vmul.f32 %v4332_v19, %v2693_v58 }
 0x49d   : > { %2210 = vrot.lane.b32.xlu1 %v2205_v2, %s3549_s8  ;;  %v2365_v2 = vmul.f32 %v4372_v57, %v2363_v50 }
 0x49e   : > { %2194 = vrot.lane.b32.xlu0 %v2190_v9, %s3550_s11  ;;  %v2383_v9 = vstv %s3234_s12  ;;  %s4566_s12 = sld [smem:[#allocation7 + $0x310]] }
 0x49f   : > { %v2384_v49 = vmul.f32 %v4337_v47, %v2383_v9 }
 0x4a1   : > { %2230 = vrot.lane.b32.xlu1 %v2225_v60, %s3550_s11  ;;  %v2364_v60 = vmul.f32 %v4332_v19, %v2363_v50 }
 0x4a2   : > { %2208 = vrot.lane.b32.xlu0 %v2204_v53, %s3549_s8  ;;  %v2713_v53 = vstv %s3262_s29  ;;  %s4573_s29 = sld [smem:[#allocation7 + $0x289]] }
 0x4a3   : > { %v2715_v41 = vmul.f32 %v4383_v18, %v2713_v53  ;;  %v2714_v11 = vmul.f32 %v4337_v47, %v2713_v53 }
 0x4a5   : > { %2286 = vrot.lane.b32.xlu1 %v2282_v59, %s3550_s11  ;;  %v2695_v59 = vmul.f32 %v4372_v57, %v2693_v58 }
 0x4a6   : > { %2228 = vrot.lane.b32.xlu0 %v2224_v16, %s3550_s11  ;;  %v1945_v16 = vstv %s3196_s26  ;;  %s4577_s26 = sld [smem:[#allocation7 + $0x390]] }
 0x4a9   : > { %2618 = vrot.lane.b32.xlu1 %v2613_v6, %s3550_s11  ;;  %v2385_v6 = vmul.f32 %v4383_v18, %v2383_v9 }
 0x4aa   : > { %2288 = vrot.lane.b32.xlu0 %v2283_v26, %s3550_s11  ;;  %v2397_v26 = vstv %s4515_s13  ;;  %s4588_s13 = sld [smem:[#allocation7 + $0x311]] }
 0x4ad   : > { %2616 = vrot.lane.b32.xlu1 %v2612_v52, %s3550_s11  ;;  %v1947_v52 = vmul.f32 %v4314_v8, %v1945_v16 }
 0x4ae   : > { %2302 = vrot.lane.b32.xlu0 %v2297_v25, %s3549_s8  ;;  %v1942_v25 = vstv %s3195_s25  ;;  %s4596_s25 = sld [smem:[#allocation7 + $0x391]] }
 0x4af   : > { %v1949_v8 = vadd.f32 %v1947_v52, %v1942_v25 }
 0x4b1   : > { %2630 = vrot.lane.b32.xlu1 %v2626_v13, %s3549_s8  ;;  %v2399_v13 = vmul.f32 %v4383_v18, %v2397_v26 }
 0x4b2   : > { %2300 = vrot.lane.b32.xlu0 %v2296_v63, %s3549_s8  ;;  %v1946_v63 = vmul.f32 %v4320_v62, %v1945_v16 }
 0x4b4   : > { %v1948_v12 = vadd.f32 %v1946_v63, %v1942_v25  ;;  %v2451_v63 = vstv %s4566_s12  ;;  %s4642_s12 = sld [smem:[#allocation7 + $0x316]] }
 0x4b5   : > { %2320 = vrot.lane.b32.xlu1 %v2316_v20, %s3550_s11  ;;  %v2728_v20 = vmul.f32 %v4337_v47, %v2727_v32 }
 0x4b6   : > { %2632 = vrot.lane.b32.xlu0 %v2627_v34, %s3549_s8  ;;  %v2417_v34 = vstv %s4525_s28  ;;  %s4604_s28 = sld [smem:[#allocation7 + $0x313]] }
 0x4b7   : > { %v2418_v62 = vmul.f32 %v4342_v24, %v2417_v34  ;;  %v2419_v58 = vmul.f32 %v4394_v15, %v2417_v34 }
 0x4b9   : > { %2652 = vrot.lane.b32.xlu1 %v2647_v22, %s3550_s11  ;;  %v2398_v22 = vmul.f32 %v4337_v47, %v2397_v26 }
 0x4ba   : > { %2322 = vrot.lane.b32.xlu0 %v2317_v48, %s3550_s11 }
 0x4bd   : > { %2650 = vrot.lane.b32.xlu1 %v2646_v40, %s3550_s11  ;;  %v1979_v40 = vstv %s4531_s9  ;;  %s4611_s9 = sld [smem:[#allocation7 + $0x28f]] }
 0x4be   : > { %2336 = vrot.lane.b32.xlu0 %v2331_v27, %s3549_s8 }
 0x4c1   : > { %2664 = vrot.lane.b32.xlu1 %v2660_v0, %s3549_s8  ;;  %v2747_v0 = vstv %s4536_s10  ;;  %s4615_s10 = sld [smem:[#allocation7 + $0x393]] }
 0x4c2   : > { %2334 = vrot.lane.b32.xlu0 %v2330_v29, %s3549_s8  ;;  %v1981_v29 = vmul.f32 %v4361_v55, %v1979_v40 }
 0x4c5   : > { %2354 = vrot.lane.b32.xlu1 %v2350_v42, %s3550_s11 }
 0x4c6   : > { %2666 = vrot.lane.b32.xlu0 %v2661_v31, %s3549_s8  ;;  %v1980_v31 = vmul.f32 %v4327_v17, %v1979_v40  ;;  %v2748_v17 = vmul.f32 %v4342_v24, %v2747_v0 }
 0x4c9   : > { %2686 = vrot.lane.b32.xlu1 %v2681_v33, %s3550_s11  ;;  %v2749_v33 = vmul.f32 %v4394_v15, %v2747_v0 }
 0x4ca   : > { %2356 = vrot.lane.b32.xlu0 %v2351_v54, %s3550_s11 }
 0x4cd   : > { %2684 = vrot.lane.b32.xlu1 %v2680_v37, %s3550_s11 }
 0x4ce   : > { %2370 = vrot.lane.b32.xlu0 %v2365_v2, %s3549_s8 }
 0x4d1   : > { %2698 = vrot.lane.b32.xlu1 %v2694_v45, %s3549_s8  ;;  %v2431_v45 = vstv %s4550_s15  ;;  %s4626_s15 = sld [smem:[#allocation7 + $0x314]] }
 0x4d2   : > { %2368 = vrot.lane.b32.xlu0 %v2364_v60, %s3549_s8 }
 0x4d5   : > { %2388 = vrot.lane.b32.xlu1 %v2384_v49, %s3550_s11  ;;  %v2013_v49 = vstv %s4554_s17  ;;  %s4630_s17 = sld [smem:[#allocation7 + $0x292]] }
 0x4d6   : > { %2700 = vrot.lane.b32.xlu0 %v2695_v59, %s3549_s8  ;;  %v2761_v59 = vstv %s4558_s7  ;;  %v2014_v52 = vmul.f32 %v4332_v19, %v2013_v49  ;;  %v2452_v19 = vmul.f32 %v4421_v56, %v2451_v63  ;;  %s4634_s7 = sld [smem:[#allocation7 + $0x394]] }
 0x4d7   : > { %v2762_v32 = vmul.f32 %v4342_v24, %v2761_v59 }
 0x4d9   : > { %2720 = vrot.lane.b32.xlu1 %v2715_v41, %s3550_s11  ;;  %v2433_v41 = vmul.f32 %v4394_v15, %v2431_v45 }
 0x4da   : > { %2390 = vrot.lane.b32.xlu0 %v2385_v6, %s3550_s11  ;;  %v2015_v6 = vmul.f32 %v4372_v57, %v2013_v49 }
 0x4dd   : > { %v4540_v14 = vpop.xlane.xlu1 %1926  ;;  %2718 = vrot.lane.b32.xlu1 %v2714_v11, %s3550_s11  ;;  %v4545_v21 = vpop.xlane.xlu0 %1923 }
 0x4de   : > { %2404 = vrot.lane.b32.xlu0 %v2399_v13, %s3549_s8 }
 0x4e1   : > { %v1959_v48 = vpop.permute.xlu1 %1958  ;;  %2732 = vrot.lane.b32.xlu1 %v2728_v20, %s3549_s8  ;;  %v1957_v27 = vpop.permute.xlu0 %1956 }
 0x4e2   : > { %v1963_v35 = vadd.f32 %v1959_v48, %v1949_v8  ;;  %2402 = vrot.lane.b32.xlu0 %v2398_v22, %s3549_s8  ;;  %v1962_v42 = vadd.f32 %v1957_v27, %v1948_v12  ;;  %v2432_v8 = vmul.f32 %v4342_v24, %v2431_v45  ;;  %v2047_v12 = vstv %s4573_s29  ;;  %s4649_s29 = sld [smem:[#allocation7 + $0x295]] }
 0x4e3   : > { %v2049_v0 = vmul.f32 %v4383_v18, %v2047_v12  ;;  %v2081_v45 = vstv %s4592_s16  ;;  %s4668_s16 = sld [smem:[#allocation7 + $0x298]] }
 0x4e5   : > { %v1973_v30 = vpop.permute.xlu1 %1972  ;;  %2422 = vrot.lane.b32.xlu1 %v2418_v62, %s3550_s11  ;;  %v1971_v50 = vpop.permute.xlu0 %1970  ;;  %v2781_v62 = vstv %s4577_s26  ;;  %s4653_s26 = sld [smem:[#allocation7 + $0x396]] }
 0x4e6   : > { %v1977_v54 = vadd.f32 %v1973_v30, %v1963_v35  ;;  %v1976_v37 = vadd.f32 %v1971_v50, %v1962_v42  ;;  %2734 = vrot.lane.b32.xlu0 %v2729_v28, %s3549_s8  ;;  %v2763_v35 = vmul.f32 %v4394_v15, %v2761_v59  ;;  %v2048_v42 = vmul.f32 %v4337_v47, %v2047_v12 }
 0x4e7   : > { %v2783_v30 = vmul.f32 %v4407_v23, %v2781_v62  ;;  %v2453_v50 = vmul.f32 %v4407_v23, %v2451_v63  ;;  %v2782_v47 = vmul.f32 %v4421_v56, %v2781_v62 }
 0x4e8   : > { %v1983_v2 = vadd.f32 %v1981_v29, %v1977_v54  ;;  %v1982_v60 = vadd.f32 %v1980_v31, %v1976_v37  ;;  %v2465_v37 = vstv %s4588_s13  ;;  %s4664_s13 = sld [smem:[#allocation7 + $0x317]] }
 0x4e9   : > { %v1993_v9 = vpop.permute.xlu1 %1992  ;;  %2754 = vrot.lane.b32.xlu1 %v2749_v33, %s3550_s11  ;;  %v1991_v53 = vpop.permute.xlu0 %1990  ;;  %v2467_v49 = vmul.f32 %v4407_v23, %v2465_v37 }
 0x4ea   : > { %2424 = vrot.lane.b32.xlu0 %v2419_v58, %s3550_s11  ;;  %v1997_v16 = vadd.f32 %v1993_v9, %v1983_v2  ;;  %v1996_v26 = vadd.f32 %v1991_v53, %v1982_v60  ;;  %v2795_v60 = vstv %s4596_s25  ;;  %v2083_v53 = vmul.f32 %v4394_v15, %v2081_v45  ;;  %s4672_s25 = sld [smem:[#allocation7 + $0x397]] }
 0x4ed   : > { %v2007_v11 = vpop.permute.xlu1 %2006  ;;  %2752 = vrot.lane.b32.xlu1 %v2748_v17, %s3550_s11  ;;  %v2005_v13 = vpop.permute.xlu0 %2004 }
 0x4ee   : > { %v2011_v25 = vadd.f32 %v2007_v11, %v1997_v16  ;;  %v2010_v20 = vadd.f32 %v2005_v13, %v1996_v26  ;;  %2438 = vrot.lane.b32.xlu0 %v2433_v41, %s3549_s8  ;;  %v2082_v16 = vmul.f32 %v4342_v24, %v2081_v45 }
 0x4f0   : > { %v2017_v34 = vadd.f32 %v2015_v6, %v2011_v25  ;;  %v2016_v48 = vadd.f32 %v2014_v52, %v2010_v20  ;;  %v2796_v6 = vmul.f32 %v4421_v56, %v2795_v60  ;;  %v2485_v52 = vstv %s4604_s28  ;;  %s4680_s28 = sld [smem:[#allocation7 + $0x300]] }
 0x4f1   : > { %v2027_v22 = vpop.permute.xlu1 %2026  ;;  %2766 = vrot.lane.b32.xlu1 %v2762_v32, %s3549_s8  ;;  %v2025_v40 = vpop.permute.xlu0 %2024  ;;  %v2466_v25 = vmul.f32 %v4421_v56, %v2465_v37  ;;  %v2115_v20 = vstv %s4611_s9  ;;  %v2486_v24 = vmul.f32 %v4439_v4, %v2485_v52  ;;  %s4682_s9 = sld [smem:[#allocation7 + $0x319]] }
 0x4f2   : > { %2436 = vrot.lane.b32.xlu0 %v2432_v8, %s3549_s8  ;;  %v2031_v27 = vadd.f32 %v2027_v22, %v2017_v34  ;;  %v2030_v28 = vadd.f32 %v2025_v40, %v2016_v48  ;;  %v2815_v22 = vstv %s4615_s10  ;;  %v2797_v48 = vmul.f32 %v4407_v23, %v2795_v60  ;;  %s4690_s10 = sld [smem:[#allocation8 + $0x6]] }
 0x4f3   : > { %v2117_v12 = vmul.f32 %v4407_v23, %v2115_v20  ;;  %v2116_v62 = vmul.f32 %v4421_v56, %v2115_v20  ;;  %v2816_v56 = vmul.f32 %v4439_v4, %v2815_v22 }
 0x4f5   : > { %v2041_v29 = vpop.permute.xlu1 %2040  ;;  %2456 = vrot.lane.b32.xlu1 %v2452_v19, %s3550_s11  ;;  %v2039_v33 = vpop.permute.xlu0 %2038 }
 0x4f6   : > { %v2045_v31 = vadd.f32 %v2041_v29, %v2031_v27  ;;  %v2044_v54 = vadd.f32 %v2039_v33, %v2030_v28  ;;  %2768 = vrot.lane.b32.xlu0 %v2763_v35, %s3549_s8  ;;  %v2817_v35 = vmul.f32 %v4426_v51, %v2815_v22  ;;  %v2487_v29 = vmul.f32 %v4426_v51, %v2485_v52 }
 0x4f7   : > { %v2149_v33 = vstv %s4630_s17  ;;  %s4699_s17 = sld [smem:[#allocation7 + $0x380]] }
 0x4f8   : > { %v2051_v18 = vadd.f32 %v2049_v0, %v2045_v31  ;;  %v2050_v2 = vadd.f32 %v2048_v42, %v2044_v54  ;;  %v2499_v42 = vstv %s4626_s15  ;;  %s4696_s15 = sld [smem:[#allocation7 + $0x29a]] }
 0x4f9   : > { %v2061_v58 = vpop.permute.xlu1 %2060  ;;  %2788 = vrot.lane.b32.xlu1 %v2783_v30, %s3550_s11  ;;  %v2059_v9 = vpop.permute.xlu0 %2058 }
 0x4fa   : > { %2458 = vrot.lane.b32.xlu0 %v2453_v50, %s3550_s11  ;;  %v2065_v17 = vadd.f32 %v2061_v58, %v2051_v18  ;;  %v2064_v59 = vadd.f32 %v2059_v9, %v2050_v2  ;;  %v2829_v18 = vstv %s4634_s7  ;;  %v2501_v58 = vmul.f32 %v4426_v51, %v2499_v42  ;;  %s4705_s7 = sld [smem:[#allocation7 + $0x399]] }
 0x4fb   : > { %v2151_v2 = vmul.f32 %v4426_v51, %v2149_v33  ;;  %v2830_v9 = vmul.f32 %v4439_v4, %v2829_v18 }
 0x4fd   : > { %v2075_v41 = vpop.permute.xlu1 %2074  ;;  %2786 = vrot.lane.b32.xlu1 %v2782_v47, %s3550_s11  ;;  %v2073_v11 = vpop.permute.xlu0 %2072  ;;  %v2150_v47 = vmul.f32 %v4439_v4, %v2149_v33 }
 0x4fe   : > { %v2079_v26 = vadd.f32 %v2075_v41, %v2065_v17  ;;  %v2078_v32 = vadd.f32 %v2073_v11, %v2064_v59  ;;  %2472 = vrot.lane.b32.xlu0 %v2467_v49, %s3549_s8  ;;  %v2519_v17 = vstv %s4642_s12  ;;  %v2500_v59 = vmul.f32 %v4439_v4, %v2499_v42  ;;  %s4710_s12 = sld [smem:[#allocation8 + $0x7]] }
 0x4ff   : > { %v2520_v11 = vmul.f32 %v4454_v46, %v2519_v17  ;;  %v2831_v4 = vmul.f32 %v4426_v51, %v2829_v18  ;;  %v2521_v51 = vmul.f32 %v4444_v36, %v2519_v17  ;;  %v2553_v18 = vstv %s4682_s9  ;;  %s4784_s9 = sld [smem:[#allocation7 + $0x30c]] }
 0x500   : > { %v2085_v13 = vadd.f32 %v2083_v53, %v2079_v26  ;;  %v2084_v63 = vadd.f32 %v2082_v16, %v2078_v32  ;;  %v2183_v26 = vstv %s4649_s29  ;;  %s4723_s29 = sld [smem:[#allocation7 + $0x31a]] }
 0x501   : > { %v2095_v15 = vpop.permute.xlu1 %2094  ;;  %2800 = vrot.lane.b32.xlu1 %v2796_v6, %s3549_s8  ;;  %v2093_v34 = vpop.permute.xlu0 %2092  ;;  %v2184_v20 = vmul.f32 %v4454_v46, %v2183_v26 }
 0x502   : > { %v2099_v8 = vadd.f32 %v2095_v15, %v2085_v13  ;;  %2470 = vrot.lane.b32.xlu0 %v2466_v25, %s3549_s8  ;;  %v2098_v19 = vadd.f32 %v2093_v34, %v2084_v63  ;;  %v2849_v25 = vstv %s4653_s26  ;;  %v2185_v15 = vmul.f32 %v4444_v36, %v2183_v26  ;;  %s4728_s26 = sld [smem:[#allocation7 + $0x303]] }
 0x503   : > { %v2237_v26 = vstv %s4696_s15  ;;  %s4799_s15 = sld [smem:[#allocation7 + $0x30f]] }
 0x505   : > { %v2109_v40 = vpop.permute.xlu1 %2108  ;;  %2490 = vrot.lane.b32.xlu1 %v2486_v24, %s3550_s11  ;;  %v2107_v0 = vpop.permute.xlu0 %2106  ;;  %v2851_v24 = vmul.f32 %v4444_v36, %v2849_v25 }
 0x506   : > { %v2113_v27 = vadd.f32 %v2109_v40, %v2099_v8  ;;  %v2112_v28 = vadd.f32 %v2107_v0, %v2098_v19  ;;  %2802 = vrot.lane.b32.xlu0 %v2797_v48, %s3549_s8 }
 0x508   : > { %v2119_v23 = vadd.f32 %v2117_v12, %v2113_v27  ;;  %v2118_v31 = vadd.f32 %v2116_v62, %v2112_v28  ;;  %v2533_v12 = vstv %s4664_s13  ;;  %v2217_v62 = vstv %s4668_s16  ;;  %s4731_s13 = sld [smem:[#allocation7 + $0x39a]]  ;;  %s4737_s16 = sld [smem:[#allocation7 + $0x383]] }
 0x509   : > { %v2129_v30 = vpop.permute.xlu1 %2128  ;;  %2822 = vrot.lane.b32.xlu1 %v2817_v35, %s3550_s11  ;;  %v2127_v50 = vpop.permute.xlu0 %2126  ;;  %v2850_v35 = vmul.f32 %v4454_v46, %v2849_v25  ;;  %v2863_v28 = vstv %s4672_s25  ;;  %v2219_v42 = vmul.f32 %v4459_v1, %v2217_v62  ;;  %v2554_v25 = vmul.f32 %v4468_v44, %v2553_v18  ;;  %s3230_s25 = sld [smem:[#allocation7 + $0x306]] }
 0x50a   : > { %v2133_v54 = vadd.f32 %v2129_v30, %v2119_v23  ;;  %v2132_v37 = vadd.f32 %v2127_v50, %v2118_v31  ;;  %2492 = vrot.lane.b32.xlu0 %v2487_v29, %s3550_s11  ;;  %v2535_v23 = vmul.f32 %v4444_v36, %v2533_v12  ;;  %v2218_v31 = vmul.f32 %v4468_v44, %v2217_v62 }
 0x50b   : > { %v2864_v33 = vmul.f32 %v4454_v46, %v2863_v28  ;;  %v2275_v50 = vstv %s4680_s28  ;;  %s3261_s28 = sld [smem:[#allocation7 + $0x389]] }
 0x50d   : > { %v2143_v45 = vpop.permute.xlu1 %2142  ;;  %2820 = vrot.lane.b32.xlu1 %v2816_v56, %s3550_s11  ;;  %v2141_v49 = vpop.permute.xlu0 %2140 }
 0x50e   : > { %v2147_v60 = vadd.f32 %v2143_v45, %v2133_v54  ;;  %v2146_v53 = vadd.f32 %v2141_v49, %v2132_v37  ;;  %2506 = vrot.lane.b32.xlu0 %v2501_v58, %s3549_s8  ;;  %v2534_v58 = vmul.f32 %v4454_v46, %v2533_v12  ;;  %v2555_v49 = vmul.f32 %v4459_v1, %v2553_v18 }
 0x50f   : > { %v2865_v46 = vmul.f32 %v4444_v36, %v2863_v28  ;;  %v2239_v36 = vmul.f32 %v4459_v1, %v2237_v26 }
 0x510   : > { %v2153_v41 = vadd.f32 %v2151_v2, %v2147_v60  ;;  %v2152_v6 = vadd.f32 %v2150_v47, %v2146_v53 }
 0x511   : > { %v2163_v16 = vpop.permute.xlu1 %2162  ;;  %2834 = vrot.lane.b32.xlu1 %v2830_v9, %s3549_s8  ;;  %v2161_v32 = vpop.permute.xlu0 %2160  ;;  %v3394_v9 = vld [vmem:[%s3727_s23 + $0x8] sm:$0x3f] }
 0x512   : > { %v2167_v52 = vadd.f32 %v2163_v16, %v2153_v41  ;;  %v2166_v13 = vadd.f32 %v2161_v32, %v2152_v6  ;;  %2504 = vrot.lane.b32.xlu0 %v2500_v59, %s3549_s8  ;;  %v2277_v60 = vmul.f32 %v3394_v9, %v2275_v50  ;;  %v2272_v59 = vstv %s4690_s10  ;;  %v3395_v16 = vld [vmem:[%s3727_s23] sm:$0xff]  ;;  %s4796_s10 = sld [smem:[#allocation7 + $0x38c]] }
 0x513   : > { %v2276_v6 = vmul.f32 %v3395_v16, %v2275_v50  ;;  %v2605_v32 = vstv %s4699_s17  ;;  %s4812_s17 = sld [smem:[#allocation7 + $0x38f]] }
 0x515   : > { %v2177_v63 = vpop.permute.xlu1 %2176  ;;  %2524 = vrot.lane.b32.xlu1 %v2520_v11, %s3550_s11  ;;  %v2175_v34 = vpop.permute.xlu0 %2174 }
 0x516   : > { %v2181_v8 = vadd.f32 %v2177_v63, %v2167_v52  ;;  %v2180_v22 = vadd.f32 %v2175_v34, %v2166_v13  ;;  %2836 = vrot.lane.b32.xlu0 %v2831_v4, %s3549_s8  ;;  %v2279_v52 = vadd.f32 %v2277_v60, %v2272_v59  ;;  %v2606_v4 = vmul.f32 %v3395_v16, %v2605_v32 }
 0x517   : > { %v2278_v63 = vadd.f32 %v2276_v6, %v2272_v59 }
 0x518   : > { %v2187_v48 = vadd.f32 %v2185_v15, %v2181_v8  ;;  %v2186_v40 = vadd.f32 %v2184_v20, %v2180_v22  ;;  %v2883_v15 = vstv %s4705_s7  ;;  %v2607_v8 = vmul.f32 %v3394_v9, %v2605_v32  ;;  %s4815_s7 = sld [smem:[#allocation7 + $0x312]] }
 0x519   : > { %v2197_v19 = vpop.permute.xlu1 %2196  ;;  %2856 = vrot.lane.b32.xlu1 %v2851_v24, %s3550_s11  ;;  %v2195_v0 = vpop.permute.xlu0 %2194  ;;  %v2602_v24 = vstv %s4710_s12  ;;  %v2885_v22 = vmul.f32 %v4459_v1, %v2883_v15  ;;  %s4830_s12 = sld [smem:[#allocation7 + $0x392]] }
 0x51a   : > { %v2201_v27 = vadd.f32 %v2197_v19, %v2187_v48  ;;  %v2200_v29 = vadd.f32 %v2195_v0, %v2186_v40  ;;  %2526 = vrot.lane.b32.xlu0 %v2521_v51, %s3550_s11  ;;  %v2608_v48 = vadd.f32 %v2606_v4, %v2602_v24  ;;  %v2238_v19 = vmul.f32 %v4468_v44, %v2237_v26 }
 0x51b   : > { %v2567_v40 = vstv %s4723_s29  ;;  %v2884_v0 = vmul.f32 %v4468_v44, %v2883_v15  ;;  %s4835_s29 = sld [smem:[#allocation7 + $0x315]] }
 0x51c   : > { %v2568_v9 = vmul.f32 %v4468_v44, %v2567_v40 }
 0x51d   : > { %v2211_v30 = vpop.permute.xlu1 %2210  ;;  %2854 = vrot.lane.b32.xlu1 %v2850_v35, %s3550_s11  ;;  %v2209_v54 = vpop.permute.xlu0 %2208  ;;  %v2609_v35 = vadd.f32 %v2607_v8, %v2602_v24  ;;  %v3397_v24 = vld [vmem:[%s3727_s23 + $0x2] sm:$0xff] }
 0x51e   : > { %v2215_v56 = vadd.f32 %v2211_v30, %v2201_v27  ;;  %v2214_v37 = vadd.f32 %v2209_v54, %v2200_v29  ;;  %2540 = vrot.lane.b32.xlu0 %v2535_v23, %s3549_s8  ;;  %v2309_v23 = vstv %s4728_s26  ;;  %s4848_s26 = sld [smem:[#allocation7 + $0x395]] }
 0x51f   : > { %v2311_v18 = vmul.f32 %v4361_v55, %v2309_v23 }
 0x520   : > { %v2221_v2 = vadd.f32 %v2219_v42, %v2215_v56  ;;  %v2220_v47 = vadd.f32 %v2218_v31, %v2214_v37  ;;  %v2897_v42 = vstv %s4731_s13  ;;  %v2569_v31 = vmul.f32 %v4459_v1, %v2567_v40  ;;  %s4853_s13 = sld [smem:[#allocation7 + $0x318]] }
 0x521   : > { %v2231_v45 = vpop.permute.xlu1 %2230  ;;  %2868 = vrot.lane.b32.xlu1 %v2864_v33, %s3549_s8  ;;  %v2229_v53 = vpop.permute.xlu0 %2228  ;;  %v3396_v33 = vld [vmem:[%s3727_s23 + $0x1] sm:$0xff]  ;;  %v2639_v37 = vstv %s4737_s16  ;;  %v2899_v26 = vmul.f32 %v4459_v1, %v2897_v42  ;;  %s4861_s16 = sld [smem:[#allocation7 + $0x398]] }
 0x522   : > { %v4714_v17 = vadd.f32 %v2231_v45, %v2221_v2  ;;  %v4717_v41 = vadd.f32 %v2229_v53, %v2220_v47  ;;  %2538 = vrot.lane.b32.xlu0 %v2534_v58, %s3549_s8  ;;  %v2310_v56 = vmul.f32 %v3396_v33, %v2309_v23  ;;  %v2898_v58 = vmul.f32 %v4468_v44, %v2897_v42 }
 0x525   : > { %v2287_v11 = vpop.permute.xlu1 %2286  ;;  %2560 = vrot.lane.b32.xlu1 %v2555_v49, %s3550_s11  ;;  %v2289_v13 = vpop.permute.xlu0 %2288  ;;  %v2641_v49 = vmul.f32 %v4361_v55, %v2639_v37 }
 0x526   : > { %2870 = vrot.lane.b32.xlu0 %v2865_v46, %s3549_s8  ;;  %v2293_v20 = vadd.f32 %v2289_v13, %v2279_v52  ;;  %v2292_v62 = vadd.f32 %v2287_v11, %v2278_v63  ;;  %v2640_v52 = vmul.f32 %v3396_v33, %v2639_v37  ;;  %v2343_v63 = vstv %s3230_s25 }
 0x527   : > { %v2344_v8 = vmul.f32 %v3397_v24, %v2343_v63  ;;  %v2345_v1 = vmul.f32 %v4372_v57, %v2343_v63 }
 0x529   : > { %v2619_v34 = vpop.permute.xlu1 %2618  ;;  %2558 = vrot.lane.b32.xlu1 %v2554_v25, %s3550_s11  ;;  %v2303_v51 = vpop.permute.xlu0 %2302 }
 0x52a   : > { %v2307_v12 = vadd.f32 %v2303_v51, %v2293_v20  ;;  %2244 = vrot.lane.b32.xlu0 %v2239_v36, %s3549_s8  ;;  %v2623_v54 = vadd.f32 %v2619_v34, %v2609_v35 }
 0x52c   : > { %v2313_v59 = vadd.f32 %v2311_v18, %v2307_v12 }
 0x52d   : > { %v2617_v27 = vpop.permute.xlu1 %2616  ;;  %2890 = vrot.lane.b32.xlu1 %v2885_v22, %s3550_s11  ;;  %v2301_v29 = vpop.permute.xlu0 %2300 }
 0x52e   : > { %v2622_v28 = vadd.f32 %v2617_v27, %v2608_v48  ;;  %v2306_v30 = vadd.f32 %v2301_v29, %v2292_v62  ;;  %2242 = vrot.lane.b32.xlu0 %v2238_v19, %s3549_s8 }
 0x530   : > { %v2312_v60 = vadd.f32 %v2310_v56, %v2306_v30 }
 0x531   : > { %v2631_v50 = vpop.permute.xlu1 %2630  ;;  %2888 = vrot.lane.b32.xlu1 %v2884_v0, %s3550_s11  ;;  %v2633_v45 = vpop.permute.xlu0 %2632  ;;  %s3258_s11 = sld [smem:[#allocation7 + $0x386]] }
 0x532   : > { %v2636_v2 = vadd.f32 %v2631_v50, %v2622_v28  ;;  %v2637_v47 = vadd.f32 %v2633_v45, %v2623_v54  ;;  %2574 = vrot.lane.b32.xlu0 %v2569_v31, %s3549_s8 }
 0x534   : > { %v2643_v11 = vadd.f32 %v2641_v49, %v2637_v47  ;;  %v2642_v13 = vadd.f32 %v2640_v52, %v2636_v2 }
 0x535   : > { %v2321_v53 = vpop.permute.xlu1 %2320  ;;  %2902 = vrot.lane.b32.xlu1 %v2898_v58, %s3549_s8  ;;  %v2323_v16 = vpop.permute.xlu0 %2322 }
 0x536   : > { %v2326_v46 = vadd.f32 %v2321_v53, %v2312_v60  ;;  %v2327_v6 = vadd.f32 %v2323_v16, %v2313_v59  ;;  %2572 = vrot.lane.b32.xlu0 %v2568_v9, %s3549_s8 }
 0x537   : > { %v2673_v22 = vstv %s3258_s11 }
 0x538   : > { %v2675_v40 = vmul.f32 %v4372_v57, %v2673_v22  ;;  %v2674_v23 = vmul.f32 %v3397_v24, %v2673_v22 }
 0x539   : > { %v2653_v32 = vpop.permute.xlu1 %2652  ;;  %v2337_v25 = vpop.permute.xlu0 %2336 }
 0x53a   : > { %v2657_v44 = vadd.f32 %v2653_v32, %v2643_v11  ;;  %v2341_v55 = vadd.f32 %v2337_v25, %v2327_v6  ;;  %2904 = vrot.lane.b32.xlu0 %v2899_v26, %s3549_s8  ;;  %s3233_s8 = sld [smem:[#allocation7 + $0x309]] }
 0x53c   : > { %v2347_v35 = vadd.f32 %v2345_v1, %v2341_v55 }
 0x53d   : > { %v2651_v4 = vpop.permute.xlu1 %2650  ;;  %v2335_v36 = vpop.permute.xlu0 %2334 }
 0x53e   : > { %v2656_v15 = vadd.f32 %v2651_v4, %v2642_v13  ;;  %v2340_v20 = vadd.f32 %v2335_v36, %v2326_v46 }
 0x540   : > { %v2346_v19 = vadd.f32 %v2344_v8, %v2340_v20  ;;  %v2377_v63 = vstv %s3233_s8  ;;  %v3398_v8 = vld [vmem:[%s3727_s23 + $0x18] sm:$0x3f]  ;;  %s3279_s8 = sshll.u32 %s3603_s22, 4  ;;  %s3551_s22 = smov [#allocation9]  }
 0x541   : > { %v2665_v34 = vpop.permute.xlu1 %2664  ;;  %v2667_v48 = vpop.permute.xlu0 %2666 }
 0x542   : > { %v2670_v51 = vadd.f32 %v2665_v34, %v2656_v15  ;;  %v2671_v12 = vadd.f32 %v2667_v48, %v2657_v44  ;;  %v2379_v34 = vmul.f32 %v3398_v8, %v2377_v63 }
 0x544   : > { %v2677_v29 = vadd.f32 %v2675_v40, %v2671_v12  ;;  %v2676_v56 = vadd.f32 %v2674_v23, %v2670_v51  ;;  %v3399_v51 = vld [vmem:[%s3727_s23 + $0x10] sm:$0xff]  ;;  %v2411_v40 = vstv %s4784_s9 }
 0x545   : > { %v2355_v62 = vpop.permute.xlu1 %2354  ;;  %v2357_v0 = vpop.permute.xlu0 %2356  ;;  %v2378_v48 = vmul.f32 %v3399_v51, %v2377_v63  ;;  %v2741_v63 = vstv %s4796_s10 }
 0x546   : > { %v2360_v27 = vadd.f32 %v2355_v62, %v2346_v19  ;;  %v2361_v28 = vadd.f32 %v2357_v0, %v2347_v35  ;;  %v2707_v19 = vstv %s3261_s28  ;;  %s266_s28 = scalar_lea.vmem [#allocation9], %s3723_s14 }
 0x547   : > { %v2708_v0 = vmul.f32 %v3399_v51, %v2707_v19  ;;  %s2946_s9 = sshll.u32 %s266_s28, 4  ;;  %s4935_s9 = int_to_ptr.vmem [resolvable:$true] %s2946_s9 }
 0x549   : > { %v2687_v42 = vpop.permute.xlu1 %2686  ;;  %v2371_v31 = vpop.permute.xlu0 %2370 }
 0x54a   : > { %v2691_v30 = vadd.f32 %v2687_v42, %v2677_v29  ;;  %v2375_v33 = vadd.f32 %v2371_v31, %v2361_v28  ;;  %v3400_v42 = vld [vmem:[%s3727_s23 + $0x19] sm:$0x3f] }
 0x54b   : > { %v2743_v51 = vmul.f32 %v3400_v42, %v2741_v63 }
 0x54c   : > { %v2381_v12 = vadd.f32 %v2379_v34, %v2375_v33 }
 0x54d   : > { %v2685_v54 = vpop.permute.xlu1 %2684  ;;  %v2369_v18 = vpop.permute.xlu0 %2368 }
 0x54e   : > { %v2690_v50 = vadd.f32 %v2685_v54, %v2676_v56  ;;  %v2374_v37 = vadd.f32 %v2369_v18, %v2360_v27  ;;  %v2709_v27 = vmul.f32 %v3398_v8, %v2707_v19  ;;  %v2445_v8 = vstv %s4799_s15 }
 0x550   : > { %v2380_v29 = vadd.f32 %v2378_v48, %v2374_v37 }
 0x551   : > { %v2699_v58 = vpop.permute.xlu1 %2698  ;;  %v2701_v45 = vpop.permute.xlu0 %2700 }
 0x552   : > { %v2704_v2 = vadd.f32 %v2699_v58, %v2690_v50  ;;  %v2705_v57 = vadd.f32 %v2701_v45, %v2691_v30  ;;  %v2413_v30 = vmul.f32 %v3400_v42, %v2411_v40  ;;  %v3401_v58 = vld [vmem:[%s3727_s23 + $0x11] sm:$0xff]  ;;  %v2775_v42 = vstv %s4812_s17  ;;  %s4933_s17 = scalar_lea.hbm %s4982_s5, %s3279_s8 }
 0x553   : > { %v2412_v45 = vmul.f32 %v3401_v58, %v2411_v40  ;;  %v3402_v40 = vld [vmem:[%s3727_s23 + $0x1a] sm:$0x3f] }
 0x554   : > { %v2711_v56 = vadd.f32 %v2709_v27, %v2705_v57  ;;  %v2710_v54 = vadd.f32 %v2708_v0, %v2704_v2 }
 0x555   : > { %v2389_v47 = vpop.permute.xlu1 %2388  ;;  %v2391_v9 = vpop.permute.xlu0 %2390 }
 0x556   : > { %v2395_v62 = vadd.f32 %v2391_v9, %v2381_v12  ;;  %v2394_v31 = vadd.f32 %v2389_v47, %v2380_v29 }
 0x559   : > { %v2721_v60 = vpop.permute.xlu1 %2720  ;;  %v2405_v49 = vpop.permute.xlu0 %2404 }
 0x55a   : > { %v2409_v23 = vadd.f32 %v2405_v49, %v2395_v62  ;;  %v2725_v37 = vadd.f32 %v2721_v60, %v2711_v56  ;;  %v2447_v60 = vmul.f32 %v3402_v40, %v2445_v8 }
 0x55c   : > { %v2415_v9 = vadd.f32 %v2413_v30, %v2409_v23 }
 0x55d   : > { %v2719_v53 = vpop.permute.xlu1 %2718  ;;  %v2403_v59 = vpop.permute.xlu0 %2402 }
 0x55e   : > { %v2408_v18 = vadd.f32 %v2403_v59, %v2394_v31  ;;  %v2724_v49 = vadd.f32 %v2719_v53, %v2710_v54  ;;  %v2742_v59 = vmul.f32 %v3401_v58, %v2741_v63 }
 0x560   : > { %v2414_v12 = vadd.f32 %v2412_v45, %v2408_v18  ;;  %v2777_v18 = vmul.f32 %v3402_v40, %v2775_v42 }
 0x561   : > { %v2733_v46 = vpop.permute.xlu1 %2732  ;;  %v2735_v16 = vpop.permute.xlu0 %2734 }
 0x562   : > { %v2738_v2 = vadd.f32 %v2733_v46, %v2724_v49  ;;  %v2739_v57 = vadd.f32 %v2735_v16, %v2725_v37  ;;  %v3403_v16 = vld [vmem:[%s3727_s23 + $0x12] sm:$0xff] }
 0x563   : > { %v2446_v29 = vmul.f32 %v3403_v16, %v2445_v8  ;;  %v2776_v58 = vmul.f32 %v3403_v16, %v2775_v42 }
 0x564   : > { %v2744_v27 = vadd.f32 %v2742_v59, %v2738_v2 }
 0x565   : > { %v4764_v6 = vpop.permute.xlu1 %2422  ;;  %v2425_v26 = vpop.permute.xlu0 %2424 }
 0x566   : > { %v2429_v47 = vadd.f32 %v2425_v26, %v2415_v9  ;;  %v2428_v53 = vadd.f32 %v4764_v6, %v2414_v12  ;;  %v2745_v26 = vadd.f32 %v2743_v51, %v2739_v57  ;;  %v2479_v6 = vstv %s4815_s7  ;;  %s2934_s7 = scalar_lea.sflag [#allocation4], %s3723_s14 }
 0x567   : > { %v2809_v51 = vstv %s4830_s12  ;;  %v2513_v12 = vstv %s4835_s29  ;;  %s3468_s12 = scalar_lea.vmem %s4935_s9, 16  ;;  %s3472_s29 = sshll.u32 %s3551_s22, 4  ;;  %s3473_s29 = int_to_ptr.vmem [resolvable:$false] %s3472_s29 }
 0x568   : > { %p3469_p5 = scmp.ne.s32.totalorder %s4935_s9, %s3468_s12  ;;  %p3475_p6 = scmp.lt.s32.totalorder %s4935_s9, %s3473_s29 }
 0x569   : > { %v4766_v11 = vpop.permute.xlu1 %2754  ;;  %v2439_v52 = vpop.permute.xlu0 %2438 }
 0x56a   : > { %v2443_v19 = vadd.f32 %v2439_v52, %v2429_v47  ;;  %v2759_v52 = vadd.f32 %v4766_v11, %v2745_v26  ;;  %p3470_p8 = pnand %p3469_p5, %p4999_p0 }
 0x56c   : > { %v2449_v23 = vadd.f32 %v2447_v60, %v2443_v19  ;;  %p3471_p10 = pneg %p3470_p8 }
 0x56d   : > { %v4768_v32 = vpop.permute.xlu1 %2752  ;;  %v4770_v44 = vpop.permute.xlu0 %2436 }
 0x56e   : > { %v2442_v46 = vadd.f32 %v4770_v44, %v2428_v53  ;;  %v2758_v30 = vadd.f32 %v4768_v32, %v2744_v27  ;;  %v3404_v32 = vld [vmem:[%s3727_s23 + $0x28] sm:$0x3f] }
 0x56f   : > { %v2481_v63 = vmul.f32 %v3404_v32, %v2479_v6  ;;  %v2811_v60 = vmul.f32 %v3404_v32, %v2809_v51 }
 0x570   : > { %v2448_v9 = vadd.f32 %v2446_v29, %v2442_v46 }
 0x571   : > { %v4772_v25 = vpop.permute.xlu1 %2766  ;;  %v4774_v55 = vpop.permute.xlu0 %2768 }
 0x572   : > { %v2772_v44 = vadd.f32 %v4772_v25, %v2758_v30  ;;  %v2773_v54 = vadd.f32 %v4774_v55, %v2759_v52  ;;  %v3405_v55 = vld [vmem:[%s3727_s23 + $0x20] sm:$0xff] }
 0x573   : > { %v2480_v2 = vmul.f32 %v3405_v55, %v2479_v6  ;;  %v2810_v53 = vmul.f32 %v3405_v55, %v2809_v51  ;;  %v2843_v6 = vstv %s4848_s26  ;;  %v2877_v51 = vstv %s4861_s16  ;;  %s3474_s26 = scalar_lea.vmem %s3473_s29, 32 }
 0x574   : > { %v2778_v8 = vadd.f32 %v2776_v58, %v2772_v44  ;;  %v2547_v44 = vstv %s4853_s13  ;;  %p3476_p12 = scmp.lt.s32.totalorder %s3474_s26, %s3468_s12 }
 0x575   : > { %v4776_v13 = vpop.permute.xlu1 %2456  ;;  %v4778_v4 = vpop.permute.xlu0 %2458 }
 0x576   : > { %v2463_v31 = vadd.f32 %v4778_v4, %v2449_v23  ;;  %v2462_v37 = vadd.f32 %v4776_v13, %v2448_v9  ;;  %v2779_v4 = vadd.f32 %v2777_v18, %v2773_v54  ;;  %p3477_p7 = por %p3476_p12, %p3475_p6 }
 0x578   : > { %p3478_p9 = pnand %p3477_p7, %p3471_p10 }
 0x579   : > { %v4780_v15 = vpop.permute.xlu1 %2788  ;;  %v4782_v36 = vpop.permute.xlu0 %2472 }
 0x57a   : > { %v2477_v11 = vadd.f32 %v4782_v36, %v2463_v31  ;;  %v2793_v36 = vadd.f32 %v4780_v15, %v2779_v4 }
 0x57c   : > { %v2483_v57 = vadd.f32 %v2481_v63, %v2477_v11 }
 0x57d   : > { %v4786_v20 = vpop.permute.xlu1 %2786  ;;  %v4788_v24 = vpop.permute.xlu0 %2470 }
 0x57e   : > { %v2476_v25 = vadd.f32 %v4788_v24, %v2462_v37  ;;  %v2792_v59 = vadd.f32 %v4786_v20, %v2778_v8  ;;  %v3406_v20 = vld [vmem:[%s3727_s23 + $0x29] sm:$0x3f] }
 0x57f   : > { %v2515_v46 = vmul.f32 %v3406_v20, %v2513_v12  ;;  %v2845_v9 = vmul.f32 %v3406_v20, %v2843_v6  ;;  %v3408_v37 = vld [vmem:[%s3727_s23 + $0x2a] sm:$0x3f] }
 0x580   : > { %v2482_v27 = vadd.f32 %v2480_v2, %v2476_v25  ;;  %v2549_v4 = vmul.f32 %v3408_v37, %v2547_v44  ;;  %v3409_v2 = vld [vmem:[%s3727_s23 + $0x22] sm:$0xff] }
 0x581   : > { %v4791_v1 = vpop.permute.xlu1 %2800  ;;  %v4793_v22 = vpop.permute.xlu0 %2802 }
 0x582   : > { %v2806_v40 = vadd.f32 %v4791_v1, %v2792_v59  ;;  %v2807_v24 = vadd.f32 %v4793_v22, %v2793_v36  ;;  %v3407_v22 = vld [vmem:[%s3727_s23 + $0x21] sm:$0xff] }
 0x583   : > { %v2514_v52 = vmul.f32 %v3407_v22, %v2513_v12 }
 0x584   : > { %v2812_v23 = vadd.f32 %v2810_v53, %v2806_v40 }
 0x585   : > { %v4801_v35 = vpop.permute.xlu1 %2490  ;;  %v4803_v28 = vpop.permute.xlu0 %2492 }
 0x586   : > { %v2497_v13 = vadd.f32 %v4803_v28, %v2483_v57  ;;  %v2496_v16 = vadd.f32 %v4801_v35, %v2482_v27  ;;  %v2813_v28 = vadd.f32 %v2811_v60, %v2807_v24  ;;  %v2548_v57 = vmul.f32 %v3409_v2, %v2547_v44 }
 0x587   : > { %v2879_v60 = vmul.f32 %v3408_v37, %v2877_v51  ;;  %v2878_v27 = vmul.f32 %v3409_v2, %v2877_v51  ;;  %v1598_v37 = vsel %vm607_vm2, %v4317_v61, 0.0 }
 0x589   : > { %v4806_v33 = vpop.permute.xlu1 %2822  ;;  %v4808_v50 = vpop.permute.xlu0 %2506 }
 0x58a   : > { %v2511_v15 = vadd.f32 %v4808_v50, %v2497_v13  ;;  %v2827_v50 = vadd.f32 %v4806_v33, %v2813_v28 }
 0x58c   : > { %v2517_v30 = vadd.f32 %v2515_v46, %v2511_v15 }
 0x58d   : > { %v4817_v34 = vpop.permute.xlu1 %2820  ;;  %v4819_v48 = vpop.permute.xlu0 %2504 }
 0x58e   : > { %v2510_v1 = vadd.f32 %v4819_v48, %v2496_v16  ;;  %v2826_v31 = vadd.f32 %v4817_v34, %v2812_v23  ;;  %v2844_v48 = vmul.f32 %v3407_v22, %v2843_v6 }
 0x590   : > { %v2516_v32 = vadd.f32 %v2514_v52, %v2510_v1 }
 0x591   : > { %v4823_v62 = vpop.permute.xlu1 %2834  ;;  %v4825_v0 = vpop.permute.xlu0 %2836 }
 0x592   : > { %v2840_v18 = vadd.f32 %v4823_v62, %v2826_v31  ;;  %v2841_v58 = vadd.f32 %v4825_v0, %v2827_v50 }
 0x594   : > { %v2846_v55 = vadd.f32 %v2844_v48, %v2840_v18  ;;  %v938_v48 = vsel %vm607_vm2, %v4086_v39, 0.0 }
 0x595   : > { %v2525_v56 = vpop.permute.xlu1 %2524  ;;  %v2527_v45 = vpop.permute.xlu0 %2526 }
 0x596   : > { %v2531_v54 = vadd.f32 %v2527_v45, %v2517_v30  ;;  %v2530_v8 = vadd.f32 %v2525_v56, %v2516_v32  ;;  %v2847_v45 = vadd.f32 %v2845_v9, %v2841_v58  ;;  %v608_v9 = vsel %vm607_vm2, %v3987_v5, 0.0 }
 0x597   : > { %v1268_v32 = vsel %vm607_vm2, %v4218_v38, 0.0 }
 0x599   : > { %v4843_v49 = vpop.permute.xlu1 %2856  ;;  %v2541_v47 = vpop.permute.xlu0 %2540 }
 0x59a   : > { %v2545_v63 = vadd.f32 %v2541_v47, %v2531_v54  ;;  %v2861_v13 = vadd.f32 %v4843_v49, %v2847_v45 }
 0x59c   : > { %v2551_v36 = vadd.f32 %v2549_v4, %v2545_v63  ;;  %v939_v63 = vadd.f32 %v938_v48, %v4089_v10  ;;  %v267_v48 = vld [vmem:[%s4981_s4] sm:$0x1] }
 0x59d   : > { %v2855_v19 = vpop.permute.xlu1 %2854  ;;  %v2539_v26 = vpop.permute.xlu0 %2538 }
 0x59e   : > { %v2544_v0 = vadd.f32 %v2539_v26, %v2530_v8  ;;  %v2860_v47 = vadd.f32 %v2855_v19, %v2846_v55  ;;  %v1928_v8 = vsel %vm607_vm2, %v4540_v14, 0.0  ;;  %v940_v5 = vrot.slane %v939_v63, 4 }
 0x5a0   : > { %v2550_v20 = vadd.f32 %v2548_v57, %v2544_v0  ;;  %v941_v45 = vadd.f32 %v940_v5, %v939_v63 }
 0x5a1   : > { %v2869_v29 = vpop.permute.xlu1 %2868  ;;  %v2871_v42 = vpop.permute.xlu0 %2870 }
 0x5a2   : > { %v2874_v24 = vadd.f32 %v2869_v29, %v2860_v47  ;;  %v2875_v15 = vadd.f32 %v2871_v42, %v2861_v13  ;;  %v942_v57 = vrot.slane %v941_v45, 2 }
 0x5a4   : > { %v2880_v19 = vadd.f32 %v2878_v27, %v2874_v24  ;;  %v2881_v1 = vadd.f32 %v2879_v60, %v2875_v15 }
 0x5a5   : > { %v2561_v35 = vpop.permute.xlu1 %2560  ;;  %v2245_v11 = vpop.permute.xlu0 %2244 }
 0x5a6   : > { %v2249_v33 = vadd.f32 %v2245_v11, %v4714_v17  ;;  %v2565_v17 = vadd.f32 %v2561_v35, %v2551_v36  ;;  %v609_v11 = vadd.f32 %v608_v9, %v3989_v7  ;;  %v1929_v7 = vadd.f32 %v1928_v8, %v4545_v21  ;;  %v1607_v8 = vld [vmem:[%s4980_s3 + $0x3] sm:$0x1] }
 0x5a7   : > { %v943_v36 = vadd.f32 %v942_v57, %v941_v45  ;;  %v1937_v45 = vld [vmem:[%s4980_s3 + $0x4] sm:$0x1] }
 0x5a8   : > { %v2251_v34 = vmax.f32 %v2249_v33, 0.0  ;;  %v610_v4 = vrot.slane %v609_v11, 4  ;;  %v1269_v33 = vadd.f32 %v1268_v32, %v4221_v43  ;;  %v1930_v2 = vrot.slane %v1929_v7, 4 }
 0x5a9   : > { %v2559_v25 = vpop.permute.xlu1 %2558  ;;  %v2243_v62 = vpop.permute.xlu0 %2242 }
 0x5aa   : > { %v2248_v59 = vadd.f32 %v2243_v62, %v4717_v41  ;;  %v2255_v12 = vsel %vm603_vm0, %v2251_v34, 0.0  ;;  %v2564_v41 = vadd.f32 %v2559_v25, %v2550_v20  ;;  %v1599_v34 = vadd.f32 %v1598_v37, %v4323_v3 }
 0x5ab   : > { %2256 = vadd.xlane.f32.xlu0 %v2255_v12  ;;  %v611_v39 = vadd.f32 %v610_v4, %v609_v11  ;;  %v1270_v25 = vrot.slane %v1269_v33, 4  ;;  %v1931_v0 = vadd.f32 %v1930_v2, %v1929_v7  ;;  %v1277_v11 = vld [vmem:[%s4980_s3 + $0x2] sm:$0x1] }
 0x5ac   : > { %v2250_v56 = vmax.f32 %v2248_v59, 0.0  ;;  %v1600_v38 = vrot.slane %v1599_v34, 4 }
 0x5ad   : > { %v2891_v40 = vpop.permute.xlu1 %2890  ;;  %v2575_v53 = vpop.permute.xlu0 %2574  ;;  %v612_v55 = vrot.slane %v611_v39, 2  ;;  %v1271_v10 = vadd.f32 %v1270_v25, %v1269_v33  ;;  %v1932_v21 = vrot.slane %v1931_v0, 2 }
 0x5ae   : > { %v2579_v46 = vadd.f32 %v2575_v53, %v2565_v17  ;;  %v2252_v26 = vsel %vm599_vm1, %v2250_v56, 0.0  ;;  %v2895_v29 = vadd.f32 %v2891_v40, %v2881_v1  ;;  %v1601_v61 = vadd.f32 %v1600_v38, %v1599_v34 }
 0x5af   : > { %2253 = vadd.xlane.f32.xlu1 %v2252_v26  ;;  %v613_v51 = vadd.f32 %v612_v55, %v611_v39  ;;  %v1272_v43 = vrot.slane %v1271_v10, 2  ;;  %v944_v56 = vrot.slane %v943_v36, 1  ;;  %v1933_v15 = vadd.f32 %v1932_v21, %v1931_v0 }
 0x5b0   : > { %v2581_v16 = vmax.f32 %v2579_v46, 0.0  ;;  %v1602_v14 = vrot.slane %v1601_v61, 2 }
 0x5b1   : > { %v2889_v28 = vpop.permute.xlu1 %2888  ;;  %v2573_v23 = vpop.permute.xlu0 %2572  ;;  %v614_v47 = vrot.slane %v613_v51, 1  ;;  %v1273_v13 = vadd.f32 %v1272_v43, %v1271_v10  ;;  %v945_v46 = vadd.f32 %v944_v56, %v943_v36  ;;  %v2597_v36 = vld [vmem:[%s4980_s3 + $0x6] sm:$0x1] }
 0x5b2   : > { %v2578_v49 = vadd.f32 %v2573_v23, %v2564_v41  ;;  %v2585_v22 = vsel %vm603_vm0, %v2581_v16, 0.0  ;;  %v2894_v52 = vadd.f32 %v2889_v28, %v2880_v19  ;;  %v1603_v40 = vadd.f32 %v1602_v14, %v1601_v61  ;;  %v2267_v61 = vld [vmem:[%s4980_s3 + $0x5] sm:$0x1] }
 0x5b3   : > { %2586 = vadd.xlane.f32.xlu0 %v2585_v22  ;;  %v615_v53 = vadd.f32 %v614_v47, %v613_v51  ;;  %v1274_v27 = vrot.slane %v1273_v13, 1  ;;  %v617_v22 = vld [vmem:[%s4980_s3] sm:$0x1] }
 0x5b4   : > { %v2580_v30 = vmax.f32 %v2578_v49, 0.0  ;;  %v1604_v26 = vrot.slane %v1603_v40, 1  ;;  %v1934_v49 = vrot.slane %v1933_v15, 1 }
 0x5b5   : > { %v2903_v6 = vpop.permute.xlu1 %2902  ;;  %v2905_v50 = vpop.permute.xlu0 %2904  ;;  %v618_v23 = vmul.f32 0.0051020407, %v615_v53  ;;  %v1275_v1 = vadd.f32 %v1274_v27, %v1273_v13 }
 0x5b6   : > { %v2908_v42 = vadd.f32 %v2903_v6, %v2894_v52  ;;  %v2909_v31 = vadd.f32 %v2905_v50, %v2895_v29  ;;  %v2582_v44 = vsel %vm599_vm1, %v2580_v30, 0.0  ;;  %v948_v29 = vmul.f32 0.0051020407, %v945_v46 }
 0x5b7   : > { %2583 = vadd.xlane.f32.xlu0 %v2582_v44  ;;  %v1605_v30 = vadd.f32 %v1604_v26, %v1603_v40 }
 0x5b8   : > { %v2910_v54 = vmax.f32 %v2908_v42, 0.0  ;;  %v2911_v35 = vmax.f32 %v2909_v31, 0.0  ;;  %v947_v31 = vld [vmem:[%s4980_s3 + $0x1] sm:$0x1] }
 0x5b9   : > { %v949_v63 = vmul.f32 %v948_v29, %v947_v31  ;;  %v1608_v37 = vmul.f32 0.0051020407, %v1605_v30 }
 0x5ba   : > { %v2912_v18 = vsel %vm599_vm1, %v2910_v54, 0.0  ;;  %v2915_v58 = vsel %vm603_vm0, %v2911_v35, 0.0  ;;  %v619_v35 = vmul.f32 %v618_v23, %v617_v22 }
 0x5bb   : > { %2913 = vadd.xlane.f32.xlu0 %v2912_v18  ;;  %2916 = vadd.xlane.f32.xlu1 %v2915_v58  ;;  %v1278_v18 = vmul.f32 0.0051020407, %v1275_v1  ;;  %v1935_v58 = vadd.f32 %v1934_v49, %v1933_v15  ;;  %v1609_v10 = vmul.f32 %v1608_v37, %v1607_v8 }
 0x5bc   : > { %v620_v34 = vadd.f32 %v619_v35, %v267_v48 }
 0x5bd   : > { %v1279_v39 = vmul.f32 %v1278_v18, %v1277_v11  ;;  %v1938_v25 = vmul.f32 0.0051020407, %v1935_v58 }
 0x5be   : > { %v950_v55 = vadd.f32 %v949_v63, %v620_v34 }
 0x5bf   : > { %v1939_v43 = vmul.f32 %v1938_v25, %v1937_v45 }
 0x5c0   : > { %v1280_v51 = vadd.f32 %v1279_v39, %v950_v55 }
 0x638   : > { %v2257_v62 = vpop.xlane.xlu0 %2256 }
 0x639   : > { %v2258_v59 = vsel %vm607_vm2, %v2257_v62, 0.0 }
 0x63c   : > { %v2254_v3 = vpop.xlane.xlu1 %2253 }
 0x63d   : > { %v2259_v12 = vadd.f32 %v2258_v59, %v2254_v3  ;;  %v1610_v59 = vadd.f32 %v1609_v10, %v1280_v51 }
 0x63f   : > { %v2260_v17 = vrot.slane %v2259_v12, 4  ;;  %v1940_v47 = vadd.f32 %v1939_v43, %v1610_v59 }
 0x640   : > { %v2587_v24 = vpop.xlane.xlu0 %2586 }
 0x641   : > { %v2261_v60 = vadd.f32 %v2260_v17, %v2259_v12  ;;  %v2588_v41 = vsel %vm607_vm2, %v2587_v24, 0.0  ;;  %v2927_v17 = vld [vmem:[%s4980_s3 + $0x7] sm:$0x1] }
 0x643   : > { %v2262_v20 = vrot.slane %v2261_v60, 2 }
 0x644   : > { %v2584_v16 = vpop.xlane.xlu0 %2583 }
 0x645   : > { %v2263_v28 = vadd.f32 %v2262_v20, %v2261_v60  ;;  %v2589_v19 = vadd.f32 %v2588_v41, %v2584_v16 }
 0x647   : > { %v2590_v52 = vrot.slane %v2589_v19, 4  ;;  %v2264_v6 = vrot.slane %v2263_v28, 1 }
 0x648   : > { %v2917_v42 = vpop.xlane.xlu1 %2916  ;;  %v2914_v50 = vpop.xlane.xlu0 %2913 }
 0x649   : > { %v2591_v44 = vadd.f32 %v2590_v52, %v2589_v19  ;;  %v2918_v54 = vsel %vm607_vm2, %v2917_v42, 0.0  ;;  %v2265_v4 = vadd.f32 %v2264_v6, %v2263_v28 }
 0x64a   : > { %v2919_v9 = vadd.f32 %v2918_v54, %v2914_v50 }
 0x64b   : > { %v2592_v32 = vrot.slane %v2591_v44, 2  ;;  %v2268_v2 = vmul.f32 0.0051020407, %v2265_v4 }
 0x64c   : > { %v2920_v33 = vrot.slane %v2919_v9, 4 }
 0x64d   : > { %v2593_v5 = vadd.f32 %v2592_v32, %v2591_v44  ;;  %v2269_v3 = vmul.f32 %v2268_v2, %v2267_v61 }
 0x64e   : > { %v2921_v7 = vadd.f32 %v2920_v33, %v2919_v9 }
 0x64f   : > { %v2594_v38 = vrot.slane %v2593_v5, 1  ;;  %v2270_v56 = vadd.f32 %v2269_v3, %v1940_v47 }
 0x650   : > { %v2922_v57 = vrot.slane %v2921_v7, 2 }
 0x651   : > { %v2595_v62 = vadd.f32 %v2594_v38, %v2593_v5 }
 0x652   : > { %v2923_v0 = vadd.f32 %v2922_v57, %v2921_v7 }
 0x653   : > { %v2598_v14 = vmul.f32 0.0051020407, %v2595_v62 }
 0x654   : > { %v2924_v12 = vrot.slane %v2923_v0, 1 }
 0x655   : > { %v2599_v13 = vmul.f32 %v2598_v14, %v2597_v36 }
 0x656   : > { %v2925_v21 = vadd.f32 %v2924_v12, %v2923_v0 }
 0x657   : > { %v2600_v24 = vadd.f32 %v2599_v13, %v2270_v56 }
 0x658   : > { %v2928_v40 = vmul.f32 0.0051020407, %v2925_v21 }
 0x65a   : > { %v2929_v60 = vmul.f32 %v2928_v40, %v2927_v17 }
 0x65c   : > { %v2930_v53 = vadd.f32 %v2929_v60, %v2600_v24 }
 0x65e   : > { %3356 = vtanh.f32 %v2930_v53 }
 0x668   : > { %v3357_v27 = vpop.eup %3356 }
 0x669   : > { %2932 = vst [vmem:[%s266_s28] sm:$0x1] %v3357_v27 }
 0x66a   : > { %3481 = shalt.err (!%p3478_p9)
}
 0x66b   : > { %s3482_s14 = scalar_lea.hbm %s4933_s17, 16  ;;  %s3486_s23 = scalar_lea.hbm %s4982_s5, 32 }
 0x66c   : > { %p3483_p2 = scmp.ne.s32.totalorder %s4933_s17, %s3482_s14  ;;  %p3487_p13 = scmp.lt.u32.totalorder %s4933_s17, %s4982_s5 }
 0x66d   : > { %p3488_p1 = scmp.lt.u32.totalorder %s3486_s23, %s3482_s14  ;;  %p3490_p5 = scmp.lt.u32.totalorder %s3482_s14, %s4933_s17 }
 0x66e   : > { %p3484_p11 = pnand %p3483_p2, %p4999_p0 }
 0x66f   : > { %p3489_p4 = por %p3488_p1, %p3487_p13 }
 0x670   : > { %p3485_p3 = pneg %p3484_p11 }
 0x671   : > { %p3491_p8 = por %p3490_p5, %p3489_p4 }
 0x673   : > { %p3492_p10 = pnand %p3491_p8, %p3485_p3 }
 0x675   : > { %3495 = shalt.err (!%p3492_p10)
}
 0x676   : > { %3295 = dma.vmem_to_hbm [thread:$0]  (%p4999_p0), %s4935_s9, 16, %s4933_s17, %s2934_s7  }
 0x677 PF: > { %s2958_s8 = sand.u32 1, %s3530_s18   ;;  %p5000_p6 = scmp.ne.s32.totalorder %s4989_s6, 0 }
 0x678   : > { %p5001_p12 = scmp.ge.s32.totalorder %s3542_s21, 2  ;;  %s2959_s28 = scalar_lea.sflag [#allocation4], %s2958_s8 }
 0x67a   : > { %p3309_p7 = pnand %p5001_p12, %p5000_p6 }
 0x67c   : > { %3525 = dma.done.wait (!%p3309_p7), %s2959_s28, 16  }
 0x67d   : > { %3527 = vsyncadd (!%p3309_p7), %s2959_s28, 4294967280  ;;  %p20_p9 = scmp.ge.s32.totalorder %s3607_s24, 4   ;;  %s5002_s18 = smov %s3534_s19 }
 0x67e   : > { %s5003_s19 = smov %s3538_s20  ;;  %s5004_s20 = smov %s3619_s27 }
 0x67f   : > { %s5005_s21 = smov %s3607_s24  ;;  %22 = sbr.rel (!%p20_p9) target bundleno = 7 (0x7), region = 97 }
 0x686   :  { %2963 = vsyncpa [#allocation3], 1 }
 0x687   :  { %2965 = vsyncpa [#allocation3 + $0x1], 1 }
 0x688   :  { %2966 = vsyncpa [#allocation4], 1 }
 0x689   :  { %2968 = vsyncpa [#allocation4 + $0x1], 1 }
 0x68a   :  { %2969 = vsyncpa [#allocation5], 1 }
 0x68b   :  { %2971 = vsyncpa [#allocation5 + $0x1], 1 }
 0x68c   :  { %2972 = vsyncpa [#allocation6], 1 }
 0x68d   :  { %2974 = vsyncpa [#allocation6 + $0x1], 1 }

</bundles_post_ra>
